<compile_context>
chip_gen: v5e
topology: v5e:2x2
jax: 0.10.0
libtpu: 0.0.40
codegen_flags: <defaults>
</compile_context>

<pallas_src>
from functools import partial

import jax
import jax.numpy as jnp
import numpy as np
from jax.experimental import pallas as pl
from jax.experimental.pallas import tpu as pltpu


def _highway_output3d_kernel(x_ref, wf_ref, bf_ref, wg_ref, bg_ref, o_ref,
                             *, tD, H, W, Wp):
    # x_ref : (1, Dp, Cin, P) bf16, P = Hp*Wp  — padded volume, resident across D-tiles
    # wf_ref: (2*Cout, 125*Cin) bf16           — fused conv weights, cols ordered (kd,kh,kw,cin)
    # bf_ref: (2*Cout, 1) f32                  — [b5; b3]
    # wg_ref: (Cout, Cout) bf16                — highway gate weight (pre-transposed)
    # bg_ref: (Cout, 1) f32                    — gate bias (init -3.0)
    # o_ref : (1, Cout, tD*H*W) f32            — lane-dense output tile
    Cout = wg_ref.shape[0]
    HW = H * W
    Pv = (H - 1) * Wp + W                      # last column that can hold a valid output

    d0 = pl.multiple_of(pl.program_id(1) * tD, tD)
    slab = x_ref[0, pl.ds(d0, tD + 4), :, :]   # (tD+4, Cin, P): one load, planes sliced below

    y5_parts, y3_parts = [], []
    for i in range(tD):                        # static unroll over the D tile
        taps = []
        for kd in range(5):
            base = slab[i + kd]                # (Cin, P) — leading-dim index, free
            for kh in range(5):
                for kw in range(5):
                    off = kh * Wp + kw         # static lane offset; off + Pv <= P
                    taps.append(base[:, off:off + Pv])
        patT = jnp.concatenate(taps, axis=0)   # (125*Cin, Pv) — sublane-axis stack

        # Both convolutions in ONE MXU matmul (bf16 operands, f32 accumulation),
        # result already in channels-major, lane-dense orientation.
        y = jnp.dot(wf_ref[...], patT, preferred_element_type=jnp.float32) + bf_ref[...]

        # Drop the padded-border (garbage) columns: keep j = h*Wp + w with w < W.
        yc = jnp.concatenate([y[:, h * Wp:h * Wp + W] for h in range(H)], axis=1)  # (2Cout, HW)
        y5_parts.append(yc[:Cout])
        y3_parts.append(yc[Cout:])

    y5 = jnp.concatenate(y5_parts, axis=-1)    # (Cout, tD*HW), lane dense
    y3 = jnp.concatenate(y3_parts, axis=-1)

    # HighwayLayer: sigmoid 1x1x1 gate on the 5x5x5 branch (bf16 matmul, f32 accumulate).
    gate = jax.nn.sigmoid(
        jnp.dot(wg_ref[...], y5.astype(jnp.bfloat16),
                preferred_element_type=jnp.float32) + bg_ref[...])
    o_ref[0] = jnp.tanh(gate * (y5 - y3) + y3)  # == tanh(g*y5 + (1-g)*y3)


def highway_output3d(x_ncdhw, params, *, tile_d=4, vmem_limit_bytes=40 * 1024 * 1024):
    """x_ncdhw: (N, Cin, D, H, W) float32 (PyTorch layout). Returns (N, Cout, D, H, W)."""
    w5, b5, w3, b3, wg, bg = params
    N, Cin, D, H, W = x_ncdhw.shape
    Cout = w5.shape[-1]
    Dp, Hp, Wp = D + 4, H + 4, W + 4
    P, HW, S, K = Hp * Wp, H * W, D * H * W, 125 * Cin

    tD = tile_d
    assert D % tD == 0, "tile_d must divide D"
    assert (tD * HW) % 128 == 0 or tD == D, \
        "output block lane width (tile_d*H*W) must be a multiple of 128 (or the full volume)"

    # Activations: pad the 5^3 halo, move channels off the minor dims, flatten (Hp, Wp)
    # into a lane-dense axis and pre-cast to bf16 (single fused pad/transpose/cast pass).
    xp = jnp.pad(x_ncdhw, ((0, 0), (0, 0), (2, 2), (2, 2), (2, 2)))
    x_t = jnp.transpose(xp, (0, 2, 1, 3, 4)).reshape(N, Dp, Cin, P).astype(jnp.bfloat16)

    # Fused conv weights in (2*Cout, K) orientation, columns ordered (kd, kh, kw, cin).
    # The 3x3x3 kernel is zero-padded to a centered 5x5x5 window (pad=1 vs pad=2 offset).
    w3p = jnp.pad(w3, ((1, 1), (1, 1), (1, 1), (0, 0), (0, 0)))
    wf = jnp.concatenate(
        [jnp.transpose(w5, (4, 0, 1, 2, 3)).reshape(Cout, K),
         jnp.transpose(w3p, (4, 0, 1, 2, 3)).reshape(Cout, K)],
        axis=0).astype(jnp.bfloat16)                                  # (2*Cout, K)
    bf = jnp.concatenate([b5, b3]).reshape(2 * Cout, 1).astype(jnp.float32)
    wg_t = wg.T.astype(jnp.bfloat16)                                  # (Cout, Cout)
    bg_t = bg.reshape(Cout, 1).astype(jnp.float32)

    kernel = partial(_highway_output3d_kernel, tD=tD, H=H, W=W, Wp=Wp)

    out = pl.pallas_call(
        kernel,
        out_shape=jax.ShapeDtypeStruct((N, Cout, S), jnp.float32),
        grid=(N, D // tD),
        in_specs=[
            # Constant block index along the D-tile axis -> stays resident per batch elem.
            pl.BlockSpec((1, Dp, Cin, P), lambda n, d: (n, 0, 0, 0)),
            pl.BlockSpec((2 * Cout, K), lambda n, d: (0, 0)),
            pl.BlockSpec((2 * Cout, 1), lambda n, d: (0, 0)),
            pl.BlockSpec((Cout, Cout), lambda n, d: (0, 0)),
            pl.BlockSpec((Cout, 1), lambda n, d: (0, 0)),
        ],
        out_specs=pl.BlockSpec((1, Cout, tD * HW), lambda n, d: (n, 0, d)),
        compiler_params=pltpu.CompilerParams(
            dimension_semantics=("parallel", "parallel"),
            vmem_limit_bytes=vmem_limit_bytes),
    )(x_t, wf, bf, wg_t, bg_t)

    # (N, Cout, S) -> NCDHW is a pure metadata reshape.
    return out.reshape(N, Cout, D, H, W)


def _reference(x_ncdhw, params):
    """Pure-JAX f32 reference (lax conv, HIGHEST precision)."""
    w5, b5, w3, b3, wg, bg = params
    x = jnp.transpose(x_ncdhw, (0, 2, 3, 4, 1))

    def conv3d(x, w, b, pad):
        y = jax.lax.conv_general_dilated(
            x, w, window_strides=(1, 1, 1), padding=[(pad, pad)] * 3,
            dimension_numbers=("NDHWC", "DHWIO", "NDHWC"),
            precision=jax.lax.Precision.HIGHEST)
        return y + b.reshape(1, 1, 1, 1, -1)

    y5 = conv3d(x, w5, b5, 2)
    y3 = conv3d(x, w3, b3, 1)
    gate = jax.nn.sigmoid(
        jnp.einsum("ndhwc,co->ndhwo", y5, wg, precision=jax.lax.Precision.HIGHEST)
        + bg.reshape(1, 1, 1, 1, -1))
    out = jnp.tanh(gate * y5 + (1.0 - gate) * y3)
    return jnp.transpose(out, (0, 4, 1, 2, 3))


def _init_params(key, Cin, Cout):
    """Deterministic synthetic parameters (weights in (kd, kh, kw, Cin, Cout) layout)."""
    k1, k2, k3, k4, k5 = jax.random.split(key, 5)
    w5 = jax.random.normal(k1, (5, 5, 5, Cin, Cout), jnp.float32) / np.sqrt(Cin * 125)
    b5 = 0.1 * jax.random.normal(k2, (Cout,), jnp.float32)
    w3 = jax.random.normal(k3, (3, 3, 3, Cin, Cout), jnp.float32) / np.sqrt(Cin * 27)
    b3 = 0.1 * jax.random.normal(k4, (Cout,), jnp.float32)
    wg = jax.random.normal(k5, (Cout, Cout), jnp.float32) / np.sqrt(Cout)
    bg = jnp.full((Cout,), -3.0, jnp.float32)   # HighwayLayer init_bias = -3.0
    return (w5, b5, w3, b3, wg, bg)


if __name__ == "__main__":
    key = jax.random.PRNGKey(0)
    kx, kp = jax.random.split(key)

    N, Cin, Cout, D, H, W = 2, 4, 4, 8, 8, 8
    x = jax.random.normal(kx, (N, Cin, D, H, W), jnp.float32)
    params = _init_params(kp, Cin, Cout)

    out = highway_output3d(x, params, tile_d=4)
    out = jax.block_until_ready(out)

    ref = _reference(x, params)
    # Tolerance covers bf16 operand rounding (activations + weights) with f32 accumulation.
    np.testing.assert_allclose(np.asarray(out), np.asarray(ref), atol=3e-2, rtol=3e-2)
    print("KERNEL_OK")
</pallas_src>

<mosaic_0001>
module attributes {stable_mosaic.version = 11 : i64} {
  func.func @_highway_output3d_kernel(%arg0: i32, %arg1: i32, %arg2: memref<1x12x4x144xbf16, #tpu.memory_space<vmem>>, %arg3: memref<8x500xbf16, #tpu.memory_space<vmem>>, %arg4: memref<8x1xf32, #tpu.memory_space<vmem>>, %arg5: memref<4x4xbf16, #tpu.memory_space<vmem>>, %arg6: memref<4x1xf32, #tpu.memory_space<vmem>>, %arg7: memref<1x4x256xf32, #tpu.memory_space<vmem>>) attributes {dimension_semantics = [#tpu.dimension_semantics<parallel>, #tpu.dimension_semantics<parallel>], iteration_bounds = array<i64: 2, 2>, scalar_prefetch = 0 : i64, scratch_operands = 0 : i64, tpu.core_type = #tpu.core_type<tc>, window_params = [{transform_indices = @transform_0, window_bounds = array<i64: 1, 12, 4, 144>}, {pipeline_mode = #tpu.pipeline_mode<synchronous>, transform_indices = @transform_1, window_bounds = array<i64: 8, 500>}, {pipeline_mode = #tpu.pipeline_mode<synchronous>, transform_indices = @transform_2, window_bounds = array<i64: 8, 1>}, {pipeline_mode = #tpu.pipeline_mode<synchronous>, transform_indices = @transform_3, window_bounds = array<i64: 4, 4>}, {pipeline_mode = #tpu.pipeline_mode<synchronous>, transform_indices = @transform_4, window_bounds = array<i64: 4, 1>}, {transform_indices = @transform_5, window_bounds = array<i64: 1, 4, 256>}]} {
    %c4_i32 = arith.constant 4 : i32
    %0 = arith.muli %arg1, %c4_i32 : i32
    %1 = tpu.assume_multiple %0, 4 : i32
    %c0 = arith.constant 0 : index
    %2 = arith.index_cast %1 : i32 to index
    %c0_0 = arith.constant 0 : index
    %c0_1 = arith.constant 0 : index
    %3 = vector.load %arg2[%c0, %2, %c0_0, %c0_1] : memref<1x12x4x144xbf16, #tpu.memory_space<vmem>>, vector<1x8x4x144xbf16>
    %4 = vector.shape_cast %3 : vector<1x8x4x144xbf16> to vector<8x4x144xbf16>
    %5 = vector.extract_strided_slice %4 {offsets = [0, 0, 0], sizes = [1, 4, 144], strides = [1, 1, 1]} : vector<8x4x144xbf16> to vector<1x4x144xbf16>
    %6 = vector.shape_cast %5 : vector<1x4x144xbf16> to vector<4x144xbf16>
    %7 = vector.extract_strided_slice %6 {offsets = [0, 0], sizes = [4, 92], strides = [1, 1]} : vector<4x144xbf16> to vector<4x92xbf16>
    %8 = vector.extract_strided_slice %6 {offsets = [0, 1], sizes = [4, 92], strides = [1, 1]} : vector<4x144xbf16> to vector<4x92xbf16>
    %9 = vector.extract_strided_slice %6 {offsets = [0, 2], sizes = [4, 92], strides = [1, 1]} : vector<4x144xbf16> to vector<4x92xbf16>
    %10 = vector.extract_strided_slice %6 {offsets = [0, 3], sizes = [4, 92], strides = [1, 1]} : vector<4x144xbf16> to vector<4x92xbf16>
    %11 = vector.extract_strided_slice %6 {offsets = [0, 4], sizes = [4, 92], strides = [1, 1]} : vector<4x144xbf16> to vector<4x92xbf16>
    %12 = vector.extract_strided_slice %6 {offsets = [0, 12], sizes = [4, 92], strides = [1, 1]} : vector<4x144xbf16> to vector<4x92xbf16>
    %13 = vector.extract_strided_slice %6 {offsets = [0, 13], sizes = [4, 92], strides = [1, 1]} : vector<4x144xbf16> to vector<4x92xbf16>
    %14 = vector.extract_strided_slice %6 {offsets = [0, 14], sizes = [4, 92], strides = [1, 1]} : vector<4x144xbf16> to vector<4x92xbf16>
    %15 = vector.extract_strided_slice %6 {offsets = [0, 15], sizes = [4, 92], strides = [1, 1]} : vector<4x144xbf16> to vector<4x92xbf16>
    %16 = vector.extract_strided_slice %6 {offsets = [0, 16], sizes = [4, 92], strides = [1, 1]} : vector<4x144xbf16> to vector<4x92xbf16>
    %17 = vector.extract_strided_slice %6 {offsets = [0, 24], sizes = [4, 92], strides = [1, 1]} : vector<4x144xbf16> to vector<4x92xbf16>
    %18 = vector.extract_strided_slice %6 {offsets = [0, 25], sizes = [4, 92], strides = [1, 1]} : vector<4x144xbf16> to vector<4x92xbf16>
    %19 = vector.extract_strided_slice %6 {offsets = [0, 26], sizes = [4, 92], strides = [1, 1]} : vector<4x144xbf16> to vector<4x92xbf16>
    %20 = vector.extract_strided_slice %6 {offsets = [0, 27], sizes = [4, 92], strides = [1, 1]} : vector<4x144xbf16> to vector<4x92xbf16>
    %21 = vector.extract_strided_slice %6 {offsets = [0, 28], sizes = [4, 92], strides = [1, 1]} : vector<4x144xbf16> to vector<4x92xbf16>
    %22 = vector.extract_strided_slice %6 {offsets = [0, 36], sizes = [4, 92], strides = [1, 1]} : vector<4x144xbf16> to vector<4x92xbf16>
    %23 = vector.extract_strided_slice %6 {offsets = [0, 37], sizes = [4, 92], strides = [1, 1]} : vector<4x144xbf16> to vector<4x92xbf16>
    %24 = vector.extract_strided_slice %6 {offsets = [0, 38], sizes = [4, 92], strides = [1, 1]} : vector<4x144xbf16> to vector<4x92xbf16>
    %25 = vector.extract_strided_slice %6 {offsets = [0, 39], sizes = [4, 92], strides = [1, 1]} : vector<4x144xbf16> to vector<4x92xbf16>
    %26 = vector.extract_strided_slice %6 {offsets = [0, 40], sizes = [4, 92], strides = [1, 1]} : vector<4x144xbf16> to vector<4x92xbf16>
    %27 = vector.extract_strided_slice %6 {offsets = [0, 48], sizes = [4, 92], strides = [1, 1]} : vector<4x144xbf16> to vector<4x92xbf16>
    %28 = vector.extract_strided_slice %6 {offsets = [0, 49], sizes = [4, 92], strides = [1, 1]} : vector<4x144xbf16> to vector<4x92xbf16>
    %29 = vector.extract_strided_slice %6 {offsets = [0, 50], sizes = [4, 92], strides = [1, 1]} : vector<4x144xbf16> to vector<4x92xbf16>
    %30 = vector.extract_strided_slice %6 {offsets = [0, 51], sizes = [4, 92], strides = [1, 1]} : vector<4x144xbf16> to vector<4x92xbf16>
    %31 = vector.extract_strided_slice %6 {offsets = [0, 52], sizes = [4, 92], strides = [1, 1]} : vector<4x144xbf16> to vector<4x92xbf16>
    %32 = vector.extract_strided_slice %4 {offsets = [1, 0, 0], sizes = [1, 4, 144], strides = [1, 1, 1]} : vector<8x4x144xbf16> to vector<1x4x144xbf16>
    %33 = vector.shape_cast %32 : vector<1x4x144xbf16> to vector<4x144xbf16>
    %34 = vector.extract_strided_slice %33 {offsets = [0, 0], sizes = [4, 92], strides = [1, 1]} : vector<4x144xbf16> to vector<4x92xbf16>
    %35 = vector.extract_strided_slice %33 {offsets = [0, 1], sizes = [4, 92], strides = [1, 1]} : vector<4x144xbf16> to vector<4x92xbf16>
    %36 = vector.extract_strided_slice %33 {offsets = [0, 2], sizes = [4, 92], strides = [1, 1]} : vector<4x144xbf16> to vector<4x92xbf16>
    %37 = vector.extract_strided_slice %33 {offsets = [0, 3], sizes = [4, 92], strides = [1, 1]} : vector<4x144xbf16> to vector<4x92xbf16>
    %38 = vector.extract_strided_slice %33 {offsets = [0, 4], sizes = [4, 92], strides = [1, 1]} : vector<4x144xbf16> to vector<4x92xbf16>
    %39 = vector.extract_strided_slice %33 {offsets = [0, 12], sizes = [4, 92], strides = [1, 1]} : vector<4x144xbf16> to vector<4x92xbf16>
    %40 = vector.extract_strided_slice %33 {offsets = [0, 13], sizes = [4, 92], strides = [1, 1]} : vector<4x144xbf16> to vector<4x92xbf16>
    %41 = vector.extract_strided_slice %33 {offsets = [0, 14], sizes = [4, 92], strides = [1, 1]} : vector<4x144xbf16> to vector<4x92xbf16>
    %42 = vector.extract_strided_slice %33 {offsets = [0, 15], sizes = [4, 92], strides = [1, 1]} : vector<4x144xbf16> to vector<4x92xbf16>
    %43 = vector.extract_strided_slice %33 {offsets = [0, 16], sizes = [4, 92], strides = [1, 1]} : vector<4x144xbf16> to vector<4x92xbf16>
    %44 = vector.extract_strided_slice %33 {offsets = [0, 24], sizes = [4, 92], strides = [1, 1]} : vector<4x144xbf16> to vector<4x92xbf16>
    %45 = vector.extract_strided_slice %33 {offsets = [0, 25], sizes = [4, 92], strides = [1, 1]} : vector<4x144xbf16> to vector<4x92xbf16>
    %46 = vector.extract_strided_slice %33 {offsets = [0, 26], sizes = [4, 92], strides = [1, 1]} : vector<4x144xbf16> to vector<4x92xbf16>
    %47 = vector.extract_strided_slice %33 {offsets = [0, 27], sizes = [4, 92], strides = [1, 1]} : vector<4x144xbf16> to vector<4x92xbf16>
    %48 = vector.extract_strided_slice %33 {offsets = [0, 28], sizes = [4, 92], strides = [1, 1]} : vector<4x144xbf16> to vector<4x92xbf16>
    %49 = vector.extract_strided_slice %33 {offsets = [0, 36], sizes = [4, 92], strides = [1, 1]} : vector<4x144xbf16> to vector<4x92xbf16>
    %50 = vector.extract_strided_slice %33 {offsets = [0, 37], sizes = [4, 92], strides = [1, 1]} : vector<4x144xbf16> to vector<4x92xbf16>
    %51 = vector.extract_strided_slice %33 {offsets = [0, 38], sizes = [4, 92], strides = [1, 1]} : vector<4x144xbf16> to vector<4x92xbf16>
    %52 = vector.extract_strided_slice %33 {offsets = [0, 39], sizes = [4, 92], strides = [1, 1]} : vector<4x144xbf16> to vector<4x92xbf16>
    %53 = vector.extract_strided_slice %33 {offsets = [0, 40], sizes = [4, 92], strides = [1, 1]} : vector<4x144xbf16> to vector<4x92xbf16>
    %54 = vector.extract_strided_slice %33 {offsets = [0, 48], sizes = [4, 92], strides = [1, 1]} : vector<4x144xbf16> to vector<4x92xbf16>
    %55 = vector.extract_strided_slice %33 {offsets = [0, 49], sizes = [4, 92], strides = [1, 1]} : vector<4x144xbf16> to vector<4x92xbf16>
    %56 = vector.extract_strided_slice %33 {offsets = [0, 50], sizes = [4, 92], strides = [1, 1]} : vector<4x144xbf16> to vector<4x92xbf16>
    %57 = vector.extract_strided_slice %33 {offsets = [0, 51], sizes = [4, 92], strides = [1, 1]} : vector<4x144xbf16> to vector<4x92xbf16>
    %58 = vector.extract_strided_slice %33 {offsets = [0, 52], sizes = [4, 92], strides = [1, 1]} : vector<4x144xbf16> to vector<4x92xbf16>
    %59 = vector.extract_strided_slice %4 {offsets = [2, 0, 0], sizes = [1, 4, 144], strides = [1, 1, 1]} : vector<8x4x144xbf16> to vector<1x4x144xbf16>
    %60 = vector.shape_cast %59 : vector<1x4x144xbf16> to vector<4x144xbf16>
    %61 = vector.extract_strided_slice %60 {offsets = [0, 0], sizes = [4, 92], strides = [1, 1]} : vector<4x144xbf16> to vector<4x92xbf16>
    %62 = vector.extract_strided_slice %60 {offsets = [0, 1], sizes = [4, 92], strides = [1, 1]} : vector<4x144xbf16> to vector<4x92xbf16>
    %63 = vector.extract_strided_slice %60 {offsets = [0, 2], sizes = [4, 92], strides = [1, 1]} : vector<4x144xbf16> to vector<4x92xbf16>
    %64 = vector.extract_strided_slice %60 {offsets = [0, 3], sizes = [4, 92], strides = [1, 1]} : vector<4x144xbf16> to vector<4x92xbf16>
    %65 = vector.extract_strided_slice %60 {offsets = [0, 4], sizes = [4, 92], strides = [1, 1]} : vector<4x144xbf16> to vector<4x92xbf16>
    %66 = vector.extract_strided_slice %60 {offsets = [0, 12], sizes = [4, 92], strides = [1, 1]} : vector<4x144xbf16> to vector<4x92xbf16>
    %67 = vector.extract_strided_slice %60 {offsets = [0, 13], sizes = [4, 92], strides = [1, 1]} : vector<4x144xbf16> to vector<4x92xbf16>
    %68 = vector.extract_strided_slice %60 {offsets = [0, 14], sizes = [4, 92], strides = [1, 1]} : vector<4x144xbf16> to vector<4x92xbf16>
    %69 = vector.extract_strided_slice %60 {offsets = [0, 15], sizes = [4, 92], strides = [1, 1]} : vector<4x144xbf16> to vector<4x92xbf16>
    %70 = vector.extract_strided_slice %60 {offsets = [0, 16], sizes = [4, 92], strides = [1, 1]} : vector<4x144xbf16> to vector<4x92xbf16>
    %71 = vector.extract_strided_slice %60 {offsets = [0, 24], sizes = [4, 92], strides = [1, 1]} : vector<4x144xbf16> to vector<4x92xbf16>
    %72 = vector.extract_strided_slice %60 {offsets = [0, 25], sizes = [4, 92], strides = [1, 1]} : vector<4x144xbf16> to vector<4x92xbf16>
    %73 = vector.extract_strided_slice %60 {offsets = [0, 26], sizes = [4, 92], strides = [1, 1]} : vector<4x144xbf16> to vector<4x92xbf16>
    %74 = vector.extract_strided_slice %60 {offsets = [0, 27], sizes = [4, 92], strides = [1, 1]} : vector<4x144xbf16> to vector<4x92xbf16>
    %75 = vector.extract_strided_slice %60 {offsets = [0, 28], sizes = [4, 92], strides = [1, 1]} : vector<4x144xbf16> to vector<4x92xbf16>
    %76 = vector.extract_strided_slice %60 {offsets = [0, 36], sizes = [4, 92], strides = [1, 1]} : vector<4x144xbf16> to vector<4x92xbf16>
    %77 = vector.extract_strided_slice %60 {offsets = [0, 37], sizes = [4, 92], strides = [1, 1]} : vector<4x144xbf16> to vector<4x92xbf16>
    %78 = vector.extract_strided_slice %60 {offsets = [0, 38], sizes = [4, 92], strides = [1, 1]} : vector<4x144xbf16> to vector<4x92xbf16>
    %79 = vector.extract_strided_slice %60 {offsets = [0, 39], sizes = [4, 92], strides = [1, 1]} : vector<4x144xbf16> to vector<4x92xbf16>
    %80 = vector.extract_strided_slice %60 {offsets = [0, 40], sizes = [4, 92], strides = [1, 1]} : vector<4x144xbf16> to vector<4x92xbf16>
    %81 = vector.extract_strided_slice %60 {offsets = [0, 48], sizes = [4, 92], strides = [1, 1]} : vector<4x144xbf16> to vector<4x92xbf16>
    %82 = vector.extract_strided_slice %60 {offsets = [0, 49], sizes = [4, 92], strides = [1, 1]} : vector<4x144xbf16> to vector<4x92xbf16>
    %83 = vector.extract_strided_slice %60 {offsets = [0, 50], sizes = [4, 92], strides = [1, 1]} : vector<4x144xbf16> to vector<4x92xbf16>
    %84 = vector.extract_strided_slice %60 {offsets = [0, 51], sizes = [4, 92], strides = [1, 1]} : vector<4x144xbf16> to vector<4x92xbf16>
    %85 = vector.extract_strided_slice %60 {offsets = [0, 52], sizes = [4, 92], strides = [1, 1]} : vector<4x144xbf16> to vector<4x92xbf16>
    %86 = vector.extract_strided_slice %4 {offsets = [3, 0, 0], sizes = [1, 4, 144], strides = [1, 1, 1]} : vector<8x4x144xbf16> to vector<1x4x144xbf16>
    %87 = vector.shape_cast %86 : vector<1x4x144xbf16> to vector<4x144xbf16>
    %88 = vector.extract_strided_slice %87 {offsets = [0, 0], sizes = [4, 92], strides = [1, 1]} : vector<4x144xbf16> to vector<4x92xbf16>
    %89 = vector.extract_strided_slice %87 {offsets = [0, 1], sizes = [4, 92], strides = [1, 1]} : vector<4x144xbf16> to vector<4x92xbf16>
    %90 = vector.extract_strided_slice %87 {offsets = [0, 2], sizes = [4, 92], strides = [1, 1]} : vector<4x144xbf16> to vector<4x92xbf16>
    %91 = vector.extract_strided_slice %87 {offsets = [0, 3], sizes = [4, 92], strides = [1, 1]} : vector<4x144xbf16> to vector<4x92xbf16>
    %92 = vector.extract_strided_slice %87 {offsets = [0, 4], sizes = [4, 92], strides = [1, 1]} : vector<4x144xbf16> to vector<4x92xbf16>
    %93 = vector.extract_strided_slice %87 {offsets = [0, 12], sizes = [4, 92], strides = [1, 1]} : vector<4x144xbf16> to vector<4x92xbf16>
    %94 = vector.extract_strided_slice %87 {offsets = [0, 13], sizes = [4, 92], strides = [1, 1]} : vector<4x144xbf16> to vector<4x92xbf16>
    %95 = vector.extract_strided_slice %87 {offsets = [0, 14], sizes = [4, 92], strides = [1, 1]} : vector<4x144xbf16> to vector<4x92xbf16>
    %96 = vector.extract_strided_slice %87 {offsets = [0, 15], sizes = [4, 92], strides = [1, 1]} : vector<4x144xbf16> to vector<4x92xbf16>
    %97 = vector.extract_strided_slice %87 {offsets = [0, 16], sizes = [4, 92], strides = [1, 1]} : vector<4x144xbf16> to vector<4x92xbf16>
    %98 = vector.extract_strided_slice %87 {offsets = [0, 24], sizes = [4, 92], strides = [1, 1]} : vector<4x144xbf16> to vector<4x92xbf16>
    %99 = vector.extract_strided_slice %87 {offsets = [0, 25], sizes = [4, 92], strides = [1, 1]} : vector<4x144xbf16> to vector<4x92xbf16>
    %100 = vector.extract_strided_slice %87 {offsets = [0, 26], sizes = [4, 92], strides = [1, 1]} : vector<4x144xbf16> to vector<4x92xbf16>
    %101 = vector.extract_strided_slice %87 {offsets = [0, 27], sizes = [4, 92], strides = [1, 1]} : vector<4x144xbf16> to vector<4x92xbf16>
    %102 = vector.extract_strided_slice %87 {offsets = [0, 28], sizes = [4, 92], strides = [1, 1]} : vector<4x144xbf16> to vector<4x92xbf16>
    %103 = vector.extract_strided_slice %87 {offsets = [0, 36], sizes = [4, 92], strides = [1, 1]} : vector<4x144xbf16> to vector<4x92xbf16>
    %104 = vector.extract_strided_slice %87 {offsets = [0, 37], sizes = [4, 92], strides = [1, 1]} : vector<4x144xbf16> to vector<4x92xbf16>
    %105 = vector.extract_strided_slice %87 {offsets = [0, 38], sizes = [4, 92], strides = [1, 1]} : vector<4x144xbf16> to vector<4x92xbf16>
    %106 = vector.extract_strided_slice %87 {offsets = [0, 39], sizes = [4, 92], strides = [1, 1]} : vector<4x144xbf16> to vector<4x92xbf16>
    %107 = vector.extract_strided_slice %87 {offsets = [0, 40], sizes = [4, 92], strides = [1, 1]} : vector<4x144xbf16> to vector<4x92xbf16>
    %108 = vector.extract_strided_slice %87 {offsets = [0, 48], sizes = [4, 92], strides = [1, 1]} : vector<4x144xbf16> to vector<4x92xbf16>
    %109 = vector.extract_strided_slice %87 {offsets = [0, 49], sizes = [4, 92], strides = [1, 1]} : vector<4x144xbf16> to vector<4x92xbf16>
    %110 = vector.extract_strided_slice %87 {offsets = [0, 50], sizes = [4, 92], strides = [1, 1]} : vector<4x144xbf16> to vector<4x92xbf16>
    %111 = vector.extract_strided_slice %87 {offsets = [0, 51], sizes = [4, 92], strides = [1, 1]} : vector<4x144xbf16> to vector<4x92xbf16>
    %112 = vector.extract_strided_slice %87 {offsets = [0, 52], sizes = [4, 92], strides = [1, 1]} : vector<4x144xbf16> to vector<4x92xbf16>
    %113 = vector.extract_strided_slice %4 {offsets = [4, 0, 0], sizes = [1, 4, 144], strides = [1, 1, 1]} : vector<8x4x144xbf16> to vector<1x4x144xbf16>
    %114 = vector.shape_cast %113 : vector<1x4x144xbf16> to vector<4x144xbf16>
    %115 = vector.extract_strided_slice %114 {offsets = [0, 0], sizes = [4, 92], strides = [1, 1]} : vector<4x144xbf16> to vector<4x92xbf16>
    %116 = vector.extract_strided_slice %114 {offsets = [0, 1], sizes = [4, 92], strides = [1, 1]} : vector<4x144xbf16> to vector<4x92xbf16>
    %117 = vector.extract_strided_slice %114 {offsets = [0, 2], sizes = [4, 92], strides = [1, 1]} : vector<4x144xbf16> to vector<4x92xbf16>
    %118 = vector.extract_strided_slice %114 {offsets = [0, 3], sizes = [4, 92], strides = [1, 1]} : vector<4x144xbf16> to vector<4x92xbf16>
    %119 = vector.extract_strided_slice %114 {offsets = [0, 4], sizes = [4, 92], strides = [1, 1]} : vector<4x144xbf16> to vector<4x92xbf16>
    %120 = vector.extract_strided_slice %114 {offsets = [0, 12], sizes = [4, 92], strides = [1, 1]} : vector<4x144xbf16> to vector<4x92xbf16>
    %121 = vector.extract_strided_slice %114 {offsets = [0, 13], sizes = [4, 92], strides = [1, 1]} : vector<4x144xbf16> to vector<4x92xbf16>
    %122 = vector.extract_strided_slice %114 {offsets = [0, 14], sizes = [4, 92], strides = [1, 1]} : vector<4x144xbf16> to vector<4x92xbf16>
    %123 = vector.extract_strided_slice %114 {offsets = [0, 15], sizes = [4, 92], strides = [1, 1]} : vector<4x144xbf16> to vector<4x92xbf16>
    %124 = vector.extract_strided_slice %114 {offsets = [0, 16], sizes = [4, 92], strides = [1, 1]} : vector<4x144xbf16> to vector<4x92xbf16>
    %125 = vector.extract_strided_slice %114 {offsets = [0, 24], sizes = [4, 92], strides = [1, 1]} : vector<4x144xbf16> to vector<4x92xbf16>
    %126 = vector.extract_strided_slice %114 {offsets = [0, 25], sizes = [4, 92], strides = [1, 1]} : vector<4x144xbf16> to vector<4x92xbf16>
    %127 = vector.extract_strided_slice %114 {offsets = [0, 26], sizes = [4, 92], strides = [1, 1]} : vector<4x144xbf16> to vector<4x92xbf16>
    %128 = vector.extract_strided_slice %114 {offsets = [0, 27], sizes = [4, 92], strides = [1, 1]} : vector<4x144xbf16> to vector<4x92xbf16>
    %129 = vector.extract_strided_slice %114 {offsets = [0, 28], sizes = [4, 92], strides = [1, 1]} : vector<4x144xbf16> to vector<4x92xbf16>
    %130 = vector.extract_strided_slice %114 {offsets = [0, 36], sizes = [4, 92], strides = [1, 1]} : vector<4x144xbf16> to vector<4x92xbf16>
    %131 = vector.extract_strided_slice %114 {offsets = [0, 37], sizes = [4, 92], strides = [1, 1]} : vector<4x144xbf16> to vector<4x92xbf16>
    %132 = vector.extract_strided_slice %114 {offsets = [0, 38], sizes = [4, 92], strides = [1, 1]} : vector<4x144xbf16> to vector<4x92xbf16>
    %133 = vector.extract_strided_slice %114 {offsets = [0, 39], sizes = [4, 92], strides = [1, 1]} : vector<4x144xbf16> to vector<4x92xbf16>
    %134 = vector.extract_strided_slice %114 {offsets = [0, 40], sizes = [4, 92], strides = [1, 1]} : vector<4x144xbf16> to vector<4x92xbf16>
    %135 = vector.extract_strided_slice %114 {offsets = [0, 48], sizes = [4, 92], strides = [1, 1]} : vector<4x144xbf16> to vector<4x92xbf16>
    %136 = vector.extract_strided_slice %114 {offsets = [0, 49], sizes = [4, 92], strides = [1, 1]} : vector<4x144xbf16> to vector<4x92xbf16>
    %137 = vector.extract_strided_slice %114 {offsets = [0, 50], sizes = [4, 92], strides = [1, 1]} : vector<4x144xbf16> to vector<4x92xbf16>
    %138 = vector.extract_strided_slice %114 {offsets = [0, 51], sizes = [4, 92], strides = [1, 1]} : vector<4x144xbf16> to vector<4x92xbf16>
    %139 = vector.extract_strided_slice %114 {offsets = [0, 52], sizes = [4, 92], strides = [1, 1]} : vector<4x144xbf16> to vector<4x92xbf16>
    %140 = tpu.concatenate %7, %8, %9, %10, %11, %12, %13, %14, %15, %16, %17, %18, %19, %20, %21, %22 in 0 : vector<4x92xbf16>, vector<4x92xbf16>, vector<4x92xbf16>, vector<4x92xbf16>, vector<4x92xbf16>, vector<4x92xbf16>, vector<4x92xbf16>, vector<4x92xbf16>, vector<4x92xbf16>, vector<4x92xbf16>, vector<4x92xbf16>, vector<4x92xbf16>, vector<4x92xbf16>, vector<4x92xbf16>, vector<4x92xbf16>, vector<4x92xbf16> -> vector<64x92xbf16>
    %141 = tpu.concatenate %23, %24, %25, %26, %27, %28, %29, %30, %31, %34, %35, %36, %37, %38, %39, %40 in 0 : vector<4x92xbf16>, vector<4x92xbf16>, vector<4x92xbf16>, vector<4x92xbf16>, vector<4x92xbf16>, vector<4x92xbf16>, vector<4x92xbf16>, vector<4x92xbf16>, vector<4x92xbf16>, vector<4x92xbf16>, vector<4x92xbf16>, vector<4x92xbf16>, vector<4x92xbf16>, vector<4x92xbf16>, vector<4x92xbf16>, vector<4x92xbf16> -> vector<64x92xbf16>
    %142 = tpu.concatenate %41, %42, %43, %44, %45, %46, %47, %48, %49, %50, %51, %52, %53, %54, %55, %56 in 0 : vector<4x92xbf16>, vector<4x92xbf16>, vector<4x92xbf16>, vector<4x92xbf16>, vector<4x92xbf16>, vector<4x92xbf16>, vector<4x92xbf16>, vector<4x92xbf16>, vector<4x92xbf16>, vector<4x92xbf16>, vector<4x92xbf16>, vector<4x92xbf16>, vector<4x92xbf16>, vector<4x92xbf16>, vector<4x92xbf16>, vector<4x92xbf16> -> vector<64x92xbf16>
    %143 = tpu.concatenate %57, %58, %61, %62, %63, %64, %65, %66, %67, %68, %69, %70, %71, %72, %73, %74 in 0 : vector<4x92xbf16>, vector<4x92xbf16>, vector<4x92xbf16>, vector<4x92xbf16>, vector<4x92xbf16>, vector<4x92xbf16>, vector<4x92xbf16>, vector<4x92xbf16>, vector<4x92xbf16>, vector<4x92xbf16>, vector<4x92xbf16>, vector<4x92xbf16>, vector<4x92xbf16>, vector<4x92xbf16>, vector<4x92xbf16>, vector<4x92xbf16> -> vector<64x92xbf16>
    %144 = tpu.concatenate %75, %76, %77, %78, %79, %80, %81, %82, %83, %84, %85, %88, %89, %90, %91, %92 in 0 : vector<4x92xbf16>, vector<4x92xbf16>, vector<4x92xbf16>, vector<4x92xbf16>, vector<4x92xbf16>, vector<4x92xbf16>, vector<4x92xbf16>, vector<4x92xbf16>, vector<4x92xbf16>, vector<4x92xbf16>, vector<4x92xbf16>, vector<4x92xbf16>, vector<4x92xbf16>, vector<4x92xbf16>, vector<4x92xbf16>, vector<4x92xbf16> -> vector<64x92xbf16>
    %145 = tpu.concatenate %93, %94, %95, %96, %97, %98, %99, %100, %101, %102, %103, %104, %105, %106, %107, %108 in 0 : vector<4x92xbf16>, vector<4x92xbf16>, vector<4x92xbf16>, vector<4x92xbf16>, vector<4x92xbf16>, vector<4x92xbf16>, vector<4x92xbf16>, vector<4x92xbf16>, vector<4x92xbf16>, vector<4x92xbf16>, vector<4x92xbf16>, vector<4x92xbf16>, vector<4x92xbf16>, vector<4x92xbf16>, vector<4x92xbf16>, vector<4x92xbf16> -> vector<64x92xbf16>
    %146 = tpu.concatenate %109, %110, %111, %112, %115, %116, %117, %118, %119, %120, %121, %122, %123, %124, %125, %126 in 0 : vector<4x92xbf16>, vector<4x92xbf16>, vector<4x92xbf16>, vector<4x92xbf16>, vector<4x92xbf16>, vector<4x92xbf16>, vector<4x92xbf16>, vector<4x92xbf16>, vector<4x92xbf16>, vector<4x92xbf16>, vector<4x92xbf16>, vector<4x92xbf16>, vector<4x92xbf16>, vector<4x92xbf16>, vector<4x92xbf16>, vector<4x92xbf16> -> vector<64x92xbf16>
    %147 = tpu.concatenate %127, %128, %129, %130, %131, %132, %133, %134, %135, %136, %137, %138, %139 in 0 : vector<4x92xbf16>, vector<4x92xbf16>, vector<4x92xbf16>, vector<4x92xbf16>, vector<4x92xbf16>, vector<4x92xbf16>, vector<4x92xbf16>, vector<4x92xbf16>, vector<4x92xbf16>, vector<4x92xbf16>, vector<4x92xbf16>, vector<4x92xbf16>, vector<4x92xbf16> -> vector<52x92xbf16>
    %148 = tpu.concatenate %140, %141, %142, %143, %144, %145, %146, %147 in 0 : vector<64x92xbf16>, vector<64x92xbf16>, vector<64x92xbf16>, vector<64x92xbf16>, vector<64x92xbf16>, vector<64x92xbf16>, vector<64x92xbf16>, vector<52x92xbf16> -> vector<500x92xbf16>
    %c0_2 = arith.constant 0 : index
    %c0_3 = arith.constant 0 : index
    %149 = vector.load %arg3[%c0_2, %c0_3] : memref<8x500xbf16, #tpu.memory_space<vmem>>, vector<8x500xbf16>
    %cst = arith.constant dense<0.000000e+00> : vector<8x92xf32>
    %150 = tpu.matmul %149, %148, %cst {dimension_numbers = #tpu.dot_dimension_numbers<[1], [0], [0], [1], [0, 0, 1, 1], [], []>} : vector<8x500xbf16>, vector<500x92xbf16>, vector<8x92xf32> -> vector<8x92xf32>
    %c0_4 = arith.constant 0 : index
    %c0_5 = arith.constant 0 : index
    %151 = vector.load %arg4[%c0_4, %c0_5] : memref<8x1xf32, #tpu.memory_space<vmem>>, vector<8x1xf32>
    %152 = vector.broadcast %151 : vector<8x1xf32> to vector<8x92xf32>
    %153 = arith.addf %150, %152 : vector<8x92xf32>
    %154 = vector.extract_strided_slice %153 {offsets = [0, 0], sizes = [8, 8], strides = [1, 1]} : vector<8x92xf32> to vector<8x8xf32>
    %155 = vector.extract_strided_slice %153 {offsets = [0, 12], sizes = [8, 8], strides = [1, 1]} : vector<8x92xf32> to vector<8x8xf32>
    %156 = vector.extract_strided_slice %153 {offsets = [0, 24], sizes = [8, 8], strides = [1, 1]} : vector<8x92xf32> to vector<8x8xf32>
    %157 = vector.extract_strided_slice %153 {offsets = [0, 36], sizes = [8, 8], strides = [1, 1]} : vector<8x92xf32> to vector<8x8xf32>
    %158 = vector.extract_strided_slice %153 {offsets = [0, 48], sizes = [8, 8], strides = [1, 1]} : vector<8x92xf32> to vector<8x8xf32>
    %159 = vector.extract_strided_slice %153 {offsets = [0, 60], sizes = [8, 8], strides = [1, 1]} : vector<8x92xf32> to vector<8x8xf32>
    %160 = vector.extract_strided_slice %153 {offsets = [0, 72], sizes = [8, 8], strides = [1, 1]} : vector<8x92xf32> to vector<8x8xf32>
    %161 = vector.extract_strided_slice %153 {offsets = [0, 84], sizes = [8, 8], strides = [1, 1]} : vector<8x92xf32> to vector<8x8xf32>
    %162 = tpu.concatenate %154, %155, %156, %157, %158, %159, %160, %161 in 1 : vector<8x8xf32>, vector<8x8xf32>, vector<8x8xf32>, vector<8x8xf32>, vector<8x8xf32>, vector<8x8xf32>, vector<8x8xf32>, vector<8x8xf32> -> vector<8x64xf32>
    %163 = vector.extract_strided_slice %162 {offsets = [0, 0], sizes = [4, 64], strides = [1, 1]} : vector<8x64xf32> to vector<4x64xf32>
    %164 = vector.extract_strided_slice %162 {offsets = [4, 0], sizes = [4, 64], strides = [1, 1]} : vector<8x64xf32> to vector<4x64xf32>
    %165 = vector.extract_strided_slice %4 {offsets = [1, 0, 0], sizes = [1, 4, 144], strides = [1, 1, 1]} : vector<8x4x144xbf16> to vector<1x4x144xbf16>
    %166 = vector.shape_cast %165 : vector<1x4x144xbf16> to vector<4x144xbf16>
    %167 = vector.extract_strided_slice %166 {offsets = [0, 0], sizes = [4, 92], strides = [1, 1]} : vector<4x144xbf16> to vector<4x92xbf16>
    %168 = vector.extract_strided_slice %166 {offsets = [0, 1], sizes = [4, 92], strides = [1, 1]} : vector<4x144xbf16> to vector<4x92xbf16>
    %169 = vector.extract_strided_slice %166 {offsets = [0, 2], sizes = [4, 92], strides = [1, 1]} : vector<4x144xbf16> to vector<4x92xbf16>
    %170 = vector.extract_strided_slice %166 {offsets = [0, 3], sizes = [4, 92], strides = [1, 1]} : vector<4x144xbf16> to vector<4x92xbf16>
    %171 = vector.extract_strided_slice %166 {offsets = [0, 4], sizes = [4, 92], strides = [1, 1]} : vector<4x144xbf16> to vector<4x92xbf16>
    %172 = vector.extract_strided_slice %166 {offsets = [0, 12], sizes = [4, 92], strides = [1, 1]} : vector<4x144xbf16> to vector<4x92xbf16>
    %173 = vector.extract_strided_slice %166 {offsets = [0, 13], sizes = [4, 92], strides = [1, 1]} : vector<4x144xbf16> to vector<4x92xbf16>
    %174 = vector.extract_strided_slice %166 {offsets = [0, 14], sizes = [4, 92], strides = [1, 1]} : vector<4x144xbf16> to vector<4x92xbf16>
    %175 = vector.extract_strided_slice %166 {offsets = [0, 15], sizes = [4, 92], strides = [1, 1]} : vector<4x144xbf16> to vector<4x92xbf16>
    %176 = vector.extract_strided_slice %166 {offsets = [0, 16], sizes = [4, 92], strides = [1, 1]} : vector<4x144xbf16> to vector<4x92xbf16>
    %177 = vector.extract_strided_slice %166 {offsets = [0, 24], sizes = [4, 92], strides = [1, 1]} : vector<4x144xbf16> to vector<4x92xbf16>
    %178 = vector.extract_strided_slice %166 {offsets = [0, 25], sizes = [4, 92], strides = [1, 1]} : vector<4x144xbf16> to vector<4x92xbf16>
    %179 = vector.extract_strided_slice %166 {offsets = [0, 26], sizes = [4, 92], strides = [1, 1]} : vector<4x144xbf16> to vector<4x92xbf16>
    %180 = vector.extract_strided_slice %166 {offsets = [0, 27], sizes = [4, 92], strides = [1, 1]} : vector<4x144xbf16> to vector<4x92xbf16>
    %181 = vector.extract_strided_slice %166 {offsets = [0, 28], sizes = [4, 92], strides = [1, 1]} : vector<4x144xbf16> to vector<4x92xbf16>
    %182 = vector.extract_strided_slice %166 {offsets = [0, 36], sizes = [4, 92], strides = [1, 1]} : vector<4x144xbf16> to vector<4x92xbf16>
    %183 = vector.extract_strided_slice %166 {offsets = [0, 37], sizes = [4, 92], strides = [1, 1]} : vector<4x144xbf16> to vector<4x92xbf16>
    %184 = vector.extract_strided_slice %166 {offsets = [0, 38], sizes = [4, 92], strides = [1, 1]} : vector<4x144xbf16> to vector<4x92xbf16>
    %185 = vector.extract_strided_slice %166 {offsets = [0, 39], sizes = [4, 92], strides = [1, 1]} : vector<4x144xbf16> to vector<4x92xbf16>
    %186 = vector.extract_strided_slice %166 {offsets = [0, 40], sizes = [4, 92], strides = [1, 1]} : vector<4x144xbf16> to vector<4x92xbf16>
    %187 = vector.extract_strided_slice %166 {offsets = [0, 48], sizes = [4, 92], strides = [1, 1]} : vector<4x144xbf16> to vector<4x92xbf16>
    %188 = vector.extract_strided_slice %166 {offsets = [0, 49], sizes = [4, 92], strides = [1, 1]} : vector<4x144xbf16> to vector<4x92xbf16>
    %189 = vector.extract_strided_slice %166 {offsets = [0, 50], sizes = [4, 92], strides = [1, 1]} : vector<4x144xbf16> to vector<4x92xbf16>
    %190 = vector.extract_strided_slice %166 {offsets = [0, 51], sizes = [4, 92], strides = [1, 1]} : vector<4x144xbf16> to vector<4x92xbf16>
    %191 = vector.extract_strided_slice %166 {offsets = [0, 52], sizes = [4, 92], strides = [1, 1]} : vector<4x144xbf16> to vector<4x92xbf16>
    %192 = vector.extract_strided_slice %4 {offsets = [2, 0, 0], sizes = [1, 4, 144], strides = [1, 1, 1]} : vector<8x4x144xbf16> to vector<1x4x144xbf16>
    %193 = vector.shape_cast %192 : vector<1x4x144xbf16> to vector<4x144xbf16>
    %194 = vector.extract_strided_slice %193 {offsets = [0, 0], sizes = [4, 92], strides = [1, 1]} : vector<4x144xbf16> to vector<4x92xbf16>
    %195 = vector.extract_strided_slice %193 {offsets = [0, 1], sizes = [4, 92], strides = [1, 1]} : vector<4x144xbf16> to vector<4x92xbf16>
    %196 = vector.extract_strided_slice %193 {offsets = [0, 2], sizes = [4, 92], strides = [1, 1]} : vector<4x144xbf16> to vector<4x92xbf16>
    %197 = vector.extract_strided_slice %193 {offsets = [0, 3], sizes = [4, 92], strides = [1, 1]} : vector<4x144xbf16> to vector<4x92xbf16>
    %198 = vector.extract_strided_slice %193 {offsets = [0, 4], sizes = [4, 92], strides = [1, 1]} : vector<4x144xbf16> to vector<4x92xbf16>
    %199 = vector.extract_strided_slice %193 {offsets = [0, 12], sizes = [4, 92], strides = [1, 1]} : vector<4x144xbf16> to vector<4x92xbf16>
    %200 = vector.extract_strided_slice %193 {offsets = [0, 13], sizes = [4, 92], strides = [1, 1]} : vector<4x144xbf16> to vector<4x92xbf16>
    %201 = vector.extract_strided_slice %193 {offsets = [0, 14], sizes = [4, 92], strides = [1, 1]} : vector<4x144xbf16> to vector<4x92xbf16>
    %202 = vector.extract_strided_slice %193 {offsets = [0, 15], sizes = [4, 92], strides = [1, 1]} : vector<4x144xbf16> to vector<4x92xbf16>
    %203 = vector.extract_strided_slice %193 {offsets = [0, 16], sizes = [4, 92], strides = [1, 1]} : vector<4x144xbf16> to vector<4x92xbf16>
    %204 = vector.extract_strided_slice %193 {offsets = [0, 24], sizes = [4, 92], strides = [1, 1]} : vector<4x144xbf16> to vector<4x92xbf16>
    %205 = vector.extract_strided_slice %193 {offsets = [0, 25], sizes = [4, 92], strides = [1, 1]} : vector<4x144xbf16> to vector<4x92xbf16>
    %206 = vector.extract_strided_slice %193 {offsets = [0, 26], sizes = [4, 92], strides = [1, 1]} : vector<4x144xbf16> to vector<4x92xbf16>
    %207 = vector.extract_strided_slice %193 {offsets = [0, 27], sizes = [4, 92], strides = [1, 1]} : vector<4x144xbf16> to vector<4x92xbf16>
    %208 = vector.extract_strided_slice %193 {offsets = [0, 28], sizes = [4, 92], strides = [1, 1]} : vector<4x144xbf16> to vector<4x92xbf16>
    %209 = vector.extract_strided_slice %193 {offsets = [0, 36], sizes = [4, 92], strides = [1, 1]} : vector<4x144xbf16> to vector<4x92xbf16>
    %210 = vector.extract_strided_slice %193 {offsets = [0, 37], sizes = [4, 92], strides = [1, 1]} : vector<4x144xbf16> to vector<4x92xbf16>
    %211 = vector.extract_strided_slice %193 {offsets = [0, 38], sizes = [4, 92], strides = [1, 1]} : vector<4x144xbf16> to vector<4x92xbf16>
    %212 = vector.extract_strided_slice %193 {offsets = [0, 39], sizes = [4, 92], strides = [1, 1]} : vector<4x144xbf16> to vector<4x92xbf16>
    %213 = vector.extract_strided_slice %193 {offsets = [0, 40], sizes = [4, 92], strides = [1, 1]} : vector<4x144xbf16> to vector<4x92xbf16>
    %214 = vector.extract_strided_slice %193 {offsets = [0, 48], sizes = [4, 92], strides = [1, 1]} : vector<4x144xbf16> to vector<4x92xbf16>
    %215 = vector.extract_strided_slice %193 {offsets = [0, 49], sizes = [4, 92], strides = [1, 1]} : vector<4x144xbf16> to vector<4x92xbf16>
    %216 = vector.extract_strided_slice %193 {offsets = [0, 50], sizes = [4, 92], strides = [1, 1]} : vector<4x144xbf16> to vector<4x92xbf16>
    %217 = vector.extract_strided_slice %193 {offsets = [0, 51], sizes = [4, 92], strides = [1, 1]} : vector<4x144xbf16> to vector<4x92xbf16>
    %218 = vector.extract_strided_slice %193 {offsets = [0, 52], sizes = [4, 92], strides = [1, 1]} : vector<4x144xbf16> to vector<4x92xbf16>
    %219 = vector.extract_strided_slice %4 {offsets = [3, 0, 0], sizes = [1, 4, 144], strides = [1, 1, 1]} : vector<8x4x144xbf16> to vector<1x4x144xbf16>
    %220 = vector.shape_cast %219 : vector<1x4x144xbf16> to vector<4x144xbf16>
    %221 = vector.extract_strided_slice %220 {offsets = [0, 0], sizes = [4, 92], strides = [1, 1]} : vector<4x144xbf16> to vector<4x92xbf16>
    %222 = vector.extract_strided_slice %220 {offsets = [0, 1], sizes = [4, 92], strides = [1, 1]} : vector<4x144xbf16> to vector<4x92xbf16>
    %223 = vector.extract_strided_slice %220 {offsets = [0, 2], sizes = [4, 92], strides = [1, 1]} : vector<4x144xbf16> to vector<4x92xbf16>
    %224 = vector.extract_strided_slice %220 {offsets = [0, 3], sizes = [4, 92], strides = [1, 1]} : vector<4x144xbf16> to vector<4x92xbf16>
    %225 = vector.extract_strided_slice %220 {offsets = [0, 4], sizes = [4, 92], strides = [1, 1]} : vector<4x144xbf16> to vector<4x92xbf16>
    %226 = vector.extract_strided_slice %220 {offsets = [0, 12], sizes = [4, 92], strides = [1, 1]} : vector<4x144xbf16> to vector<4x92xbf16>
    %227 = vector.extract_strided_slice %220 {offsets = [0, 13], sizes = [4, 92], strides = [1, 1]} : vector<4x144xbf16> to vector<4x92xbf16>
    %228 = vector.extract_strided_slice %220 {offsets = [0, 14], sizes = [4, 92], strides = [1, 1]} : vector<4x144xbf16> to vector<4x92xbf16>
    %229 = vector.extract_strided_slice %220 {offsets = [0, 15], sizes = [4, 92], strides = [1, 1]} : vector<4x144xbf16> to vector<4x92xbf16>
    %230 = vector.extract_strided_slice %220 {offsets = [0, 16], sizes = [4, 92], strides = [1, 1]} : vector<4x144xbf16> to vector<4x92xbf16>
    %231 = vector.extract_strided_slice %220 {offsets = [0, 24], sizes = [4, 92], strides = [1, 1]} : vector<4x144xbf16> to vector<4x92xbf16>
    %232 = vector.extract_strided_slice %220 {offsets = [0, 25], sizes = [4, 92], strides = [1, 1]} : vector<4x144xbf16> to vector<4x92xbf16>
    %233 = vector.extract_strided_slice %220 {offsets = [0, 26], sizes = [4, 92], strides = [1, 1]} : vector<4x144xbf16> to vector<4x92xbf16>
    %234 = vector.extract_strided_slice %220 {offsets = [0, 27], sizes = [4, 92], strides = [1, 1]} : vector<4x144xbf16> to vector<4x92xbf16>
    %235 = vector.extract_strided_slice %220 {offsets = [0, 28], sizes = [4, 92], strides = [1, 1]} : vector<4x144xbf16> to vector<4x92xbf16>
    %236 = vector.extract_strided_slice %220 {offsets = [0, 36], sizes = [4, 92], strides = [1, 1]} : vector<4x144xbf16> to vector<4x92xbf16>
    %237 = vector.extract_strided_slice %220 {offsets = [0, 37], sizes = [4, 92], strides = [1, 1]} : vector<4x144xbf16> to vector<4x92xbf16>
    %238 = vector.extract_strided_slice %220 {offsets = [0, 38], sizes = [4, 92], strides = [1, 1]} : vector<4x144xbf16> to vector<4x92xbf16>
    %239 = vector.extract_strided_slice %220 {offsets = [0, 39], sizes = [4, 92], strides = [1, 1]} : vector<4x144xbf16> to vector<4x92xbf16>
    %240 = vector.extract_strided_slice %220 {offsets = [0, 40], sizes = [4, 92], strides = [1, 1]} : vector<4x144xbf16> to vector<4x92xbf16>
    %241 = vector.extract_strided_slice %220 {offsets = [0, 48], sizes = [4, 92], strides = [1, 1]} : vector<4x144xbf16> to vector<4x92xbf16>
    %242 = vector.extract_strided_slice %220 {offsets = [0, 49], sizes = [4, 92], strides = [1, 1]} : vector<4x144xbf16> to vector<4x92xbf16>
    %243 = vector.extract_strided_slice %220 {offsets = [0, 50], sizes = [4, 92], strides = [1, 1]} : vector<4x144xbf16> to vector<4x92xbf16>
    %244 = vector.extract_strided_slice %220 {offsets = [0, 51], sizes = [4, 92], strides = [1, 1]} : vector<4x144xbf16> to vector<4x92xbf16>
    %245 = vector.extract_strided_slice %220 {offsets = [0, 52], sizes = [4, 92], strides = [1, 1]} : vector<4x144xbf16> to vector<4x92xbf16>
    %246 = vector.extract_strided_slice %4 {offsets = [4, 0, 0], sizes = [1, 4, 144], strides = [1, 1, 1]} : vector<8x4x144xbf16> to vector<1x4x144xbf16>
    %247 = vector.shape_cast %246 : vector<1x4x144xbf16> to vector<4x144xbf16>
    %248 = vector.extract_strided_slice %247 {offsets = [0, 0], sizes = [4, 92], strides = [1, 1]} : vector<4x144xbf16> to vector<4x92xbf16>
    %249 = vector.extract_strided_slice %247 {offsets = [0, 1], sizes = [4, 92], strides = [1, 1]} : vector<4x144xbf16> to vector<4x92xbf16>
    %250 = vector.extract_strided_slice %247 {offsets = [0, 2], sizes = [4, 92], strides = [1, 1]} : vector<4x144xbf16> to vector<4x92xbf16>
    %251 = vector.extract_strided_slice %247 {offsets = [0, 3], sizes = [4, 92], strides = [1, 1]} : vector<4x144xbf16> to vector<4x92xbf16>
    %252 = vector.extract_strided_slice %247 {offsets = [0, 4], sizes = [4, 92], strides = [1, 1]} : vector<4x144xbf16> to vector<4x92xbf16>
    %253 = vector.extract_strided_slice %247 {offsets = [0, 12], sizes = [4, 92], strides = [1, 1]} : vector<4x144xbf16> to vector<4x92xbf16>
    %254 = vector.extract_strided_slice %247 {offsets = [0, 13], sizes = [4, 92], strides = [1, 1]} : vector<4x144xbf16> to vector<4x92xbf16>
    %255 = vector.extract_strided_slice %247 {offsets = [0, 14], sizes = [4, 92], strides = [1, 1]} : vector<4x144xbf16> to vector<4x92xbf16>
    %256 = vector.extract_strided_slice %247 {offsets = [0, 15], sizes = [4, 92], strides = [1, 1]} : vector<4x144xbf16> to vector<4x92xbf16>
    %257 = vector.extract_strided_slice %247 {offsets = [0, 16], sizes = [4, 92], strides = [1, 1]} : vector<4x144xbf16> to vector<4x92xbf16>
    %258 = vector.extract_strided_slice %247 {offsets = [0, 24], sizes = [4, 92], strides = [1, 1]} : vector<4x144xbf16> to vector<4x92xbf16>
    %259 = vector.extract_strided_slice %247 {offsets = [0, 25], sizes = [4, 92], strides = [1, 1]} : vector<4x144xbf16> to vector<4x92xbf16>
    %260 = vector.extract_strided_slice %247 {offsets = [0, 26], sizes = [4, 92], strides = [1, 1]} : vector<4x144xbf16> to vector<4x92xbf16>
    %261 = vector.extract_strided_slice %247 {offsets = [0, 27], sizes = [4, 92], strides = [1, 1]} : vector<4x144xbf16> to vector<4x92xbf16>
    %262 = vector.extract_strided_slice %247 {offsets = [0, 28], sizes = [4, 92], strides = [1, 1]} : vector<4x144xbf16> to vector<4x92xbf16>
    %263 = vector.extract_strided_slice %247 {offsets = [0, 36], sizes = [4, 92], strides = [1, 1]} : vector<4x144xbf16> to vector<4x92xbf16>
    %264 = vector.extract_strided_slice %247 {offsets = [0, 37], sizes = [4, 92], strides = [1, 1]} : vector<4x144xbf16> to vector<4x92xbf16>
    %265 = vector.extract_strided_slice %247 {offsets = [0, 38], sizes = [4, 92], strides = [1, 1]} : vector<4x144xbf16> to vector<4x92xbf16>
    %266 = vector.extract_strided_slice %247 {offsets = [0, 39], sizes = [4, 92], strides = [1, 1]} : vector<4x144xbf16> to vector<4x92xbf16>
    %267 = vector.extract_strided_slice %247 {offsets = [0, 40], sizes = [4, 92], strides = [1, 1]} : vector<4x144xbf16> to vector<4x92xbf16>
    %268 = vector.extract_strided_slice %247 {offsets = [0, 48], sizes = [4, 92], strides = [1, 1]} : vector<4x144xbf16> to vector<4x92xbf16>
    %269 = vector.extract_strided_slice %247 {offsets = [0, 49], sizes = [4, 92], strides = [1, 1]} : vector<4x144xbf16> to vector<4x92xbf16>
    %270 = vector.extract_strided_slice %247 {offsets = [0, 50], sizes = [4, 92], strides = [1, 1]} : vector<4x144xbf16> to vector<4x92xbf16>
    %271 = vector.extract_strided_slice %247 {offsets = [0, 51], sizes = [4, 92], strides = [1, 1]} : vector<4x144xbf16> to vector<4x92xbf16>
    %272 = vector.extract_strided_slice %247 {offsets = [0, 52], sizes = [4, 92], strides = [1, 1]} : vector<4x144xbf16> to vector<4x92xbf16>
    %273 = vector.extract_strided_slice %4 {offsets = [5, 0, 0], sizes = [1, 4, 144], strides = [1, 1, 1]} : vector<8x4x144xbf16> to vector<1x4x144xbf16>
    %274 = vector.shape_cast %273 : vector<1x4x144xbf16> to vector<4x144xbf16>
    %275 = vector.extract_strided_slice %274 {offsets = [0, 0], sizes = [4, 92], strides = [1, 1]} : vector<4x144xbf16> to vector<4x92xbf16>
    %276 = vector.extract_strided_slice %274 {offsets = [0, 1], sizes = [4, 92], strides = [1, 1]} : vector<4x144xbf16> to vector<4x92xbf16>
    %277 = vector.extract_strided_slice %274 {offsets = [0, 2], sizes = [4, 92], strides = [1, 1]} : vector<4x144xbf16> to vector<4x92xbf16>
    %278 = vector.extract_strided_slice %274 {offsets = [0, 3], sizes = [4, 92], strides = [1, 1]} : vector<4x144xbf16> to vector<4x92xbf16>
    %279 = vector.extract_strided_slice %274 {offsets = [0, 4], sizes = [4, 92], strides = [1, 1]} : vector<4x144xbf16> to vector<4x92xbf16>
    %280 = vector.extract_strided_slice %274 {offsets = [0, 12], sizes = [4, 92], strides = [1, 1]} : vector<4x144xbf16> to vector<4x92xbf16>
    %281 = vector.extract_strided_slice %274 {offsets = [0, 13], sizes = [4, 92], strides = [1, 1]} : vector<4x144xbf16> to vector<4x92xbf16>
    %282 = vector.extract_strided_slice %274 {offsets = [0, 14], sizes = [4, 92], strides = [1, 1]} : vector<4x144xbf16> to vector<4x92xbf16>
    %283 = vector.extract_strided_slice %274 {offsets = [0, 15], sizes = [4, 92], strides = [1, 1]} : vector<4x144xbf16> to vector<4x92xbf16>
    %284 = vector.extract_strided_slice %274 {offsets = [0, 16], sizes = [4, 92], strides = [1, 1]} : vector<4x144xbf16> to vector<4x92xbf16>
    %285 = vector.extract_strided_slice %274 {offsets = [0, 24], sizes = [4, 92], strides = [1, 1]} : vector<4x144xbf16> to vector<4x92xbf16>
    %286 = vector.extract_strided_slice %274 {offsets = [0, 25], sizes = [4, 92], strides = [1, 1]} : vector<4x144xbf16> to vector<4x92xbf16>
    %287 = vector.extract_strided_slice %274 {offsets = [0, 26], sizes = [4, 92], strides = [1, 1]} : vector<4x144xbf16> to vector<4x92xbf16>
    %288 = vector.extract_strided_slice %274 {offsets = [0, 27], sizes = [4, 92], strides = [1, 1]} : vector<4x144xbf16> to vector<4x92xbf16>
    %289 = vector.extract_strided_slice %274 {offsets = [0, 28], sizes = [4, 92], strides = [1, 1]} : vector<4x144xbf16> to vector<4x92xbf16>
    %290 = vector.extract_strided_slice %274 {offsets = [0, 36], sizes = [4, 92], strides = [1, 1]} : vector<4x144xbf16> to vector<4x92xbf16>
    %291 = vector.extract_strided_slice %274 {offsets = [0, 37], sizes = [4, 92], strides = [1, 1]} : vector<4x144xbf16> to vector<4x92xbf16>
    %292 = vector.extract_strided_slice %274 {offsets = [0, 38], sizes = [4, 92], strides = [1, 1]} : vector<4x144xbf16> to vector<4x92xbf16>
    %293 = vector.extract_strided_slice %274 {offsets = [0, 39], sizes = [4, 92], strides = [1, 1]} : vector<4x144xbf16> to vector<4x92xbf16>
    %294 = vector.extract_strided_slice %274 {offsets = [0, 40], sizes = [4, 92], strides = [1, 1]} : vector<4x144xbf16> to vector<4x92xbf16>
    %295 = vector.extract_strided_slice %274 {offsets = [0, 48], sizes = [4, 92], strides = [1, 1]} : vector<4x144xbf16> to vector<4x92xbf16>
    %296 = vector.extract_strided_slice %274 {offsets = [0, 49], sizes = [4, 92], strides = [1, 1]} : vector<4x144xbf16> to vector<4x92xbf16>
    %297 = vector.extract_strided_slice %274 {offsets = [0, 50], sizes = [4, 92], strides = [1, 1]} : vector<4x144xbf16> to vector<4x92xbf16>
    %298 = vector.extract_strided_slice %274 {offsets = [0, 51], sizes = [4, 92], strides = [1, 1]} : vector<4x144xbf16> to vector<4x92xbf16>
    %299 = vector.extract_strided_slice %274 {offsets = [0, 52], sizes = [4, 92], strides = [1, 1]} : vector<4x144xbf16> to vector<4x92xbf16>
    %300 = tpu.concatenate %167, %168, %169, %170, %171, %172, %173, %174, %175, %176, %177, %178, %179, %180, %181, %182 in 0 : vector<4x92xbf16>, vector<4x92xbf16>, vector<4x92xbf16>, vector<4x92xbf16>, vector<4x92xbf16>, vector<4x92xbf16>, vector<4x92xbf16>, vector<4x92xbf16>, vector<4x92xbf16>, vector<4x92xbf16>, vector<4x92xbf16>, vector<4x92xbf16>, vector<4x92xbf16>, vector<4x92xbf16>, vector<4x92xbf16>, vector<4x92xbf16> -> vector<64x92xbf16>
    %301 = tpu.concatenate %183, %184, %185, %186, %187, %188, %189, %190, %191, %194, %195, %196, %197, %198, %199, %200 in 0 : vector<4x92xbf16>, vector<4x92xbf16>, vector<4x92xbf16>, vector<4x92xbf16>, vector<4x92xbf16>, vector<4x92xbf16>, vector<4x92xbf16>, vector<4x92xbf16>, vector<4x92xbf16>, vector<4x92xbf16>, vector<4x92xbf16>, vector<4x92xbf16>, vector<4x92xbf16>, vector<4x92xbf16>, vector<4x92xbf16>, vector<4x92xbf16> -> vector<64x92xbf16>
    %302 = tpu.concatenate %201, %202, %203, %204, %205, %206, %207, %208, %209, %210, %211, %212, %213, %214, %215, %216 in 0 : vector<4x92xbf16>, vector<4x92xbf16>, vector<4x92xbf16>, vector<4x92xbf16>, vector<4x92xbf16>, vector<4x92xbf16>, vector<4x92xbf16>, vector<4x92xbf16>, vector<4x92xbf16>, vector<4x92xbf16>, vector<4x92xbf16>, vector<4x92xbf16>, vector<4x92xbf16>, vector<4x92xbf16>, vector<4x92xbf16>, vector<4x92xbf16> -> vector<64x92xbf16>
    %303 = tpu.concatenate %217, %218, %221, %222, %223, %224, %225, %226, %227, %228, %229, %230, %231, %232, %233, %234 in 0 : vector<4x92xbf16>, vector<4x92xbf16>, vector<4x92xbf16>, vector<4x92xbf16>, vector<4x92xbf16>, vector<4x92xbf16>, vector<4x92xbf16>, vector<4x92xbf16>, vector<4x92xbf16>, vector<4x92xbf16>, vector<4x92xbf16>, vector<4x92xbf16>, vector<4x92xbf16>, vector<4x92xbf16>, vector<4x92xbf16>, vector<4x92xbf16> -> vector<64x92xbf16>
    %304 = tpu.concatenate %235, %236, %237, %238, %239, %240, %241, %242, %243, %244, %245, %248, %249, %250, %251, %252 in 0 : vector<4x92xbf16>, vector<4x92xbf16>, vector<4x92xbf16>, vector<4x92xbf16>, vector<4x92xbf16>, vector<4x92xbf16>, vector<4x92xbf16>, vector<4x92xbf16>, vector<4x92xbf16>, vector<4x92xbf16>, vector<4x92xbf16>, vector<4x92xbf16>, vector<4x92xbf16>, vector<4x92xbf16>, vector<4x92xbf16>, vector<4x92xbf16> -> vector<64x92xbf16>
    %305 = tpu.concatenate %253, %254, %255, %256, %257, %258, %259, %260, %261, %262, %263, %264, %265, %266, %267, %268 in 0 : vector<4x92xbf16>, vector<4x92xbf16>, vector<4x92xbf16>, vector<4x92xbf16>, vector<4x92xbf16>, vector<4x92xbf16>, vector<4x92xbf16>, vector<4x92xbf16>, vector<4x92xbf16>, vector<4x92xbf16>, vector<4x92xbf16>, vector<4x92xbf16>, vector<4x92xbf16>, vector<4x92xbf16>, vector<4x92xbf16>, vector<4x92xbf16> -> vector<64x92xbf16>
    %306 = tpu.concatenate %269, %270, %271, %272, %275, %276, %277, %278, %279, %280, %281, %282, %283, %284, %285, %286 in 0 : vector<4x92xbf16>, vector<4x92xbf16>, vector<4x92xbf16>, vector<4x92xbf16>, vector<4x92xbf16>, vector<4x92xbf16>, vector<4x92xbf16>, vector<4x92xbf16>, vector<4x92xbf16>, vector<4x92xbf16>, vector<4x92xbf16>, vector<4x92xbf16>, vector<4x92xbf16>, vector<4x92xbf16>, vector<4x92xbf16>, vector<4x92xbf16> -> vector<64x92xbf16>
    %307 = tpu.concatenate %287, %288, %289, %290, %291, %292, %293, %294, %295, %296, %297, %298, %299 in 0 : vector<4x92xbf16>, vector<4x92xbf16>, vector<4x92xbf16>, vector<4x92xbf16>, vector<4x92xbf16>, vector<4x92xbf16>, vector<4x92xbf16>, vector<4x92xbf16>, vector<4x92xbf16>, vector<4x92xbf16>, vector<4x92xbf16>, vector<4x92xbf16>, vector<4x92xbf16> -> vector<52x92xbf16>
    %308 = tpu.concatenate %300, %301, %302, %303, %304, %305, %306, %307 in 0 : vector<64x92xbf16>, vector<64x92xbf16>, vector<64x92xbf16>, vector<64x92xbf16>, vector<64x92xbf16>, vector<64x92xbf16>, vector<64x92xbf16>, vector<52x92xbf16> -> vector<500x92xbf16>
    %c0_6 = arith.constant 0 : index
    %c0_7 = arith.constant 0 : index
    %309 = vector.load %arg3[%c0_6, %c0_7] : memref<8x500xbf16, #tpu.memory_space<vmem>>, vector<8x500xbf16>
    %cst_8 = arith.constant dense<0.000000e+00> : vector<8x92xf32>
    %310 = tpu.matmul %309, %308, %cst_8 {dimension_numbers = #tpu.dot_dimension_numbers<[1], [0], [0], [1], [0, 0, 1, 1], [], []>} : vector<8x500xbf16>, vector<500x92xbf16>, vector<8x92xf32> -> vector<8x92xf32>
    %c0_9 = arith.constant 0 : index
    %c0_10 = arith.constant 0 : index
    %311 = vector.load %arg4[%c0_9, %c0_10] : memref<8x1xf32, #tpu.memory_space<vmem>>, vector<8x1xf32>
    %312 = vector.broadcast %311 : vector<8x1xf32> to vector<8x92xf32>
    %313 = arith.addf %310, %312 : vector<8x92xf32>
    %314 = vector.extract_strided_slice %313 {offsets = [0, 0], sizes = [8, 8], strides = [1, 1]} : vector<8x92xf32> to vector<8x8xf32>
    %315 = vector.extract_strided_slice %313 {offsets = [0, 12], sizes = [8, 8], strides = [1, 1]} : vector<8x92xf32> to vector<8x8xf32>
    %316 = vector.extract_strided_slice %313 {offsets = [0, 24], sizes = [8, 8], strides = [1, 1]} : vector<8x92xf32> to vector<8x8xf32>
    %317 = vector.extract_strided_slice %313 {offsets = [0, 36], sizes = [8, 8], strides = [1, 1]} : vector<8x92xf32> to vector<8x8xf32>
    %318 = vector.extract_strided_slice %313 {offsets = [0, 48], sizes = [8, 8], strides = [1, 1]} : vector<8x92xf32> to vector<8x8xf32>
    %319 = vector.extract_strided_slice %313 {offsets = [0, 60], sizes = [8, 8], strides = [1, 1]} : vector<8x92xf32> to vector<8x8xf32>
    %320 = vector.extract_strided_slice %313 {offsets = [0, 72], sizes = [8, 8], strides = [1, 1]} : vector<8x92xf32> to vector<8x8xf32>
    %321 = vector.extract_strided_slice %313 {offsets = [0, 84], sizes = [8, 8], strides = [1, 1]} : vector<8x92xf32> to vector<8x8xf32>
    %322 = tpu.concatenate %314, %315, %316, %317, %318, %319, %320, %321 in 1 : vector<8x8xf32>, vector<8x8xf32>, vector<8x8xf32>, vector<8x8xf32>, vector<8x8xf32>, vector<8x8xf32>, vector<8x8xf32>, vector<8x8xf32> -> vector<8x64xf32>
    %323 = vector.extract_strided_slice %322 {offsets = [0, 0], sizes = [4, 64], strides = [1, 1]} : vector<8x64xf32> to vector<4x64xf32>
    %324 = vector.extract_strided_slice %322 {offsets = [4, 0], sizes = [4, 64], strides = [1, 1]} : vector<8x64xf32> to vector<4x64xf32>
    %325 = vector.extract_strided_slice %4 {offsets = [2, 0, 0], sizes = [1, 4, 144], strides = [1, 1, 1]} : vector<8x4x144xbf16> to vector<1x4x144xbf16>
    %326 = vector.shape_cast %325 : vector<1x4x144xbf16> to vector<4x144xbf16>
    %327 = vector.extract_strided_slice %326 {offsets = [0, 0], sizes = [4, 92], strides = [1, 1]} : vector<4x144xbf16> to vector<4x92xbf16>
    %328 = vector.extract_strided_slice %326 {offsets = [0, 1], sizes = [4, 92], strides = [1, 1]} : vector<4x144xbf16> to vector<4x92xbf16>
    %329 = vector.extract_strided_slice %326 {offsets = [0, 2], sizes = [4, 92], strides = [1, 1]} : vector<4x144xbf16> to vector<4x92xbf16>
    %330 = vector.extract_strided_slice %326 {offsets = [0, 3], sizes = [4, 92], strides = [1, 1]} : vector<4x144xbf16> to vector<4x92xbf16>
    %331 = vector.extract_strided_slice %326 {offsets = [0, 4], sizes = [4, 92], strides = [1, 1]} : vector<4x144xbf16> to vector<4x92xbf16>
    %332 = vector.extract_strided_slice %326 {offsets = [0, 12], sizes = [4, 92], strides = [1, 1]} : vector<4x144xbf16> to vector<4x92xbf16>
    %333 = vector.extract_strided_slice %326 {offsets = [0, 13], sizes = [4, 92], strides = [1, 1]} : vector<4x144xbf16> to vector<4x92xbf16>
    %334 = vector.extract_strided_slice %326 {offsets = [0, 14], sizes = [4, 92], strides = [1, 1]} : vector<4x144xbf16> to vector<4x92xbf16>
    %335 = vector.extract_strided_slice %326 {offsets = [0, 15], sizes = [4, 92], strides = [1, 1]} : vector<4x144xbf16> to vector<4x92xbf16>
    %336 = vector.extract_strided_slice %326 {offsets = [0, 16], sizes = [4, 92], strides = [1, 1]} : vector<4x144xbf16> to vector<4x92xbf16>
    %337 = vector.extract_strided_slice %326 {offsets = [0, 24], sizes = [4, 92], strides = [1, 1]} : vector<4x144xbf16> to vector<4x92xbf16>
    %338 = vector.extract_strided_slice %326 {offsets = [0, 25], sizes = [4, 92], strides = [1, 1]} : vector<4x144xbf16> to vector<4x92xbf16>
    %339 = vector.extract_strided_slice %326 {offsets = [0, 26], sizes = [4, 92], strides = [1, 1]} : vector<4x144xbf16> to vector<4x92xbf16>
    %340 = vector.extract_strided_slice %326 {offsets = [0, 27], sizes = [4, 92], strides = [1, 1]} : vector<4x144xbf16> to vector<4x92xbf16>
    %341 = vector.extract_strided_slice %326 {offsets = [0, 28], sizes = [4, 92], strides = [1, 1]} : vector<4x144xbf16> to vector<4x92xbf16>
    %342 = vector.extract_strided_slice %326 {offsets = [0, 36], sizes = [4, 92], strides = [1, 1]} : vector<4x144xbf16> to vector<4x92xbf16>
    %343 = vector.extract_strided_slice %326 {offsets = [0, 37], sizes = [4, 92], strides = [1, 1]} : vector<4x144xbf16> to vector<4x92xbf16>
    %344 = vector.extract_strided_slice %326 {offsets = [0, 38], sizes = [4, 92], strides = [1, 1]} : vector<4x144xbf16> to vector<4x92xbf16>
    %345 = vector.extract_strided_slice %326 {offsets = [0, 39], sizes = [4, 92], strides = [1, 1]} : vector<4x144xbf16> to vector<4x92xbf16>
    %346 = vector.extract_strided_slice %326 {offsets = [0, 40], sizes = [4, 92], strides = [1, 1]} : vector<4x144xbf16> to vector<4x92xbf16>
    %347 = vector.extract_strided_slice %326 {offsets = [0, 48], sizes = [4, 92], strides = [1, 1]} : vector<4x144xbf16> to vector<4x92xbf16>
    %348 = vector.extract_strided_slice %326 {offsets = [0, 49], sizes = [4, 92], strides = [1, 1]} : vector<4x144xbf16> to vector<4x92xbf16>
    %349 = vector.extract_strided_slice %326 {offsets = [0, 50], sizes = [4, 92], strides = [1, 1]} : vector<4x144xbf16> to vector<4x92xbf16>
    %350 = vector.extract_strided_slice %326 {offsets = [0, 51], sizes = [4, 92], strides = [1, 1]} : vector<4x144xbf16> to vector<4x92xbf16>
    %351 = vector.extract_strided_slice %326 {offsets = [0, 52], sizes = [4, 92], strides = [1, 1]} : vector<4x144xbf16> to vector<4x92xbf16>
    %352 = vector.extract_strided_slice %4 {offsets = [3, 0, 0], sizes = [1, 4, 144], strides = [1, 1, 1]} : vector<8x4x144xbf16> to vector<1x4x144xbf16>
    %353 = vector.shape_cast %352 : vector<1x4x144xbf16> to vector<4x144xbf16>
    %354 = vector.extract_strided_slice %353 {offsets = [0, 0], sizes = [4, 92], strides = [1, 1]} : vector<4x144xbf16> to vector<4x92xbf16>
    %355 = vector.extract_strided_slice %353 {offsets = [0, 1], sizes = [4, 92], strides = [1, 1]} : vector<4x144xbf16> to vector<4x92xbf16>
    %356 = vector.extract_strided_slice %353 {offsets = [0, 2], sizes = [4, 92], strides = [1, 1]} : vector<4x144xbf16> to vector<4x92xbf16>
    %357 = vector.extract_strided_slice %353 {offsets = [0, 3], sizes = [4, 92], strides = [1, 1]} : vector<4x144xbf16> to vector<4x92xbf16>
    %358 = vector.extract_strided_slice %353 {offsets = [0, 4], sizes = [4, 92], strides = [1, 1]} : vector<4x144xbf16> to vector<4x92xbf16>
    %359 = vector.extract_strided_slice %353 {offsets = [0, 12], sizes = [4, 92], strides = [1, 1]} : vector<4x144xbf16> to vector<4x92xbf16>
    %360 = vector.extract_strided_slice %353 {offsets = [0, 13], sizes = [4, 92], strides = [1, 1]} : vector<4x144xbf16> to vector<4x92xbf16>
    %361 = vector.extract_strided_slice %353 {offsets = [0, 14], sizes = [4, 92], strides = [1, 1]} : vector<4x144xbf16> to vector<4x92xbf16>
    %362 = vector.extract_strided_slice %353 {offsets = [0, 15], sizes = [4, 92], strides = [1, 1]} : vector<4x144xbf16> to vector<4x92xbf16>
    %363 = vector.extract_strided_slice %353 {offsets = [0, 16], sizes = [4, 92], strides = [1, 1]} : vector<4x144xbf16> to vector<4x92xbf16>
    %364 = vector.extract_strided_slice %353 {offsets = [0, 24], sizes = [4, 92], strides = [1, 1]} : vector<4x144xbf16> to vector<4x92xbf16>
    %365 = vector.extract_strided_slice %353 {offsets = [0, 25], sizes = [4, 92], strides = [1, 1]} : vector<4x144xbf16> to vector<4x92xbf16>
    %366 = vector.extract_strided_slice %353 {offsets = [0, 26], sizes = [4, 92], strides = [1, 1]} : vector<4x144xbf16> to vector<4x92xbf16>
    %367 = vector.extract_strided_slice %353 {offsets = [0, 27], sizes = [4, 92], strides = [1, 1]} : vector<4x144xbf16> to vector<4x92xbf16>
    %368 = vector.extract_strided_slice %353 {offsets = [0, 28], sizes = [4, 92], strides = [1, 1]} : vector<4x144xbf16> to vector<4x92xbf16>
    %369 = vector.extract_strided_slice %353 {offsets = [0, 36], sizes = [4, 92], strides = [1, 1]} : vector<4x144xbf16> to vector<4x92xbf16>
    %370 = vector.extract_strided_slice %353 {offsets = [0, 37], sizes = [4, 92], strides = [1, 1]} : vector<4x144xbf16> to vector<4x92xbf16>
    %371 = vector.extract_strided_slice %353 {offsets = [0, 38], sizes = [4, 92], strides = [1, 1]} : vector<4x144xbf16> to vector<4x92xbf16>
    %372 = vector.extract_strided_slice %353 {offsets = [0, 39], sizes = [4, 92], strides = [1, 1]} : vector<4x144xbf16> to vector<4x92xbf16>
    %373 = vector.extract_strided_slice %353 {offsets = [0, 40], sizes = [4, 92], strides = [1, 1]} : vector<4x144xbf16> to vector<4x92xbf16>
    %374 = vector.extract_strided_slice %353 {offsets = [0, 48], sizes = [4, 92], strides = [1, 1]} : vector<4x144xbf16> to vector<4x92xbf16>
    %375 = vector.extract_strided_slice %353 {offsets = [0, 49], sizes = [4, 92], strides = [1, 1]} : vector<4x144xbf16> to vector<4x92xbf16>
    %376 = vector.extract_strided_slice %353 {offsets = [0, 50], sizes = [4, 92], strides = [1, 1]} : vector<4x144xbf16> to vector<4x92xbf16>
    %377 = vector.extract_strided_slice %353 {offsets = [0, 51], sizes = [4, 92], strides = [1, 1]} : vector<4x144xbf16> to vector<4x92xbf16>
    %378 = vector.extract_strided_slice %353 {offsets = [0, 52], sizes = [4, 92], strides = [1, 1]} : vector<4x144xbf16> to vector<4x92xbf16>
    %379 = vector.extract_strided_slice %4 {offsets = [4, 0, 0], sizes = [1, 4, 144], strides = [1, 1, 1]} : vector<8x4x144xbf16> to vector<1x4x144xbf16>
    %380 = vector.shape_cast %379 : vector<1x4x144xbf16> to vector<4x144xbf16>
    %381 = vector.extract_strided_slice %380 {offsets = [0, 0], sizes = [4, 92], strides = [1, 1]} : vector<4x144xbf16> to vector<4x92xbf16>
    %382 = vector.extract_strided_slice %380 {offsets = [0, 1], sizes = [4, 92], strides = [1, 1]} : vector<4x144xbf16> to vector<4x92xbf16>
    %383 = vector.extract_strided_slice %380 {offsets = [0, 2], sizes = [4, 92], strides = [1, 1]} : vector<4x144xbf16> to vector<4x92xbf16>
    %384 = vector.extract_strided_slice %380 {offsets = [0, 3], sizes = [4, 92], strides = [1, 1]} : vector<4x144xbf16> to vector<4x92xbf16>
    %385 = vector.extract_strided_slice %380 {offsets = [0, 4], sizes = [4, 92], strides = [1, 1]} : vector<4x144xbf16> to vector<4x92xbf16>
    %386 = vector.extract_strided_slice %380 {offsets = [0, 12], sizes = [4, 92], strides = [1, 1]} : vector<4x144xbf16> to vector<4x92xbf16>
    %387 = vector.extract_strided_slice %380 {offsets = [0, 13], sizes = [4, 92], strides = [1, 1]} : vector<4x144xbf16> to vector<4x92xbf16>
    %388 = vector.extract_strided_slice %380 {offsets = [0, 14], sizes = [4, 92], strides = [1, 1]} : vector<4x144xbf16> to vector<4x92xbf16>
    %389 = vector.extract_strided_slice %380 {offsets = [0, 15], sizes = [4, 92], strides = [1, 1]} : vector<4x144xbf16> to vector<4x92xbf16>
    %390 = vector.extract_strided_slice %380 {offsets = [0, 16], sizes = [4, 92], strides = [1, 1]} : vector<4x144xbf16> to vector<4x92xbf16>
    %391 = vector.extract_strided_slice %380 {offsets = [0, 24], sizes = [4, 92], strides = [1, 1]} : vector<4x144xbf16> to vector<4x92xbf16>
    %392 = vector.extract_strided_slice %380 {offsets = [0, 25], sizes = [4, 92], strides = [1, 1]} : vector<4x144xbf16> to vector<4x92xbf16>
    %393 = vector.extract_strided_slice %380 {offsets = [0, 26], sizes = [4, 92], strides = [1, 1]} : vector<4x144xbf16> to vector<4x92xbf16>
    %394 = vector.extract_strided_slice %380 {offsets = [0, 27], sizes = [4, 92], strides = [1, 1]} : vector<4x144xbf16> to vector<4x92xbf16>
    %395 = vector.extract_strided_slice %380 {offsets = [0, 28], sizes = [4, 92], strides = [1, 1]} : vector<4x144xbf16> to vector<4x92xbf16>
    %396 = vector.extract_strided_slice %380 {offsets = [0, 36], sizes = [4, 92], strides = [1, 1]} : vector<4x144xbf16> to vector<4x92xbf16>
    %397 = vector.extract_strided_slice %380 {offsets = [0, 37], sizes = [4, 92], strides = [1, 1]} : vector<4x144xbf16> to vector<4x92xbf16>
    %398 = vector.extract_strided_slice %380 {offsets = [0, 38], sizes = [4, 92], strides = [1, 1]} : vector<4x144xbf16> to vector<4x92xbf16>
    %399 = vector.extract_strided_slice %380 {offsets = [0, 39], sizes = [4, 92], strides = [1, 1]} : vector<4x144xbf16> to vector<4x92xbf16>
    %400 = vector.extract_strided_slice %380 {offsets = [0, 40], sizes = [4, 92], strides = [1, 1]} : vector<4x144xbf16> to vector<4x92xbf16>
    %401 = vector.extract_strided_slice %380 {offsets = [0, 48], sizes = [4, 92], strides = [1, 1]} : vector<4x144xbf16> to vector<4x92xbf16>
    %402 = vector.extract_strided_slice %380 {offsets = [0, 49], sizes = [4, 92], strides = [1, 1]} : vector<4x144xbf16> to vector<4x92xbf16>
    %403 = vector.extract_strided_slice %380 {offsets = [0, 50], sizes = [4, 92], strides = [1, 1]} : vector<4x144xbf16> to vector<4x92xbf16>
    %404 = vector.extract_strided_slice %380 {offsets = [0, 51], sizes = [4, 92], strides = [1, 1]} : vector<4x144xbf16> to vector<4x92xbf16>
    %405 = vector.extract_strided_slice %380 {offsets = [0, 52], sizes = [4, 92], strides = [1, 1]} : vector<4x144xbf16> to vector<4x92xbf16>
    %406 = vector.extract_strided_slice %4 {offsets = [5, 0, 0], sizes = [1, 4, 144], strides = [1, 1, 1]} : vector<8x4x144xbf16> to vector<1x4x144xbf16>
    %407 = vector.shape_cast %406 : vector<1x4x144xbf16> to vector<4x144xbf16>
    %408 = vector.extract_strided_slice %407 {offsets = [0, 0], sizes = [4, 92], strides = [1, 1]} : vector<4x144xbf16> to vector<4x92xbf16>
    %409 = vector.extract_strided_slice %407 {offsets = [0, 1], sizes = [4, 92], strides = [1, 1]} : vector<4x144xbf16> to vector<4x92xbf16>
    %410 = vector.extract_strided_slice %407 {offsets = [0, 2], sizes = [4, 92], strides = [1, 1]} : vector<4x144xbf16> to vector<4x92xbf16>
    %411 = vector.extract_strided_slice %407 {offsets = [0, 3], sizes = [4, 92], strides = [1, 1]} : vector<4x144xbf16> to vector<4x92xbf16>
    %412 = vector.extract_strided_slice %407 {offsets = [0, 4], sizes = [4, 92], strides = [1, 1]} : vector<4x144xbf16> to vector<4x92xbf16>
    %413 = vector.extract_strided_slice %407 {offsets = [0, 12], sizes = [4, 92], strides = [1, 1]} : vector<4x144xbf16> to vector<4x92xbf16>
    %414 = vector.extract_strided_slice %407 {offsets = [0, 13], sizes = [4, 92], strides = [1, 1]} : vector<4x144xbf16> to vector<4x92xbf16>
    %415 = vector.extract_strided_slice %407 {offsets = [0, 14], sizes = [4, 92], strides = [1, 1]} : vector<4x144xbf16> to vector<4x92xbf16>
    %416 = vector.extract_strided_slice %407 {offsets = [0, 15], sizes = [4, 92], strides = [1, 1]} : vector<4x144xbf16> to vector<4x92xbf16>
    %417 = vector.extract_strided_slice %407 {offsets = [0, 16], sizes = [4, 92], strides = [1, 1]} : vector<4x144xbf16> to vector<4x92xbf16>
    %418 = vector.extract_strided_slice %407 {offsets = [0, 24], sizes = [4, 92], strides = [1, 1]} : vector<4x144xbf16> to vector<4x92xbf16>
    %419 = vector.extract_strided_slice %407 {offsets = [0, 25], sizes = [4, 92], strides = [1, 1]} : vector<4x144xbf16> to vector<4x92xbf16>
    %420 = vector.extract_strided_slice %407 {offsets = [0, 26], sizes = [4, 92], strides = [1, 1]} : vector<4x144xbf16> to vector<4x92xbf16>
    %421 = vector.extract_strided_slice %407 {offsets = [0, 27], sizes = [4, 92], strides = [1, 1]} : vector<4x144xbf16> to vector<4x92xbf16>
    %422 = vector.extract_strided_slice %407 {offsets = [0, 28], sizes = [4, 92], strides = [1, 1]} : vector<4x144xbf16> to vector<4x92xbf16>
    %423 = vector.extract_strided_slice %407 {offsets = [0, 36], sizes = [4, 92], strides = [1, 1]} : vector<4x144xbf16> to vector<4x92xbf16>
    %424 = vector.extract_strided_slice %407 {offsets = [0, 37], sizes = [4, 92], strides = [1, 1]} : vector<4x144xbf16> to vector<4x92xbf16>
    %425 = vector.extract_strided_slice %407 {offsets = [0, 38], sizes = [4, 92], strides = [1, 1]} : vector<4x144xbf16> to vector<4x92xbf16>
    %426 = vector.extract_strided_slice %407 {offsets = [0, 39], sizes = [4, 92], strides = [1, 1]} : vector<4x144xbf16> to vector<4x92xbf16>
    %427 = vector.extract_strided_slice %407 {offsets = [0, 40], sizes = [4, 92], strides = [1, 1]} : vector<4x144xbf16> to vector<4x92xbf16>
    %428 = vector.extract_strided_slice %407 {offsets = [0, 48], sizes = [4, 92], strides = [1, 1]} : vector<4x144xbf16> to vector<4x92xbf16>
    %429 = vector.extract_strided_slice %407 {offsets = [0, 49], sizes = [4, 92], strides = [1, 1]} : vector<4x144xbf16> to vector<4x92xbf16>
    %430 = vector.extract_strided_slice %407 {offsets = [0, 50], sizes = [4, 92], strides = [1, 1]} : vector<4x144xbf16> to vector<4x92xbf16>
    %431 = vector.extract_strided_slice %407 {offsets = [0, 51], sizes = [4, 92], strides = [1, 1]} : vector<4x144xbf16> to vector<4x92xbf16>
    %432 = vector.extract_strided_slice %407 {offsets = [0, 52], sizes = [4, 92], strides = [1, 1]} : vector<4x144xbf16> to vector<4x92xbf16>
    %433 = vector.extract_strided_slice %4 {offsets = [6, 0, 0], sizes = [1, 4, 144], strides = [1, 1, 1]} : vector<8x4x144xbf16> to vector<1x4x144xbf16>
    %434 = vector.shape_cast %433 : vector<1x4x144xbf16> to vector<4x144xbf16>
    %435 = vector.extract_strided_slice %434 {offsets = [0, 0], sizes = [4, 92], strides = [1, 1]} : vector<4x144xbf16> to vector<4x92xbf16>
    %436 = vector.extract_strided_slice %434 {offsets = [0, 1], sizes = [4, 92], strides = [1, 1]} : vector<4x144xbf16> to vector<4x92xbf16>
    %437 = vector.extract_strided_slice %434 {offsets = [0, 2], sizes = [4, 92], strides = [1, 1]} : vector<4x144xbf16> to vector<4x92xbf16>
    %438 = vector.extract_strided_slice %434 {offsets = [0, 3], sizes = [4, 92], strides = [1, 1]} : vector<4x144xbf16> to vector<4x92xbf16>
    %439 = vector.extract_strided_slice %434 {offsets = [0, 4], sizes = [4, 92], strides = [1, 1]} : vector<4x144xbf16> to vector<4x92xbf16>
    %440 = vector.extract_strided_slice %434 {offsets = [0, 12], sizes = [4, 92], strides = [1, 1]} : vector<4x144xbf16> to vector<4x92xbf16>
    %441 = vector.extract_strided_slice %434 {offsets = [0, 13], sizes = [4, 92], strides = [1, 1]} : vector<4x144xbf16> to vector<4x92xbf16>
    %442 = vector.extract_strided_slice %434 {offsets = [0, 14], sizes = [4, 92], strides = [1, 1]} : vector<4x144xbf16> to vector<4x92xbf16>
    %443 = vector.extract_strided_slice %434 {offsets = [0, 15], sizes = [4, 92], strides = [1, 1]} : vector<4x144xbf16> to vector<4x92xbf16>
    %444 = vector.extract_strided_slice %434 {offsets = [0, 16], sizes = [4, 92], strides = [1, 1]} : vector<4x144xbf16> to vector<4x92xbf16>
    %445 = vector.extract_strided_slice %434 {offsets = [0, 24], sizes = [4, 92], strides = [1, 1]} : vector<4x144xbf16> to vector<4x92xbf16>
    %446 = vector.extract_strided_slice %434 {offsets = [0, 25], sizes = [4, 92], strides = [1, 1]} : vector<4x144xbf16> to vector<4x92xbf16>
    %447 = vector.extract_strided_slice %434 {offsets = [0, 26], sizes = [4, 92], strides = [1, 1]} : vector<4x144xbf16> to vector<4x92xbf16>
    %448 = vector.extract_strided_slice %434 {offsets = [0, 27], sizes = [4, 92], strides = [1, 1]} : vector<4x144xbf16> to vector<4x92xbf16>
    %449 = vector.extract_strided_slice %434 {offsets = [0, 28], sizes = [4, 92], strides = [1, 1]} : vector<4x144xbf16> to vector<4x92xbf16>
    %450 = vector.extract_strided_slice %434 {offsets = [0, 36], sizes = [4, 92], strides = [1, 1]} : vector<4x144xbf16> to vector<4x92xbf16>
    %451 = vector.extract_strided_slice %434 {offsets = [0, 37], sizes = [4, 92], strides = [1, 1]} : vector<4x144xbf16> to vector<4x92xbf16>
    %452 = vector.extract_strided_slice %434 {offsets = [0, 38], sizes = [4, 92], strides = [1, 1]} : vector<4x144xbf16> to vector<4x92xbf16>
    %453 = vector.extract_strided_slice %434 {offsets = [0, 39], sizes = [4, 92], strides = [1, 1]} : vector<4x144xbf16> to vector<4x92xbf16>
    %454 = vector.extract_strided_slice %434 {offsets = [0, 40], sizes = [4, 92], strides = [1, 1]} : vector<4x144xbf16> to vector<4x92xbf16>
    %455 = vector.extract_strided_slice %434 {offsets = [0, 48], sizes = [4, 92], strides = [1, 1]} : vector<4x144xbf16> to vector<4x92xbf16>
    %456 = vector.extract_strided_slice %434 {offsets = [0, 49], sizes = [4, 92], strides = [1, 1]} : vector<4x144xbf16> to vector<4x92xbf16>
    %457 = vector.extract_strided_slice %434 {offsets = [0, 50], sizes = [4, 92], strides = [1, 1]} : vector<4x144xbf16> to vector<4x92xbf16>
    %458 = vector.extract_strided_slice %434 {offsets = [0, 51], sizes = [4, 92], strides = [1, 1]} : vector<4x144xbf16> to vector<4x92xbf16>
    %459 = vector.extract_strided_slice %434 {offsets = [0, 52], sizes = [4, 92], strides = [1, 1]} : vector<4x144xbf16> to vector<4x92xbf16>
    %460 = tpu.concatenate %327, %328, %329, %330, %331, %332, %333, %334, %335, %336, %337, %338, %339, %340, %341, %342 in 0 : vector<4x92xbf16>, vector<4x92xbf16>, vector<4x92xbf16>, vector<4x92xbf16>, vector<4x92xbf16>, vector<4x92xbf16>, vector<4x92xbf16>, vector<4x92xbf16>, vector<4x92xbf16>, vector<4x92xbf16>, vector<4x92xbf16>, vector<4x92xbf16>, vector<4x92xbf16>, vector<4x92xbf16>, vector<4x92xbf16>, vector<4x92xbf16> -> vector<64x92xbf16>
    %461 = tpu.concatenate %343, %344, %345, %346, %347, %348, %349, %350, %351, %354, %355, %356, %357, %358, %359, %360 in 0 : vector<4x92xbf16>, vector<4x92xbf16>, vector<4x92xbf16>, vector<4x92xbf16>, vector<4x92xbf16>, vector<4x92xbf16>, vector<4x92xbf16>, vector<4x92xbf16>, vector<4x92xbf16>, vector<4x92xbf16>, vector<4x92xbf16>, vector<4x92xbf16>, vector<4x92xbf16>, vector<4x92xbf16>, vector<4x92xbf16>, vector<4x92xbf16> -> vector<64x92xbf16>
    %462 = tpu.concatenate %361, %362, %363, %364, %365, %366, %367, %368, %369, %370, %371, %372, %373, %374, %375, %376 in 0 : vector<4x92xbf16>, vector<4x92xbf16>, vector<4x92xbf16>, vector<4x92xbf16>, vector<4x92xbf16>, vector<4x92xbf16>, vector<4x92xbf16>, vector<4x92xbf16>, vector<4x92xbf16>, vector<4x92xbf16>, vector<4x92xbf16>, vector<4x92xbf16>, vector<4x92xbf16>, vector<4x92xbf16>, vector<4x92xbf16>, vector<4x92xbf16> -> vector<64x92xbf16>
    %463 = tpu.concatenate %377, %378, %381, %382, %383, %384, %385, %386, %387, %388, %389, %390, %391, %392, %393, %394 in 0 : vector<4x92xbf16>, vector<4x92xbf16>, vector<4x92xbf16>, vector<4x92xbf16>, vector<4x92xbf16>, vector<4x92xbf16>, vector<4x92xbf16>, vector<4x92xbf16>, vector<4x92xbf16>, vector<4x92xbf16>, vector<4x92xbf16>, vector<4x92xbf16>, vector<4x92xbf16>, vector<4x92xbf16>, vector<4x92xbf16>, vector<4x92xbf16> -> vector<64x92xbf16>
    %464 = tpu.concatenate %395, %396, %397, %398, %399, %400, %401, %402, %403, %404, %405, %408, %409, %410, %411, %412 in 0 : vector<4x92xbf16>, vector<4x92xbf16>, vector<4x92xbf16>, vector<4x92xbf16>, vector<4x92xbf16>, vector<4x92xbf16>, vector<4x92xbf16>, vector<4x92xbf16>, vector<4x92xbf16>, vector<4x92xbf16>, vector<4x92xbf16>, vector<4x92xbf16>, vector<4x92xbf16>, vector<4x92xbf16>, vector<4x92xbf16>, vector<4x92xbf16> -> vector<64x92xbf16>
    %465 = tpu.concatenate %413, %414, %415, %416, %417, %418, %419, %420, %421, %422, %423, %424, %425, %426, %427, %428 in 0 : vector<4x92xbf16>, vector<4x92xbf16>, vector<4x92xbf16>, vector<4x92xbf16>, vector<4x92xbf16>, vector<4x92xbf16>, vector<4x92xbf16>, vector<4x92xbf16>, vector<4x92xbf16>, vector<4x92xbf16>, vector<4x92xbf16>, vector<4x92xbf16>, vector<4x92xbf16>, vector<4x92xbf16>, vector<4x92xbf16>, vector<4x92xbf16> -> vector<64x92xbf16>
    %466 = tpu.concatenate %429, %430, %431, %432, %435, %436, %437, %438, %439, %440, %441, %442, %443, %444, %445, %446 in 0 : vector<4x92xbf16>, vector<4x92xbf16>, vector<4x92xbf16>, vector<4x92xbf16>, vector<4x92xbf16>, vector<4x92xbf16>, vector<4x92xbf16>, vector<4x92xbf16>, vector<4x92xbf16>, vector<4x92xbf16>, vector<4x92xbf16>, vector<4x92xbf16>, vector<4x92xbf16>, vector<4x92xbf16>, vector<4x92xbf16>, vector<4x92xbf16> -> vector<64x92xbf16>
    %467 = tpu.concatenate %447, %448, %449, %450, %451, %452, %453, %454, %455, %456, %457, %458, %459 in 0 : vector<4x92xbf16>, vector<4x92xbf16>, vector<4x92xbf16>, vector<4x92xbf16>, vector<4x92xbf16>, vector<4x92xbf16>, vector<4x92xbf16>, vector<4x92xbf16>, vector<4x92xbf16>, vector<4x92xbf16>, vector<4x92xbf16>, vector<4x92xbf16>, vector<4x92xbf16> -> vector<52x92xbf16>
    %468 = tpu.concatenate %460, %461, %462, %463, %464, %465, %466, %467 in 0 : vector<64x92xbf16>, vector<64x92xbf16>, vector<64x92xbf16>, vector<64x92xbf16>, vector<64x92xbf16>, vector<64x92xbf16>, vector<64x92xbf16>, vector<52x92xbf16> -> vector<500x92xbf16>
    %c0_11 = arith.constant 0 : index
    %c0_12 = arith.constant 0 : index
    %469 = vector.load %arg3[%c0_11, %c0_12] : memref<8x500xbf16, #tpu.memory_space<vmem>>, vector<8x500xbf16>
    %cst_13 = arith.constant dense<0.000000e+00> : vector<8x92xf32>
    %470 = tpu.matmul %469, %468, %cst_13 {dimension_numbers = #tpu.dot_dimension_numbers<[1], [0], [0], [1], [0, 0, 1, 1], [], []>} : vector<8x500xbf16>, vector<500x92xbf16>, vector<8x92xf32> -> vector<8x92xf32>
    %c0_14 = arith.constant 0 : index
    %c0_15 = arith.constant 0 : index
    %471 = vector.load %arg4[%c0_14, %c0_15] : memref<8x1xf32, #tpu.memory_space<vmem>>, vector<8x1xf32>
    %472 = vector.broadcast %471 : vector<8x1xf32> to vector<8x92xf32>
    %473 = arith.addf %470, %472 : vector<8x92xf32>
    %474 = vector.extract_strided_slice %473 {offsets = [0, 0], sizes = [8, 8], strides = [1, 1]} : vector<8x92xf32> to vector<8x8xf32>
    %475 = vector.extract_strided_slice %473 {offsets = [0, 12], sizes = [8, 8], strides = [1, 1]} : vector<8x92xf32> to vector<8x8xf32>
    %476 = vector.extract_strided_slice %473 {offsets = [0, 24], sizes = [8, 8], strides = [1, 1]} : vector<8x92xf32> to vector<8x8xf32>
    %477 = vector.extract_strided_slice %473 {offsets = [0, 36], sizes = [8, 8], strides = [1, 1]} : vector<8x92xf32> to vector<8x8xf32>
    %478 = vector.extract_strided_slice %473 {offsets = [0, 48], sizes = [8, 8], strides = [1, 1]} : vector<8x92xf32> to vector<8x8xf32>
    %479 = vector.extract_strided_slice %473 {offsets = [0, 60], sizes = [8, 8], strides = [1, 1]} : vector<8x92xf32> to vector<8x8xf32>
    %480 = vector.extract_strided_slice %473 {offsets = [0, 72], sizes = [8, 8], strides = [1, 1]} : vector<8x92xf32> to vector<8x8xf32>
    %481 = vector.extract_strided_slice %473 {offsets = [0, 84], sizes = [8, 8], strides = [1, 1]} : vector<8x92xf32> to vector<8x8xf32>
    %482 = tpu.concatenate %474, %475, %476, %477, %478, %479, %480, %481 in 1 : vector<8x8xf32>, vector<8x8xf32>, vector<8x8xf32>, vector<8x8xf32>, vector<8x8xf32>, vector<8x8xf32>, vector<8x8xf32>, vector<8x8xf32> -> vector<8x64xf32>
    %483 = vector.extract_strided_slice %482 {offsets = [0, 0], sizes = [4, 64], strides = [1, 1]} : vector<8x64xf32> to vector<4x64xf32>
    %484 = vector.extract_strided_slice %482 {offsets = [4, 0], sizes = [4, 64], strides = [1, 1]} : vector<8x64xf32> to vector<4x64xf32>
    %485 = vector.extract_strided_slice %4 {offsets = [3, 0, 0], sizes = [1, 4, 144], strides = [1, 1, 1]} : vector<8x4x144xbf16> to vector<1x4x144xbf16>
    %486 = vector.shape_cast %485 : vector<1x4x144xbf16> to vector<4x144xbf16>
    %487 = vector.extract_strided_slice %486 {offsets = [0, 0], sizes = [4, 92], strides = [1, 1]} : vector<4x144xbf16> to vector<4x92xbf16>
    %488 = vector.extract_strided_slice %486 {offsets = [0, 1], sizes = [4, 92], strides = [1, 1]} : vector<4x144xbf16> to vector<4x92xbf16>
    %489 = vector.extract_strided_slice %486 {offsets = [0, 2], sizes = [4, 92], strides = [1, 1]} : vector<4x144xbf16> to vector<4x92xbf16>
    %490 = vector.extract_strided_slice %486 {offsets = [0, 3], sizes = [4, 92], strides = [1, 1]} : vector<4x144xbf16> to vector<4x92xbf16>
    %491 = vector.extract_strided_slice %486 {offsets = [0, 4], sizes = [4, 92], strides = [1, 1]} : vector<4x144xbf16> to vector<4x92xbf16>
    %492 = vector.extract_strided_slice %486 {offsets = [0, 12], sizes = [4, 92], strides = [1, 1]} : vector<4x144xbf16> to vector<4x92xbf16>
    %493 = vector.extract_strided_slice %486 {offsets = [0, 13], sizes = [4, 92], strides = [1, 1]} : vector<4x144xbf16> to vector<4x92xbf16>
    %494 = vector.extract_strided_slice %486 {offsets = [0, 14], sizes = [4, 92], strides = [1, 1]} : vector<4x144xbf16> to vector<4x92xbf16>
    %495 = vector.extract_strided_slice %486 {offsets = [0, 15], sizes = [4, 92], strides = [1, 1]} : vector<4x144xbf16> to vector<4x92xbf16>
    %496 = vector.extract_strided_slice %486 {offsets = [0, 16], sizes = [4, 92], strides = [1, 1]} : vector<4x144xbf16> to vector<4x92xbf16>
    %497 = vector.extract_strided_slice %486 {offsets = [0, 24], sizes = [4, 92], strides = [1, 1]} : vector<4x144xbf16> to vector<4x92xbf16>
    %498 = vector.extract_strided_slice %486 {offsets = [0, 25], sizes = [4, 92], strides = [1, 1]} : vector<4x144xbf16> to vector<4x92xbf16>
    %499 = vector.extract_strided_slice %486 {offsets = [0, 26], sizes = [4, 92], strides = [1, 1]} : vector<4x144xbf16> to vector<4x92xbf16>
    %500 = vector.extract_strided_slice %486 {offsets = [0, 27], sizes = [4, 92], strides = [1, 1]} : vector<4x144xbf16> to vector<4x92xbf16>
    %501 = vector.extract_strided_slice %486 {offsets = [0, 28], sizes = [4, 92], strides = [1, 1]} : vector<4x144xbf16> to vector<4x92xbf16>
    %502 = vector.extract_strided_slice %486 {offsets = [0, 36], sizes = [4, 92], strides = [1, 1]} : vector<4x144xbf16> to vector<4x92xbf16>
    %503 = vector.extract_strided_slice %486 {offsets = [0, 37], sizes = [4, 92], strides = [1, 1]} : vector<4x144xbf16> to vector<4x92xbf16>
    %504 = vector.extract_strided_slice %486 {offsets = [0, 38], sizes = [4, 92], strides = [1, 1]} : vector<4x144xbf16> to vector<4x92xbf16>
    %505 = vector.extract_strided_slice %486 {offsets = [0, 39], sizes = [4, 92], strides = [1, 1]} : vector<4x144xbf16> to vector<4x92xbf16>
    %506 = vector.extract_strided_slice %486 {offsets = [0, 40], sizes = [4, 92], strides = [1, 1]} : vector<4x144xbf16> to vector<4x92xbf16>
    %507 = vector.extract_strided_slice %486 {offsets = [0, 48], sizes = [4, 92], strides = [1, 1]} : vector<4x144xbf16> to vector<4x92xbf16>
    %508 = vector.extract_strided_slice %486 {offsets = [0, 49], sizes = [4, 92], strides = [1, 1]} : vector<4x144xbf16> to vector<4x92xbf16>
    %509 = vector.extract_strided_slice %486 {offsets = [0, 50], sizes = [4, 92], strides = [1, 1]} : vector<4x144xbf16> to vector<4x92xbf16>
    %510 = vector.extract_strided_slice %486 {offsets = [0, 51], sizes = [4, 92], strides = [1, 1]} : vector<4x144xbf16> to vector<4x92xbf16>
    %511 = vector.extract_strided_slice %486 {offsets = [0, 52], sizes = [4, 92], strides = [1, 1]} : vector<4x144xbf16> to vector<4x92xbf16>
    %512 = vector.extract_strided_slice %4 {offsets = [4, 0, 0], sizes = [1, 4, 144], strides = [1, 1, 1]} : vector<8x4x144xbf16> to vector<1x4x144xbf16>
    %513 = vector.shape_cast %512 : vector<1x4x144xbf16> to vector<4x144xbf16>
    %514 = vector.extract_strided_slice %513 {offsets = [0, 0], sizes = [4, 92], strides = [1, 1]} : vector<4x144xbf16> to vector<4x92xbf16>
    %515 = vector.extract_strided_slice %513 {offsets = [0, 1], sizes = [4, 92], strides = [1, 1]} : vector<4x144xbf16> to vector<4x92xbf16>
    %516 = vector.extract_strided_slice %513 {offsets = [0, 2], sizes = [4, 92], strides = [1, 1]} : vector<4x144xbf16> to vector<4x92xbf16>
    %517 = vector.extract_strided_slice %513 {offsets = [0, 3], sizes = [4, 92], strides = [1, 1]} : vector<4x144xbf16> to vector<4x92xbf16>
    %518 = vector.extract_strided_slice %513 {offsets = [0, 4], sizes = [4, 92], strides = [1, 1]} : vector<4x144xbf16> to vector<4x92xbf16>
    %519 = vector.extract_strided_slice %513 {offsets = [0, 12], sizes = [4, 92], strides = [1, 1]} : vector<4x144xbf16> to vector<4x92xbf16>
    %520 = vector.extract_strided_slice %513 {offsets = [0, 13], sizes = [4, 92], strides = [1, 1]} : vector<4x144xbf16> to vector<4x92xbf16>
    %521 = vector.extract_strided_slice %513 {offsets = [0, 14], sizes = [4, 92], strides = [1, 1]} : vector<4x144xbf16> to vector<4x92xbf16>
    %522 = vector.extract_strided_slice %513 {offsets = [0, 15], sizes = [4, 92], strides = [1, 1]} : vector<4x144xbf16> to vector<4x92xbf16>
    %523 = vector.extract_strided_slice %513 {offsets = [0, 16], sizes = [4, 92], strides = [1, 1]} : vector<4x144xbf16> to vector<4x92xbf16>
    %524 = vector.extract_strided_slice %513 {offsets = [0, 24], sizes = [4, 92], strides = [1, 1]} : vector<4x144xbf16> to vector<4x92xbf16>
    %525 = vector.extract_strided_slice %513 {offsets = [0, 25], sizes = [4, 92], strides = [1, 1]} : vector<4x144xbf16> to vector<4x92xbf16>
    %526 = vector.extract_strided_slice %513 {offsets = [0, 26], sizes = [4, 92], strides = [1, 1]} : vector<4x144xbf16> to vector<4x92xbf16>
    %527 = vector.extract_strided_slice %513 {offsets = [0, 27], sizes = [4, 92], strides = [1, 1]} : vector<4x144xbf16> to vector<4x92xbf16>
    %528 = vector.extract_strided_slice %513 {offsets = [0, 28], sizes = [4, 92], strides = [1, 1]} : vector<4x144xbf16> to vector<4x92xbf16>
    %529 = vector.extract_strided_slice %513 {offsets = [0, 36], sizes = [4, 92], strides = [1, 1]} : vector<4x144xbf16> to vector<4x92xbf16>
    %530 = vector.extract_strided_slice %513 {offsets = [0, 37], sizes = [4, 92], strides = [1, 1]} : vector<4x144xbf16> to vector<4x92xbf16>
    %531 = vector.extract_strided_slice %513 {offsets = [0, 38], sizes = [4, 92], strides = [1, 1]} : vector<4x144xbf16> to vector<4x92xbf16>
    %532 = vector.extract_strided_slice %513 {offsets = [0, 39], sizes = [4, 92], strides = [1, 1]} : vector<4x144xbf16> to vector<4x92xbf16>
    %533 = vector.extract_strided_slice %513 {offsets = [0, 40], sizes = [4, 92], strides = [1, 1]} : vector<4x144xbf16> to vector<4x92xbf16>
    %534 = vector.extract_strided_slice %513 {offsets = [0, 48], sizes = [4, 92], strides = [1, 1]} : vector<4x144xbf16> to vector<4x92xbf16>
    %535 = vector.extract_strided_slice %513 {offsets = [0, 49], sizes = [4, 92], strides = [1, 1]} : vector<4x144xbf16> to vector<4x92xbf16>
    %536 = vector.extract_strided_slice %513 {offsets = [0, 50], sizes = [4, 92], strides = [1, 1]} : vector<4x144xbf16> to vector<4x92xbf16>
    %537 = vector.extract_strided_slice %513 {offsets = [0, 51], sizes = [4, 92], strides = [1, 1]} : vector<4x144xbf16> to vector<4x92xbf16>
    %538 = vector.extract_strided_slice %513 {offsets = [0, 52], sizes = [4, 92], strides = [1, 1]} : vector<4x144xbf16> to vector<4x92xbf16>
    %539 = vector.extract_strided_slice %4 {offsets = [5, 0, 0], sizes = [1, 4, 144], strides = [1, 1, 1]} : vector<8x4x144xbf16> to vector<1x4x144xbf16>
    %540 = vector.shape_cast %539 : vector<1x4x144xbf16> to vector<4x144xbf16>
    %541 = vector.extract_strided_slice %540 {offsets = [0, 0], sizes = [4, 92], strides = [1, 1]} : vector<4x144xbf16> to vector<4x92xbf16>
    %542 = vector.extract_strided_slice %540 {offsets = [0, 1], sizes = [4, 92], strides = [1, 1]} : vector<4x144xbf16> to vector<4x92xbf16>
    %543 = vector.extract_strided_slice %540 {offsets = [0, 2], sizes = [4, 92], strides = [1, 1]} : vector<4x144xbf16> to vector<4x92xbf16>
    %544 = vector.extract_strided_slice %540 {offsets = [0, 3], sizes = [4, 92], strides = [1, 1]} : vector<4x144xbf16> to vector<4x92xbf16>
    %545 = vector.extract_strided_slice %540 {offsets = [0, 4], sizes = [4, 92], strides = [1, 1]} : vector<4x144xbf16> to vector<4x92xbf16>
    %546 = vector.extract_strided_slice %540 {offsets = [0, 12], sizes = [4, 92], strides = [1, 1]} : vector<4x144xbf16> to vector<4x92xbf16>
    %547 = vector.extract_strided_slice %540 {offsets = [0, 13], sizes = [4, 92], strides = [1, 1]} : vector<4x144xbf16> to vector<4x92xbf16>
    %548 = vector.extract_strided_slice %540 {offsets = [0, 14], sizes = [4, 92], strides = [1, 1]} : vector<4x144xbf16> to vector<4x92xbf16>
    %549 = vector.extract_strided_slice %540 {offsets = [0, 15], sizes = [4, 92], strides = [1, 1]} : vector<4x144xbf16> to vector<4x92xbf16>
    %550 = vector.extract_strided_slice %540 {offsets = [0, 16], sizes = [4, 92], strides = [1, 1]} : vector<4x144xbf16> to vector<4x92xbf16>
    %551 = vector.extract_strided_slice %540 {offsets = [0, 24], sizes = [4, 92], strides = [1, 1]} : vector<4x144xbf16> to vector<4x92xbf16>
    %552 = vector.extract_strided_slice %540 {offsets = [0, 25], sizes = [4, 92], strides = [1, 1]} : vector<4x144xbf16> to vector<4x92xbf16>
    %553 = vector.extract_strided_slice %540 {offsets = [0, 26], sizes = [4, 92], strides = [1, 1]} : vector<4x144xbf16> to vector<4x92xbf16>
    %554 = vector.extract_strided_slice %540 {offsets = [0, 27], sizes = [4, 92], strides = [1, 1]} : vector<4x144xbf16> to vector<4x92xbf16>
    %555 = vector.extract_strided_slice %540 {offsets = [0, 28], sizes = [4, 92], strides = [1, 1]} : vector<4x144xbf16> to vector<4x92xbf16>
    %556 = vector.extract_strided_slice %540 {offsets = [0, 36], sizes = [4, 92], strides = [1, 1]} : vector<4x144xbf16> to vector<4x92xbf16>
    %557 = vector.extract_strided_slice %540 {offsets = [0, 37], sizes = [4, 92], strides = [1, 1]} : vector<4x144xbf16> to vector<4x92xbf16>
    %558 = vector.extract_strided_slice %540 {offsets = [0, 38], sizes = [4, 92], strides = [1, 1]} : vector<4x144xbf16> to vector<4x92xbf16>
    %559 = vector.extract_strided_slice %540 {offsets = [0, 39], sizes = [4, 92], strides = [1, 1]} : vector<4x144xbf16> to vector<4x92xbf16>
    %560 = vector.extract_strided_slice %540 {offsets = [0, 40], sizes = [4, 92], strides = [1, 1]} : vector<4x144xbf16> to vector<4x92xbf16>
    %561 = vector.extract_strided_slice %540 {offsets = [0, 48], sizes = [4, 92], strides = [1, 1]} : vector<4x144xbf16> to vector<4x92xbf16>
    %562 = vector.extract_strided_slice %540 {offsets = [0, 49], sizes = [4, 92], strides = [1, 1]} : vector<4x144xbf16> to vector<4x92xbf16>
    %563 = vector.extract_strided_slice %540 {offsets = [0, 50], sizes = [4, 92], strides = [1, 1]} : vector<4x144xbf16> to vector<4x92xbf16>
    %564 = vector.extract_strided_slice %540 {offsets = [0, 51], sizes = [4, 92], strides = [1, 1]} : vector<4x144xbf16> to vector<4x92xbf16>
    %565 = vector.extract_strided_slice %540 {offsets = [0, 52], sizes = [4, 92], strides = [1, 1]} : vector<4x144xbf16> to vector<4x92xbf16>
    %566 = vector.extract_strided_slice %4 {offsets = [6, 0, 0], sizes = [1, 4, 144], strides = [1, 1, 1]} : vector<8x4x144xbf16> to vector<1x4x144xbf16>
    %567 = vector.shape_cast %566 : vector<1x4x144xbf16> to vector<4x144xbf16>
    %568 = vector.extract_strided_slice %567 {offsets = [0, 0], sizes = [4, 92], strides = [1, 1]} : vector<4x144xbf16> to vector<4x92xbf16>
    %569 = vector.extract_strided_slice %567 {offsets = [0, 1], sizes = [4, 92], strides = [1, 1]} : vector<4x144xbf16> to vector<4x92xbf16>
    %570 = vector.extract_strided_slice %567 {offsets = [0, 2], sizes = [4, 92], strides = [1, 1]} : vector<4x144xbf16> to vector<4x92xbf16>
    %571 = vector.extract_strided_slice %567 {offsets = [0, 3], sizes = [4, 92], strides = [1, 1]} : vector<4x144xbf16> to vector<4x92xbf16>
    %572 = vector.extract_strided_slice %567 {offsets = [0, 4], sizes = [4, 92], strides = [1, 1]} : vector<4x144xbf16> to vector<4x92xbf16>
    %573 = vector.extract_strided_slice %567 {offsets = [0, 12], sizes = [4, 92], strides = [1, 1]} : vector<4x144xbf16> to vector<4x92xbf16>
    %574 = vector.extract_strided_slice %567 {offsets = [0, 13], sizes = [4, 92], strides = [1, 1]} : vector<4x144xbf16> to vector<4x92xbf16>
    %575 = vector.extract_strided_slice %567 {offsets = [0, 14], sizes = [4, 92], strides = [1, 1]} : vector<4x144xbf16> to vector<4x92xbf16>
    %576 = vector.extract_strided_slice %567 {offsets = [0, 15], sizes = [4, 92], strides = [1, 1]} : vector<4x144xbf16> to vector<4x92xbf16>
    %577 = vector.extract_strided_slice %567 {offsets = [0, 16], sizes = [4, 92], strides = [1, 1]} : vector<4x144xbf16> to vector<4x92xbf16>
    %578 = vector.extract_strided_slice %567 {offsets = [0, 24], sizes = [4, 92], strides = [1, 1]} : vector<4x144xbf16> to vector<4x92xbf16>
    %579 = vector.extract_strided_slice %567 {offsets = [0, 25], sizes = [4, 92], strides = [1, 1]} : vector<4x144xbf16> to vector<4x92xbf16>
    %580 = vector.extract_strided_slice %567 {offsets = [0, 26], sizes = [4, 92], strides = [1, 1]} : vector<4x144xbf16> to vector<4x92xbf16>
    %581 = vector.extract_strided_slice %567 {offsets = [0, 27], sizes = [4, 92], strides = [1, 1]} : vector<4x144xbf16> to vector<4x92xbf16>
    %582 = vector.extract_strided_slice %567 {offsets = [0, 28], sizes = [4, 92], strides = [1, 1]} : vector<4x144xbf16> to vector<4x92xbf16>
    %583 = vector.extract_strided_slice %567 {offsets = [0, 36], sizes = [4, 92], strides = [1, 1]} : vector<4x144xbf16> to vector<4x92xbf16>
    %584 = vector.extract_strided_slice %567 {offsets = [0, 37], sizes = [4, 92], strides = [1, 1]} : vector<4x144xbf16> to vector<4x92xbf16>
    %585 = vector.extract_strided_slice %567 {offsets = [0, 38], sizes = [4, 92], strides = [1, 1]} : vector<4x144xbf16> to vector<4x92xbf16>
    %586 = vector.extract_strided_slice %567 {offsets = [0, 39], sizes = [4, 92], strides = [1, 1]} : vector<4x144xbf16> to vector<4x92xbf16>
    %587 = vector.extract_strided_slice %567 {offsets = [0, 40], sizes = [4, 92], strides = [1, 1]} : vector<4x144xbf16> to vector<4x92xbf16>
    %588 = vector.extract_strided_slice %567 {offsets = [0, 48], sizes = [4, 92], strides = [1, 1]} : vector<4x144xbf16> to vector<4x92xbf16>
    %589 = vector.extract_strided_slice %567 {offsets = [0, 49], sizes = [4, 92], strides = [1, 1]} : vector<4x144xbf16> to vector<4x92xbf16>
    %590 = vector.extract_strided_slice %567 {offsets = [0, 50], sizes = [4, 92], strides = [1, 1]} : vector<4x144xbf16> to vector<4x92xbf16>
    %591 = vector.extract_strided_slice %567 {offsets = [0, 51], sizes = [4, 92], strides = [1, 1]} : vector<4x144xbf16> to vector<4x92xbf16>
    %592 = vector.extract_strided_slice %567 {offsets = [0, 52], sizes = [4, 92], strides = [1, 1]} : vector<4x144xbf16> to vector<4x92xbf16>
    %593 = vector.extract_strided_slice %4 {offsets = [7, 0, 0], sizes = [1, 4, 144], strides = [1, 1, 1]} : vector<8x4x144xbf16> to vector<1x4x144xbf16>
    %594 = vector.shape_cast %593 : vector<1x4x144xbf16> to vector<4x144xbf16>
    %595 = vector.extract_strided_slice %594 {offsets = [0, 0], sizes = [4, 92], strides = [1, 1]} : vector<4x144xbf16> to vector<4x92xbf16>
    %596 = vector.extract_strided_slice %594 {offsets = [0, 1], sizes = [4, 92], strides = [1, 1]} : vector<4x144xbf16> to vector<4x92xbf16>
    %597 = vector.extract_strided_slice %594 {offsets = [0, 2], sizes = [4, 92], strides = [1, 1]} : vector<4x144xbf16> to vector<4x92xbf16>
    %598 = vector.extract_strided_slice %594 {offsets = [0, 3], sizes = [4, 92], strides = [1, 1]} : vector<4x144xbf16> to vector<4x92xbf16>
    %599 = vector.extract_strided_slice %594 {offsets = [0, 4], sizes = [4, 92], strides = [1, 1]} : vector<4x144xbf16> to vector<4x92xbf16>
    %600 = vector.extract_strided_slice %594 {offsets = [0, 12], sizes = [4, 92], strides = [1, 1]} : vector<4x144xbf16> to vector<4x92xbf16>
    %601 = vector.extract_strided_slice %594 {offsets = [0, 13], sizes = [4, 92], strides = [1, 1]} : vector<4x144xbf16> to vector<4x92xbf16>
    %602 = vector.extract_strided_slice %594 {offsets = [0, 14], sizes = [4, 92], strides = [1, 1]} : vector<4x144xbf16> to vector<4x92xbf16>
    %603 = vector.extract_strided_slice %594 {offsets = [0, 15], sizes = [4, 92], strides = [1, 1]} : vector<4x144xbf16> to vector<4x92xbf16>
    %604 = vector.extract_strided_slice %594 {offsets = [0, 16], sizes = [4, 92], strides = [1, 1]} : vector<4x144xbf16> to vector<4x92xbf16>
    %605 = vector.extract_strided_slice %594 {offsets = [0, 24], sizes = [4, 92], strides = [1, 1]} : vector<4x144xbf16> to vector<4x92xbf16>
    %606 = vector.extract_strided_slice %594 {offsets = [0, 25], sizes = [4, 92], strides = [1, 1]} : vector<4x144xbf16> to vector<4x92xbf16>
    %607 = vector.extract_strided_slice %594 {offsets = [0, 26], sizes = [4, 92], strides = [1, 1]} : vector<4x144xbf16> to vector<4x92xbf16>
    %608 = vector.extract_strided_slice %594 {offsets = [0, 27], sizes = [4, 92], strides = [1, 1]} : vector<4x144xbf16> to vector<4x92xbf16>
    %609 = vector.extract_strided_slice %594 {offsets = [0, 28], sizes = [4, 92], strides = [1, 1]} : vector<4x144xbf16> to vector<4x92xbf16>
    %610 = vector.extract_strided_slice %594 {offsets = [0, 36], sizes = [4, 92], strides = [1, 1]} : vector<4x144xbf16> to vector<4x92xbf16>
    %611 = vector.extract_strided_slice %594 {offsets = [0, 37], sizes = [4, 92], strides = [1, 1]} : vector<4x144xbf16> to vector<4x92xbf16>
    %612 = vector.extract_strided_slice %594 {offsets = [0, 38], sizes = [4, 92], strides = [1, 1]} : vector<4x144xbf16> to vector<4x92xbf16>
    %613 = vector.extract_strided_slice %594 {offsets = [0, 39], sizes = [4, 92], strides = [1, 1]} : vector<4x144xbf16> to vector<4x92xbf16>
    %614 = vector.extract_strided_slice %594 {offsets = [0, 40], sizes = [4, 92], strides = [1, 1]} : vector<4x144xbf16> to vector<4x92xbf16>
    %615 = vector.extract_strided_slice %594 {offsets = [0, 48], sizes = [4, 92], strides = [1, 1]} : vector<4x144xbf16> to vector<4x92xbf16>
    %616 = vector.extract_strided_slice %594 {offsets = [0, 49], sizes = [4, 92], strides = [1, 1]} : vector<4x144xbf16> to vector<4x92xbf16>
    %617 = vector.extract_strided_slice %594 {offsets = [0, 50], sizes = [4, 92], strides = [1, 1]} : vector<4x144xbf16> to vector<4x92xbf16>
    %618 = vector.extract_strided_slice %594 {offsets = [0, 51], sizes = [4, 92], strides = [1, 1]} : vector<4x144xbf16> to vector<4x92xbf16>
    %619 = vector.extract_strided_slice %594 {offsets = [0, 52], sizes = [4, 92], strides = [1, 1]} : vector<4x144xbf16> to vector<4x92xbf16>
    %620 = tpu.concatenate %487, %488, %489, %490, %491, %492, %493, %494, %495, %496, %497, %498, %499, %500, %501, %502 in 0 : vector<4x92xbf16>, vector<4x92xbf16>, vector<4x92xbf16>, vector<4x92xbf16>, vector<4x92xbf16>, vector<4x92xbf16>, vector<4x92xbf16>, vector<4x92xbf16>, vector<4x92xbf16>, vector<4x92xbf16>, vector<4x92xbf16>, vector<4x92xbf16>, vector<4x92xbf16>, vector<4x92xbf16>, vector<4x92xbf16>, vector<4x92xbf16> -> vector<64x92xbf16>
    %621 = tpu.concatenate %503, %504, %505, %506, %507, %508, %509, %510, %511, %514, %515, %516, %517, %518, %519, %520 in 0 : vector<4x92xbf16>, vector<4x92xbf16>, vector<4x92xbf16>, vector<4x92xbf16>, vector<4x92xbf16>, vector<4x92xbf16>, vector<4x92xbf16>, vector<4x92xbf16>, vector<4x92xbf16>, vector<4x92xbf16>, vector<4x92xbf16>, vector<4x92xbf16>, vector<4x92xbf16>, vector<4x92xbf16>, vector<4x92xbf16>, vector<4x92xbf16> -> vector<64x92xbf16>
    %622 = tpu.concatenate %521, %522, %523, %524, %525, %526, %527, %528, %529, %530, %531, %532, %533, %534, %535, %536 in 0 : vector<4x92xbf16>, vector<4x92xbf16>, vector<4x92xbf16>, vector<4x92xbf16>, vector<4x92xbf16>, vector<4x92xbf16>, vector<4x92xbf16>, vector<4x92xbf16>, vector<4x92xbf16>, vector<4x92xbf16>, vector<4x92xbf16>, vector<4x92xbf16>, vector<4x92xbf16>, vector<4x92xbf16>, vector<4x92xbf16>, vector<4x92xbf16> -> vector<64x92xbf16>
    %623 = tpu.concatenate %537, %538, %541, %542, %543, %544, %545, %546, %547, %548, %549, %550, %551, %552, %553, %554 in 0 : vector<4x92xbf16>, vector<4x92xbf16>, vector<4x92xbf16>, vector<4x92xbf16>, vector<4x92xbf16>, vector<4x92xbf16>, vector<4x92xbf16>, vector<4x92xbf16>, vector<4x92xbf16>, vector<4x92xbf16>, vector<4x92xbf16>, vector<4x92xbf16>, vector<4x92xbf16>, vector<4x92xbf16>, vector<4x92xbf16>, vector<4x92xbf16> -> vector<64x92xbf16>
    %624 = tpu.concatenate %555, %556, %557, %558, %559, %560, %561, %562, %563, %564, %565, %568, %569, %570, %571, %572 in 0 : vector<4x92xbf16>, vector<4x92xbf16>, vector<4x92xbf16>, vector<4x92xbf16>, vector<4x92xbf16>, vector<4x92xbf16>, vector<4x92xbf16>, vector<4x92xbf16>, vector<4x92xbf16>, vector<4x92xbf16>, vector<4x92xbf16>, vector<4x92xbf16>, vector<4x92xbf16>, vector<4x92xbf16>, vector<4x92xbf16>, vector<4x92xbf16> -> vector<64x92xbf16>
    %625 = tpu.concatenate %573, %574, %575, %576, %577, %578, %579, %580, %581, %582, %583, %584, %585, %586, %587, %588 in 0 : vector<4x92xbf16>, vector<4x92xbf16>, vector<4x92xbf16>, vector<4x92xbf16>, vector<4x92xbf16>, vector<4x92xbf16>, vector<4x92xbf16>, vector<4x92xbf16>, vector<4x92xbf16>, vector<4x92xbf16>, vector<4x92xbf16>, vector<4x92xbf16>, vector<4x92xbf16>, vector<4x92xbf16>, vector<4x92xbf16>, vector<4x92xbf16> -> vector<64x92xbf16>
    %626 = tpu.concatenate %589, %590, %591, %592, %595, %596, %597, %598, %599, %600, %601, %602, %603, %604, %605, %606 in 0 : vector<4x92xbf16>, vector<4x92xbf16>, vector<4x92xbf16>, vector<4x92xbf16>, vector<4x92xbf16>, vector<4x92xbf16>, vector<4x92xbf16>, vector<4x92xbf16>, vector<4x92xbf16>, vector<4x92xbf16>, vector<4x92xbf16>, vector<4x92xbf16>, vector<4x92xbf16>, vector<4x92xbf16>, vector<4x92xbf16>, vector<4x92xbf16> -> vector<64x92xbf16>
    %627 = tpu.concatenate %607, %608, %609, %610, %611, %612, %613, %614, %615, %616, %617, %618, %619 in 0 : vector<4x92xbf16>, vector<4x92xbf16>, vector<4x92xbf16>, vector<4x92xbf16>, vector<4x92xbf16>, vector<4x92xbf16>, vector<4x92xbf16>, vector<4x92xbf16>, vector<4x92xbf16>, vector<4x92xbf16>, vector<4x92xbf16>, vector<4x92xbf16>, vector<4x92xbf16> -> vector<52x92xbf16>
    %628 = tpu.concatenate %620, %621, %622, %623, %624, %625, %626, %627 in 0 : vector<64x92xbf16>, vector<64x92xbf16>, vector<64x92xbf16>, vector<64x92xbf16>, vector<64x92xbf16>, vector<64x92xbf16>, vector<64x92xbf16>, vector<52x92xbf16> -> vector<500x92xbf16>
    %c0_16 = arith.constant 0 : index
    %c0_17 = arith.constant 0 : index
    %629 = vector.load %arg3[%c0_16, %c0_17] : memref<8x500xbf16, #tpu.memory_space<vmem>>, vector<8x500xbf16>
    %cst_18 = arith.constant dense<0.000000e+00> : vector<8x92xf32>
    %630 = tpu.matmul %629, %628, %cst_18 {dimension_numbers = #tpu.dot_dimension_numbers<[1], [0], [0], [1], [0, 0, 1, 1], [], []>} : vector<8x500xbf16>, vector<500x92xbf16>, vector<8x92xf32> -> vector<8x92xf32>
    %c0_19 = arith.constant 0 : index
    %c0_20 = arith.constant 0 : index
    %631 = vector.load %arg4[%c0_19, %c0_20] : memref<8x1xf32, #tpu.memory_space<vmem>>, vector<8x1xf32>
    %632 = vector.broadcast %631 : vector<8x1xf32> to vector<8x92xf32>
    %633 = arith.addf %630, %632 : vector<8x92xf32>
    %634 = vector.extract_strided_slice %633 {offsets = [0, 0], sizes = [8, 8], strides = [1, 1]} : vector<8x92xf32> to vector<8x8xf32>
    %635 = vector.extract_strided_slice %633 {offsets = [0, 12], sizes = [8, 8], strides = [1, 1]} : vector<8x92xf32> to vector<8x8xf32>
    %636 = vector.extract_strided_slice %633 {offsets = [0, 24], sizes = [8, 8], strides = [1, 1]} : vector<8x92xf32> to vector<8x8xf32>
    %637 = vector.extract_strided_slice %633 {offsets = [0, 36], sizes = [8, 8], strides = [1, 1]} : vector<8x92xf32> to vector<8x8xf32>
    %638 = vector.extract_strided_slice %633 {offsets = [0, 48], sizes = [8, 8], strides = [1, 1]} : vector<8x92xf32> to vector<8x8xf32>
    %639 = vector.extract_strided_slice %633 {offsets = [0, 60], sizes = [8, 8], strides = [1, 1]} : vector<8x92xf32> to vector<8x8xf32>
    %640 = vector.extract_strided_slice %633 {offsets = [0, 72], sizes = [8, 8], strides = [1, 1]} : vector<8x92xf32> to vector<8x8xf32>
    %641 = vector.extract_strided_slice %633 {offsets = [0, 84], sizes = [8, 8], strides = [1, 1]} : vector<8x92xf32> to vector<8x8xf32>
    %642 = tpu.concatenate %634, %635, %636, %637, %638, %639, %640, %641 in 1 : vector<8x8xf32>, vector<8x8xf32>, vector<8x8xf32>, vector<8x8xf32>, vector<8x8xf32>, vector<8x8xf32>, vector<8x8xf32>, vector<8x8xf32> -> vector<8x64xf32>
    %643 = vector.extract_strided_slice %642 {offsets = [0, 0], sizes = [4, 64], strides = [1, 1]} : vector<8x64xf32> to vector<4x64xf32>
    %644 = vector.extract_strided_slice %642 {offsets = [4, 0], sizes = [4, 64], strides = [1, 1]} : vector<8x64xf32> to vector<4x64xf32>
    %645 = tpu.concatenate %163, %323, %483, %643 in 1 : vector<4x64xf32>, vector<4x64xf32>, vector<4x64xf32>, vector<4x64xf32> -> vector<4x256xf32>
    %646 = tpu.concatenate %164, %324, %484, %644 in 1 : vector<4x64xf32>, vector<4x64xf32>, vector<4x64xf32>, vector<4x64xf32> -> vector<4x256xf32>
    %c0_21 = arith.constant 0 : index
    %c0_22 = arith.constant 0 : index
    %647 = vector.load %arg5[%c0_21, %c0_22] : memref<4x4xbf16, #tpu.memory_space<vmem>>, vector<4x4xbf16>
    %648 = arith.truncf %645 : vector<4x256xf32> to vector<4x256xbf16>
    %cst_23 = arith.constant dense<0.000000e+00> : vector<4x256xf32>
    %649 = tpu.matmul %647, %648, %cst_23 {dimension_numbers = #tpu.dot_dimension_numbers<[1], [0], [0], [1], [0, 0, 1, 1], [], []>} : vector<4x4xbf16>, vector<4x256xbf16>, vector<4x256xf32> -> vector<4x256xf32>
    %c0_24 = arith.constant 0 : index
    %c0_25 = arith.constant 0 : index
    %650 = vector.load %arg6[%c0_24, %c0_25] : memref<4x1xf32, #tpu.memory_space<vmem>>, vector<4x1xf32>
    %651 = vector.broadcast %650 : vector<4x1xf32> to vector<4x256xf32>
    %652 = arith.addf %649, %651 : vector<4x256xf32>
    %653 = arith.negf %652 : vector<4x256xf32>
    %654 = math.exp %653 : vector<4x256xf32>
    %cst_26 = arith.constant 1.000000e+00 : f32
    %655 = vector.broadcast %cst_26 : f32 to vector<4x256xf32>
    %656 = arith.addf %655, %654 : vector<4x256xf32>
    %657 = arith.divf %655, %656 : vector<4x256xf32>
    %658 = arith.subf %645, %646 : vector<4x256xf32>
    %659 = arith.mulf %657, %658 : vector<4x256xf32>
    %660 = arith.addf %659, %646 : vector<4x256xf32>
    %661 = math.tanh %660 : vector<4x256xf32>
    %c0_27 = arith.constant 0 : index
    %c0_28 = arith.constant 0 : index
    %c0_29 = arith.constant 0 : index
    %662 = vector.load %arg7[%c0_27, %c0_28, %c0_29] : memref<1x4x256xf32, #tpu.memory_space<vmem>>, vector<1x4x256xf32>
    %663 = vector.shape_cast %662 : vector<1x4x256xf32> to vector<4x256xf32>
    %664 = vector.shape_cast %661 : vector<4x256xf32> to vector<1x4x256xf32>
    tpu.vector_store %arg7[%c0_27, %c0_28, %c0_29], %664 {strides = array<i32>} : memref<1x4x256xf32, #tpu.memory_space<vmem>>, vector<1x4x256xf32>,
    return
  }
  func.func @transform_0(%arg0: i32, %arg1: i32) -> (i32, i32, i32, i32) {
    %c0_i32 = arith.constant 0 : i32
    %c0_i32_0 = arith.constant 0 : i32
    %c0_i32_1 = arith.constant 0 : i32
    %c0_i32_2 = arith.constant 0 : i32
    return %arg0, %c0_i32, %c0_i32_0, %c0_i32_1 : i32, i32, i32, i32
  }
  func.func @transform_1(%arg0: i32, %arg1: i32) -> (i32, i32) {
    %c0_i32 = arith.constant 0 : i32
    %c0_i32_0 = arith.constant 0 : i32
    %c0_i32_1 = arith.constant 0 : i32
    return %c0_i32, %c0_i32_0 : i32, i32
  }
  func.func @transform_2(%arg0: i32, %arg1: i32) -> (i32, i32) {
    %c0_i32 = arith.constant 0 : i32
    %c0_i32_0 = arith.constant 0 : i32
    %c0_i32_1 = arith.constant 0 : i32
    return %c0_i32, %c0_i32_0 : i32, i32
  }
  func.func @transform_3(%arg0: i32, %arg1: i32) -> (i32, i32) {
    %c0_i32 = arith.constant 0 : i32
    %c0_i32_0 = arith.constant 0 : i32
    %c0_i32_1 = arith.constant 0 : i32
    return %c0_i32, %c0_i32_0 : i32, i32
  }
  func.func @transform_4(%arg0: i32, %arg1: i32) -> (i32, i32) {
    %c0_i32 = arith.constant 0 : i32
    %c0_i32_0 = arith.constant 0 : i32
    %c0_i32_1 = arith.constant 0 : i32
    return %c0_i32, %c0_i32_0 : i32, i32
  }
  func.func @transform_5(%arg0: i32, %arg1: i32) -> (i32, i32, i32) {
    %c0_i32 = arith.constant 0 : i32
    %c0_i32_0 = arith.constant 0 : i32
    return %arg0, %c0_i32, %arg1 : i32, i32, i32
  }
}

</mosaic_0001>

<bundles_post_ra>
// kernel: tpu_custom_call.1
= control target key start
LH: loop header
LB: loop body
LE: loop exit
PB: predicated region body
PF: predicated region fallthrough
CT: control target
= control target key end

     0   :  { %s9415_s0 = inlined_call_operand.hbm [shape: bf16[2,12,4,144], index: 0, kind: input, shape index: {}]   ;;  %s9416_s1 = inlined_call_operand.hbm [shape: bf16[8,500], index: 1, kind: input, shape index: {}]   ;;  %s9417_s2 = inlined_call_operand.vmem [shape: f32[8,1], index: 2, kind: input, shape index: {}]   ;;  %s9418_s3 = inlined_call_operand.vmem [shape: bf16[4,4], index: 3, kind: input, shape index: {}]   ;;  %s9419_s4 = inlined_call_operand.vmem [shape: f32[4,1], index: 4, kind: input, shape index: {}]   ;;  %s9420_s5 = inlined_call_operand.hbm [shape: f32[2,4,512], index: 5, kind: output, shape index: {}]  }
   0x1   :  { %9592 = sst [smem:[#allocation76_spill]] %s9415_s0 }
   0x2   :  { %9593 = sst [smem:[#allocation77_spill]] %s9416_s1 }
   0x3   :  { %9594 = sst [smem:[#allocation78_spill]] %s9417_s2 }
   0x4   :  { %9595 = sst [smem:[#allocation79_spill]] %s9418_s3 }
   0x5   :  { %9596 = sst [smem:[#allocation80_spill]] %s9419_s4 }
   0x6   :  { %9597 = sst [smem:[#allocation81_spill]] %s9420_s5 }
   0x7   :  { %10 = vsyncpa [#allocation3], 0 }
   0x8   :  { %12 = vsyncpa [#allocation3 + $0x1], 0 }
   0x9   :  { %13 = vsyncpa [#allocation6], 0 }
   0xa   :  { %14 = vsyncpa [#allocation4], 0 }
   0xb   :  { %16 = vsyncpa [#allocation4 + $0x1], 0  ;;  %s6468_s18 = smov 0   ;;  %s6470_s19 = smov 0  }
   0xc   :  { %s6472_s20 = smov 0   ;;  %s6474_s21 = smov 0  }
   0xd   :  { %s6476_s22 = smov 0   ;;  %s6478_s23 = smov 0  }
   0xe   :  { %s6480_s24 = smov 0   ;;  %s6482_s25 = smov 0  }
   0xf   :  { %s6484_s26 = smov 0   ;;  %s6486_s27 = smov 0  }
  0x10   :  { %s6488_s28 = smov 0  }
  0x11 LB: > { %9598 = sst [smem:[#allocation11_spill]] %s6344_s18  ;;  %s5989_s29 = sadd.s32 4294967295, %s6384_s28   ;;  %s6384_s28 = sphi %s6488_s28, %s22_s28   ;;  %s6380_s27 = sphi %s6486_s27, %s9905_s27   ;;  %s6376_s26 = sphi %s6484_s26, %s9904_s26   ;;  %s6372_s25 = sphi %s6482_s25, %s9903_s25   ;;  %s6368_s24 = sphi %s6480_s24, %s9902_s24   ;;  %s6364_s23 = sphi %s6478_s23, %s9901_s23   ;;  %s6360_s22 = sphi %s6476_s22, %s9900_s22   ;;  %s6356_s21 = sphi %s6474_s21, %s9899_s21   ;;  %s6352_s20 = sphi %s6472_s20, %s9898_s20   ;;  %s6348_s19 = sphi %s6470_s19, %s9897_s19   ;;  %s6344_s18 = sphi %s6468_s18, %s9896_s18  }
  0x12   : > { %9599 = sst [smem:[#allocation12_spill]] %s6348_s19  ;;  %s5990_s30 = sadd.s32 4294967294, %s6384_s28  }
  0x13   : > { %9600 = sst [smem:[#allocation13_spill]] %s6352_s20  ;;  %p48_p0 = scmp.ne.s32.totalorder %s6364_s23, %s6360_s22 }
  0x14   : > { %9601 = sst [smem:[#allocation14_spill]] %s6360_s22  ;;  %p49_p1 = scmp.eq.s32.totalorder %s6384_s28, 0 }
  0x15   : > { %9602 = sst [smem:[#allocation15_spill]] %s6364_s23  ;;  %p54_p2 = scmp.ne.s32.totalorder %s6360_s22, %s6356_s21 }
  0x16   : > { %9603 = sst [smem:[#allocation16_spill]] %s6368_s24  ;;  %p6528_p3 = scmp.eq.s32.totalorder %s5989_s29, 0 }
  0x17   : > { %9604 = sst [smem:[#allocation17_spill]] %s6372_s25  ;;  %p6533_p4 = por %p49_p1, %p48_p0 }
  0x18   : > { %9605 = sst [smem:[#allocation18_spill]] %s6376_s26  ;;  %p163_p5 = scmp.ne.s32.totalorder %s6352_s20, %s6348_s19 }
  0x19   : > { %9606 = sst [smem:[#allocation19_spill]] %s6380_s27  ;;  %p6541_p6 = por %p6528_p3, %p54_p2 }
  0x1a   : > { %9607 = sst [smem:[#allocation20_spill]] %s6384_s28  ;;  %p164_p7 = scmp.eq.s32.totalorder %s5989_s29, 3 }
  0x1b   : > { %p169_p8 = scmp.ne.s32.totalorder %s6348_s19, %s6344_s18  ;;  %p170_p9 = scmp.eq.s32.totalorder %s5990_s30, 3 }
  0x1c   : > { %p6547_p10 = por %p164_p7, %p163_p5  ;;  %p5991_p11 = scmp.ge.s32.totalorder %s6384_s28, 1 }
  0x1d   : > { %p6552_p12 = por %p170_p9, %p169_p8  ;;  %p177_p13 = scmp.lt.s32.totalorder %s6384_s28, 5 }
  0x1e   : > { %s9611_s11 = scalar_select %p6547_p10, 1, 0 }
  0x1f   : > { %s9613_s12 = scalar_select %p6552_p12, 1, 0 }
  0x20   : > { %9612 = sst [smem:[#allocation21_spill]] %s9611_s11  ;;  %p6560_p0 = pnand %p5991_p11, %p177_p13 }
  0x21   : > { %9614 = sst [smem:[#allocation22_spill]] %s9613_s12  ;;  %s6386_s17 = smov [#allocation5]  }
  0x22   : > { %s9615_s1 = sld [smem:[#allocation77_spill]]  ;;  %p6028_p1 = pneg %p6560_p0 }
  0x23   : > { %s191_s21 = sshll.u32 %s6386_s17, 4  ;;  %p6041_p2 = scmp.lt.s32.totalorder %s6384_s28, 4  ;;  %s192_s21 = int_to_ptr.vmem [resolvable:$true] %s191_s21 }
  0x24   : > { %p6029_p5 = pnand %p6028_p1, %p6528_p3  ;;  %s31_s30 = sadd.s32 1, %s6376_s26 }
  0x25   : > { %p6571_p7 = pnand %p6041_p2, %p6533_p4  ;;  %s34_s13 = sadd.s32 1, %s6380_s27 }
  0x26   : > { %p32_p8 = scmp.ge.s32.totalorder %s31_s30, 2  ;;  %s211_s14 = sand.u32 1, %s6364_s23  }
  0x27   : > { %s6017_s8 = smul.u32 48, %s211_s14  ;;  %s9620_s0 = sld [smem:[#allocation76_spill]] }
  0x28   : > { %s189_s15 = sshll.u32 %s9615_s1, 4  ;;  %s9907_s30 = smov (%p32_p8, %s31_s30), 0  ;;  %s190_s15 = int_to_ptr.hbm [resolvable:$true] %s189_s15 }
  0x29   : > { %6031 = dma.hbm_to_vmem [thread:$0]  (!%p6029_p5), %s190_s15, 256, %s192_s21, [#allocation6]  }
  0x2a   : > { %9618 = sst [smem:[#allocation23_spill]] %s9907_s30  ;;  %s9909_s13 = smov (!%p32_p8, %s34_s13), %s6380_s27 }
  0x2b   : > { %s149_s9 = ssub.s32 %s6376_s26, %s9907_s30  ;;  %p36_p4 = scmp.ge.s32.totalorder %s9909_s13, 2 }
  0x2c   : > { %s6018_s17 = smul.u32 48, %s6380_s27  ;;  %s215_s6 = scalar_lea.vmem [#allocation2], %s6017_s8 }
  0x2d   : > { %s223_s15 = sshll.u32 %s215_s6, 4  ;;  %s9911_s13 = smov (%p36_p4, %s9909_s13), 0  ;;  %s224_s15 = int_to_ptr.vmem [resolvable:$true] %s223_s15 }
  0x2e   : > { %9619 = sst [smem:[#allocation24_spill]] %s9911_s13  ;;  %s220_s12 = scalar_lea.hbm %s9620_s0, %s6018_s17 }
  0x2f   : > { %s38_s18 = ssub.s32 %s6380_s27, %s9911_s13  ;;  %s221_s28 = sshll.u32 %s220_s12, 4  ;;  %s222_s28 = int_to_ptr.hbm [resolvable:$true] %s221_s28 }
  0x30   : > { %p39_p9 = scmp.eq.s32.totalorder %s38_s18, 0  ;;  %s150_s11 = sor.u32 %s149_s9, %s38_s18 }
  0x31   : > { %p151_p11 = scmp.eq.s32.totalorder %s150_s11, 0  ;;  %s9621_s30 = sadd.s32 1, %s6364_s23 }
  0x32   : > { %s6594_s26 = scalar_select %p39_p9, %s6364_s23, %s9621_s30  }
  0x33   : > { %s9623_s8 = sadd.s32 1, %s6352_s20  ;;  %s212_s6 = scalar_lea.sflag [#allocation3], %s211_s14 }
  0x34   : > { %9622 = sst [smem:[#allocation25_spill]] %s6594_s26  ;;  %s6387_s19 = smov 64  }
  0x35   : > { %s6599_s5 = scalar_select %p151_p11, %s6352_s20, %s9623_s8  }
  0x36   : > { %s6388_s25 = smov 4   ;;  %235 = sbr.rel (%p6560_p0) target bundleno = 4732 (0x127c), region = 40 }
  0x37   : > { %9624 = sst [smem:[#allocation26_spill]] %s6599_s5 }
  0x38   : > { %6035 = dma.hbm_to_vmem [thread:$0]  (!%p6571_p7), %s222_s28, 768, %s224_s15, %s212_s6, %s6387_s19, %s6387_s19, %s6388_s25  }
  0x3b   : > { %s237_s1 = sand.u32 1, %s6360_s22  }
  0x3c   : > { %s6019_s18 = smul.u32 48, %s237_s1  ;;  %s238_s11 = scalar_lea.sflag [#allocation3], %s237_s1 }
  0x3e   : > { %s241_s12 = scalar_lea.vmem [#allocation2], %s6019_s18 }
  0x3f   : > { %6331 = dma.done.wait (%p6541_p6), %s238_s11, 768  }
  0x40   : > { %6333 = vsyncadd (%p6541_p6), %s238_s11, 4294966528 }
  0x41   : > { %6335 = dma.done.wait (%p6528_p3), [#allocation6], 256  }
  0x42   : > { %6337 = vsyncadd (%p6528_p3), [#allocation6], 4294967040  ;;  %v6389_v0 = vmov 0   ;;  %s6016_s19 = sshll.u32 %s6368_s24, 4  ;;  %s9626_s2 = sld [smem:[#allocation78_spill]]  ;;  %vm376_vm0 = vcmask 1041408  }
  0x43   : > { %6184 = vset.pattern.permute.xlu0 %v6389_v0  ;;  %6185 = vset.pattern.permute.xlu2 %v6389_v0  ;;  %s6615_s25 = scalar_lea.vmem %s241_s12, %s6016_s19 [#allocation2]  ;;  %s9525_s7 = smov 127   ;;  %vm9589_vm1 = vcmask 1039360   ;;  %vm379_vm2 = vcmask 1043456   ;;  %vm9588_vm3 = vcmask 1031168   ;;  %vm382_vm4 = vcmask 1045504  }
  0x44   : > { %9625 = sst [smem:[#allocation27_spill]] %s6615_s25  ;;  %v6621_v2 = vld [vmem:[%s6615_s25] sm:$0xf]  ;;  %s9449_s10 = smov 126   ;;  %v6681_v34 = vld [vmem:[%s6615_s25 + $0x4] sm:$0xf] }
  0x45   : > { %290 = vst [vmem:[#allocation1 + $0x1] ss:$4 sm:$0xff] %v6621_v2  ;;  %s9445_s29 = smov 125   ;;  %s9439_s30 = smov 124   ;;  %vm9553_vm5 = vcmask 1022976   ;;  %vm458_vm6 = vcmask 957440  }
  0x46   : > { %s9532_s14 = smov 116   ;;  %s9447_s9 = smov 115   ;;  %vm470_vm7 = vcmask 949248   ;;  %vm9473_vm8 = vcmask 941056   ;;  %vm9472_vm9 = vcmask 932864   ;;  %vm9469_vm10 = vcmask 924672  }
  0x47   : > { %s9505_s17 = smov 114   ;;  %s9435_s15 = smov 113   ;;  %vm649_vm11 = vcmask 859136   ;;  %vm661_vm12 = vcmask 850944   ;;  %vm673_vm13 = vcmask 842752   ;;  %vm684_vm14 = vcmask 834560  }
  0x48   : > { %v1590_v1 = vld [vmem:[%s9626_s2] sm:$0xff]  ;;  %s9433_s21 = smov 112   ;;  %s9451_s8 = smov 104   ;;  %vm9527_vm15 = vcmask 769024  }
  0x49   : > { %1593 = vperm.xlu0 %6184, %v1590_v1   ;;  %s9522_s6 = smov 103   ;;  %s9514_s1 = smov 102  }
  0x4a   : > { %s9431_s18 = smov 101   ;;  %s9443_s11 = smov 100  }
  0x4b   : > { %s9510_s12 = smov 92   ;;  %s9482_s19 = smov 117  }
  0x4c   : > { %v291_v3 = vld.sshfl [vmem:[#allocation1] sm:$0xff pattern:$0x73625140]  ;;  %s9478_s28 = smov 37   ;;  %s9467_s16 = smov 36  }
  0x4d   : > { %296 = vst [vmem:[#allocation1 + $0x2] ss:$4 sm:$0xff] %v6621_v2  ;;  %s9648_s0 = smov 117   ;;  %s9649_s2 = smov 116  }
  0x4e   : > { %s9651_s13 = smov 79   ;;  %s9652_s27 = smov 106  }
  0x4f   : > { %s9653_s26 = smov 105   ;;  %s9654_s23 = smov 103  }
  0x50   : > { %s9655_s22 = smov 102   ;;  %s9659_s5 = smov 92  }
  0x51   : > { %293 = vrot.lane.b32.xlu0 %v291_v3, %s9525_s7  ;;  %s9660_s20 = smov 25   ;;  %s9661_s24 = smov 24  }
  0x52   : > { %s9663_s3 = smov 91   ;;  %s9666_s4 = smov 94  }
  0x54   : > { %v297_v4 = vld.sshfl [vmem:[#allocation1] sm:$0xff pattern:$0x73625140] }
  0x55   : > { %302 = vst [vmem:[#allocation1 + $0x3] ss:$4 sm:$0xff] %v6621_v2 }
  0x59   : > { %299 = vrot.lane.b32.xlu0 %v297_v4, %s9449_s10 }
  0x5c   : > { %v303_v5 = vld.sshfl [vmem:[#allocation1] sm:$0xff pattern:$0x73625140] }
  0x5d   : > { %305 = vrot.lane.b32.xlu1 %v303_v5, %s9445_s29  ;;  %307 = vst [vmem:[#allocation1] ss:$4 sm:$0xff] %v6621_v2 }
  0x64   : > { %v308_v6 = vld.sshfl [vmem:[#allocation1] sm:$0xff pattern:$0x73625140] }
  0x65   : > { %310 = vrot.lane.b32.xlu1 %v308_v6, %s9439_s30  ;;  %313 = vst [vmem:[#allocation1 + $0x1] ss:$4 sm:$0xff] %v6621_v2  ;;  %s9530_s30 = smov 24  }
  0x6c   : > { %v314_v7 = vld.sshfl [vmem:[#allocation1] sm:$0xff pattern:$0x73625140] }
  0x6d   : > { %319 = vst [vmem:[#allocation1 + $0x2] ss:$4 sm:$0xff] %v6621_v2  ;;  %316 = vrot.lane.b32.xlu2 %v314_v7, %s9532_s14 }
  0x74   : > { %v320_v8 = vld.sshfl [vmem:[#allocation1] sm:$0xff pattern:$0x73625140] }
  0x75   : > { %325 = vst [vmem:[#allocation1 + $0x3] ss:$4 sm:$0xff] %v6621_v2  ;;  %322 = vrot.lane.b32.xlu2 %v320_v8, %s9447_s9 }
  0x7c   : > { %v326_v9 = vld.sshfl [vmem:[#allocation1] sm:$0xff pattern:$0x73625140] }
  0x7d   : > { %330 = vst [vmem:[#allocation1] ss:$4 sm:$0xff] %v6621_v2  ;;  %328 = vrot.lane.b32.xlu0 %v326_v9, %s9505_s17 }
  0x84   : > { %v331_v10 = vld.sshfl [vmem:[#allocation1] sm:$0xff pattern:$0x73625140] }
  0x85   : > { %333 = vrot.lane.b32.xlu1 %v331_v10, %s9435_s15  ;;  %336 = vst [vmem:[#allocation1 + $0x1] ss:$4 sm:$0xff] %v6621_v2 }
  0x8c   : > { %v337_v11 = vld.sshfl [vmem:[#allocation1] sm:$0xff pattern:$0x73625140] }
  0x8d   : > { %342 = vst [vmem:[#allocation1 + $0x2] ss:$4 sm:$0xff] %v6621_v2  ;;  %339 = vrot.lane.b32.xlu2 %v337_v11, %s9433_s21  ;;  %s9437_s21 = smov 34  }
  0x94   : > { %v343_v12 = vld.sshfl [vmem:[#allocation1] sm:$0xff pattern:$0x73625140] }
  0x95   : > { %348 = vst [vmem:[#allocation1 + $0x3] ss:$4 sm:$0xff] %v6621_v2  ;;  %345 = vrot.lane.b32.xlu0 %v343_v12, %s9451_s8 }
  0x9c   : > { %v349_v13 = vld.sshfl [vmem:[#allocation1] sm:$0xff pattern:$0x73625140] }
  0x9d   : > { %351 = vrot.lane.b32.xlu1 %v349_v13, %s9522_s6  ;;  %353 = vst [vmem:[#allocation1] ss:$4 sm:$0xff] %v6621_v2 }
  0xa4   : > { %v354_v14 = vld.sshfl [vmem:[#allocation1] sm:$0xff pattern:$0x73625140] }
  0xa5   : > { %359 = vst [vmem:[#allocation1 + $0x1] ss:$4 sm:$0xff] %v6621_v2  ;;  %356 = vrot.lane.b32.xlu2 %v354_v14, %s9514_s1 }
  0xac   : > { %v360_v15 = vld.sshfl [vmem:[#allocation1] sm:$0xff pattern:$0x73625140] }
  0xad   : > { %365 = vst [vmem:[#allocation1 + $0x2] ss:$4 sm:$0xff] %v6621_v2  ;;  %362 = vrot.lane.b32.xlu0 %v360_v15, %s9431_s18  ;;  %s9474_s18 = smov 35  }
  0xb4   : > { %v366_v16 = vld.sshfl [vmem:[#allocation1] sm:$0xff pattern:$0x73625140] }
  0xb5   : > { %368 = vrot.lane.b32.xlu1 %v366_v16, %s9443_s11  ;;  %371 = vst [vmem:[#allocation1 + $0x3] ss:$4 sm:$0xff] %v6621_v2  ;;  %s9507_s11 = smov 118  }
  0xbb   : > { %v6686_v37 = vpop.permute.xlu0 %1593 }
  0xbc   : > { %v372_v17 = vld.sshfl [vmem:[#allocation1] sm:$0xff pattern:$0x73625140]  ;;  %9627 = vst [vmem:[#allocation28_spill] sm:$0xff] %v6686_v37 }
  0xbd   : > { %410 = vst [vmem:[#allocation1] ss:$4 sm:$0xff] %v6621_v2  ;;  %374 = vrot.lane.b32.xlu2 %v372_v17, %s9510_s12 }
  0xc3   : > { %v6693_v41 = vpop.permute.xlu0 %293 }
  0xc4   : > { %v6654_v18 = vld.sshfl [vmem:[#allocation1] sm:$0xff pattern:$0x73625140]  ;;  %v6656_v19 = vld.sshfl [vmem:[#allocation1 + $0x8] sm:$0xff pattern:$0x73625140] }
  0xc5   : > { %414 = vst [vmem:[#allocation1 + $0x1] ss:$4 sm:$0xff] %v6621_v2 }
  0xc7   : > { %v6698_v43 = vpop.permute.xlu2 %316 }
  0xcb   : > { %v6702_v45 = vpop.permute.xlu0 %299 }
  0xcc   : > { %v417_v20 = vld.sshfl [vmem:[#allocation1 + $0x8] sm:$0xff pattern:$0x73625140]  ;;  %v415_v21 = vld.sshfl [vmem:[#allocation1] sm:$0xff pattern:$0x73625140] }
  0xcd   : > { %421 = vrot.lane.b32.xlu1 %v417_v20, %s9525_s7  ;;  %419 = vrot.lane.b32.xlu0 %v415_v21, %s9525_s7  ;;  %426 = vst [vmem:[#allocation1 + $0x2] ss:$4 sm:$0xff] %v6621_v2 }
  0xcf   : > { %v6690_v39 = vpop.permute.xlu1 %305  ;;  %v6706_v47 = vpop.permute.xlu2 %322 }
  0xd4   : > { %v427_v22 = vld.sshfl [vmem:[#allocation1] sm:$0xff pattern:$0x73625140]  ;;  %v429_v23 = vld.sshfl [vmem:[#allocation1 + $0x8] sm:$0xff pattern:$0x73625140] }
  0xd5   : > { %438 = vst [vmem:[#allocation1 + $0x3] ss:$4 sm:$0xff] %v6621_v2  ;;  %433 = vrot.lane.b32.xlu0 %v429_v23, %s9449_s10  ;;  %431 = vrot.lane.b32.xlu2 %v427_v22, %s9449_s10 }
  0xd7   : > { %v6700_v44 = vpop.permute.xlu1 %310 }
  0xdc   : > { %v439_v24 = vld.sshfl [vmem:[#allocation1] sm:$0xff pattern:$0x73625140]  ;;  %v441_v25 = vld.sshfl [vmem:[#allocation1 + $0x8] sm:$0xff pattern:$0x73625140] }
  0xdd   : > { %443 = vrot.lane.b32.xlu1 %v439_v24, %s9445_s29  ;;  %449 = vst [vmem:[#allocation1] ss:$4 sm:$0xff] %v6621_v2  ;;  %445 = vrot.lane.b32.xlu2 %v441_v25, %s9445_s29  ;;  %s9503_s29 = smov 106  }
  0xe4   : > { %v452_v26 = vld.sshfl [vmem:[#allocation1 + $0x8] sm:$0xff pattern:$0x73625140]  ;;  %v450_v27 = vld.sshfl [vmem:[#allocation1] sm:$0xff pattern:$0x73625140] }
  0xe5   : > { %456 = vrot.lane.b32.xlu1 %v452_v26, %s9482_s19  ;;  %454 = vrot.lane.b32.xlu0 %v450_v27, %s9482_s19  ;;  %461 = vst [vmem:[#allocation1 + $0x1] ss:$4 sm:$0xff] %v6621_v2 }
  0xe7   : > { %v6713_v51 = vpop.permute.xlu2 %339 }
  0xec   : > { %v462_v28 = vld.sshfl [vmem:[#allocation1] sm:$0xff pattern:$0x73625140]  ;;  %v464_v29 = vld.sshfl [vmem:[#allocation1 + $0x8] sm:$0xff pattern:$0x73625140] }
  0xed   : > { %473 = vst [vmem:[#allocation1 + $0x2] ss:$4 sm:$0xff] %v6621_v2  ;;  %468 = vrot.lane.b32.xlu0 %v464_v29, %s9532_s14  ;;  %466 = vrot.lane.b32.xlu2 %v462_v28, %s9532_s14 }
  0xef   : > { %v6708_v48 = vpop.permute.xlu0 %328 }
  0xf4   : > { %v474_v30 = vld.sshfl [vmem:[#allocation1] sm:$0xff pattern:$0x73625140]  ;;  %v476_v31 = vld.sshfl [vmem:[#allocation1 + $0x8] sm:$0xff pattern:$0x73625140] }
  0xf5   : > { %478 = vrot.lane.b32.xlu1 %v474_v30, %s9447_s9  ;;  %485 = vst [vmem:[#allocation1 + $0x3] ss:$4 sm:$0xff] %v6621_v2  ;;  %480 = vrot.lane.b32.xlu2 %v476_v31, %s9447_s9 }
  0xf7   : > { %v6710_v49 = vpop.permute.xlu1 %333 }
  0xfc   : > { %v488_v32 = vld.sshfl [vmem:[#allocation1 + $0x8] sm:$0xff pattern:$0x73625140]  ;;  %v486_v33 = vld.sshfl [vmem:[#allocation1] sm:$0xff pattern:$0x73625140] }
  0xfd   : > { %492 = vrot.lane.b32.xlu1 %v488_v32, %s9505_s17  ;;  %490 = vrot.lane.b32.xlu0 %v486_v33, %s9505_s17  ;;  %496 = vst [vmem:[#allocation1] ss:$4 sm:$0xff] %v6621_v2 }
  0xff   : > { %v6722_v55 = vpop.permute.xlu2 %356 }
 0x104   : > { %v499_v35 = vld.sshfl [vmem:[#allocation1 + $0x8] sm:$0xff pattern:$0x73625140]  ;;  %v497_v36 = vld.sshfl [vmem:[#allocation1] sm:$0xff pattern:$0x73625140] }
 0x105   : > { %503 = vrot.lane.b32.xlu0 %v499_v35, %s9435_s15  ;;  %509 = vst [vmem:[#allocation1 + $0x1] ss:$4 sm:$0xff] %v6681_v34  ;;  %501 = vrot.lane.b32.xlu2 %v497_v36, %s9435_s15  ;;  %s9441_s15 = smov 33  }
 0x107   : > { %v6716_v52 = vpop.permute.xlu0 %345 }
 0x10c   : > { %v510_v38 = vld.sshfl [vmem:[#allocation1] sm:$0xff pattern:$0x73625140] }
 0x10d   : > { %512 = vrot.lane.b32.xlu1 %v510_v38, %s9478_s28  ;;  %515 = vst [vmem:[#allocation1 + $0x2] ss:$4 sm:$0xff] %v6681_v34 }
 0x10f   : > { %v6718_v53 = vpop.permute.xlu1 %351 }
 0x114   : > { %v516_v40 = vld.sshfl [vmem:[#allocation1] sm:$0xff pattern:$0x73625140] }
 0x115   : > { %521 = vst [vmem:[#allocation1 + $0x3] ss:$4 sm:$0xff] %v6681_v34  ;;  %518 = vrot.lane.b32.xlu2 %v516_v40, %s9467_s16 }
 0x117   : > { %v6730_v59 = vpop.permute.xlu2 %374 }
 0x11c   : > { %v522_v42 = vld.sshfl [vmem:[#allocation1] sm:$0xff pattern:$0x73625140] }
 0x11d   : > { %524 = vrot.lane.b32.xlu0 %v522_v42, %s9474_s18  ;;  %526 = vst [vmem:[#allocation1] ss:$4 sm:$0xff] %v6681_v34 }
 0x11f   : > { %v6724_v56 = vpop.permute.xlu0 %362 }
 0x124   : > { %v527_v46 = vld.sshfl [vmem:[#allocation1] sm:$0xff pattern:$0x73625140] }
 0x125   : > { %529 = vrot.lane.b32.xlu1 %v527_v46, %s9437_s21  ;;  %532 = vst [vmem:[#allocation1 + $0x1] ss:$4 sm:$0xff] %v6681_v34  ;;  %s9528_s21 = smov 25  }
 0x127   : > { %v6726_v57 = vpop.permute.xlu1 %368 }
 0x12c   : > { %v533_v50 = vld.sshfl [vmem:[#allocation1] sm:$0xff pattern:$0x73625140] }
 0x12d   : > { %538 = vst [vmem:[#allocation1 + $0x2] ss:$4 sm:$0xff] %v6681_v34  ;;  %535 = vrot.lane.b32.xlu2 %v533_v50, %s9441_s15  ;;  %s9457_s15 = smov 91  }
 0x12f   : > { %v432_v63 = vpop.permute.xlu2 %431 }
 0x134   : > { %v539_v54 = vld.sshfl [vmem:[#allocation1] sm:$0xff pattern:$0x73625140] }
 0x135   : > { %541 = vrot.lane.b32.xlu0 %v539_v54, %s9528_s21  ;;  %544 = vst [vmem:[#allocation1 + $0x3] ss:$4 sm:$0xff] %v6681_v34 }
 0x137   : > { %v446_v8 = vpop.permute.xlu2 %445 }
 0x13c   : > { %v545_v58 = vld.sshfl [vmem:[#allocation1] sm:$0xff pattern:$0x73625140] }
 0x13d   : > { %547 = vrot.lane.b32.xlu1 %v545_v58, %s9530_s30  ;;  %594 = vst [vmem:[#allocation1 + $0x1] ss:$4 sm:$0xff] %v6681_v34 }
 0x13f   : > { %v420_v60 = vpop.permute.xlu0 %419  ;;  %v422_v62 = vpop.permute.xlu1 %421 }
 0x140   : > { %v552_v0 = vsel %vm376_vm0, %v6656_v19, %v422_v62  ;;  %v424_v1 = vsel %vm9589_vm1, %v420_v60, %v422_v62 }
 0x141   : > { %v550_v5 = vsel %vm376_vm0, %v6654_v18, %v424_v1 }
 0x144   : > { %v595_v61 = vld.sshfl [vmem:[#allocation1] sm:$0xff pattern:$0x73625140] }
 0x145   : > { %600 = vst [vmem:[#allocation1 + $0x2] ss:$4 sm:$0xff] %v6681_v34  ;;  %597 = vrot.lane.b32.xlu2 %v595_v61, %s9525_s7 }
 0x147   : > { %v434_v3 = vpop.permute.xlu0 %433  ;;  %v467_v18 = vpop.permute.xlu2 %466 }
 0x148   : > { %v556_v4 = vsel %vm379_vm2, %v552_v0, %v434_v3  ;;  %v436_v7 = vsel %vm9588_vm3, %v432_v63, %v434_v3 }
 0x149   : > { %v560_v9 = vsel %vm382_vm4, %v556_v4, %v446_v8  ;;  %v554_v11 = vsel %vm379_vm2, %v550_v5, %v436_v7 }
 0x14a   : > { %1464 = vrot.lane.b32.xlu1 %v560_v9, %s9457_s15 }
 0x14c   : > { %v601_v6 = vld.sshfl [vmem:[#allocation1] sm:$0xff pattern:$0x73625140] }
 0x14d   : > { %603 = vrot.lane.b32.xlu0 %v601_v6, %s9449_s10  ;;  %606 = vst [vmem:[#allocation1 + $0x3] ss:$4 sm:$0xff] %v6681_v34  ;;  %s9455_s10 = smov 94  }
 0x14f   : > { %v444_v10 = vpop.permute.xlu1 %443  ;;  %v481_v23 = vpop.permute.xlu2 %480 }
 0x150   : > { %v448_v12 = vsel %vm9553_vm5, %v444_v10, %v446_v8 }
 0x151   : > { %v558_v13 = vsel %vm382_vm4, %v554_v11, %v448_v12 }
 0x154   : > { %v607_v14 = vld.sshfl [vmem:[#allocation1] sm:$0xff pattern:$0x73625140] }
 0x155   : > { %1462 = vrot.lane.b32.xlu0 %v558_v13, %s9457_s15  ;;  %611 = vst [vmem:[#allocation1] ss:$4 sm:$0xff] %v6681_v34  ;;  %609 = vrot.lane.b32.xlu1 %v607_v14, %s9507_s11 }
 0x157   : > { %v457_v16 = vpop.permute.xlu1 %456  ;;  %v455_v17 = vpop.permute.xlu0 %454 }
 0x158   : > { %v459_v30 = vsel %vm458_vm6, %v455_v17, %v457_v16 }
 0x15c   : > { %v612_v15 = vld.sshfl [vmem:[#allocation1] sm:$0xff pattern:$0x73625140] }
 0x15d   : > { %617 = vst [vmem:[#allocation1 + $0x1] ss:$4 sm:$0xff] %v6681_v34  ;;  %614 = vrot.lane.b32.xlu2 %v612_v15, %s9482_s19 }
 0x15f   : > { %v469_v21 = vpop.permute.xlu0 %468  ;;  %v502_v50 = vpop.permute.xlu2 %501 }
 0x160   : > { %v566_v22 = vsel %vm376_vm0, %v457_v16, %v469_v21  ;;  %v471_v31 = vsel %vm470_vm7, %v467_v18, %v469_v21 }
 0x161   : > { %v570_v25 = vsel %vm379_vm2, %v566_v22, %v481_v23  ;;  %v563_v33 = vsel %vm376_vm0, %v459_v30, %v471_v31 }
 0x164   : > { %v618_v19 = vld.sshfl [vmem:[#allocation1] sm:$0xff pattern:$0x73625140] }
 0x165   : > { %620 = vrot.lane.b32.xlu0 %v618_v19, %s9532_s14  ;;  %623 = vst [vmem:[#allocation1 + $0x2] ss:$4 sm:$0xff] %v6681_v34 }
 0x167   : > { %v479_v20 = vpop.permute.xlu1 %478 }
 0x168   : > { %v483_v35 = vsel %vm9473_vm8, %v479_v20, %v481_v23  ;;  %vm720_vm8 = vcmask 752640  }
 0x169   : > { %v568_v42 = vsel %vm379_vm2, %v563_v33, %v483_v35 }
 0x16c   : > { %v624_v24 = vld.sshfl [vmem:[#allocation1] sm:$0xff pattern:$0x73625140] }
 0x16d   : > { %629 = vst [vmem:[#allocation1 + $0x3] ss:$4 sm:$0xff] %v6681_v34  ;;  %626 = vrot.lane.b32.xlu1 %v624_v24, %s9447_s9  ;;  %s9498_s9 = smov 105  }
 0x16f   : > { %v493_v26 = vpop.permute.xlu1 %492  ;;  %v491_v32 = vpop.permute.xlu0 %490 }
 0x170   : > { %v574_v27 = vsel %vm382_vm4, %v570_v25, %v493_v26  ;;  %v495_v36 = vsel %vm9472_vm9, %v491_v32, %v493_v26  ;;  %v519_v0 = vpop.permute.xlu2 %518  ;;  %vm9490_vm9 = vcmask 744448  }
 0x171   : > { %1468 = vrot.lane.b32.xlu0 %v574_v27, %s9457_s15  ;;  %v572_v46 = vsel %vm382_vm4, %v568_v42, %v495_v36 }
 0x172   : > { %1466 = vrot.lane.b32.xlu2 %v572_v46, %s9457_s15 }
 0x174   : > { %v630_v28 = vld.sshfl [vmem:[#allocation1] sm:$0xff pattern:$0x73625140] }
 0x175   : > { %634 = vst [vmem:[#allocation1] ss:$4 sm:$0xff] %v6681_v34 }
 0x177   : > { %v504_v54 = vpop.permute.xlu0 %503 }
 0x178   : > { %v506_v61 = vsel %vm9469_vm10, %v502_v50, %v504_v54  ;;  %vm9491_vm10 = vcmask 760832  }
 0x17a   : > { %632 = vrot.lane.b32.xlu2 %v630_v28, %s9505_s17 }
 0x17c   : > { %v635_v29 = vld.sshfl [vmem:[#allocation1] sm:$0xff pattern:$0x73625140] }
 0x17d   : > { %637 = vrot.lane.b32.xlu0 %v635_v29, %s9503_s29  ;;  %640 = vst [vmem:[#allocation1 + $0x1] ss:$4 sm:$0xff] %v6681_v34  ;;  %v6815_v29 = vld [vmem:[%s6615_s25 + $0x8] sm:$0xf] }
 0x17f   : > { %v513_v62 = vpop.permute.xlu1 %512 }
 0x180   : > { %v577_v63 = vsel %vm376_vm0, %v506_v61, %v513_v62  ;;  %v579_v7 = vsel %vm376_vm0, %v504_v54, %v513_v62 }
 0x181   : > { %v581_v1 = vsel %vm379_vm2, %v577_v63, %v519_v0  ;;  %v582_v8 = vsel %vm379_vm2, %v579_v7, %v519_v0 }
 0x184   : > { %v641_v38 = vld.sshfl [vmem:[#allocation1] sm:$0xff pattern:$0x73625140]  ;;  %v643_v40 = vld.sshfl [vmem:[#allocation1 + $0x8] sm:$0xff pattern:$0x73625140] }
 0x185   : > { %652 = vst [vmem:[#allocation1 + $0x2] ss:$4 sm:$0xff] %v6681_v34  ;;  %645 = vrot.lane.b32.xlu1 %v641_v38, %s9498_s9  ;;  %647 = vrot.lane.b32.xlu2 %v643_v40, %s9498_s9 }
 0x187   : > { %v536_v15 = vpop.permute.xlu2 %535 }
 0x18c   : > { %v653_v58 = vld.sshfl [vmem:[#allocation1] sm:$0xff pattern:$0x73625140]  ;;  %v655_v60 = vld.sshfl [vmem:[#allocation1 + $0x8] sm:$0xff pattern:$0x73625140] }
 0x18d   : > { %657 = vrot.lane.b32.xlu0 %v653_v58, %s9451_s8  ;;  %664 = vst [vmem:[#allocation1 + $0x3] ss:$4 sm:$0xff] %v6681_v34  ;;  %659 = vrot.lane.b32.xlu1 %v655_v60, %s9451_s8  ;;  %s9453_s8 = smov 93  }
 0x18f   : > { %v525_v5 = vpop.permute.xlu0 %524 }
 0x190   : > { %v584_v6 = vsel %vm382_vm4, %v581_v1, %v525_v5  ;;  %v585_v11 = vsel %vm382_vm4, %v582_v8, %v525_v5 }
 0x191   : > { %1472 = vrot.lane.b32.xlu2 %v585_v11, %s9457_s15 }
 0x194   : > { %v667_v3 = vld.sshfl [vmem:[#allocation1 + $0x8] sm:$0xff pattern:$0x73625140]  ;;  %v665_v4 = vld.sshfl [vmem:[#allocation1] sm:$0xff pattern:$0x73625140] }
 0x195   : > { %671 = vrot.lane.b32.xlu0 %v667_v3, %s9522_s6  ;;  %675 = vst [vmem:[#allocation1] ss:$4 sm:$0xff] %v6681_v34  ;;  %1470 = vrot.lane.b32.xlu1 %v584_v6, %s9457_s15 }
 0x197   : > { %v530_v14 = vpop.permute.xlu1 %529 }
 0x198   : > { %v588_v18 = vsel %vm376_vm0, %v530_v14, %v536_v15 }
 0x199   : > { %669 = vrot.lane.b32.xlu2 %v665_v4, %s9522_s6 }
 0x19c   : > { %v676_v9 = vld.sshfl [vmem:[#allocation1] sm:$0xff pattern:$0x73625140]  ;;  %v678_v10 = vld.sshfl [vmem:[#allocation1 + $0x8] sm:$0xff pattern:$0x73625140] }
 0x19d   : > { %687 = vst [vmem:[#allocation1 + $0x1] ss:$4 sm:$0xff] %v6681_v34  ;;  %680 = vrot.lane.b32.xlu1 %v676_v9, %s9514_s1 }
 0x19f   : > { %v598_v28 = vpop.permute.xlu2 %597 }
 0x1a0   : > { %v723_v32 = vsel %vm376_vm0, %v6681_v34, %v598_v28 }
 0x1a1   : > { %682 = vrot.lane.b32.xlu2 %v678_v10, %s9514_s1 }
 0x1a4   : > { %v688_v12 = vld.sshfl [vmem:[#allocation1] sm:$0xff pattern:$0x73625140]  ;;  %v690_v13 = vld.sshfl [vmem:[#allocation1 + $0x8] sm:$0xff pattern:$0x73625140] }
 0x1a5   : > { %692 = vrot.lane.b32.xlu0 %v688_v12, %s9455_s10  ;;  %699 = vst [vmem:[#allocation1 + $0x2] ss:$4 sm:$0xff] %v6681_v34  ;;  %694 = vrot.lane.b32.xlu1 %v690_v13, %s9455_s10  ;;  %s9461_s10 = smov 50  }
 0x1a7   : > { %v542_v19 = vpop.permute.xlu0 %541 }
 0x1a8   : > { %v590_v20 = vsel %vm379_vm2, %v588_v18, %v542_v19 }
 0x1ac   : > { %v702_v16 = vld.sshfl [vmem:[#allocation1 + $0x8] sm:$0xff pattern:$0x73625140]  ;;  %v700_v17 = vld.sshfl [vmem:[#allocation1] sm:$0xff pattern:$0x73625140] }
 0x1ad   : > { %706 = vrot.lane.b32.xlu0 %v702_v16, %s9453_s8  ;;  %711 = vst [vmem:[#allocation1 + $0x3] ss:$4 sm:$0xff] %v6681_v34  ;;  %704 = vrot.lane.b32.xlu2 %v700_v17, %s9453_s8  ;;  %s9459_s8 = smov 51  }
 0x1af   : > { %v548_v21 = vpop.permute.xlu1 %547 }
 0x1b0   : > { %v592_v22 = vsel %vm382_vm4, %v590_v20, %v548_v21 }
 0x1b4   : > { %v712_v23 = vld.sshfl [vmem:[#allocation1] sm:$0xff pattern:$0x73625140]  ;;  %v714_v24 = vld.sshfl [vmem:[#allocation1 + $0x8] sm:$0xff pattern:$0x73625140] }
 0x1b5   : > { %1474 = vrot.lane.b32.xlu0 %v592_v22, %s9457_s15  ;;  %716 = vrot.lane.b32.xlu1 %v712_v23, %s9510_s12  ;;  %749 = vst [vmem:[#allocation1] ss:$4 sm:$0xff] %v6681_v34  ;;  %s9463_s15 = smov 49  }
 0x1b6   : > { %718 = vrot.lane.b32.xlu2 %v714_v24, %s9510_s12 }
 0x1b7   : > { %v615_v50 = vpop.permute.xlu2 %614 }
 0x1bc   : > { %v6806_v25 = vld.sshfl [vmem:[#allocation1] sm:$0xff pattern:$0x73625140]  ;;  %v6808_v26 = vld.sshfl [vmem:[#allocation1 + $0x8] sm:$0xff pattern:$0x73625140]  ;;  %v6812_v27 = vpop.permute.xlu1 %1464 }
 0x1bd   : > { %753 = vst [vmem:[#allocation1 + $0x1] ss:$4 sm:$0xff] %v6681_v34 }
 0x1bf   : > { %v604_v33 = vpop.permute.xlu0 %603 }
 0x1c0   : > { %v725_v35 = vsel %vm379_vm2, %v723_v32, %v604_v33 }
 0x1c4   : > { %v756_v30 = vld.sshfl [vmem:[#allocation1 + $0x8] sm:$0xff pattern:$0x73625140]  ;;  %v754_v31 = vld.sshfl [vmem:[#allocation1] sm:$0xff pattern:$0x73625140] }
 0x1c5   : > { %760 = vrot.lane.b32.xlu1 %v756_v30, %s9525_s7  ;;  %758 = vrot.lane.b32.xlu0 %v754_v31, %s9525_s7  ;;  %765 = vst [vmem:[#allocation1 + $0x2] ss:$4 sm:$0xff] %v6815_v29 }
 0x1c7   : > { %v610_v36 = vpop.permute.xlu1 %609  ;;  %v6829_v46 = vpop.permute.xlu0 %1462 }
 0x1c8   : > { %v727_v38 = vsel %vm382_vm4, %v725_v35, %v610_v36 }
 0x1cc   : > { %v766_v40 = vld.sshfl [vmem:[#allocation1] sm:$0xff pattern:$0x73625140]  ;;  %v6833_v60 = vpop.permute.xlu2 %1466 }
 0x1cd   : > { %1488 = vrot.lane.b32.xlu1 %v727_v38, %s9505_s17  ;;  %771 = vst [vmem:[#allocation1 + $0x3] ss:$4 sm:$0xff] %v6815_v29  ;;  %768 = vrot.lane.b32.xlu2 %v766_v40, %s9459_s8  ;;  %s9512_s8 = smov 48  }
 0x1d4   : > { %v772_v42 = vld.sshfl [vmem:[#allocation1] sm:$0xff pattern:$0x73625140]  ;;  %v633_v62 = vpop.permute.xlu2 %632 }
 0x1d5   : > { %774 = vrot.lane.b32.xlu0 %v772_v42, %s9461_s10  ;;  %776 = vst [vmem:[#allocation1] ss:$4 sm:$0xff] %v6815_v29  ;;  %s9516_s10 = smov 47  }
 0x1d7   : > { %v621_v58 = vpop.permute.xlu0 %620 }
 0x1d8   : > { %v730_v21 = vsel %vm376_vm0, %v615_v50, %v621_v58 }
 0x1dc   : > { %v777_v54 = vld.sshfl [vmem:[#allocation1] sm:$0xff pattern:$0x73625140] }
 0x1dd   : > { %779 = vrot.lane.b32.xlu1 %v777_v54, %s9463_s15  ;;  %782 = vst [vmem:[#allocation1 + $0x1] ss:$4 sm:$0xff] %v6815_v29  ;;  %s9465_s15 = smov 39  }
 0x1df   : > { %v627_v1 = vpop.permute.xlu1 %626  ;;  %v648_v3 = vpop.permute.xlu2 %647 }
 0x1e0   : > { %v732_v22 = vsel %vm379_vm2, %v730_v21, %v627_v1 }
 0x1e1   : > { %v734_v24 = vsel %vm382_vm4, %v732_v22, %v633_v62 }
 0x1e3   : > { %v6837_v63 = vpop.permute.xlu0 %1468 }
 0x1e4   : > { %v783_v61 = vld.sshfl [vmem:[#allocation1] sm:$0xff pattern:$0x73625140] }
 0x1e5   : > { %788 = vst [vmem:[#allocation1 + $0x2] ss:$4 sm:$0xff] %v6815_v29  ;;  %785 = vrot.lane.b32.xlu2 %v783_v61, %s9512_s8 }
 0x1eb   : > { %v1473_v7 = vpop.permute.xlu2 %1472 }
 0x1ec   : > { %v789_v0 = vld.sshfl [vmem:[#allocation1] sm:$0xff pattern:$0x73625140] }
 0x1ed   : > { %791 = vrot.lane.b32.xlu0 %v789_v0, %s9516_s10  ;;  %794 = vst [vmem:[#allocation1 + $0x3] ss:$4 sm:$0xff] %v6815_v29  ;;  %1490 = vrot.lane.b32.xlu2 %v734_v24, %s9505_s17 }
 0x1ef   : > { %v638_v5 = vpop.permute.xlu0 %637 }
 0x1f3   : > { %v670_v15 = vpop.permute.xlu2 %669 }
 0x1f4   : > { %v795_v4 = vld.sshfl [vmem:[#allocation1] sm:$0xff pattern:$0x73625140] }
 0x1f5   : > { %797 = vrot.lane.b32.xlu1 %v795_v4, %s9465_s15  ;;  %799 = vst [vmem:[#allocation1] ss:$4 sm:$0xff] %v6815_v29  ;;  %s9470_s15 = smov 38  }
 0x1f7   : > { %v646_v6 = vpop.permute.xlu1 %645 }
 0x1f8   : > { %v650_v10 = vsel %vm649_vm11, %v646_v6, %v648_v3 }
 0x1f9   : > { %v737_v12 = vsel %vm376_vm0, %v638_v5, %v650_v10 }
 0x1fb   : > { %v683_v31 = vpop.permute.xlu2 %682 }
 0x1fc   : > { %v800_v8 = vld.sshfl [vmem:[#allocation1] sm:$0xff pattern:$0x73625140] }
 0x1fd   : > { %805 = vst [vmem:[#allocation1 + $0x1] ss:$4 sm:$0xff] %v6815_v29  ;;  %802 = vrot.lane.b32.xlu2 %v800_v8, %s9470_s15  ;;  %s9494_s15 = smov 26   ;;  %v1478_v8 = vsel %vm9490_vm9, %v6833_v60, %v6837_v63  ;;  %v396_v60 = vsel %vm376_vm0, %v6710_v49, %v6713_v51 }
 0x1ff   : > { %v658_v9 = vpop.permute.xlu0 %657  ;;  %v660_v11 = vpop.permute.xlu1 %659 }
 0x200   : > { %v662_v14 = vsel %vm661_vm12, %v658_v9, %v660_v11  ;;  %v1477_v9 = vsel %vm9490_vm9, %v6829_v46, %v6812_v27  ;;  %v378_v27 = vsel %vm376_vm0, %v6621_v2, %v6693_v41 }
 0x201   : > { %v739_v17 = vsel %vm379_vm2, %v737_v12, %v662_v14 }
 0x204   : > { %v806_v13 = vld.sshfl [vmem:[#allocation1] sm:$0xff pattern:$0x73625140] }
 0x205   : > { %808 = vrot.lane.b32.xlu0 %v806_v13, %s9478_s28  ;;  %811 = vst [vmem:[#allocation1 + $0x2] ss:$4 sm:$0xff] %v6815_v29  ;;  %s9492_s28 = smov 77  }
 0x207   : > { %v672_v16 = vpop.permute.xlu0 %671  ;;  %v1471_v23 = vpop.permute.xlu1 %1470 }
 0x208   : > { %v674_v18 = vsel %vm673_vm13, %v670_v15, %v672_v16  ;;  %v705_v38 = vpop.permute.xlu2 %704  ;;  %v1479_v3 = vsel %vm9490_vm9, %v1471_v23, %v1473_v7  ;;  %v404_v7 = vsel %vm376_vm0, %v6722_v55, %v6724_v56  ;;  %v398_v56 = vsel %vm379_vm2, %v396_v60, %v6716_v52 }
 0x209   : > { %v741_v19 = vsel %vm382_vm4, %v739_v17, %v674_v18  ;;  %v406_v10 = vsel %vm379_vm2, %v404_v7, %v6726_v57  ;;  %v388_v57 = vsel %vm376_vm0, %v6700_v44, %v6698_v43  ;;  %v400_v49 = vsel %vm382_vm4, %v398_v56, %v6718_v53 }
 0x20a   : > { %v408_v55 = vsel %vm382_vm4, %v406_v10, %v6730_v59  ;;  %v390_v51 = vsel %vm379_vm2, %v388_v57, %v6706_v47  ;;  %v6907_v59 = vld [vmem:[#allocation5] sm:$0xff]  ;;  %v381_v44 = vsel %vm379_vm2, %v378_v27, %v6702_v45  ;;  %vm9501_vm9 = vcmask 973824  }
 0x20b   : > { %v392_v52 = vsel %vm382_vm4, %v390_v51, %v6708_v48  ;;  %v1598_v47 = vunpack.c.l.b16 %v6907_v59  ;;  %v384_v2 = vsel %vm382_vm4, %v381_v44, %v6690_v39 }
 0x20c   : > { %v812_v20 = vld.sshfl [vmem:[#allocation1] sm:$0xff pattern:$0x73625140] }
 0x20d   : > { %1492 = vrot.lane.b32.xlu0 %v741_v19, %s9505_s17  ;;  %814 = vrot.lane.b32.xlu1 %v812_v20, %s9467_s16  ;;  %817 = vst [vmem:[#allocation1 + $0x3] ss:$4 sm:$0xff] %v6815_v29  ;;  %s9496_s16 = smov 27   ;;  %v6919_v11 = vpack.c.b16 %v1598_v47, %v1598_v47 }
 0x20f   : > { %v681_v32 = vpop.permute.xlu1 %680  ;;  %9628 = vst [vmem:[#allocation29_spill] sm:$0xff] %v6919_v11 }
 0x210   : > { %v685_v40 = vsel %vm684_vm14, %v681_v32, %v683_v31  ;;  %v719_v0 = vpop.permute.xlu2 %718 }
 0x214   : > { %v818_v28 = vld.sshfl [vmem:[#allocation1] sm:$0xff pattern:$0x73625140] }
 0x215   : > { %822 = vst [vmem:[#allocation1] ss:$4 sm:$0xff] %v6815_v29  ;;  %820 = vrot.lane.b32.xlu2 %v818_v28, %s9474_s18  ;;  %s9476_s18 = smov 120  }
 0x217   : > { %v693_v30 = vpop.permute.xlu0 %692  ;;  %v695_v36 = vpop.permute.xlu1 %694 }
 0x218   : > { %v697_v42 = vsel %vm9527_vm15, %v693_v30, %v695_v36  ;;  %vm9540_vm15 = vcmask 818176  }
 0x219   : > { %v744_v54 = vsel %vm376_vm0, %v685_v40, %v697_v42 }
 0x21c   : > { %v823_v33 = vld.sshfl [vmem:[#allocation1] sm:$0xff pattern:$0x73625140] }
 0x21d   : > { %825 = vrot.lane.b32.xlu0 %v823_v33, %s9496_s16  ;;  %828 = vst [vmem:[#allocation1 + $0x1] ss:$4 sm:$0xff] %v6815_v29 }
 0x21f   : > { %v707_v35 = vpop.permute.xlu0 %706 }
 0x220   : > { %v709_v58 = vsel %vm9491_vm10, %v705_v38, %v707_v35  ;;  %vm9500_vm10 = vcmask 965632  }
 0x221   : > { %v746_v62 = vsel %vm379_vm2, %v744_v54, %v709_v58 }
 0x224   : > { %v829_v50 = vld.sshfl [vmem:[#allocation1] sm:$0xff pattern:$0x73625140] }
 0x225   : > { %831 = vrot.lane.b32.xlu1 %v829_v50, %s9494_s15  ;;  %834 = vst [vmem:[#allocation1 + $0x2] ss:$4 sm:$0xff] %v6815_v29 }
 0x227   : > { %v1475_v61 = vpop.permute.xlu0 %1474  ;;  %v717_v1 = vpop.permute.xlu1 %716 }
 0x228   : > { %1616 = vmatpush.bf16.msra.mxu0 %v1475_v61  ;;  %v721_v4 = vsel %vm720_vm8, %v717_v1, %v719_v0  ;;  %v769_v14 = vpop.permute.xlu2 %768 }
 0x229   : > { %v748_v5 = vsel %vm382_vm4, %v746_v62, %v721_v4 }
 0x22c   : > { %1617 = vmatpush.bf16.msra.mxu0 %v1479_v3  ;;  %v835_v6 = vld.sshfl [vmem:[#allocation1] sm:$0xff pattern:$0x73625140] }
 0x22d   : > { %840 = vst [vmem:[#allocation1 + $0x3] ss:$4 sm:$0xff] %v6815_v29  ;;  %837 = vrot.lane.b32.xlu2 %v835_v6, %s9528_s21  ;;  %1494 = vrot.lane.b32.xlu1 %v748_v5, %s9505_s17 }
 0x230   : > { %1618 = vmatpush.bf16.msra.mxu0 %v1478_v8  ;;  %v6967_v8 = vld [vmem:[%s6615_s25 + $0xc] sm:$0xf] }
 0x231   : > { %9629 = vst [vmem:[#allocation30_spill] sm:$0xff] %v6967_v8 }
 0x234   : > { %1619 = vmatpush.bf16.msra.mxu0 %v1477_v9  ;;  %v841_v63 = vld.sshfl [vmem:[#allocation1] sm:$0xff pattern:$0x73625140] }
 0x235   : > { %843 = vrot.lane.b32.xlu0 %v841_v63, %s9530_s30  ;;  %877 = vst [vmem:[#allocation1 + $0x1] ss:$4 sm:$0xff] %v6815_v29 }
 0x237   : > { %v759_v43 = vpop.permute.xlu0 %758  ;;  %v761_v41 = vpop.permute.xlu1 %760 }
 0x238   : > { %1620 = vmatpush.bf16.msra.mxu0 %v408_v55  ;;  %v762_v53 = vsel %vm9589_vm1, %v759_v43, %v761_v41  ;;  %v848_v48 = vsel %vm376_vm0, %v6808_v26, %v761_v41 }
 0x239   : > { %v846_v45 = vsel %vm376_vm0, %v6806_v25, %v762_v53  ;;  %v851_v39 = vsel %vm379_vm2, %v848_v48, %v769_v14 }
 0x23a   : > { %v850_v26 = vsel %vm379_vm2, %v846_v45, %v769_v14 }
 0x23c   : > { %1621 = vmatpush.bf16.msra.mxu0 %v400_v49  ;;  %v878_v46 = vld.sshfl [vmem:[#allocation1] sm:$0xff pattern:$0x73625140] }
 0x23d   : > { %880 = vrot.lane.b32.xlu1 %v878_v46, %s9476_s18  ;;  %883 = vst [vmem:[#allocation1 + $0x2] ss:$4 sm:$0xff] %v6815_v29  ;;  %s9480_s18 = smov 119  }
 0x23f   : > { %v6937_v19 = vpop.permute.xlu1 %1488  ;;  %v786_v28 = vpop.permute.xlu2 %785 }
 0x240   : > { %1622 = vmatpush.bf16.msra.mxu0 %v392_v52 }
 0x244   : > { %1623 = vmatpush.bf16.msra.mxu0 %v384_v2  ;;  %v886_v12 = vld.sshfl [vmem:[#allocation1 + $0x8] sm:$0xff pattern:$0x73625140]  ;;  %v884_v13 = vld.sshfl [vmem:[#allocation1] sm:$0xff pattern:$0x73625140] }
 0x245   : > { %890 = vrot.lane.b32.xlu0 %v886_v12, %s9480_s18  ;;  %895 = vst [vmem:[#allocation1 + $0x3] ss:$4 sm:$0xff] %v6815_v29  ;;  %888 = vrot.lane.b32.xlu2 %v884_v13, %s9480_s18  ;;  %s9486_s18 = smov 108  }
 0x247   : > { %1624 = vmatmul.bf16.vlgmr.msra.gmra.mxu0 %v6919_v11  ;;  %v775_v15 = vpop.permute.xlu0 %774  ;;  %v6955_v50 = vpop.permute.xlu2 %1490 }
 0x248   : > { %v854_v16 = vsel %vm382_vm4, %v851_v39, %v775_v15  ;;  %v853_v17 = vsel %vm382_vm4, %v850_v26, %v775_v15 }
 0x24c   : > { %v896_v18 = vld.sshfl [vmem:[#allocation1] sm:$0xff pattern:$0x73625140]  ;;  %v898_v25 = vld.sshfl [vmem:[#allocation1 + $0x8] sm:$0xff pattern:$0x73625140] }
 0x24d   : > { %900 = vrot.lane.b32.xlu1 %v896_v18, %s9507_s11  ;;  %906 = vst [vmem:[#allocation1] ss:$4 sm:$0xff] %v6815_v29  ;;  %1507 = vrot.lane.b32.xlu0 %v854_v16, %s9492_s28 }
 0x24e   : > { %1505 = vrot.lane.b32.xlu2 %v853_v17, %s9492_s28 }
 0x24f   : > { %v780_v24 = vpop.permute.xlu1 %779 }
 0x250   : > { %v857_v32 = vsel %vm376_vm0, %v780_v24, %v786_v28 }
 0x254   : > { %v909_v20 = vld.sshfl [vmem:[#allocation1 + $0x8] sm:$0xff pattern:$0x73625140]  ;;  %v907_v21 = vld.sshfl [vmem:[#allocation1] sm:$0xff pattern:$0x73625140] }
 0x255   : > { %913 = vrot.lane.b32.xlu1 %v909_v20, %s9482_s19  ;;  %911 = vrot.lane.b32.xlu0 %v907_v21, %s9482_s19  ;;  %917 = vst [vmem:[#allocation1 + $0x1] ss:$4 sm:$0xff] %v6815_v29  ;;  %s9484_s19 = smov 107  }
 0x256   : > { %902 = vrot.lane.b32.xlu2 %v898_v25, %s9507_s11  ;;  %s9638_s11 = smov 101  }
 0x257   : > { %v803_v61 = vpop.permute.xlu2 %802 }
 0x25c   : > { %v918_v22 = vld.sshfl [vmem:[#allocation1] sm:$0xff pattern:$0x73625140]  ;;  %v920_v23 = vld.sshfl [vmem:[#allocation1 + $0x8] sm:$0xff pattern:$0x73625140] }
 0x25d   : > { %928 = vst [vmem:[#allocation1 + $0x2] ss:$4 sm:$0xff] %v6815_v29  ;;  %924 = vrot.lane.b32.xlu0 %v920_v23, %s9532_s14 }
 0x25e   : > { %922 = vrot.lane.b32.xlu2 %v918_v22, %s9532_s14 }
 0x25f   : > { %v792_v33 = vpop.permute.xlu0 %791 }
 0x260   : > { %v859_v35 = vsel %vm379_vm2, %v857_v32, %v792_v33 }
 0x264   : > { %v929_v30 = vld.sshfl [vmem:[#allocation1] sm:$0xff pattern:$0x73625140]  ;;  %v931_v31 = vld.sshfl [vmem:[#allocation1 + $0x8] sm:$0xff pattern:$0x73625140] }
 0x265   : > { %933 = vrot.lane.b32.xlu1 %v929_v30, %s9486_s18  ;;  %940 = vst [vmem:[#allocation1 + $0x3] ss:$4 sm:$0xff] %v6815_v29 }
 0x266   : > { %935 = vrot.lane.b32.xlu2 %v931_v31, %s9486_s18  ;;  %s9488_s18 = smov 28  }
 0x267   : > { %v798_v36 = vpop.permute.xlu1 %797 }
 0x268   : > { %v861_v38 = vsel %vm382_vm4, %v859_v35, %v798_v36 }
 0x26c   : > { %v943_v40 = vld.sshfl [vmem:[#allocation1 + $0x8] sm:$0xff pattern:$0x73625140]  ;;  %v941_v42 = vld.sshfl [vmem:[#allocation1] sm:$0xff pattern:$0x73625140] }
 0x26d   : > { %1509 = vrot.lane.b32.xlu1 %v861_v38, %s9492_s28  ;;  %945 = vrot.lane.b32.xlu0 %v941_v42, %s9484_s19  ;;  %951 = vst [vmem:[#allocation1] ss:$4 sm:$0xff] %v6815_v29 }
 0x26f   : > { %v821_v6 = vpop.permute.xlu2 %820 }
 0x274   : > { %v954_v54 = vld.sshfl [vmem:[#allocation1 + $0x8] sm:$0xff pattern:$0x73625140]  ;;  %v952_v58 = vld.sshfl [vmem:[#allocation1] sm:$0xff pattern:$0x73625140] }
 0x275   : > { %947 = vrot.lane.b32.xlu1 %v943_v40, %s9484_s19  ;;  %958 = vrot.lane.b32.xlu0 %v954_v54, %s9503_s29  ;;  %963 = vst [vmem:[#allocation1 + $0x1] ss:$4 sm:$0xff] %v6815_v29  ;;  %s9630_s19 = smov 104  }
 0x276   : > { %956 = vrot.lane.b32.xlu2 %v952_v58, %s9503_s29  ;;  %s9636_s29 = smov 113  }
 0x277   : > { %v809_v1 = vpop.permute.xlu0 %808 }
 0x278   : > { %v864_v3 = vsel %vm376_vm0, %v803_v61, %v809_v1 }
 0x27c   : > { %v964_v62 = vld.sshfl [vmem:[#allocation1] sm:$0xff pattern:$0x73625140]  ;;  %v966_v0 = vld.sshfl [vmem:[#allocation1 + $0x8] sm:$0xff pattern:$0x73625140] }
 0x27d   : > { %968 = vrot.lane.b32.xlu1 %v964_v62, %s9498_s9  ;;  %974 = vst [vmem:[#allocation1 + $0x2] ss:$4 sm:$0xff] %v6815_v29 }
 0x27e   : > { %970 = vrot.lane.b32.xlu2 %v966_v0, %s9498_s9  ;;  %s9635_s9 = smov 115  }
 0x27f   : > { %v815_v4 = vpop.permute.xlu1 %814  ;;  %v6976_v63 = vpop.permute.xlu0 %1492 }
 0x280   : > { %v866_v5 = vsel %vm379_vm2, %v864_v3, %v815_v4 }
 0x281   : > { %v868_v7 = vsel %vm382_vm4, %v866_v5, %v821_v6 }
 0x284   : > { %v977_v9 = vld.sshfl [vmem:[#allocation1 + $0x8] sm:$0xff pattern:$0x73625140]  ;;  %v975_v10 = vld.sshfl [vmem:[#allocation1] sm:$0xff pattern:$0x73625140] }
 0x285   : > { %981 = vrot.lane.b32.xlu1 %v977_v9, %s9630_s19  ;;  %979 = vrot.lane.b32.xlu0 %v975_v10, %s9630_s19  ;;  %986 = vst [vmem:[#allocation1 + $0x3] ss:$4 sm:$0xff] %v6967_v8 }
 0x286   : > { %1511 = vrot.lane.b32.xlu2 %v868_v7, %s9492_s28 }
 0x287   : > { %v838_v49 = vpop.permute.xlu2 %837 }
 0x28c   : > { %v987_v60 = vld.sshfl [vmem:[#allocation1] sm:$0xff pattern:$0x73625140] }
 0x28d   : > { %991 = vst [vmem:[#allocation1] ss:$4 sm:$0xff] %v6967_v8 }
 0x28e   : > { %989 = vrot.lane.b32.xlu2 %v987_v60, %s9488_s18  ;;  %s9631_s18 = smov 126  }
 0x28f   : > { %v826_v57 = vpop.permute.xlu0 %825 }
 0x294   : > { %v992_v55 = vld.sshfl [vmem:[#allocation1] sm:$0xff pattern:$0x73625140] }
 0x295   : > { %994 = vrot.lane.b32.xlu0 %v992_v55, %s9496_s16  ;;  %997 = vst [vmem:[#allocation1 + $0x1] ss:$4 sm:$0xff] %v6967_v8  ;;  %s9634_s16 = smov 124  }
 0x297   : > { %v832_v51 = vpop.permute.xlu1 %831 }
 0x298   : > { %v871_v27 = vsel %vm376_vm0, %v826_v57, %v832_v51 }
 0x299   : > { %v873_v52 = vsel %vm379_vm2, %v871_v27, %v838_v49 }
 0x29c   : > { %v998_v56 = vld.sshfl [vmem:[#allocation1] sm:$0xff pattern:$0x73625140] }
 0x29d   : > { %1000 = vrot.lane.b32.xlu1 %v998_v56, %s9494_s15  ;;  %1003 = vst [vmem:[#allocation1 + $0x2] ss:$4 sm:$0xff] %v6967_v8  ;;  %s9633_s15 = smov 100  }
 0x29f   : > { %v889_v43 = vpop.permute.xlu2 %888  ;;  %v6989_v41 = vpop.permute.xlu1 %1494 }
 0x2a4   : > { %v1004_v46 = vld.sshfl [vmem:[#allocation1] sm:$0xff pattern:$0x73625140] }
 0x2a5   : > { %1009 = vst [vmem:[#allocation1 + $0x3] ss:$4 sm:$0xff] %v6967_v8  ;;  %1006 = vrot.lane.b32.xlu2 %v1004_v46, %s9528_s21 }
 0x2a7   : > { %v844_v44 = vpop.permute.xlu0 %843 }
 0x2a8   : > { %v875_v47 = vsel %vm382_vm4, %v873_v52, %v844_v44  ;;  %v6991_v53 = vpop.permute.xlu2 %1505 }
 0x2a9   : > { %1513 = vrot.lane.b32.xlu0 %v875_v47, %s9492_s28  ;;  %s9632_s28 = smov 125  }
 0x2ac   : > { %v1010_v2 = vld.sshfl [vmem:[#allocation1] sm:$0xff pattern:$0x73625140] }
 0x2ad   : > { %1042 = vst [vmem:[#allocation1 + $0x1] ss:$4 sm:$0xff] %v6967_v8 }
 0x2af   : > { %v881_v12 = vpop.permute.xlu1 %880 }
 0x2b0   : > { %v903_v13 = vpop.permute.xlu2 %902  ;;  %v1015_v17 = vsel %vm376_vm0, %v6815_v29, %v881_v12 }
 0x2b1   : > { %1012 = vrot.lane.b32.xlu0 %v1010_v2, %s9530_s30 }
 0x2b4   : > { %v1043_v48 = vld.sshfl [vmem:[#allocation1] sm:$0xff pattern:$0x73625140] }
 0x2b5   : > { %1045 = vrot.lane.b32.xlu1 %v1043_v48, %s9525_s7  ;;  %1048 = vst [vmem:[#allocation1 + $0x2] ss:$4 sm:$0xff] %v6967_v8 }
 0x2b7   : > { %v891_v14 = vpop.permute.xlu0 %890 }
 0x2b8   : > { %v923_v26 = vpop.permute.xlu2 %922  ;;  %v893_v18 = vsel %vm9501_vm9, %v889_v43, %v891_v14  ;;  %vm9509_vm9 = vcmask 875520  }
 0x2b9   : > { %v1017_v21 = vsel %vm379_vm2, %v1015_v17, %v893_v18 }
 0x2bc   : > { %v1049_v45 = vld.sshfl [vmem:[#allocation1] sm:$0xff pattern:$0x73625140] }
 0x2bd   : > { %1054 = vst [vmem:[#allocation1 + $0x3] ss:$4 sm:$0xff] %v6967_v8  ;;  %1051 = vrot.lane.b32.xlu2 %v1049_v45, %s9631_s18 }
 0x2bf   : > { %v901_v39 = vpop.permute.xlu1 %900  ;;  %v7003_v25 = vpop.permute.xlu0 %1507 }
 0x2c0   : > { %v905_v20 = vsel %vm9500_vm10, %v901_v39, %v903_v13  ;;  %v936_v30 = vpop.permute.xlu2 %935  ;;  %vm9502_vm10 = vcmask 883712  }
 0x2c1   : > { %v1019_v22 = vsel %vm382_vm4, %v1017_v21, %v905_v20 }
 0x2c2   : > { %1525 = vrot.lane.b32.xlu1 %v1019_v22, %s9633_s15 }
 0x2c4   : > { %v6998_v15 = vpop.f32.mrf.mxu0  ;;  %v1055_v16 = vld.sshfl [vmem:[#allocation1] sm:$0xff pattern:$0x73625140] }
 0x2c5   : > { %1057 = vrot.lane.b32.xlu0 %v1055_v16, %s9632_s28  ;;  %1059 = vst [vmem:[#allocation1] ss:$4 sm:$0xff] %v6967_v8 }
 0x2c7   : > { %v914_v28 = vpop.permute.xlu1 %913  ;;  %v912_v31 = vpop.permute.xlu0 %911 }
 0x2c8   : > { %v915_v42 = vsel %vm458_vm6, %v912_v31, %v914_v28 }
 0x2cc   : > { %v1060_v23 = vld.sshfl [vmem:[#allocation1] sm:$0xff pattern:$0x73625140]  ;;  %v1627_v24 = vpop.f32.mrf.mxu0 }
 0x2cd   : > { %1065 = vst [vmem:[#allocation1 + $0x1] ss:$4 sm:$0xff] %v6967_v8  ;;  %1062 = vrot.lane.b32.xlu1 %v1060_v23, %s9634_s16 }
 0x2cf   : > { %v925_v36 = vpop.permute.xlu0 %924 }
 0x2d0   : > { %v957_v35 = vpop.permute.xlu2 %956  ;;  %v926_v54 = vsel %vm470_vm7, %v923_v26, %v925_v36  ;;  %v1599_v36 = vunpack.c.h.b16 %v6907_v59 }
 0x2d1   : > { %v1022_v0 = vsel %vm376_vm0, %v915_v42, %v926_v54 }
 0x2d4   : > { %v1066_v32 = vld.sshfl [vmem:[#allocation1] sm:$0xff pattern:$0x73625140] }
 0x2d5   : > { %1071 = vst [vmem:[#allocation1 + $0x2] ss:$4 sm:$0xff] %v6967_v8  ;;  %1068 = vrot.lane.b32.xlu2 %v1066_v32, %s9532_s14 }
 0x2d7   : > { %v934_v33 = vpop.permute.xlu1 %933 }
 0x2d8   : > { %v971_v58 = vpop.permute.xlu2 %970  ;;  %v938_v62 = vsel %vm9502_vm10, %v934_v33, %v936_v30  ;;  %vm960_vm10 = vcmask 867328  }
 0x2d9   : > { %v1024_v4 = vsel %vm379_vm2, %v1022_v0, %v938_v62 }
 0x2dc   : > { %v1072_v38 = vld.sshfl [vmem:[#allocation1] sm:$0xff pattern:$0x73625140] }
 0x2dd   : > { %1074 = vrot.lane.b32.xlu0 %v1072_v38, %s9635_s9  ;;  %1077 = vst [vmem:[#allocation1 + $0x3] ss:$4 sm:$0xff] %v6967_v8 }
 0x2df   : > { %v7017_v40 = vpop.permute.xlu1 %1509  ;;  %v946_v61 = vpop.permute.xlu0 %945 }
 0x2e0   : > { %v1512_v7 = vpop.permute.xlu2 %1511 }
 0x2e4   : > { %v1078_v1 = vld.sshfl [vmem:[#allocation1] sm:$0xff pattern:$0x73625140] }
 0x2e5   : > { %1082 = vst [vmem:[#allocation1] ss:$4 sm:$0xff] %v6967_v8  ;;  %1080 = vrot.lane.b32.xlu1 %v1078_v1, %s9505_s17  ;;  %s9637_s17 = smov 112  }
 0x2e7   : > { %v948_v3 = vpop.permute.xlu1 %947  ;;  %v959_v10 = vpop.permute.xlu0 %958 }
 0x2e8   : > { %v950_v5 = vsel %vm9509_vm9, %v946_v61, %v948_v3  ;;  %v961_v55 = vsel %vm960_vm10, %v957_v35, %v959_v10  ;;  %v990_v51 = vpop.permute.xlu2 %989  ;;  %vm9524_vm9 = vcmask 629760  }
 0x2e9   : > { %v1026_v6 = vsel %vm382_vm4, %v1024_v4, %v950_v5  ;;  %v1516_v31 = vsel %vm9524_vm9, %v6991_v53, %v7003_v25  ;;  %vm9541_vm9 = vcmask 826368  }
 0x2ea   : > { %1527 = vrot.lane.b32.xlu2 %v1026_v6, %s9633_s15 }
 0x2ec   : > { %v1083_v9 = vld.sshfl [vmem:[#allocation1] sm:$0xff pattern:$0x73625140] }
 0x2ed   : > { %1088 = vst [vmem:[#allocation1 + $0x1] ss:$4 sm:$0xff] %v6967_v8 }
 0x2ef   : > { %v969_v60 = vpop.permute.xlu1 %968 }
 0x2f0   : > { %v972_v56 = vsel %vm649_vm11, %v969_v60, %v971_v58  ;;  %v7090_v58 = vld [vmem:[%s6615_s25 + $0x10] sm:$0xf] }
 0x2f1   : > { %v1029_v49 = vsel %vm376_vm0, %v961_v55, %v972_v56 }
 0x2f2   : > { %1085 = vrot.lane.b32.xlu2 %v1083_v9, %s9636_s29 }
 0x2f4   : > { %v1089_v57 = vld.sshfl [vmem:[#allocation1] sm:$0xff pattern:$0x73625140] }
 0x2f5   : > { %1091 = vrot.lane.b32.xlu0 %v1089_v57, %s9637_s17  ;;  %1094 = vst [vmem:[#allocation1 + $0x2] ss:$4 sm:$0xff] %v6967_v8 }
 0x2f7   : > { %v982_v27 = vpop.permute.xlu1 %981  ;;  %v980_v46 = vpop.permute.xlu0 %979 }
 0x2f8   : > { %v983_v52 = vsel %vm661_vm12, %v980_v46, %v982_v27 }
 0x2f9   : > { %v1031_v43 = vsel %vm379_vm2, %v1029_v49, %v983_v52 }
 0x2fa   : > { %v1033_v44 = vsel %vm382_vm4, %v1031_v43, %v990_v51 }
 0x2fc   : > { %v1095_v47 = vld.sshfl [vmem:[#allocation1] sm:$0xff pattern:$0x73625140] }
 0x2fd   : > { %1529 = vrot.lane.b32.xlu0 %v1033_v44, %s9633_s15  ;;  %1097 = vrot.lane.b32.xlu1 %v1095_v47, %s9630_s19  ;;  %1100 = vst [vmem:[#allocation1 + $0x3] ss:$4 sm:$0xff] %v6967_v8 }
 0x2ff   : > { %v1007_v21 = vpop.permute.xlu2 %1006 }
 0x304   : > { %v1103_v2 = vld.sshfl [vmem:[#allocation1 + $0x8] sm:$0xff pattern:$0x73625140]  ;;  %v1101_v48 = vld.sshfl [vmem:[#allocation1] sm:$0xff pattern:$0x73625140] }
 0x305   : > { %1107 = vrot.lane.b32.xlu0 %v1103_v2, %s9522_s6  ;;  %1110 = vst [vmem:[#allocation1] ss:$4 sm:$0xff] %v6967_v8  ;;  %1105 = vrot.lane.b32.xlu2 %v1101_v48, %s9522_s6  ;;  %s9644_s6 = smov 34  }
 0x307   : > { %v995_v14 = vpop.permute.xlu0 %994 }
 0x30c   : > { %v1111_v12 = vld.sshfl [vmem:[#allocation1] sm:$0xff pattern:$0x73625140]  ;;  %v1113_v13 = vld.sshfl [vmem:[#allocation1 + $0x8] sm:$0xff pattern:$0x73625140] }
 0x30d   : > { %1115 = vrot.lane.b32.xlu1 %v1111_v12, %s9514_s1  ;;  %1121 = vst [vmem:[#allocation1 + $0x1] ss:$4 sm:$0xff] %v6967_v8  ;;  %1117 = vrot.lane.b32.xlu2 %v1113_v13, %s9514_s1  ;;  %s9518_s1 = smov 45  }
 0x30f   : > { %v1001_v16 = vpop.permute.xlu1 %1000 }
 0x310   : > { %v1036_v20 = vsel %vm376_vm0, %v995_v14, %v1001_v16 }
 0x311   : > { %v1038_v22 = vsel %vm379_vm2, %v1036_v20, %v1007_v21 }
 0x314   : > { %v1124_v45 = vld.sshfl [vmem:[#allocation1 + $0x8] sm:$0xff pattern:$0x73625140]  ;;  %v1122_v39 = vld.sshfl [vmem:[#allocation1] sm:$0xff pattern:$0x73625140] }
 0x315   : > { %1128 = vrot.lane.b32.xlu1 %v1124_v45, %s9638_s11  ;;  %1126 = vrot.lane.b32.xlu0 %v1122_v39, %s9638_s11  ;;  %1133 = vst [vmem:[#allocation1 + $0x2] ss:$4 sm:$0xff] %v6967_v8 }
 0x317   : > { %v1052_v25 = vpop.permute.xlu2 %1051 }
 0x31b   : > { %v1514_v26 = vpop.permute.xlu0 %1513 }
 0x31c   : > { %1629 = vmatpush.bf16.msra.mxu1 %v1514_v26  ;;  %v1136_v17 = vld.sshfl [vmem:[#allocation1 + $0x8] sm:$0xff pattern:$0x73625140]  ;;  %v1134_v18 = vld.sshfl [vmem:[#allocation1] sm:$0xff pattern:$0x73625140] }
 0x31d   : > { %1140 = vrot.lane.b32.xlu0 %v1136_v17, %s9633_s15  ;;  %1145 = vst [vmem:[#allocation1 + $0x3] ss:$4 sm:$0xff] %v6967_v8  ;;  %1138 = vrot.lane.b32.xlu2 %v1134_v18, %s9633_s15 }
 0x320   : > { %1630 = vmatpush.bf16.msra.mxu1 %v1512_v7 }
 0x323   : > { %v1013_v23 = vpop.permute.xlu0 %1012 }
 0x324   : > { %1631 = vmatpush.bf16.msra.mxu1 %v7017_v40  ;;  %v1040_v24 = vsel %vm382_vm4, %v1038_v22, %v1013_v23  ;;  %v1146_v28 = vld.sshfl [vmem:[#allocation1] sm:$0xff pattern:$0x73625140]  ;;  %v1148_v30 = vld.sshfl [vmem:[#allocation1 + $0x8] sm:$0xff pattern:$0x73625140] }
 0x325   : > { %1531 = vrot.lane.b32.xlu1 %v1040_v24, %s9633_s15  ;;  %1152 = vrot.lane.b32.xlu2 %v1148_v30, %s9510_s12  ;;  %1182 = vst [vmem:[#allocation1] ss:$4 sm:$0xff] %v6967_v8 }
 0x327   : > { %v1046_v35 = vpop.permute.xlu1 %1045 }
 0x328   : > { %1632 = vmatpush.bf16.msra.mxu1 %v1516_v31  ;;  %v1156_v53 = vsel %vm376_vm0, %v6967_v8, %v1046_v35 }
 0x329   : > { %v1158_v40 = vsel %vm379_vm2, %v1156_v53, %v1052_v25 }
 0x32c   : > { %1633 = vmatpush.bf16.msra.mxu1 %v6989_v41  ;;  %v7065_v32 = vld.sshfl [vmem:[#allocation1] sm:$0xff pattern:$0x73625140]  ;;  %v7067_v33 = vld.sshfl [vmem:[#allocation1 + $0x8] sm:$0xff pattern:$0x73625140] }
 0x32d   : > { %1150 = vrot.lane.b32.xlu1 %v1146_v28, %s9510_s12  ;;  %1186 = vst [vmem:[#allocation1 + $0x1] ss:$4 sm:$0xff] %v6967_v8  ;;  %s9640_s12 = smov 49  }
 0x32f   : > { %v1069_v3 = vpop.permute.xlu2 %1068 }
 0x330   : > { %1634 = vmatpush.bf16.msra.mxu1 %v6976_v63  ;;  %v7080_v63 = vpack.c.b16 %v1599_v36, %v1599_v36 }
 0x332   : > { %9639 = vst [vmem:[#allocation31_spill] sm:$0xff] %v7080_v63 }
 0x334   : > { %1635 = vmatpush.bf16.msra.mxu1 %v6955_v50  ;;  %v1187_v41 = vld.sshfl [vmem:[#allocation1] sm:$0xff pattern:$0x73625140]  ;;  %v1189_v38 = vld.sshfl [vmem:[#allocation1 + $0x8] sm:$0xff pattern:$0x73625140]  ;;  %v7092_v61 = vpop.permute.xlu1 %1525 }
 0x335   : > { %1191 = vrot.lane.b32.xlu0 %v1187_v41, %s9525_s7  ;;  %1193 = vrot.lane.b32.xlu1 %v1189_v38, %s9525_s7  ;;  %1197 = vst [vmem:[#allocation1 + $0x2] ss:$4 sm:$0xff] %v6967_v8  ;;  %s9645_s7 = smov 33  }
 0x337   : > { %v1058_v42 = vpop.permute.xlu0 %1057 }
 0x338   : > { %1636 = vmatpush.bf16.msra.mxu1 %v6937_v19  ;;  %v1160_v59 = vsel %vm382_vm4, %v1158_v40, %v1058_v42 }
 0x339   : > { %1541 = vrot.lane.b32.xlu2 %v1160_v59, %s9532_s14 }
 0x33b   : > { %1637 = vmatmul.bf16.vlgmr.msra.gmra.mxu1 %v7080_v63 }
 0x33c   : > { %v1200_v50 = vld.sshfl [vmem:[#allocation1 + $0x8] sm:$0xff pattern:$0x73625140]  ;;  %v1198_v54 = vld.sshfl [vmem:[#allocation1] sm:$0xff pattern:$0x73625140] }
 0x33d   : > { %1204 = vrot.lane.b32.xlu0 %v1200_v50, %s9631_s18  ;;  %1208 = vst [vmem:[#allocation1 + $0x3] ss:$4 sm:$0xff] %v6967_v8 }
 0x33f   : > { %v1063_v1 = vpop.permute.xlu1 %1062 }
 0x340   : > { %v1163_v4 = vsel %vm376_vm0, %v1063_v1, %v1069_v3 }
 0x341   : > { %1202 = vrot.lane.b32.xlu2 %v1198_v54, %s9631_s18 }
 0x344   : > { %v1209_v62 = vld.sshfl [vmem:[#allocation1] sm:$0xff pattern:$0x73625140]  ;;  %v1211_v19 = vld.sshfl [vmem:[#allocation1 + $0x8] sm:$0xff pattern:$0x73625140]  ;;  %v7107_v55 = vpop.permute.xlu2 %1527 }
 0x345   : > { %1213 = vrot.lane.b32.xlu1 %v1209_v62, %s9632_s28  ;;  %1219 = vst [vmem:[#allocation1] ss:$4 sm:$0xff] %v7090_v58 }
 0x349   : > { %1215 = vrot.lane.b32.xlu2 %v1211_v19, %s9632_s28 }
 0x34c   : > { %v1220_v0 = vld.sshfl [vmem:[#allocation1] sm:$0xff pattern:$0x73625140]  ;;  %v1086_v49 = vpop.permute.xlu2 %1085 }
 0x34d   : > { %1222 = vrot.lane.b32.xlu0 %v1220_v0, %s9640_s12  ;;  %1225 = vst [vmem:[#allocation1 + $0x1] ss:$4 sm:$0xff] %v7090_v58 }
 0x34f   : > { %v1075_v5 = vpop.permute.xlu0 %1074 }
 0x350   : > { %v1165_v7 = vsel %vm379_vm2, %v1163_v4, %v1075_v5 }
 0x354   : > { %v1226_v6 = vld.sshfl [vmem:[#allocation1] sm:$0xff pattern:$0x73625140] }
 0x355   : > { %1228 = vrot.lane.b32.xlu1 %v1226_v6, %s9512_s8  ;;  %1231 = vst [vmem:[#allocation1 + $0x2] ss:$4 sm:$0xff] %v7090_v58  ;;  %s9520_s8 = smov 46  }
 0x357   : > { %v1081_v9 = vpop.permute.xlu1 %1080 }
 0x358   : > { %v1167_v10 = vsel %vm382_vm4, %v1165_v7, %v1081_v9  ;;  %v1626_v7 = vadd.f32 %v6998_v15, %v6686_v37 }
 0x359   : > { %1543 = vrot.lane.b32.xlu0 %v1167_v10, %s9532_s14 }
 0x35c   : > { %v1232_v60 = vld.sshfl [vmem:[#allocation1] sm:$0xff pattern:$0x73625140] }
 0x35d   : > { %1237 = vst [vmem:[#allocation1 + $0x3] ss:$4 sm:$0xff] %v7090_v58  ;;  %1234 = vrot.lane.b32.xlu2 %v1232_v60, %s9516_s10  ;;  %s9641_s10 = smov 37  }
 0x35f   : > { %v1106_v44 = vpop.permute.xlu2 %1105 }
 0x364   : > { %v1238_v56 = vld.sshfl [vmem:[#allocation1] sm:$0xff pattern:$0x73625140] }
 0x365   : > { %1242 = vst [vmem:[#allocation1] ss:$4 sm:$0xff] %v7090_v58  ;;  %1240 = vrot.lane.b32.xlu0 %v1238_v56, %s9520_s8  ;;  %s9643_s8 = smov 35  }
 0x367   : > { %v1092_v57 = vpop.permute.xlu0 %1091  ;;  %v1118_v39 = vpop.permute.xlu2 %1117 }
 0x368   : > { %v1170_v46 = vsel %vm376_vm0, %v1086_v49, %v1092_v57 }
 0x36c   : > { %v1243_v51 = vld.sshfl [vmem:[#allocation1] sm:$0xff pattern:$0x73625140] }
 0x36d   : > { %1245 = vrot.lane.b32.xlu1 %v1243_v51, %s9518_s1  ;;  %1248 = vst [vmem:[#allocation1 + $0x1] ss:$4 sm:$0xff] %v7090_v58  ;;  %s9642_s1 = smov 36  }
 0x36f   : > { %v7113_v27 = vpop.permute.xlu0 %1529  ;;  %v1098_v52 = vpop.permute.xlu1 %1097 }
 0x370   : > { %v1172_v47 = vsel %vm379_vm2, %v1170_v46, %v1098_v52 }
 0x374   : > { %v1249_v43 = vld.sshfl [vmem:[#allocation1] sm:$0xff pattern:$0x73625140] }
 0x375   : > { %1254 = vst [vmem:[#allocation1 + $0x2] ss:$4 sm:$0xff] %v7090_v58  ;;  %1251 = vrot.lane.b32.xlu2 %v1249_v43, %s9641_s10 }
 0x377   : > { %v1108_v2 = vpop.permute.xlu0 %1107  ;;  %v1139_v18 = vpop.permute.xlu2 %1138 }
 0x378   : > { %v1109_v48 = vsel %vm673_vm13, %v1106_v44, %v1108_v2 }
 0x379   : > { %v1174_v12 = vsel %vm382_vm4, %v1172_v47, %v1109_v48 }
 0x37a   : > { %1545 = vrot.lane.b32.xlu1 %v1174_v12, %s9532_s14 }
 0x37c   : > { %v1255_v13 = vld.sshfl [vmem:[#allocation1] sm:$0xff pattern:$0x73625140] }
 0x37d   : > { %1257 = vrot.lane.b32.xlu0 %v1255_v13, %s9642_s1  ;;  %1260 = vst [vmem:[#allocation1 + $0x3] ss:$4 sm:$0xff] %v7090_v58 }
 0x37f   : > { %v1116_v14 = vpop.permute.xlu1 %1115  ;;  %v1153_v28 = vpop.permute.xlu2 %1152 }
 0x380   : > { %v1119_v22 = vsel %vm684_vm14, %v1116_v14, %v1118_v39 }
 0x384   : > { %v1261_v45 = vld.sshfl [vmem:[#allocation1] sm:$0xff pattern:$0x73625140] }
 0x385   : > { %1263 = vrot.lane.b32.xlu1 %v1261_v45, %s9643_s8  ;;  %1265 = vst [vmem:[#allocation1] ss:$4 sm:$0xff] %v7090_v58 }
 0x387   : > { %v1129_v16 = vpop.permute.xlu1 %1128  ;;  %v1127_v17 = vpop.permute.xlu0 %1126 }
 0x388   : > { %v1131_v23 = vsel %vm9541_vm9, %v1127_v17, %v1129_v16  ;;  %vm9658_vm9 = vcmask 932864  }
 0x389   : > { %v1177_v30 = vsel %vm376_vm0, %v1119_v22, %v1131_v23 }
 0x38c   : > { %v1266_v26 = vld.sshfl [vmem:[#allocation1] sm:$0xff pattern:$0x73625140] }
 0x38d   : > { %1268 = vrot.lane.b32.xlu2 %v1266_v26, %s9644_s6  ;;  %1271 = vst [vmem:[#allocation1 + $0x1] ss:$4 sm:$0xff] %v7090_v58 }
 0x38f   : > { %v1141_v24 = vpop.permute.xlu0 %1140 }
 0x390   : > { %v1143_v31 = vsel %vm9540_vm15, %v1139_v18, %v1141_v24  ;;  %vm9657_vm15 = vcmask 941056  }
 0x391   : > { %v1179_v53 = vsel %vm379_vm2, %v1177_v30, %v1143_v31 }
 0x393   : > { %v7141_v38 = vpop.permute.xlu2 %1541 }
 0x394   : > { %v1272_v20 = vld.sshfl [vmem:[#allocation1] sm:$0xff pattern:$0x73625140] }
 0x395   : > { %1274 = vrot.lane.b32.xlu0 %v1272_v20, %s9645_s7  ;;  %1277 = vst [vmem:[#allocation1 + $0x2] ss:$4 sm:$0xff] %v7090_v58 }
 0x397   : > { %v7130_v21 = vpop.permute.xlu1 %1531 }
 0x39b   : > { %v1203_v59 = vpop.permute.xlu2 %1202 }
 0x39c   : > { %v1278_v35 = vld.sshfl [vmem:[#allocation1] sm:$0xff pattern:$0x73625140] }
 0x39d   : > { %1283 = vst [vmem:[#allocation1 + $0x3] ss:$4 sm:$0xff] %v7090_v58  ;;  %1280 = vrot.lane.b32.xlu1 %v1278_v35, %s9528_s21  ;;  %s9646_s21 = smov 127  }
 0x39f   : > { %v1151_v25 = vpop.permute.xlu1 %1150 }
 0x3a0   : > { %v1154_v36 = vsel %vm720_vm8, %v1151_v25, %v1153_v28 }
 0x3a1   : > { %v1181_v41 = vsel %vm382_vm4, %v1179_v53, %v1154_v36 }
 0x3a2   : > { %1547 = vrot.lane.b32.xlu2 %v1181_v41, %s9532_s14  ;;  %s9647_s14 = smov 118  }
 0x3a3   : > { %v1216_v5 = vpop.permute.xlu2 %1215 }
 0x3a4   : > { %v1284_v40 = vld.sshfl [vmem:[#allocation1] sm:$0xff pattern:$0x73625140] }
 0x3a5   : > { %1322 = vst [vmem:[#allocation1 + $0x1] ss:$4 sm:$0xff] %v7090_v58 }
 0x3a7   : > { %v1192_v42 = vpop.permute.xlu0 %1191  ;;  %v1194_v54 = vpop.permute.xlu1 %1193 }
 0x3a8   : > { %v1195_v62 = vsel %vm9589_vm1, %v1192_v42, %v1194_v54  ;;  %v1291_v3 = vsel %vm376_vm0, %v7067_v33, %v1194_v54 }
 0x3a9   : > { %v1289_v0 = vsel %vm376_vm0, %v7065_v32, %v1195_v62 }
 0x3aa   : > { %1286 = vrot.lane.b32.xlu2 %v1284_v40, %s9530_s30  ;;  %s9534_s30 = smov 79  }
 0x3ac   : > { %v1323_v50 = vld.sshfl [vmem:[#allocation1] sm:$0xff pattern:$0x73625140] }
 0x3ad   : > { %1325 = vrot.lane.b32.xlu0 %v1323_v50, %s9646_s21  ;;  %1328 = vst [vmem:[#allocation1 + $0x2] ss:$4 sm:$0xff] %v7090_v58 }
 0x3af   : > { %v1205_v19 = vpop.permute.xlu0 %1204 }
 0x3b0   : > { %v1206_v1 = vsel %vm9588_vm3, %v1203_v59, %v1205_v19  ;;  %v1295_v9 = vsel %vm379_vm2, %v1291_v3, %v1205_v19 }
 0x3b1   : > { %v1293_v6 = vsel %vm379_vm2, %v1289_v0, %v1206_v1  ;;  %v1299_v57 = vsel %vm382_vm4, %v1295_v9, %v1216_v5  ;;  %v7209_v1 = vld [vmem:[#allocation5 + $0x8] sm:$0xff] }
 0x3b4   : > { %v1329_v4 = vld.sshfl [vmem:[#allocation1] sm:$0xff pattern:$0x73625140] }
 0x3b5   : > { %1331 = vrot.lane.b32.xlu1 %v1329_v4, %s9631_s18  ;;  %1334 = vst [vmem:[#allocation1 + $0x3] ss:$4 sm:$0xff] %v7090_v58  ;;  %v1600_v4 = vunpack.c.l.b16 %v7209_v1 }
 0x3b7   : > { %v1214_v10 = vpop.permute.xlu1 %1213  ;;  %v1235_v14 = vpop.permute.xlu2 %1234 }
 0x3b8   : > { %v1638_v32 = vpop.f32.mrf.mxu1  ;;  %v1217_v60 = vsel %vm9553_vm5, %v1214_v10, %v1216_v5 }
 0x3b9   : > { %v7161_v56 = vadd.f32 %v1638_v32, %v1626_v7  ;;  %v1297_v33 = vsel %vm382_vm4, %v1293_v6, %v1217_v60  ;;  %v7217_v7 = vpack.c.b16 %v1600_v4, %v1600_v4 }
 0x3ba   : > { %1558 = vrot.lane.b32.xlu0 %v1297_v33, %s9534_s30 }
 0x3bb   : > { %9656 = vst [vmem:[#allocation32_spill] sm:$0xff] %v7217_v7 }
 0x3bc   : > { %v1335_v49 = vld.sshfl [vmem:[#allocation1] sm:$0xff pattern:$0x73625140] }
 0x3bd   : > { %1339 = vst [vmem:[#allocation1] ss:$4 sm:$0xff] %v7090_v58  ;;  %1560 = vrot.lane.b32.xlu1 %v1299_v57, %s9534_s30  ;;  %1337 = vrot.lane.b32.xlu2 %v1335_v49, %s9647_s14  ;;  %s9650_s30 = smov 114  }
 0x3bf   : > { %v1223_v52 = vpop.permute.xlu0 %1222 }
 0x3c0   : > { %v1640_v15 = vpop.f32.mrf.mxu1 }
 0x3c4   : > { %v1340_v51 = vld.sshfl [vmem:[#allocation1] sm:$0xff pattern:$0x73625140]  ;;  %v1342_v46 = vld.sshfl [vmem:[#allocation1 + $0x8] sm:$0xff pattern:$0x73625140] }
 0x3c5   : > { %1344 = vrot.lane.b32.xlu0 %v1340_v51, %s9648_s0  ;;  %1350 = vst [vmem:[#allocation1 + $0x1] ss:$4 sm:$0xff] %v7090_v58  ;;  %1346 = vrot.lane.b32.xlu1 %v1342_v46, %s9648_s0 }
 0x3c7   : > { %v1229_v2 = vpop.permute.xlu1 %1228 }
 0x3c8   : > { %v1302_v13 = vsel %vm376_vm0, %v1223_v52, %v1229_v2 }
 0x3c9   : > { %v1304_v45 = vsel %vm379_vm2, %v1302_v13, %v1235_v14 }
 0x3cb   : > { %v1544_v47 = vpop.permute.xlu0 %1543 }
 0x3cc   : > { %v1353_v43 = vld.sshfl [vmem:[#allocation1 + $0x8] sm:$0xff pattern:$0x73625140]  ;;  %v1351_v44 = vld.sshfl [vmem:[#allocation1] sm:$0xff pattern:$0x73625140] }
 0x3cd   : > { %1357 = vrot.lane.b32.xlu0 %v1353_v43, %s9649_s2  ;;  %1361 = vst [vmem:[#allocation1 + $0x2] ss:$4 sm:$0xff] %v7090_v58  ;;  %1355 = vrot.lane.b32.xlu2 %v1351_v44, %s9649_s2 }
 0x3cf   : > { %v1252_v23 = vpop.permute.xlu2 %1251 }
 0x3d4   : > { %v1362_v48 = vld.sshfl [vmem:[#allocation1] sm:$0xff pattern:$0x73625140]  ;;  %v1364_v12 = vld.sshfl [vmem:[#allocation1 + $0x8] sm:$0xff pattern:$0x73625140] }
 0x3d5   : > { %1372 = vst [vmem:[#allocation1 + $0x3] ss:$4 sm:$0xff] %v7090_v58  ;;  %1366 = vrot.lane.b32.xlu1 %v1362_v48, %s9635_s9  ;;  %1368 = vrot.lane.b32.xlu2 %v1364_v12, %s9635_s9 }
 0x3d7   : > { %v1241_v39 = vpop.permute.xlu0 %1240 }
 0x3d8   : > { %v1306_v26 = vsel %vm382_vm4, %v1304_v45, %v1241_v39 }
 0x3dc   : > { %v1373_v16 = vld.sshfl [vmem:[#allocation1] sm:$0xff pattern:$0x73625140]  ;;  %v1375_v17 = vld.sshfl [vmem:[#allocation1 + $0x8] sm:$0xff pattern:$0x73625140] }
 0x3dd   : > { %1377 = vrot.lane.b32.xlu0 %v1373_v16, %s9650_s30  ;;  %1382 = vst [vmem:[#allocation1] ss:$4 sm:$0xff] %v7090_v58  ;;  %1379 = vrot.lane.b32.xlu1 %v1375_v17, %s9650_s30 }
 0x3de   : > { %1562 = vrot.lane.b32.xlu2 %v1306_v26, %s9651_s13 }
 0x3df   : > { %v1246_v18 = vpop.permute.xlu1 %1245 }
 0x3e0   : > { %v1309_v35 = vsel %vm376_vm0, %v1246_v18, %v1252_v23 }
 0x3e4   : > { %v1385_v20 = vld.sshfl [vmem:[#allocation1 + $0x8] sm:$0xff pattern:$0x73625140]  ;;  %v1383_v22 = vld.sshfl [vmem:[#allocation1] sm:$0xff pattern:$0x73625140] }
 0x3e5   : > { %1389 = vrot.lane.b32.xlu0 %v1385_v20, %s9652_s27  ;;  %1393 = vst [vmem:[#allocation1 + $0x1] ss:$4 sm:$0xff] %v7090_v58 }
 0x3e6   : > { %1387 = vrot.lane.b32.xlu2 %v1383_v22, %s9652_s27 }
 0x3e7   : > { %v1269_v31 = vpop.permute.xlu2 %1268 }
 0x3ec   : > { %v1394_v24 = vld.sshfl [vmem:[#allocation1] sm:$0xff pattern:$0x73625140]  ;;  %v1396_v28 = vld.sshfl [vmem:[#allocation1 + $0x8] sm:$0xff pattern:$0x73625140]  ;;  %v1546_v30 = vpop.permute.xlu1 %1545 }
 0x3ed   : > { %1404 = vst [vmem:[#allocation1 + $0x2] ss:$4 sm:$0xff] %v7090_v58  ;;  %1398 = vrot.lane.b32.xlu1 %v1394_v24, %s9653_s26 }
 0x3ee   : > { %1400 = vrot.lane.b32.xlu2 %v1396_v28, %s9653_s26 }
 0x3ef   : > { %v1258_v25 = vpop.permute.xlu0 %1257 }
 0x3f0   : > { %v1311_v41 = vsel %vm379_vm2, %v1309_v35, %v1258_v25 }
 0x3f4   : > { %v1405_v53 = vld.sshfl [vmem:[#allocation1] sm:$0xff pattern:$0x73625140]  ;;  %v1407_v36 = vld.sshfl [vmem:[#allocation1 + $0x8] sm:$0xff pattern:$0x73625140] }
 0x3f5   : > { %1409 = vrot.lane.b32.xlu0 %v1405_v53, %s9630_s19  ;;  %1411 = vrot.lane.b32.xlu1 %v1407_v36, %s9630_s19  ;;  %1415 = vst [vmem:[#allocation1 + $0x3] ss:$4 sm:$0xff] %v7090_v58 }
 0x3f7   : > { %v1264_v40 = vpop.permute.xlu1 %1263 }
 0x3f8   : > { %v1313_v42 = vsel %vm382_vm4, %v1311_v41, %v1264_v40 }
 0x3fc   : > { %v1548_v59 = vpop.permute.xlu2 %1547  ;;  %v1418_v50 = vld.sshfl [vmem:[#allocation1 + $0x8] sm:$0xff pattern:$0x73625140]  ;;  %v1416_v54 = vld.sshfl [vmem:[#allocation1] sm:$0xff pattern:$0x73625140] }
 0x3fd   : > { %1642 = vmatpush.bf16.msra.mxu2 %v1548_v59  ;;  %1564 = vrot.lane.b32.xlu0 %v1313_v42, %s9651_s13  ;;  %1425 = vst [vmem:[#allocation1] ss:$4 sm:$0xff] %v7090_v58 }
 0x3fe   : > { %1420 = vrot.lane.b32.xlu2 %v1416_v54, %s9654_s23 }
 0x401   : > { %1643 = vmatpush.bf16.msra.mxu2 %v1546_v30 }
 0x404   : > { %v1426_v62 = vld.sshfl [vmem:[#allocation1] sm:$0xff pattern:$0x73625140]  ;;  %v1428_v19 = vld.sshfl [vmem:[#allocation1 + $0x8] sm:$0xff pattern:$0x73625140] }
 0x405   : > { %1644 = vmatpush.bf16.msra.mxu2 %v1544_v47  ;;  %1422 = vrot.lane.b32.xlu0 %v1418_v50, %s9654_s23  ;;  %1705 = vst [vmem:[#allocation1 + $0x1] ss:$4 sm:$0xff] %v6681_v34 }
 0x406   : > { %1430 = vrot.lane.b32.xlu1 %v1426_v62, %s9655_s22  ;;  %1432 = vrot.lane.b32.xlu2 %v1428_v19, %s9655_s22 }
 0x407   : > { %v1275_v3 = vpop.permute.xlu0 %1274 }
 0x408   : > { %v1316_v5 = vsel %vm376_vm0, %v1269_v31, %v1275_v3 }
 0x409   : > { %1645 = vmatpush.bf16.msra.mxu2 %v7141_v38 }
 0x40c   : > { %v1706_v0 = vld.sshfl [vmem:[#allocation1] sm:$0xff pattern:$0x73625140] }
 0x40d   : > { %1646 = vmatpush.bf16.msra.mxu2 %v7130_v21  ;;  %1711 = vst [vmem:[#allocation1 + $0x2] ss:$4 sm:$0xff] %v6681_v34  ;;  %1708 = vrot.lane.b32.xlu0 %v1706_v0, %s9646_s21 }
 0x40f   : > { %v1281_v21 = vpop.permute.xlu1 %1280 }
 0x410   : > { %v1318_v38 = vsel %vm379_vm2, %v1316_v5, %v1281_v21 }
 0x411   : > { %1647 = vmatpush.bf16.msra.mxu2 %v7113_v27  ;;  %v1287_v27 = vpop.permute.xlu2 %1286 }
 0x412   : > { %v1320_v9 = vsel %vm382_vm4, %v1318_v38, %v1287_v27 }
 0x414   : > { %v1712_v6 = vld.sshfl [vmem:[#allocation1] sm:$0xff pattern:$0x73625140] }
 0x415   : > { %1648 = vmatpush.bf16.msra.mxu2 %v7107_v55  ;;  %1714 = vrot.lane.b32.xlu1 %v1712_v6, %s9631_s18  ;;  %1717 = vst [vmem:[#allocation1 + $0x3] ss:$4 sm:$0xff] %v6681_v34 }
 0x419   : > { %1649 = vmatpush.bf16.msra.mxu2 %v7092_v61  ;;  %v1338_v57 = vpop.permute.xlu2 %1337 }
 0x41c   : > { %1650 = vmatmul.bf16.vlgmr.msra.gmra.mxu2 %v7217_v7  ;;  %v1718_v10 = vld.sshfl [vmem:[#allocation1] sm:$0xff pattern:$0x73625140] }
 0x41d   : > { %1566 = vrot.lane.b32.xlu1 %v1320_v9, %s9651_s13  ;;  %1722 = vst [vmem:[#allocation1] ss:$4 sm:$0xff] %v6681_v34  ;;  %1720 = vrot.lane.b32.xlu2 %v1718_v10, %s9632_s28  ;;  %s9667_s13 = smov 93  }
 0x41f   : > { %v1326_v55 = vpop.permute.xlu0 %1325 }
 0x420   : > { %v1436_v60 = vsel %vm376_vm0, %v7090_v58, %v1326_v55 }
 0x424   : > { %v1723_v32 = vld.sshfl [vmem:[#allocation1] sm:$0xff pattern:$0x73625140] }
 0x425   : > { %1728 = vst [vmem:[#allocation1 + $0x1] ss:$4 sm:$0xff] %v6681_v34  ;;  %1725 = vrot.lane.b32.xlu0 %v1723_v32, %s9634_s16 }
 0x427   : > { %v1332_v61 = vpop.permute.xlu1 %1331  ;;  %v1356_v43 = vpop.permute.xlu2 %1355 }
 0x428   : > { %v1438_v33 = vsel %vm379_vm2, %v1436_v60, %v1332_v61 }
 0x429   : > { %v1440_v49 = vsel %vm382_vm4, %v1438_v33, %v1338_v57 }
 0x42a   : > { %1577 = vrot.lane.b32.xlu2 %v1440_v49, %s9655_s22 }
 0x42c   : > { %v1729_v15 = vld.sshfl [vmem:[#allocation1] sm:$0xff pattern:$0x73625140]  ;;  %v7234_v46 = vpop.permute.xlu0 %1558 }
 0x42d   : > { %1731 = vrot.lane.b32.xlu1 %v1729_v15, %s9649_s2  ;;  %1734 = vst [vmem:[#allocation1 + $0x2] ss:$4 sm:$0xff] %v6681_v34 }
 0x42f   : > { %v7238_v52 = vpop.permute.xlu1 %1560  ;;  %v1369_v12 = vpop.permute.xlu2 %1368 }
 0x434   : > { %v1735_v51 = vld.sshfl [vmem:[#allocation1] sm:$0xff pattern:$0x73625140] }
 0x435   : > { %1740 = vst [vmem:[#allocation1 + $0x3] ss:$4 sm:$0xff] %v6681_v34  ;;  %1737 = vrot.lane.b32.xlu2 %v1735_v51, %s9635_s9 }
 0x437   : > { %v1345_v47 = vpop.permute.xlu0 %1344  ;;  %v1347_v2 = vpop.permute.xlu1 %1346 }
 0x438   : > { %v7246_v39 = vpop.permute.xlu2 %1562  ;;  %v1348_v16 = vsel %vm458_vm6, %v1345_v47, %v1347_v2 }
 0x43c   : > { %v1741_v44 = vld.sshfl [vmem:[#allocation1] sm:$0xff pattern:$0x73625140] }
 0x43d   : > { %1745 = vst [vmem:[#allocation1] ss:$4 sm:$0xff] %v6681_v34  ;;  %1743 = vrot.lane.b32.xlu0 %v1741_v44, %s9650_s30 }
 0x43f   : > { %v1358_v13 = vpop.permute.xlu0 %1357 }
 0x440   : > { %v1359_v26 = vsel %vm470_vm7, %v1356_v43, %v1358_v13  ;;  %v1388_v30 = vpop.permute.xlu2 %1387 }
 0x441   : > { %v1443_v18 = vsel %vm376_vm0, %v1348_v16, %v1359_v26 }
 0x444   : > { %v1746_v48 = vld.sshfl [vmem:[#allocation1] sm:$0xff pattern:$0x73625140] }
 0x445   : > { %1748 = vrot.lane.b32.xlu1 %v1746_v48, %s9636_s29  ;;  %1751 = vst [vmem:[#allocation1 + $0x1] ss:$4 sm:$0xff] %v6681_v34 }
 0x447   : > { %v1367_v14 = vpop.permute.xlu1 %1366 }
 0x448   : > { %v1370_v20 = vsel %vm9657_vm15, %v1367_v14, %v1369_v12  ;;  %v1401_v25 = vpop.permute.xlu2 %1400 }
 0x449   : > { %v1445_v24 = vsel %vm379_vm2, %v1443_v18, %v1370_v20 }
 0x44c   : > { %v1752_v45 = vld.sshfl [vmem:[#allocation1] sm:$0xff pattern:$0x73625140] }
 0x44d   : > { %1757 = vst [vmem:[#allocation1 + $0x2] ss:$4 sm:$0xff] %v6681_v34  ;;  %1754 = vrot.lane.b32.xlu2 %v1752_v45, %s9637_s17 }
 0x44f   : > { %v1378_v17 = vpop.permute.xlu0 %1377  ;;  %v1380_v23 = vpop.permute.xlu1 %1379 }
 0x450   : > { %v1381_v28 = vsel %vm9658_vm9, %v1378_v17, %v1380_v23  ;;  %vm9544_vm9 = vcmask 646144  }
 0x451   : > { %v1447_v31 = vsel %vm382_vm4, %v1445_v24, %v1381_v28 }
 0x452   : > { %1579 = vrot.lane.b32.xlu0 %v1447_v31, %s9655_s22 }
 0x454   : > { %v1758_v22 = vld.sshfl [vmem:[#allocation1] sm:$0xff pattern:$0x73625140] }
 0x455   : > { %1763 = vst [vmem:[#allocation1 + $0x3] ss:$4 sm:$0xff] %v6681_v34 }
 0x457   : > { %v1390_v53 = vpop.permute.xlu0 %1389 }
 0x458   : > { %v1421_v59 = vpop.permute.xlu2 %1420  ;;  %v1391_v54 = vsel %vm960_vm10, %v1388_v30, %v1390_v53 }
 0x45a   : > { %1760 = vrot.lane.b32.xlu0 %v1758_v22, %s9630_s19 }
 0x45c   : > { %v1764_v35 = vld.sshfl [vmem:[#allocation1] sm:$0xff pattern:$0x73625140] }
 0x45d   : > { %1766 = vrot.lane.b32.xlu1 %v1764_v35, %s9654_s23  ;;  %1768 = vst [vmem:[#allocation1] ss:$4 sm:$0xff] %v6681_v34 }
 0x45f   : > { %v1399_v41 = vpop.permute.xlu1 %1398 }
 0x460   : > { %v1402_v62 = vsel %vm649_vm11, %v1399_v41, %v1401_v25  ;;  %v1433_v6 = vpop.permute.xlu2 %1432 }
 0x461   : > { %v1450_v0 = vsel %vm376_vm0, %v1391_v54, %v1402_v62 }
 0x464   : > { %v1769_v36 = vld.sshfl [vmem:[#allocation1] sm:$0xff pattern:$0x73625140] }
 0x465   : > { %1771 = vrot.lane.b32.xlu2 %v1769_v36, %s9655_s22  ;;  %1774 = vst [vmem:[#allocation1 + $0x1] ss:$4 sm:$0xff] %v6681_v34 }
 0x467   : > { %v1410_v40 = vpop.permute.xlu0 %1409  ;;  %v1412_v19 = vpop.permute.xlu1 %1411 }
 0x468   : > { %v1413_v3 = vsel %vm661_vm12, %v1410_v40, %v1412_v19 }
 0x469   : > { %v1452_v5 = vsel %vm379_vm2, %v1450_v0, %v1413_v3 }
 0x46c   : > { %v1775_v42 = vld.sshfl [vmem:[#allocation1] sm:$0xff pattern:$0x73625140] }
 0x46d   : > { %1777 = vrot.lane.b32.xlu0 %v1775_v42, %s9638_s11  ;;  %1780 = vst [vmem:[#allocation1 + $0x2] ss:$4 sm:$0xff] %v6681_v34 }
 0x46f   : > { %v7264_v50 = vpop.permute.xlu0 %1564 }
 0x474   : > { %v1781_v4 = vld.sshfl [vmem:[#allocation1] sm:$0xff pattern:$0x73625140] }
 0x475   : > { %1786 = vst [vmem:[#allocation1 + $0x3] ss:$4 sm:$0xff] %v6681_v34 }
 0x477   : > { %v1423_v21 = vpop.permute.xlu0 %1422  ;;  %v7297_v47 = vpop.permute.xlu2 %1720 }
 0x478   : > { %v1424_v38 = vsel %vm673_vm13, %v1421_v59, %v1423_v21  ;;  %v1431_v27 = vpop.permute.xlu1 %1430 }
 0x479   : > { %v1454_v9 = vsel %vm382_vm4, %v1452_v5, %v1424_v38  ;;  %v1434_v10 = vsel %vm684_vm14, %v1431_v27, %v1433_v6 }
 0x47a   : > { %1581 = vrot.lane.b32.xlu1 %v1454_v9, %s9655_s22  ;;  %1583 = vrot.lane.b32.xlu2 %v1434_v10, %s9655_s22 }
 0x47c   : > { %v1787_v55 = vld.sshfl [vmem:[#allocation1] sm:$0xff pattern:$0x73625140] }
 0x47d   : > { %1822 = vst [vmem:[#allocation1] ss:$4 sm:$0xff] %v6681_v34 }
 0x47f   : > { %v7317_v23 = vpop.permute.xlu0 %1708 }
 0x482   : > { %1783 = vrot.lane.b32.xlu1 %v1781_v4, %s9633_s15  ;;  %1789 = vrot.lane.b32.xlu2 %v1787_v55, %s9659_s5 }
 0x484   : > { %v7280_v32 = vld.sshfl [vmem:[#allocation1] sm:$0xff pattern:$0x73625140]  ;;  %v7282_v60 = vld.sshfl [vmem:[#allocation1 + $0x8] sm:$0xff pattern:$0x73625140]  ;;  %v1578_v13 = vpop.permute.xlu2 %1577 }
 0x485   : > { %1826 = vst [vmem:[#allocation1 + $0x1] ss:$4 sm:$0xff] %v6681_v34 }
 0x487   : > { %v7310_v17 = vpop.permute.xlu1 %1714 }
 0x48c   : > { %v1827_v61 = vld.sshfl [vmem:[#allocation1] sm:$0xff pattern:$0x73625140]  ;;  %v1829_v33 = vld.sshfl [vmem:[#allocation1 + $0x8] sm:$0xff pattern:$0x73625140] }
 0x48d   : > { %1831 = vrot.lane.b32.xlu0 %v1827_v61, %s9646_s21  ;;  %1833 = vrot.lane.b32.xlu1 %v1829_v33, %s9646_s21  ;;  %1837 = vst [vmem:[#allocation1 + $0x2] ss:$4 sm:$0xff] %v6681_v34  ;;  %v1601_v61 = vunpack.c.h.b16 %v7209_v1  ;;  %v1569_v33 = vsel %vm9544_vm9, %v7234_v46, %v7238_v52  ;;  %vm9664_vm9 = vcmask 932864  }
 0x48f   : > { %v7308_v16 = vpop.permute.xlu2 %1737  ;;  %v1567_v24 = vpop.permute.xlu1 %1566 }
 0x494   : > { %v1840_v57 = vld.sshfl [vmem:[#allocation1 + $0x8] sm:$0xff pattern:$0x73625140]  ;;  %v1838_v49 = vld.sshfl [vmem:[#allocation1] sm:$0xff pattern:$0x73625140] }
 0x495   : > { %1844 = vrot.lane.b32.xlu0 %v1840_v57, %s9631_s18  ;;  %1842 = vrot.lane.b32.xlu2 %v1838_v49, %s9631_s18  ;;  %1848 = vst [vmem:[#allocation1 + $0x3] ss:$4 sm:$0xff] %v6681_v34  ;;  %v7363_v49 = vpack.c.b16 %v1601_v61, %v1601_v61 }
 0x497   : > { %v7324_v53 = vpop.permute.xlu0 %1725  ;;  %9662 = vst [vmem:[#allocation33_spill] sm:$0xff] %v7363_v49 }
 0x49c   : > { %v1851_v15 = vld.sshfl [vmem:[#allocation1 + $0x8] sm:$0xff pattern:$0x73625140]  ;;  %v1849_v51 = vld.sshfl [vmem:[#allocation1] sm:$0xff pattern:$0x73625140] }
 0x49d   : > { %1855 = vrot.lane.b32.xlu2 %v1851_v15, %s9632_s28  ;;  %1853 = vrot.lane.b32.xlu1 %v1849_v51, %s9632_s28  ;;  %1858 = vst [vmem:[#allocation1] ss:$4 sm:$0xff] %v6681_v34 }
 0x49f   : > { %v1651_v43 = vpop.f32.mrf.mxu2  ;;  %v7328_v25 = vpop.permute.xlu1 %1731 }
 0x4a0   : > { %v7295_v44 = vadd.f32 %v1651_v43, %v7161_v56 }
 0x4a4   : > { %v1861_v2 = vld.sshfl [vmem:[#allocation1 + $0x8] sm:$0xff pattern:$0x73625140]  ;;  %v1859_v48 = vld.sshfl [vmem:[#allocation1] sm:$0xff pattern:$0x73625140] }
 0x4a5   : > { %1865 = vrot.lane.b32.xlu1 %v1861_v2, %s9648_s0  ;;  %1863 = vrot.lane.b32.xlu0 %v1859_v48, %s9648_s0  ;;  %1869 = vst [vmem:[#allocation1 + $0x1] ss:$4 sm:$0xff] %v6681_v34 }
 0x4a7   : > { %v1653_v12 = vpop.f32.mrf.mxu2  ;;  %v7315_v22 = vpop.permute.xlu2 %1754 }
 0x4ac   : > { %v1870_v14 = vld.sshfl [vmem:[#allocation1] sm:$0xff pattern:$0x73625140]  ;;  %v1872_v45 = vld.sshfl [vmem:[#allocation1 + $0x8] sm:$0xff pattern:$0x73625140] }
 0x4ad   : > { %1880 = vst [vmem:[#allocation1 + $0x2] ss:$4 sm:$0xff] %v6681_v34  ;;  %1876 = vrot.lane.b32.xlu0 %v1872_v45, %s9649_s2  ;;  %1874 = vrot.lane.b32.xlu2 %v1870_v14, %s9649_s2 }
 0x4af   : > { %v7333_v42 = vpop.permute.xlu0 %1743 }
 0x4b4   : > { %v1881_v56 = vld.sshfl [vmem:[#allocation1] sm:$0xff pattern:$0x73625140]  ;;  %v1883_v26 = vld.sshfl [vmem:[#allocation1 + $0x8] sm:$0xff pattern:$0x73625140] }
 0x4b5   : > { %1885 = vrot.lane.b32.xlu1 %v1881_v56, %s9635_s9  ;;  %1891 = vst [vmem:[#allocation1 + $0x3] ss:$4 sm:$0xff] %v6681_v34  ;;  %1887 = vrot.lane.b32.xlu2 %v1883_v26, %s9635_s9 }
 0x4b7   : > { %v7335_v59 = vpop.permute.xlu1 %1748 }
 0x4bc   : > { %v1894_v18 = vld.sshfl [vmem:[#allocation1 + $0x8] sm:$0xff pattern:$0x73625140]  ;;  %v1892_v20 = vld.sshfl [vmem:[#allocation1] sm:$0xff pattern:$0x73625140] }
 0x4bd   : > { %1898 = vrot.lane.b32.xlu1 %v1894_v18, %s9650_s30  ;;  %1896 = vrot.lane.b32.xlu0 %v1892_v20, %s9650_s30  ;;  %1901 = vst [vmem:[#allocation1] ss:$4 sm:$0xff] %v6681_v34 }
 0x4bf   : > { %v7322_v31 = vpop.permute.xlu2 %1771 }
 0x4c4   : > { %v1904_v28 = vld.sshfl [vmem:[#allocation1 + $0x8] sm:$0xff pattern:$0x73625140]  ;;  %v1902_v30 = vld.sshfl [vmem:[#allocation1] sm:$0xff pattern:$0x73625140]  ;;  %v1580_v62 = vpop.permute.xlu0 %1579 }
 0x4c5   : > { %1908 = vrot.lane.b32.xlu0 %v1904_v28, %s9636_s29  ;;  %1912 = vst [vmem:[#allocation1 + $0x1] ss:$4 sm:$0xff] %v6815_v29  ;;  %1906 = vrot.lane.b32.xlu2 %v1902_v30, %s9636_s29 }
 0x4cc   : > { %v1913_v35 = vld.sshfl [vmem:[#allocation1] sm:$0xff pattern:$0x73625140]  ;;  %v7343_v3 = vpop.permute.xlu0 %1760 }
 0x4cd   : > { %1915 = vrot.lane.b32.xlu1 %v1913_v35, %s9641_s10  ;;  %1918 = vst [vmem:[#allocation1 + $0x2] ss:$4 sm:$0xff] %v6815_v29 }
 0x4cf   : > { %v7339_v19 = vpop.permute.xlu1 %1766 }
 0x4d4   : > { %v1584_v36 = vpop.permute.xlu2 %1583  ;;  %v1919_v41 = vld.sshfl [vmem:[#allocation1] sm:$0xff pattern:$0x73625140] }
 0x4d5   : > { %v1614_v40 = vsel %vm376_vm0, %v1584_v36, 0  ;;  %1924 = vst [vmem:[#allocation1 + $0x3] ss:$4 sm:$0xff] %v6815_v29  ;;  %1921 = vrot.lane.b32.xlu2 %v1919_v41, %s9642_s1 }
 0x4d6   : > { %1655 = vmatpush.bf16.msra.mxu3 %v1614_v40 }
 0x4dc   : > { %v1925_v54 = vld.sshfl [vmem:[#allocation1] sm:$0xff pattern:$0x73625140]  ;;  %v7347_v6 = vpop.permute.xlu2 %1789 }
 0x4dd   : > { %1927 = vrot.lane.b32.xlu0 %v1925_v54, %s9643_s8  ;;  %1929 = vst [vmem:[#allocation1] ss:$4 sm:$0xff] %v6815_v29 }
 0x4df   : > { %v7349_v38 = vpop.permute.xlu0 %1777 }
 0x4e4   : > { %v1930_v0 = vld.sshfl [vmem:[#allocation1] sm:$0xff pattern:$0x73625140] }
 0x4e5   : > { %1932 = vrot.lane.b32.xlu1 %v1930_v0, %s9644_s6  ;;  %1935 = vst [vmem:[#allocation1 + $0x1] ss:$4 sm:$0xff] %v6815_v29  ;;  %s9675_s6 = smov 39  }
 0x4ec   : > { %v1582_v4 = vpop.permute.xlu1 %1581  ;;  %v1936_v5 = vld.sshfl [vmem:[#allocation1] sm:$0xff pattern:$0x73625140] }
 0x4ed   : > { %1656 = vmatpush.bf16.msra.mxu3 %v1582_v4  ;;  %1941 = vst [vmem:[#allocation1 + $0x2] ss:$4 sm:$0xff] %v6815_v29  ;;  %1938 = vrot.lane.b32.xlu2 %v1936_v5, %s9645_s7  ;;  %s9672_s7 = smov 50  }
 0x4ef   : > { %v1843_v10 = vpop.permute.xlu2 %1842 }
 0x4f1   : > { %1657 = vmatpush.bf16.msra.mxu3 %v1580_v62 }
 0x4f4   : > { %v1942_v21 = vld.sshfl [vmem:[#allocation1] sm:$0xff pattern:$0x73625140]  ;;  %v7353_v27 = vpop.permute.xlu1 %1783 }
 0x4f5   : > { %1658 = vmatpush.bf16.msra.mxu3 %v1578_v13  ;;  %1944 = vrot.lane.b32.xlu0 %v1942_v21, %s9660_s20  ;;  %1947 = vst [vmem:[#allocation1 + $0x3] ss:$4 sm:$0xff] %v6815_v29 }
 0x4f7   : > { %v1856_v51 = vpop.permute.xlu2 %1855 }
 0x4f9   : > { %1659 = vmatpush.bf16.msra.mxu3 %v1567_v24 }
 0x4fc   : > { %v1948_v9 = vld.sshfl [vmem:[#allocation1] sm:$0xff pattern:$0x73625140] }
 0x4fd   : > { %1660 = vmatpush.bf16.msra.mxu3 %v7264_v50  ;;  %1950 = vrot.lane.b32.xlu1 %v1948_v9, %s9661_s24  ;;  %1997 = vst [vmem:[#allocation1 + $0x1] ss:$4 sm:$0xff] %v6815_v29 }
 0x4ff   : > { %v1832_v55 = vpop.permute.xlu0 %1831  ;;  %v1834_v57 = vpop.permute.xlu1 %1833 }
 0x500   : > { %v1955_v50 = vsel %vm376_vm0, %v7282_v60, %v1834_v57  ;;  %v1835_v46 = vsel %vm9589_vm1, %v1832_v55, %v1834_v57 }
 0x501   : > { %1661 = vmatpush.bf16.msra.mxu3 %v7246_v39  ;;  %v1953_v60 = vsel %vm376_vm0, %v7280_v32, %v1835_v46 }
 0x504   : > { %v1998_v15 = vld.sshfl [vmem:[#allocation1] sm:$0xff pattern:$0x73625140] }
 0x505   : > { %1662 = vmatpush.bf16.msra.mxu3 %v1569_v33  ;;  %2003 = vst [vmem:[#allocation1 + $0x2] ss:$4 sm:$0xff] %v6815_v29  ;;  %2000 = vrot.lane.b32.xlu2 %v1998_v15, %s9646_s21 }
 0x507   : > { %v1845_v1 = vpop.permute.xlu0 %1844  ;;  %v1875_v18 = vpop.permute.xlu2 %1874 }
 0x508   : > { %6001 = vmatmul.msk.bf16.vlgmr.msra.gmra.mxu3 %vm470_vm7, %v7363_v49  ;;  %v1959_v39 = vsel %vm379_vm2, %v1955_v50, %v1845_v1  ;;  %v1846_v43 = vsel %vm9588_vm3, %v1843_v10, %v1845_v1 }
 0x509   : > { %v1963_v52 = vsel %vm382_vm4, %v1959_v39, %v1856_v51  ;;  %v1957_v12 = vsel %vm379_vm2, %v1953_v60, %v1846_v43 }
 0x50a   : > { %2851 = vrot.lane.b32.xlu1 %v1963_v52, %s9663_s3 }
 0x50c   : > { %v2004_v2 = vld.sshfl [vmem:[#allocation1] sm:$0xff pattern:$0x73625140] }
 0x50d   : > { %2006 = vrot.lane.b32.xlu0 %v2004_v2, %s9631_s18  ;;  %2009 = vst [vmem:[#allocation1 + $0x3] ss:$4 sm:$0xff] %v6815_v29 }
 0x50f   : > { %v1854_v48 = vpop.permute.xlu1 %1853  ;;  %v1888_v41 = vpop.permute.xlu2 %1887 }
 0x510   : > { %v1857_v13 = vsel %vm9553_vm5, %v1854_v48, %v1856_v51  ;;  %vm9681_vm5 = vcmask 744448  }
 0x511   : > { %v1961_v14 = vsel %vm382_vm4, %v1957_v12, %v1857_v13 }
 0x514   : > { %v2010_v45 = vld.sshfl [vmem:[#allocation1] sm:$0xff pattern:$0x73625140] }
 0x515   : > { %2012 = vrot.lane.b32.xlu1 %v2010_v45, %s9647_s14  ;;  %2014 = vst [vmem:[#allocation1] ss:$4 sm:$0xff] %v6815_v29  ;;  %2849 = vrot.lane.b32.xlu0 %v1961_v14, %s9663_s3 }
 0x517   : > { %v1864_v32 = vpop.permute.xlu0 %1863  ;;  %v1866_v26 = vpop.permute.xlu1 %1865 }
 0x518   : > { %v1867_v30 = vsel %vm458_vm6, %v1864_v32, %v1866_v26 }
 0x51c   : > { %v2015_v56 = vld.sshfl [vmem:[#allocation1] sm:$0xff pattern:$0x73625140] }
 0x51d   : > { %2020 = vst [vmem:[#allocation1 + $0x1] ss:$4 sm:$0xff] %v6815_v29  ;;  %2017 = vrot.lane.b32.xlu2 %v2015_v56, %s9648_s0 }
 0x51f   : > { %v1877_v24 = vpop.permute.xlu0 %1876  ;;  %v1907_v57 = vpop.permute.xlu2 %1906 }
 0x520   : > { %v1878_v35 = vsel %vm470_vm7, %v1875_v18, %v1877_v24  ;;  %v1969_v36 = vsel %vm376_vm0, %v1866_v26, %v1877_v24 }
 0x521   : > { %v1966_v40 = vsel %vm376_vm0, %v1867_v30, %v1878_v35  ;;  %v1973_v0 = vsel %vm379_vm2, %v1969_v36, %v1888_v41 }
 0x524   : > { %v2021_v20 = vld.sshfl [vmem:[#allocation1] sm:$0xff pattern:$0x73625140] }
 0x525   : > { %2023 = vrot.lane.b32.xlu0 %v2021_v20, %s9649_s2  ;;  %2026 = vst [vmem:[#allocation1 + $0x2] ss:$4 sm:$0xff] %v6815_v29 }
 0x527   : > { %v1886_v28 = vpop.permute.xlu1 %1885 }
 0x528   : > { %v1889_v54 = vsel %vm9657_vm15, %v1886_v28, %v1888_v41  ;;  %vm9678_vm15 = vcmask 769024  }
 0x529   : > { %v1971_v4 = vsel %vm379_vm2, %v1966_v40, %v1889_v54 }
 0x52c   : > { %v2027_v62 = vld.sshfl [vmem:[#allocation1] sm:$0xff pattern:$0x73625140] }
 0x52d   : > { %2029 = vrot.lane.b32.xlu1 %v2027_v62, %s9635_s9  ;;  %2032 = vst [vmem:[#allocation1 + $0x3] ss:$4 sm:$0xff] %v6815_v29 }
 0x52f   : > { %v1899_v5 = vpop.permute.xlu1 %1898  ;;  %v1897_v21 = vpop.permute.xlu0 %1896 }
 0x530   : > { %v1977_v9 = vsel %vm382_vm4, %v1973_v0, %v1899_v5  ;;  %v1900_v10 = vsel %vm9664_vm9, %v1897_v21, %v1899_v5  ;;  %vm9665_vm9 = vcmask 924672   ;;  %v1922_v52 = vpop.permute.xlu2 %1921 }
 0x531   : > { %2855 = vrot.lane.b32.xlu0 %v1977_v9, %s9663_s3  ;;  %v1975_v55 = vsel %vm382_vm4, %v1971_v4, %v1900_v10 }
 0x532   : > { %2853 = vrot.lane.b32.xlu2 %v1975_v55, %s9663_s3 }
 0x534   : > { %v2033_v61 = vld.sshfl [vmem:[#allocation1] sm:$0xff pattern:$0x73625140] }
 0x535   : > { %2037 = vst [vmem:[#allocation1] ss:$4 sm:$0xff] %v6815_v29 }
 0x537   : > { %v1909_v51 = vpop.permute.xlu0 %1908 }
 0x538   : > { %v1910_v39 = vsel %vm9665_vm9, %v1907_v57, %v1909_v51  ;;  %vm9679_vm9 = vcmask 760832  }
 0x53a   : > { %2035 = vrot.lane.b32.xlu2 %v2033_v61, %s9650_s30 }
 0x53c   : > { %v2038_v33 = vld.sshfl [vmem:[#allocation1] sm:$0xff pattern:$0x73625140] }
 0x53d   : > { %2040 = vrot.lane.b32.xlu0 %v2038_v33, %s9652_s27  ;;  %2043 = vst [vmem:[#allocation1 + $0x1] ss:$4 sm:$0xff] %v6815_v29 }
 0x53f   : > { %v1916_v1 = vpop.permute.xlu1 %1915 }
 0x540   : > { %v1982_v46 = vsel %vm376_vm0, %v1909_v51, %v1916_v1  ;;  %v1980_v2 = vsel %vm376_vm0, %v1910_v39, %v1916_v1 }
 0x541   : > { %v1985_v48 = vsel %vm379_vm2, %v1982_v46, %v1922_v52  ;;  %v1984_v12 = vsel %vm379_vm2, %v1980_v2, %v1922_v52 }
 0x544   : > { %v2044_v15 = vld.sshfl [vmem:[#allocation1] sm:$0xff pattern:$0x73625140]  ;;  %v2046_v50 = vld.sshfl [vmem:[#allocation1 + $0x8] sm:$0xff pattern:$0x73625140] }
 0x545   : > { %2048 = vrot.lane.b32.xlu1 %v2044_v15, %s9653_s26  ;;  %2054 = vst [vmem:[#allocation1 + $0x2] ss:$4 sm:$0xff] %v6815_v29  ;;  %2050 = vrot.lane.b32.xlu2 %v2046_v50, %s9653_s26 }
 0x547   : > { %v1939_v30 = vpop.permute.xlu2 %1938 }
 0x54c   : > { %v2055_v60 = vld.sshfl [vmem:[#allocation1] sm:$0xff pattern:$0x73625140]  ;;  %v2057_v43 = vld.sshfl [vmem:[#allocation1 + $0x8] sm:$0xff pattern:$0x73625140] }
 0x54d   : > { %2059 = vrot.lane.b32.xlu0 %v2055_v60, %s9630_s19  ;;  %2061 = vrot.lane.b32.xlu1 %v2057_v43, %s9630_s19  ;;  %2065 = vst [vmem:[#allocation1 + $0x3] ss:$4 sm:$0xff] %v6815_v29 }
 0x54f   : > { %v1928_v13 = vpop.permute.xlu0 %1927 }
 0x550   : > { %v1988_v14 = vsel %vm382_vm4, %v1985_v48, %v1928_v13  ;;  %v1987_v45 = vsel %vm382_vm4, %v1984_v12, %v1928_v13 }
 0x551   : > { %2859 = vrot.lane.b32.xlu2 %v1988_v14, %s9663_s3 }
 0x554   : > { %v2068_v32 = vld.sshfl [vmem:[#allocation1 + $0x8] sm:$0xff pattern:$0x73625140]  ;;  %v2066_v56 = vld.sshfl [vmem:[#allocation1] sm:$0xff pattern:$0x73625140] }
 0x555   : > { %2072 = vrot.lane.b32.xlu0 %v2068_v32, %s9654_s23  ;;  %2075 = vst [vmem:[#allocation1] ss:$4 sm:$0xff] %v6815_v29  ;;  %2857 = vrot.lane.b32.xlu1 %v1987_v45, %s9663_s3 }
 0x557   : > { %v1933_v28 = vpop.permute.xlu1 %1932 }
 0x558   : > { %v1991_v36 = vsel %vm376_vm0, %v1933_v28, %v1939_v30 }
 0x559   : > { %2070 = vrot.lane.b32.xlu2 %v2066_v56, %s9654_s23 }
 0x55c   : > { %v2076_v26 = vld.sshfl [vmem:[#allocation1] sm:$0xff pattern:$0x73625140]  ;;  %v2078_v18 = vld.sshfl [vmem:[#allocation1 + $0x8] sm:$0xff pattern:$0x73625140] }
 0x55d   : > { %2086 = vst [vmem:[#allocation1 + $0x1] ss:$4 sm:$0xff] %v6815_v29  ;;  %2080 = vrot.lane.b32.xlu1 %v2076_v26, %s9655_s22 }
 0x55f   : > { %v2001_v55 = vpop.permute.xlu2 %2000 }
 0x560   : > { %v2119_v57 = vsel %vm376_vm0, %v6815_v29, %v2001_v55 }
 0x561   : > { %2082 = vrot.lane.b32.xlu2 %v2078_v18, %s9655_s22 }
 0x564   : > { %v2087_v20 = vld.sshfl [vmem:[#allocation1] sm:$0xff pattern:$0x73625140]  ;;  %v2089_v24 = vld.sshfl [vmem:[#allocation1 + $0x8] sm:$0xff pattern:$0x73625140] }
 0x565   : > { %2091 = vrot.lane.b32.xlu0 %v2087_v20, %s9666_s4  ;;  %2097 = vst [vmem:[#allocation1 + $0x2] ss:$4 sm:$0xff] %v6815_v29  ;;  %2093 = vrot.lane.b32.xlu1 %v2089_v24, %s9666_s4  ;;  %s9670_s4 = smov 108  }
 0x567   : > { %v1945_v41 = vpop.permute.xlu0 %1944 }
 0x568   : > { %v1993_v54 = vsel %vm379_vm2, %v1991_v36, %v1945_v41 }
 0x56c   : > { %v2100_v35 = vld.sshfl [vmem:[#allocation1 + $0x8] sm:$0xff pattern:$0x73625140]  ;;  %v2098_v40 = vld.sshfl [vmem:[#allocation1] sm:$0xff pattern:$0x73625140] }
 0x56d   : > { %2104 = vrot.lane.b32.xlu0 %v2100_v35, %s9667_s13  ;;  %2102 = vrot.lane.b32.xlu2 %v2098_v40, %s9667_s13  ;;  %2108 = vst [vmem:[#allocation1 + $0x3] ss:$4 sm:$0xff] %v6815_v29  ;;  %s9669_s13 = smov 51  }
 0x56f   : > { %v1951_v62 = vpop.permute.xlu1 %1950 }
 0x570   : > { %v1995_v0 = vsel %vm382_vm4, %v1993_v54, %v1951_v62 }
 0x574   : > { %v2109_v4 = vld.sshfl [vmem:[#allocation1] sm:$0xff pattern:$0x73625140]  ;;  %v2111_v5 = vld.sshfl [vmem:[#allocation1 + $0x8] sm:$0xff pattern:$0x73625140] }
 0x575   : > { %2861 = vrot.lane.b32.xlu0 %v1995_v0, %s9663_s3  ;;  %2113 = vrot.lane.b32.xlu1 %v2109_v4, %s9659_s5  ;;  %2145 = vst [vmem:[#allocation1] ss:$4 sm:$0xff] %v6815_v29  ;;  %s9671_s3 = smov 120  }
 0x576   : > { %2115 = vrot.lane.b32.xlu2 %v2111_v5, %s9659_s5 }
 0x57c   : > { %v7442_v21 = vld.sshfl [vmem:[#allocation1] sm:$0xff pattern:$0x73625140]  ;;  %v7444_v9 = vld.sshfl [vmem:[#allocation1 + $0x8] sm:$0xff pattern:$0x73625140]  ;;  %v7446_v10 = vpop.permute.xlu1 %2851 }
 0x57d   : > { %2149 = vst [vmem:[#allocation1 + $0x1] ss:$4 sm:$0xff] %v6815_v29 }
 0x57f   : > { %v2007_v15 = vpop.permute.xlu0 %2006 }
 0x580   : > { %v2121_v50 = vsel %vm379_vm2, %v2119_v57, %v2007_v15 }
 0x584   : > { %v2152_v61 = vld.sshfl [vmem:[#allocation1 + $0x8] sm:$0xff pattern:$0x73625140]  ;;  %v2150_v33 = vld.sshfl [vmem:[#allocation1] sm:$0xff pattern:$0x73625140] }
 0x585   : > { %2156 = vrot.lane.b32.xlu1 %v2152_v61, %s9646_s21  ;;  %2154 = vrot.lane.b32.xlu0 %v2150_v33, %s9646_s21  ;;  %2160 = vst [vmem:[#allocation1 + $0x2] ss:$4 sm:$0xff] %v6967_v8 }
 0x587   : > { %v2013_v51 = vpop.permute.xlu1 %2012  ;;  %v7470_v2 = vpop.permute.xlu0 %2849 }
 0x588   : > { %v2123_v1 = vsel %vm382_vm4, %v2121_v50, %v2013_v51 }
 0x58b   : > { %v1664_v39 = vpop.f32.mrf.mxu3 }
 0x58c   : > { %v7457_v46 = vadd.f32 %v1664_v39, %v7295_v44  ;;  %v2161_v52 = vld.sshfl [vmem:[#allocation1] sm:$0xff pattern:$0x73625140]  ;;  %v2018_v44 = vpop.permute.xlu2 %2017 }
 0x58d   : > { %2874 = vrot.lane.b32.xlu1 %v2123_v1, %s9650_s30  ;;  %2163 = vrot.lane.b32.xlu2 %v2161_v52, %s9669_s13  ;;  %2166 = vst [vmem:[#allocation1 + $0x3] ss:$4 sm:$0xff] %v6967_v8  ;;  %s9674_s13 = smov 48  }
 0x58e   : > { %9668 = vst [vmem:[#allocation34_spill] sm:$0xff] %v7457_v46  ;;  %1681 = vrot.lane.b32.xlu0 %v7457_v46, %s9670_s4 }
 0x593   : > { %v1666_v60 = vpop.f32.mrf.mxu3 }
 0x594   : > { %v2167_v43 = vld.sshfl [vmem:[#allocation1] sm:$0xff pattern:$0x73625140]  ;;  %v7477_v12 = vpop.permute.xlu2 %2853 }
 0x595   : > { %1669 = vrot.lane.b32.xlu1 %v7457_v46, %s9634_s16  ;;  %1672 = vrot.lane.b32.xlu2 %v7457_v46, %s9671_s3  ;;  %2171 = vst [vmem:[#allocation1] ss:$4 sm:$0xff] %v6967_v8 }
 0x596   : > { %2169 = vrot.lane.b32.xlu0 %v2167_v43, %s9672_s7  ;;  %s9673_s7 = smov 47  }
 0x597   : > { %v2024_v13 = vpop.permute.xlu0 %2023 }
 0x598   : > { %v2126_v50 = vsel %vm376_vm0, %v2018_v44, %v2024_v13 }
 0x59c   : > { %v2172_v48 = vld.sshfl [vmem:[#allocation1] sm:$0xff pattern:$0x73625140]  ;;  %v2036_v45 = vpop.permute.xlu2 %2035 }
 0x59d   : > { %1675 = vrot.lane.b32.xlu1 %v7457_v46, %s9649_s2  ;;  %1678 = vrot.lane.b32.xlu2 %v7457_v46, %s9637_s17  ;;  %2177 = vst [vmem:[#allocation1 + $0x1] ss:$4 sm:$0xff] %v6967_v8 }
 0x59f   : > { %v2030_v26 = vpop.permute.xlu1 %2029 }
 0x5a0   : > { %v2128_v51 = vsel %vm379_vm2, %v2126_v50, %v2030_v26 }
 0x5a1   : > { %v2130_v1 = vsel %vm382_vm4, %v2128_v51, %v2036_v45 }
 0x5a3   : > { %v7484_v32 = vpop.permute.xlu0 %2855 }
 0x5a4   : > { %v2178_v14 = vld.sshfl [vmem:[#allocation1] sm:$0xff pattern:$0x73625140]  ;;  %v2051_v18 = vpop.permute.xlu2 %2050 }
 0x5a5   : > { %1684 = vrot.lane.b32.xlu1 %v7457_v46, %s9630_s19  ;;  %1687 = vrot.lane.b32.xlu2 %v7457_v46, %s9633_s15  ;;  %2183 = vst [vmem:[#allocation1 + $0x2] ss:$4 sm:$0xff] %v6967_v8 }
 0x5ac   : > { %v2184_v56 = vld.sshfl [vmem:[#allocation1] sm:$0xff pattern:$0x73625140]  ;;  %v2860_v35 = vpop.permute.xlu2 %2859 }
 0x5ad   : > { %2174 = vrot.lane.b32.xlu1 %v2172_v48, %s9640_s12  ;;  %2186 = vrot.lane.b32.xlu0 %v2184_v56, %s9673_s7  ;;  %2189 = vst [vmem:[#allocation1 + $0x3] ss:$4 sm:$0xff] %v6967_v8 }
 0x5ae   : > { %2180 = vrot.lane.b32.xlu2 %v2178_v14, %s9674_s13 }
 0x5af   : > { %v2041_v24 = vpop.permute.xlu0 %2040 }
 0x5b4   : > { %v2190_v20 = vld.sshfl [vmem:[#allocation1] sm:$0xff pattern:$0x73625140]  ;;  %v2071_v4 = vpop.permute.xlu2 %2070 }
 0x5b5   : > { %2192 = vrot.lane.b32.xlu1 %v2190_v20, %s9675_s6  ;;  %2194 = vst [vmem:[#allocation1] ss:$4 sm:$0xff] %v6967_v8  ;;  %s9676_s6 = smov 38  }
 0x5b6   : > { %2876 = vrot.lane.b32.xlu2 %v2130_v1, %s9650_s30 }
 0x5b7   : > { %v2049_v28 = vpop.permute.xlu1 %2048 }
 0x5b8   : > { %v2052_v40 = vsel %vm649_vm11, %v2049_v28, %v2051_v18 }
 0x5b9   : > { %v2133_v54 = vsel %vm376_vm0, %v2041_v24, %v2052_v40 }
 0x5bc   : > { %v2195_v30 = vld.sshfl [vmem:[#allocation1] sm:$0xff pattern:$0x73625140]  ;;  %v2083_v39 = vpop.permute.xlu2 %2082 }
 0x5bd   : > { %2200 = vst [vmem:[#allocation1 + $0x1] ss:$4 sm:$0xff] %v6967_v8 }
 0x5be   : > { %2197 = vrot.lane.b32.xlu2 %v2195_v30, %s9676_s6  ;;  %s9685_s6 = smov 119  }
 0x5bf   : > { %v2060_v36 = vpop.permute.xlu0 %2059  ;;  %v2062_v41 = vpop.permute.xlu1 %2061 }
 0x5c0   : > { %v2063_v62 = vsel %vm661_vm12, %v2060_v36, %v2062_v41 }
 0x5c1   : > { %v2135_v5 = vsel %vm379_vm2, %v2133_v54, %v2063_v62 }
 0x5c4   : > { %v2201_v0 = vld.sshfl [vmem:[#allocation1] sm:$0xff pattern:$0x73625140] }
 0x5c5   : > { %2203 = vrot.lane.b32.xlu0 %v2201_v0, %s9641_s10  ;;  %2206 = vst [vmem:[#allocation1 + $0x2] ss:$4 sm:$0xff] %v6967_v8  ;;  %s9677_s10 = smov 27  }
 0x5c7   : > { %v2073_v55 = vpop.permute.xlu0 %2072  ;;  %v2858_v33 = vpop.permute.xlu1 %2857 }
 0x5c8   : > { %v2074_v61 = vsel %vm673_vm13, %v2071_v4, %v2073_v55  ;;  %v2103_v44 = vpop.permute.xlu2 %2102  ;;  %v2865_v41 = vsel %vm9681_vm5, %v2858_v33, %v2860_v35  ;;  %v1816_v35 = vsel %vm376_vm0, %v7322_v31, %v7349_v38  ;;  %v2863_v4 = vsel %vm9681_vm5, %v7470_v2, %v7446_v10 }
 0x5c9   : > { %v2137_v57 = vsel %vm382_vm4, %v2135_v5, %v2074_v61  ;;  %v1818_v5 = vsel %vm379_vm2, %v1816_v35, %v7353_v27  ;;  %v1800_v27 = vsel %vm376_vm0, %v7324_v53, %v7328_v25 }
 0x5ca   : > { %v1820_v31 = vsel %vm382_vm4, %v1818_v5, %v7347_v6  ;;  %v1792_v6 = vsel %vm376_vm0, %v6681_v34, %v7317_v23 }
 0x5cc   : > { %v2207_v15 = vld.sshfl [vmem:[#allocation1] sm:$0xff pattern:$0x73625140] }
 0x5cd   : > { %2878 = vrot.lane.b32.xlu0 %v2137_v57, %s9650_s30  ;;  %2209 = vrot.lane.b32.xlu1 %v2207_v15, %s9642_s1  ;;  %2212 = vst [vmem:[#allocation1 + $0x3] ss:$4 sm:$0xff] %v6967_v8  ;;  %s9680_s1 = smov 26  }
 0x5cf   : > { %v2081_v52 = vpop.permute.xlu1 %2080 }
 0x5d0   : > { %v2084_v45 = vsel %vm684_vm14, %v2081_v52, %v2083_v39  ;;  %v2116_v28 = vpop.permute.xlu2 %2115 }
 0x5d4   : > { %v2213_v60 = vld.sshfl [vmem:[#allocation1] sm:$0xff pattern:$0x73625140] }
 0x5d5   : > { %2217 = vst [vmem:[#allocation1] ss:$4 sm:$0xff] %v6967_v8  ;;  %2215 = vrot.lane.b32.xlu2 %v2213_v60, %s9643_s8 }
 0x5d7   : > { %v2092_v43 = vpop.permute.xlu0 %2091  ;;  %v2094_v13 = vpop.permute.xlu1 %2093 }
 0x5d8   : > { %v2095_v56 = vsel %vm9678_vm15, %v2092_v43, %v2094_v13  ;;  %vm9682_vm15 = vmmov %vm9681_vm5  ;;  %vm9696_vm5 = vcmask 883712  }
 0x5d9   : > { %v2140_v20 = vsel %vm376_vm0, %v2084_v45, %v2095_v56  ;;  %v2864_v0 = vsel %vm9682_vm15, %v7477_v12, %v7484_v32  ;;  %v1808_v32 = vsel %vm376_vm0, %v7335_v59, %v7315_v22  ;;  %v1802_v59 = vsel %vm379_vm2, %v1800_v27, %v7308_v16 }
 0x5da   : > { %v1810_v10 = vsel %vm379_vm2, %v1808_v32, %v7343_v3  ;;  %v1804_v53 = vsel %vm382_vm4, %v1802_v59, %v7333_v42  ;;  %v1794_v16 = vsel %vm379_vm2, %v1792_v6, %v7310_v17  ;;  %vm9695_vm15 = vcmask 965632  }
 0x5db   : > { %v1812_v22 = vsel %vm382_vm4, %v1810_v10, %v7339_v19  ;;  %v1796_v34 = vsel %vm382_vm4, %v1794_v16, %v7297_v47 }
 0x5dc   : > { %v2218_v48 = vld.sshfl [vmem:[#allocation1] sm:$0xff pattern:$0x73625140] }
 0x5dd   : > { %2220 = vrot.lane.b32.xlu0 %v2218_v48, %s9677_s10  ;;  %2223 = vst [vmem:[#allocation1 + $0x1] ss:$4 sm:$0xff] %v6967_v8 }
 0x5df   : > { %v2105_v14 = vpop.permute.xlu0 %2104 }
 0x5e0   : > { %v2106_v18 = vsel %vm9679_vm9, %v2103_v44, %v2105_v14  ;;  %vm9694_vm9 = vcmask 973824  }
 0x5e1   : > { %v2142_v36 = vsel %vm379_vm2, %v2140_v20, %v2106_v18 }
 0x5e4   : > { %v2224_v26 = vld.sshfl [vmem:[#allocation1] sm:$0xff pattern:$0x73625140] }
 0x5e5   : > { %2226 = vrot.lane.b32.xlu1 %v2224_v26, %s9680_s1  ;;  %2229 = vst [vmem:[#allocation1 + $0x2] ss:$4 sm:$0xff] %v6967_v8 }
 0x5e7   : > { %v2862_v24 = vpop.permute.xlu0 %2861  ;;  %v2114_v30 = vpop.permute.xlu1 %2113 }
 0x5e8   : > { %2975 = vmatpush.bf16.msrb.mxu0 %v2862_v24  ;;  %v2117_v40 = vsel %vm720_vm8, %v2114_v30, %v2116_v28  ;;  %v2164_v55 = vpop.permute.xlu2 %2163 }
 0x5e9   : > { %v2144_v54 = vsel %vm382_vm4, %v2142_v36, %v2117_v40 }
 0x5ec   : > { %2976 = vmatpush.bf16.msrb.mxu0 %v2865_v41  ;;  %v2230_v62 = vld.sshfl [vmem:[#allocation1] sm:$0xff pattern:$0x73625140] }
 0x5ed   : > { %2235 = vst [vmem:[#allocation1 + $0x3] ss:$4 sm:$0xff] %v6967_v8  ;;  %2232 = vrot.lane.b32.xlu2 %v2230_v62, %s9660_s20  ;;  %2880 = vrot.lane.b32.xlu1 %v2144_v54, %s9650_s30 }
 0x5f0   : > { %2977 = vmatpush.bf16.msrb.mxu0 %v2864_v0  ;;  %v7571_v15 = vpop.permute.xlu2 %1672 }
 0x5f1   : > { %9684 = vst [vmem:[#allocation36_spill] sm:$0xff] %v7571_v15 }
 0x5f4   : > { %2978 = vmatpush.bf16.msrb.mxu0 %v2863_v4  ;;  %v2236_v12 = vld.sshfl [vmem:[#allocation1] sm:$0xff pattern:$0x73625140] }
 0x5f5   : > { %2238 = vrot.lane.b32.xlu0 %v2236_v12, %s9661_s24  ;;  %2272 = vst [vmem:[#allocation1 + $0x1] ss:$4 sm:$0xff] %v6967_v8 }
 0x5f7   : > { %v2157_v38 = vpop.permute.xlu1 %2156  ;;  %v2155_v2 = vpop.permute.xlu0 %2154 }
 0x5f8   : > { %2979 = vmatpush.bf16.msrb.mxu0 %v1820_v31  ;;  %v2158_v19 = vsel %vm9589_vm1, %v2155_v2, %v2157_v38  ;;  %v2243_v23 = vsel %vm376_vm0, %v7444_v9, %v2157_v38  ;;  %v7589_v52 = vpop.permute.xlu2 %1678 }
 0x5f9   : > { %v2241_v42 = vsel %vm376_vm0, %v7442_v21, %v2158_v19  ;;  %v2246_v17 = vsel %vm379_vm2, %v2243_v23, %v2164_v55  ;;  %9688 = vst [vmem:[#allocation38_spill] sm:$0xff] %v7589_v52 }
 0x5fa   : > { %v2245_v50 = vsel %vm379_vm2, %v2241_v42, %v2164_v55 }
 0x5fc   : > { %2980 = vmatpush.bf16.msrb.mxu0 %v1812_v22  ;;  %v2273_v61 = vld.sshfl [vmem:[#allocation1] sm:$0xff pattern:$0x73625140] }
 0x5fd   : > { %2275 = vrot.lane.b32.xlu1 %v2273_v61, %s9671_s3  ;;  %2278 = vst [vmem:[#allocation1 + $0x2] ss:$4 sm:$0xff] %v6967_v8  ;;  %s9692_s3 = smov 107  }
 0x5ff   : > { %v7558_v3 = vpop.permute.xlu1 %2874 }
 0x600   : > { %2981 = vmatpush.bf16.msrb.mxu0 %v1804_v53  ;;  %v7562_v25 = vpop.permute.xlu0 %1681  ;;  %v7599_v13 = vpop.permute.xlu2 %1687 }
 0x601   : > { %9683 = vst [vmem:[#allocation35_spill] sm:$0xff] %v7562_v25 }
 0x602   : > { %9691 = vst [vmem:[#allocation41_spill] sm:$0xff] %v7599_v13 }
 0x604   : > { %2982 = vmatpush.bf16.msrb.mxu0 %v1796_v34  ;;  %v2281_v33 = vld.sshfl [vmem:[#allocation1 + $0x8] sm:$0xff pattern:$0x73625140]  ;;  %v2279_v57 = vld.sshfl [vmem:[#allocation1] sm:$0xff pattern:$0x73625140] }
 0x605   : > { %2285 = vrot.lane.b32.xlu0 %v2281_v33, %s9685_s6  ;;  %2289 = vst [vmem:[#allocation1 + $0x3] ss:$4 sm:$0xff] %v6967_v8  ;;  %2283 = vrot.lane.b32.xlu2 %v2279_v57, %s9685_s6  ;;  %s9687_s6 = smov 77  }
 0x607   : > { %2983 = vmatmul.bf16.vlgmr.msrb.gmra.mxu0 %v6919_v11  ;;  %v7579_v47 = vpop.permute.xlu1 %1669 }
 0x608   : > { %9686 = vst [vmem:[#allocation37_spill] sm:$0xff] %v7579_v47  ;;  %v2170_v9 = vpop.permute.xlu0 %2169  ;;  %v2181_v26 = vpop.permute.xlu2 %2180 }
 0x609   : > { %v2249_v51 = vsel %vm382_vm4, %v2246_v17, %v2170_v9  ;;  %v2248_v1 = vsel %vm382_vm4, %v2245_v50, %v2170_v9 }
 0x60c   : > { %v2290_v21 = vld.sshfl [vmem:[#allocation1] sm:$0xff pattern:$0x73625140]  ;;  %v2292_v39 = vld.sshfl [vmem:[#allocation1 + $0x8] sm:$0xff pattern:$0x73625140] }
 0x60d   : > { %2294 = vrot.lane.b32.xlu1 %v2290_v21, %s9647_s14  ;;  %2299 = vst [vmem:[#allocation1] ss:$4 sm:$0xff] %v6967_v8  ;;  %2893 = vrot.lane.b32.xlu0 %v2249_v51, %s9687_s6 }
 0x60e   : > { %2891 = vrot.lane.b32.xlu2 %v2248_v1, %s9687_s6 }
 0x60f   : > { %v7591_v60 = vpop.permute.xlu1 %1675 }
 0x610   : > { %9689 = vst [vmem:[#allocation39_spill] sm:$0xff] %v7591_v60  ;;  %v7613_v62 = vpop.permute.xlu2 %2876 }
 0x614   : > { %v2302_v43 = vld.sshfl [vmem:[#allocation1 + $0x8] sm:$0xff pattern:$0x73625140]  ;;  %v2300_v48 = vld.sshfl [vmem:[#allocation1] sm:$0xff pattern:$0x73625140] }
 0x615   : > { %2306 = vrot.lane.b32.xlu1 %v2302_v43, %s9648_s0  ;;  %2304 = vrot.lane.b32.xlu0 %v2300_v48, %s9648_s0  ;;  %2310 = vst [vmem:[#allocation1 + $0x1] ss:$4 sm:$0xff] %v6967_v8 }
 0x616   : > { %2296 = vrot.lane.b32.xlu2 %v2292_v39, %s9647_s14 }
 0x617   : > { %v7597_v44 = vpop.permute.xlu1 %1684 }
 0x618   : > { %9690 = vst [vmem:[#allocation40_spill] sm:$0xff] %v7597_v44  ;;  %v2198_v4 = vpop.permute.xlu2 %2197 }
 0x61c   : > { %v2311_v14 = vld.sshfl [vmem:[#allocation1] sm:$0xff pattern:$0x73625140]  ;;  %v2313_v45 = vld.sshfl [vmem:[#allocation1 + $0x8] sm:$0xff pattern:$0x73625140] }
 0x61d   : > { %2321 = vst [vmem:[#allocation1 + $0x2] ss:$4 sm:$0xff] %v6967_v8  ;;  %2317 = vrot.lane.b32.xlu0 %v2313_v45, %s9649_s2 }
 0x61e   : > { %2315 = vrot.lane.b32.xlu2 %v2311_v14, %s9649_s2 }
 0x61f   : > { %v2175_v56 = vpop.permute.xlu1 %2174  ;;  %v2187_v28 = vpop.permute.xlu0 %2186 }
 0x620   : > { %v2252_v24 = vsel %vm376_vm0, %v2175_v56, %v2181_v26 }
 0x621   : > { %v2254_v30 = vsel %vm379_vm2, %v2252_v24, %v2187_v28 }
 0x624   : > { %v2322_v18 = vld.sshfl [vmem:[#allocation1] sm:$0xff pattern:$0x73625140]  ;;  %v2324_v20 = vld.sshfl [vmem:[#allocation1 + $0x8] sm:$0xff pattern:$0x73625140] }
 0x625   : > { %2326 = vrot.lane.b32.xlu1 %v2322_v18, %s9670_s4  ;;  %2332 = vst [vmem:[#allocation1 + $0x3] ss:$4 sm:$0xff] %v6967_v8 }
 0x626   : > { %2328 = vrot.lane.b32.xlu2 %v2324_v20, %s9670_s4 }
 0x627   : > { %v2193_v36 = vpop.permute.xlu1 %2192 }
 0x628   : > { %v2256_v41 = vsel %vm382_vm4, %v2254_v30, %v2193_v36 }
 0x62c   : > { %v2335_v40 = vld.sshfl [vmem:[#allocation1 + $0x8] sm:$0xff pattern:$0x73625140]  ;;  %v2333_v54 = vld.sshfl [vmem:[#allocation1] sm:$0xff pattern:$0x73625140] }
 0x62d   : > { %2895 = vrot.lane.b32.xlu1 %v2256_v41, %s9687_s6  ;;  %2337 = vrot.lane.b32.xlu0 %v2333_v54, %s9692_s3  ;;  %2342 = vst [vmem:[#allocation1] ss:$4 sm:$0xff] %v6967_v8 }
 0x62f   : > { %v2216_v2 = vpop.permute.xlu2 %2215 }
 0x634   : > { %v2345_v0 = vld.sshfl [vmem:[#allocation1 + $0x8] sm:$0xff pattern:$0x73625140]  ;;  %v2343_v35 = vld.sshfl [vmem:[#allocation1] sm:$0xff pattern:$0x73625140] }
 0x635   : > { %2339 = vrot.lane.b32.xlu1 %v2335_v40, %s9692_s3  ;;  %2349 = vrot.lane.b32.xlu0 %v2345_v0, %s9652_s27  ;;  %2353 = vst [vmem:[#allocation1 + $0x1] ss:$4 sm:$0xff] %v6967_v8  ;;  %s9693_s3 = smov 28  }
 0x636   : > { %2347 = vrot.lane.b32.xlu2 %v2343_v35, %s9652_s27 }
 0x637   : > { %v2204_v32 = vpop.permute.xlu0 %2203 }
 0x638   : > { %v2259_v31 = vsel %vm376_vm0, %v2198_v4, %v2204_v32 }
 0x63c   : > { %v2354_v5 = vld.sshfl [vmem:[#allocation1] sm:$0xff pattern:$0x73625140]  ;;  %v2356_v12 = vld.sshfl [vmem:[#allocation1 + $0x8] sm:$0xff pattern:$0x73625140] }
 0x63d   : > { %2358 = vrot.lane.b32.xlu1 %v2354_v5, %s9653_s26  ;;  %2364 = vst [vmem:[#allocation1 + $0x2] ss:$4 sm:$0xff] %v6967_v8 }
 0x63e   : > { %2360 = vrot.lane.b32.xlu2 %v2356_v12, %s9653_s26 }
 0x63f   : > { %v2210_v38 = vpop.permute.xlu1 %2209  ;;  %v7631_v61 = vpop.permute.xlu0 %2878 }
 0x640   : > { %v2261_v10 = vsel %vm379_vm2, %v2259_v31, %v2210_v38 }
 0x641   : > { %v2263_v27 = vsel %vm382_vm4, %v2261_v10, %v2216_v2 }
 0x644   : > { %v2367_v55 = vld.sshfl [vmem:[#allocation1 + $0x8] sm:$0xff pattern:$0x73625140]  ;;  %v2365_v22 = vld.sshfl [vmem:[#allocation1] sm:$0xff pattern:$0x73625140] }
 0x645   : > { %2371 = vrot.lane.b32.xlu1 %v2367_v55, %s9630_s19  ;;  %2369 = vrot.lane.b32.xlu0 %v2365_v22, %s9630_s19  ;;  %2375 = vst [vmem:[#allocation1 + $0x3] ss:$4 sm:$0xff] %v7090_v58 }
 0x646   : > { %2897 = vrot.lane.b32.xlu2 %v2263_v27, %s9687_s6 }
 0x647   : > { %v2233_v19 = vpop.permute.xlu2 %2232 }
 0x64c   : > { %v2376_v59 = vld.sshfl [vmem:[#allocation1] sm:$0xff pattern:$0x73625140] }
 0x64d   : > { %2380 = vst [vmem:[#allocation1] ss:$4 sm:$0xff] %v7090_v58 }
 0x64e   : > { %2378 = vrot.lane.b32.xlu2 %v2376_v59, %s9693_s3  ;;  %s9700_s3 = smov 45  }
 0x64f   : > { %v2221_v16 = vpop.permute.xlu0 %2220 }
 0x654   : > { %v2381_v6 = vld.sshfl [vmem:[#allocation1] sm:$0xff pattern:$0x73625140] }
 0x655   : > { %2383 = vrot.lane.b32.xlu0 %v2381_v6, %s9677_s10  ;;  %2386 = vst [vmem:[#allocation1 + $0x1] ss:$4 sm:$0xff] %v7090_v58  ;;  %s9708_s10 = smov 79  }
 0x657   : > { %v2227_v34 = vpop.permute.xlu1 %2226 }
 0x658   : > { %v2266_v23 = vsel %vm376_vm0, %v2221_v16, %v2227_v34 }
 0x659   : > { %v2268_v57 = vsel %vm379_vm2, %v2266_v23, %v2233_v19 }
 0x65c   : > { %v2387_v53 = vld.sshfl [vmem:[#allocation1] sm:$0xff pattern:$0x73625140] }
 0x65d   : > { %2389 = vrot.lane.b32.xlu1 %v2387_v53, %s9680_s1  ;;  %2392 = vst [vmem:[#allocation1 + $0x2] ss:$4 sm:$0xff] %v7090_v58  ;;  %s9704_s1 = smov 33  }
 0x65f   : > { %v2284_v42 = vpop.permute.xlu2 %2283  ;;  %v7644_v51 = vpop.permute.xlu1 %2880 }
 0x664   : > { %v2393_v33 = vld.sshfl [vmem:[#allocation1] sm:$0xff pattern:$0x73625140] }
 0x665   : > { %2398 = vst [vmem:[#allocation1 + $0x3] ss:$4 sm:$0xff] %v7090_v58  ;;  %2395 = vrot.lane.b32.xlu2 %v2393_v33, %s9660_s20 }
 0x667   : > { %v2239_v17 = vpop.permute.xlu0 %2238 }
 0x668   : > { %v2270_v9 = vsel %vm382_vm4, %v2268_v57, %v2239_v17  ;;  %v7646_v1 = vpop.permute.xlu2 %2891 }
 0x669   : > { %2899 = vrot.lane.b32.xlu0 %v2270_v9, %s9687_s6  ;;  %s9701_s6 = smov 37  }
 0x66c   : > { %v2399_v50 = vld.sshfl [vmem:[#allocation1] sm:$0xff pattern:$0x73625140] }
 0x66d   : > { %2431 = vst [vmem:[#allocation1 + $0x1] ss:$4 sm:$0xff] %v7090_v58 }
 0x66f   : > { %v2276_v39 = vpop.permute.xlu1 %2275 }
 0x670   : > { %v2297_v43 = vpop.permute.xlu2 %2296  ;;  %v2404_v45 = vsel %vm376_vm0, %v6967_v8, %v2276_v39 }
 0x671   : > { %2401 = vrot.lane.b32.xlu0 %v2399_v50, %s9661_s24 }
 0x674   : > { %v2432_v21 = vld.sshfl [vmem:[#allocation1] sm:$0xff pattern:$0x73625140] }
 0x675   : > { %2434 = vrot.lane.b32.xlu1 %v2432_v21, %s9646_s21  ;;  %2437 = vst [vmem:[#allocation1 + $0x2] ss:$4 sm:$0xff] %v7090_v58 }
 0x677   : > { %v2286_v48 = vpop.permute.xlu0 %2285 }
 0x678   : > { %v2287_v56 = vsel %vm9694_vm9, %v2284_v42, %v2286_v48  ;;  %v2316_v20 = vpop.permute.xlu2 %2315  ;;  %vm9697_vm9 = vcmask 875520  }
 0x679   : > { %v2406_v28 = vsel %vm379_vm2, %v2404_v45, %v2287_v56 }
 0x67c   : > { %v2438_v14 = vld.sshfl [vmem:[#allocation1] sm:$0xff pattern:$0x73625140] }
 0x67d   : > { %2443 = vst [vmem:[#allocation1 + $0x3] ss:$4 sm:$0xff] %v7090_v58  ;;  %2440 = vrot.lane.b32.xlu2 %v2438_v14, %s9631_s18 }
 0x67f   : > { %v2295_v26 = vpop.permute.xlu1 %2294  ;;  %v7660_v36 = vpop.permute.xlu0 %2893 }
 0x680   : > { %v2298_v30 = vsel %vm9695_vm15, %v2295_v26, %v2297_v43  ;;  %v2329_v35 = vpop.permute.xlu2 %2328  ;;  %vm9698_vm15 = vcmask 629760  }
 0x681   : > { %v2408_v41 = vsel %vm382_vm4, %v2406_v28, %v2298_v30 }
 0x682   : > { %2910 = vrot.lane.b32.xlu1 %v2408_v41, %s9633_s15 }
 0x684   : > { %v7656_v18 = vpop.f32.mrf.mxu0  ;;  %v2444_v24 = vld.sshfl [vmem:[#allocation1] sm:$0xff pattern:$0x73625140] }
 0x685   : > { %2446 = vrot.lane.b32.xlu0 %v2444_v24, %s9632_s28  ;;  %2448 = vst [vmem:[#allocation1] ss:$4 sm:$0xff] %v7090_v58 }
 0x687   : > { %v2307_v0 = vpop.permute.xlu1 %2306  ;;  %v2305_v4 = vpop.permute.xlu0 %2304 }
 0x688   : > { %v2308_v2 = vsel %vm458_vm6, %v2305_v4, %v2307_v0 }
 0x68c   : > { %v2449_v40 = vld.sshfl [vmem:[#allocation1] sm:$0xff pattern:$0x73625140]  ;;  %v2986_v54 = vpop.f32.mrf.mxu0 }
 0x68d   : > { %2454 = vst [vmem:[#allocation1 + $0x1] ss:$4 sm:$0xff] %v7090_v58  ;;  %2451 = vrot.lane.b32.xlu1 %v2449_v40, %s9634_s16 }
 0x68f   : > { %v2318_v31 = vpop.permute.xlu0 %2317 }
 0x690   : > { %v2348_v32 = vpop.permute.xlu2 %2347  ;;  %v2319_v27 = vsel %vm470_vm7, %v2316_v20, %v2318_v31 }
 0x691   : > { %v2411_v6 = vsel %vm376_vm0, %v2308_v2, %v2319_v27 }
 0x694   : > { %v2455_v5 = vld.sshfl [vmem:[#allocation1] sm:$0xff pattern:$0x73625140] }
 0x695   : > { %2460 = vst [vmem:[#allocation1 + $0x2] ss:$4 sm:$0xff] %v7090_v58  ;;  %2457 = vrot.lane.b32.xlu2 %v2455_v5, %s9649_s2 }
 0x697   : > { %v2327_v12 = vpop.permute.xlu1 %2326 }
 0x698   : > { %v2361_v55 = vpop.permute.xlu2 %2360  ;;  %v2330_v59 = vsel %vm9696_vm5, %v2327_v12, %v2329_v35  ;;  %vm9705_vm5 = vcmask 826368  }
 0x699   : > { %v2413_v19 = vsel %vm379_vm2, %v2411_v6, %v2330_v59  ;;  %v2901_v59 = vsel %vm9698_vm15, %v7646_v1, %v7660_v36  ;;  %vm9707_vm15 = vcmask 1022976  }
 0x69c   : > { %v2461_v38 = vld.sshfl [vmem:[#allocation1] sm:$0xff pattern:$0x73625140] }
 0x69d   : > { %2463 = vrot.lane.b32.xlu0 %v2461_v38, %s9635_s9  ;;  %2466 = vst [vmem:[#allocation1 + $0x3] ss:$4 sm:$0xff] %v7090_v58 }
 0x69f   : > { %v7672_v10 = vpop.permute.xlu1 %2895  ;;  %v2338_v22 = vpop.permute.xlu0 %2337 }
 0x6a0   : > { %v2898_v33 = vpop.permute.xlu2 %2897 }
 0x6a4   : > { %v2467_v53 = vld.sshfl [vmem:[#allocation1] sm:$0xff pattern:$0x73625140] }
 0x6a5   : > { %2471 = vst [vmem:[#allocation1] ss:$4 sm:$0xff] %v7090_v58  ;;  %2469 = vrot.lane.b32.xlu1 %v2467_v53, %s9650_s30 }
 0x6a7   : > { %v2340_v16 = vpop.permute.xlu1 %2339  ;;  %v2350_v42 = vpop.permute.xlu0 %2349 }
 0x6a8   : > { %v2341_v34 = vsel %vm9697_vm9, %v2338_v22, %v2340_v16  ;;  %v2351_v9 = vsel %vm960_vm10, %v2348_v32, %v2350_v42  ;;  %v2379_v43 = vpop.permute.xlu2 %2378  ;;  %vm9706_vm9 = vcmask 818176  }
 0x6a9   : > { %v2415_v23 = vsel %vm382_vm4, %v2413_v19, %v2341_v34 }
 0x6aa   : > { %2912 = vrot.lane.b32.xlu2 %v2415_v23, %s9633_s15 }
 0x6ac   : > { %v2472_v57 = vld.sshfl [vmem:[#allocation1] sm:$0xff pattern:$0x73625140] }
 0x6ad   : > { %2477 = vst [vmem:[#allocation1 + $0x1] ss:$4 sm:$0xff] %v7090_v58 }
 0x6af   : > { %v2359_v17 = vpop.permute.xlu1 %2358 }
 0x6b0   : > { %v2362_v50 = vsel %vm649_vm11, %v2359_v17, %v2361_v55 }
 0x6b1   : > { %v2418_v39 = vsel %vm376_vm0, %v2351_v9, %v2362_v50 }
 0x6b2   : > { %2474 = vrot.lane.b32.xlu2 %v2472_v57, %s9636_s29 }
 0x6b4   : > { %v2478_v21 = vld.sshfl [vmem:[#allocation1] sm:$0xff pattern:$0x73625140] }
 0x6b5   : > { %2480 = vrot.lane.b32.xlu0 %v2478_v21, %s9637_s17  ;;  %2483 = vst [vmem:[#allocation1 + $0x2] ss:$4 sm:$0xff] %v7090_v58 }
 0x6b7   : > { %v2372_v48 = vpop.permute.xlu1 %2371  ;;  %v2370_v14 = vpop.permute.xlu0 %2369 }
 0x6b8   : > { %v2373_v45 = vsel %vm661_vm12, %v2370_v14, %v2372_v48 }
 0x6b9   : > { %v2420_v56 = vsel %vm379_vm2, %v2418_v39, %v2373_v45 }
 0x6ba   : > { %v2422_v26 = vsel %vm382_vm4, %v2420_v56, %v2379_v43 }
 0x6bc   : > { %v2484_v20 = vld.sshfl [vmem:[#allocation1] sm:$0xff pattern:$0x73625140] }
 0x6bd   : > { %2914 = vrot.lane.b32.xlu0 %v2422_v26, %s9633_s15  ;;  %2486 = vrot.lane.b32.xlu1 %v2484_v20, %s9630_s19  ;;  %2489 = vst [vmem:[#allocation1 + $0x3] ss:$4 sm:$0xff] %v7090_v58 }
 0x6bf   : > { %v2396_v31 = vpop.permute.xlu2 %2395 }
 0x6c4   : > { %v2492_v24 = vld.sshfl [vmem:[#allocation1 + $0x8] sm:$0xff pattern:$0x73625140]  ;;  %v2490_v28 = vld.sshfl [vmem:[#allocation1] sm:$0xff pattern:$0x73625140] }
 0x6c5   : > { %2496 = vrot.lane.b32.xlu0 %v2492_v24, %s9654_s23  ;;  %2499 = vst [vmem:[#allocation1] ss:$4 sm:$0xff] %v7090_v58  ;;  %2494 = vrot.lane.b32.xlu2 %v2490_v28, %s9654_s23 }
 0x6c7   : > { %v2384_v40 = vpop.permute.xlu0 %2383 }
 0x6cc   : > { %v2500_v30 = vld.sshfl [vmem:[#allocation1] sm:$0xff pattern:$0x73625140]  ;;  %v2502_v41 = vld.sshfl [vmem:[#allocation1 + $0x8] sm:$0xff pattern:$0x73625140] }
 0x6cd   : > { %2504 = vrot.lane.b32.xlu1 %v2500_v30, %s9655_s22  ;;  %2510 = vst [vmem:[#allocation1 + $0x1] ss:$4 sm:$0xff] %v7090_v58  ;;  %2506 = vrot.lane.b32.xlu2 %v2502_v41, %s9655_s22 }
 0x6cf   : > { %v2390_v4 = vpop.permute.xlu1 %2389 }
 0x6d0   : > { %v2425_v32 = vsel %vm376_vm0, %v2384_v40, %v2390_v4 }
 0x6d1   : > { %v2427_v38 = vsel %vm379_vm2, %v2425_v32, %v2396_v31 }
 0x6d4   : > { %v2513_v54 = vld.sshfl [vmem:[#allocation1 + $0x8] sm:$0xff pattern:$0x73625140]  ;;  %v2511_v0 = vld.sshfl [vmem:[#allocation1] sm:$0xff pattern:$0x73625140] }
 0x6d5   : > { %2517 = vrot.lane.b32.xlu1 %v2513_v54, %s9638_s11  ;;  %2515 = vrot.lane.b32.xlu0 %v2511_v0, %s9638_s11  ;;  %2521 = vst [vmem:[#allocation1 + $0x2] ss:$4 sm:$0xff] %v7090_v58 }
 0x6d7   : > { %v2441_v36 = vpop.permute.xlu2 %2440 }
 0x6db   : > { %v2900_v35 = vpop.permute.xlu0 %2899 }
 0x6dc   : > { %2988 = vmatpush.bf16.msrb.mxu1 %v2900_v35  ;;  %v2524_v5 = vld.sshfl [vmem:[#allocation1 + $0x8] sm:$0xff pattern:$0x73625140]  ;;  %v2522_v12 = vld.sshfl [vmem:[#allocation1] sm:$0xff pattern:$0x73625140] }
 0x6dd   : > { %2528 = vrot.lane.b32.xlu0 %v2524_v5, %s9633_s15  ;;  %2532 = vst [vmem:[#allocation1 + $0x3] ss:$4 sm:$0xff] %v7090_v58  ;;  %2526 = vrot.lane.b32.xlu2 %v2522_v12, %s9633_s15 }
 0x6e0   : > { %2989 = vmatpush.bf16.msrb.mxu1 %v2898_v33  ;;  %v7742_v33 = vld [vmem:[%s6615_s25 + $0x14] sm:$0xf]  ;;  %s9699_s25 = smov 46  }
 0x6e3   : > { %v2402_v2 = vpop.permute.xlu0 %2401 }
 0x6e4   : > { %v2429_v27 = vsel %vm382_vm4, %v2427_v38, %v2402_v2  ;;  %2990 = vmatpush.bf16.msrb.mxu1 %v7672_v10  ;;  %v2533_v55 = vld.sshfl [vmem:[#allocation1] sm:$0xff pattern:$0x73625140]  ;;  %v2535_v22 = vld.sshfl [vmem:[#allocation1 + $0x8] sm:$0xff pattern:$0x73625140] }
 0x6e5   : > { %2916 = vrot.lane.b32.xlu1 %v2429_v27, %s9633_s15  ;;  %2539 = vrot.lane.b32.xlu2 %v2535_v22, %s9659_s5  ;;  %2569 = vst [vmem:[#allocation1] ss:$4 sm:$0xff] %v7090_v58 }
 0x6e7   : > { %v2435_v10 = vpop.permute.xlu1 %2434 }
 0x6e8   : > { %2991 = vmatpush.bf16.msrb.mxu1 %v2901_v59  ;;  %v2543_v1 = vsel %vm376_vm0, %v7090_v58, %v2435_v10 }
 0x6e9   : > { %v2545_v19 = vsel %vm379_vm2, %v2543_v1, %v2441_v36 }
 0x6ec   : > { %2992 = vmatpush.bf16.msrb.mxu1 %v7644_v51  ;;  %v7720_v6 = vld.sshfl [vmem:[#allocation1] sm:$0xff pattern:$0x73625140]  ;;  %v7722_v53 = vld.sshfl [vmem:[#allocation1 + $0x8] sm:$0xff pattern:$0x73625140] }
 0x6ed   : > { %2537 = vrot.lane.b32.xlu1 %v2533_v55, %s9659_s5  ;;  %2573 = vst [vmem:[#allocation1 + $0x1] ss:$4 sm:$0xff] %v7090_v58 }
 0x6ef   : > { %v2458_v50 = vpop.permute.xlu2 %2457 }
 0x6f0   : > { %2993 = vmatpush.bf16.msrb.mxu1 %v7631_v61 }
 0x6f4   : > { %2994 = vmatpush.bf16.msrb.mxu1 %v7613_v62  ;;  %v2574_v16 = vld.sshfl [vmem:[#allocation1] sm:$0xff pattern:$0x73625140]  ;;  %v2576_v51 = vld.sshfl [vmem:[#allocation1 + $0x8] sm:$0xff pattern:$0x73625140]  ;;  %v7744_v57 = vpop.permute.xlu1 %2910 }
 0x6f5   : > { %2578 = vrot.lane.b32.xlu0 %v2574_v16, %s9646_s21  ;;  %2580 = vrot.lane.b32.xlu1 %v2576_v51, %s9646_s21  ;;  %2584 = vst [vmem:[#allocation1 + $0x2] ss:$4 sm:$0xff] %v7090_v58 }
 0x6f7   : > { %v2447_v34 = vpop.permute.xlu0 %2446 }
 0x6f8   : > { %2995 = vmatpush.bf16.msrb.mxu1 %v7558_v3  ;;  %v2547_v61 = vsel %vm382_vm4, %v2545_v19, %v2447_v34 }
 0x6f9   : > { %2926 = vrot.lane.b32.xlu2 %v2547_v61, %s9649_s2 }
 0x6fb   : > { %2996 = vmatmul.bf16.vlgmr.msrb.gmra.mxu1 %v7080_v63 }
 0x6fc   : > { %v2587_v62 = vld.sshfl [vmem:[#allocation1 + $0x8] sm:$0xff pattern:$0x73625140]  ;;  %v2585_v23 = vld.sshfl [vmem:[#allocation1] sm:$0xff pattern:$0x73625140] }
 0x6fd   : > { %2591 = vrot.lane.b32.xlu0 %v2587_v62, %s9631_s18  ;;  %2595 = vst [vmem:[#allocation1 + $0x3] ss:$4 sm:$0xff] %v7090_v58 }
 0x6ff   : > { %v2452_v9 = vpop.permute.xlu1 %2451 }
 0x700   : > { %v2550_v21 = vsel %vm376_vm0, %v2452_v9, %v2458_v50 }
 0x701   : > { %2589 = vrot.lane.b32.xlu2 %v2585_v23, %s9631_s18 }
 0x704   : > { %v2596_v42 = vld.sshfl [vmem:[#allocation1] sm:$0xff pattern:$0x73625140]  ;;  %v2598_v3 = vld.sshfl [vmem:[#allocation1 + $0x8] sm:$0xff pattern:$0x73625140]  ;;  %v7759_v26 = vpop.permute.xlu2 %2912 }
 0x705   : > { %2600 = vrot.lane.b32.xlu1 %v2596_v42, %s9632_s28  ;;  %2606 = vst [vmem:[#allocation1] ss:$4 sm:$0xff] %v7742_v33 }
 0x709   : > { %2602 = vrot.lane.b32.xlu2 %v2598_v3, %s9632_s28 }
 0x70c   : > { %v2607_v17 = vld.sshfl [vmem:[#allocation1] sm:$0xff pattern:$0x73625140]  ;;  %v2475_v28 = vpop.permute.xlu2 %2474 }
 0x70d   : > { %2609 = vrot.lane.b32.xlu0 %v2607_v17, %s9640_s12  ;;  %2612 = vst [vmem:[#allocation1 + $0x1] ss:$4 sm:$0xff] %v7742_v33 }
 0x70f   : > { %v2464_v39 = vpop.permute.xlu0 %2463 }
 0x710   : > { %v2552_v48 = vsel %vm379_vm2, %v2550_v21, %v2464_v39 }
 0x714   : > { %v2613_v43 = vld.sshfl [vmem:[#allocation1] sm:$0xff pattern:$0x73625140] }
 0x715   : > { %2615 = vrot.lane.b32.xlu1 %v2613_v43, %s9674_s13  ;;  %2618 = vst [vmem:[#allocation1 + $0x2] ss:$4 sm:$0xff] %v7742_v33 }
 0x717   : > { %v2470_v14 = vpop.permute.xlu1 %2469 }
 0x718   : > { %v2554_v45 = vsel %vm382_vm4, %v2552_v48, %v2470_v14 }
 0x719   : > { %2928 = vrot.lane.b32.xlu0 %v2554_v45, %s9649_s2 }
 0x71c   : > { %v2619_v56 = vld.sshfl [vmem:[#allocation1] sm:$0xff pattern:$0x73625140] }
 0x71d   : > { %2624 = vst [vmem:[#allocation1 + $0x3] ss:$4 sm:$0xff] %v7742_v33  ;;  %2621 = vrot.lane.b32.xlu2 %v2619_v56, %s9673_s7 }
 0x71f   : > { %v2495_v35 = vpop.permute.xlu2 %2494 }
 0x724   : > { %v2625_v20 = vld.sshfl [vmem:[#allocation1] sm:$0xff pattern:$0x73625140] }
 0x725   : > { %2629 = vst [vmem:[#allocation1] ss:$4 sm:$0xff] %v7742_v33  ;;  %2627 = vrot.lane.b32.xlu0 %v2625_v20, %s9699_s25  ;;  %s9703_s25 = smov 34  }
 0x727   : > { %v2481_v24 = vpop.permute.xlu0 %2480  ;;  %v2507_v27 = vpop.permute.xlu2 %2506 }
 0x728   : > { %v2557_v40 = vsel %vm376_vm0, %v2475_v28, %v2481_v24 }
 0x72c   : > { %v2630_v30 = vld.sshfl [vmem:[#allocation1] sm:$0xff pattern:$0x73625140] }
 0x72d   : > { %2632 = vrot.lane.b32.xlu1 %v2630_v30, %s9700_s3  ;;  %2635 = vst [vmem:[#allocation1 + $0x1] ss:$4 sm:$0xff] %v7742_v33  ;;  %s9702_s3 = smov 36  }
 0x72f   : > { %v7765_v41 = vpop.permute.xlu0 %2914  ;;  %v2487_v54 = vpop.permute.xlu1 %2486 }
 0x730   : > { %v2559_v4 = vsel %vm379_vm2, %v2557_v40, %v2487_v54 }
 0x734   : > { %v2636_v0 = vld.sshfl [vmem:[#allocation1] sm:$0xff pattern:$0x73625140] }
 0x735   : > { %2641 = vst [vmem:[#allocation1 + $0x2] ss:$4 sm:$0xff] %v7742_v33  ;;  %2638 = vrot.lane.b32.xlu2 %v2636_v0, %s9701_s6  ;;  %v2985_v0 = vadd.f32 %v7656_v18, %v6686_v37 }
 0x737   : > { %v2497_v5 = vpop.permute.xlu0 %2496  ;;  %v2527_v10 = vpop.permute.xlu2 %2526 }
 0x738   : > { %v2498_v12 = vsel %vm673_vm13, %v2495_v35, %v2497_v5 }
 0x739   : > { %v2561_v32 = vsel %vm382_vm4, %v2559_v4, %v2498_v12 }
 0x73a   : > { %2930 = vrot.lane.b32.xlu1 %v2561_v32, %s9649_s2 }
 0x73c   : > { %v2642_v31 = vld.sshfl [vmem:[#allocation1] sm:$0xff pattern:$0x73625140] }
 0x73d   : > { %2644 = vrot.lane.b32.xlu0 %v2642_v31, %s9702_s3  ;;  %2647 = vst [vmem:[#allocation1 + $0x3] ss:$4 sm:$0xff] %v7742_v33 }
 0x73f   : > { %v2505_v38 = vpop.permute.xlu1 %2504  ;;  %v2540_v34 = vpop.permute.xlu2 %2539 }
 0x740   : > { %v2508_v16 = vsel %vm684_vm14, %v2505_v38, %v2507_v27 }
 0x744   : > { %v2648_v2 = vld.sshfl [vmem:[#allocation1] sm:$0xff pattern:$0x73625140] }
 0x745   : > { %2650 = vrot.lane.b32.xlu1 %v2648_v2, %s9643_s8  ;;  %2652 = vst [vmem:[#allocation1] ss:$4 sm:$0xff] %v7742_v33 }
 0x747   : > { %v2518_v22 = vpop.permute.xlu1 %2517  ;;  %v2516_v59 = vpop.permute.xlu0 %2515 }
 0x748   : > { %v2519_v51 = vsel %vm9705_vm5, %v2516_v59, %v2518_v22  ;;  %vm9709_vm5 = vcmask 941056  }
 0x749   : > { %v2564_v61 = vsel %vm376_vm0, %v2508_v16, %v2519_v51 }
 0x74c   : > { %v2653_v55 = vld.sshfl [vmem:[#allocation1] sm:$0xff pattern:$0x73625140] }
 0x74d   : > { %2655 = vrot.lane.b32.xlu2 %v2653_v55, %s9703_s25  ;;  %2658 = vst [vmem:[#allocation1 + $0x1] ss:$4 sm:$0xff] %v7742_v33 }
 0x74f   : > { %v2529_v19 = vpop.permute.xlu0 %2528 }
 0x750   : > { %v2530_v62 = vsel %vm9706_vm9, %v2527_v10, %v2529_v19  ;;  %vm9710_vm9 = vcmask 932864  }
 0x751   : > { %v2566_v42 = vsel %vm379_vm2, %v2564_v61, %v2530_v62 }
 0x753   : > { %v7793_v50 = vpop.permute.xlu2 %2926 }
 0x754   : > { %v2659_v1 = vld.sshfl [vmem:[#allocation1] sm:$0xff pattern:$0x73625140] }
 0x755   : > { %2661 = vrot.lane.b32.xlu0 %v2659_v1, %s9704_s1  ;;  %2664 = vst [vmem:[#allocation1 + $0x2] ss:$4 sm:$0xff] %v7742_v33 }
 0x757   : > { %v7782_v36 = vpop.permute.xlu1 %2916 }
 0x75b   : > { %v2590_v43 = vpop.permute.xlu2 %2589 }
 0x75c   : > { %v2665_v23 = vld.sshfl [vmem:[#allocation1] sm:$0xff pattern:$0x73625140] }
 0x75d   : > { %2670 = vst [vmem:[#allocation1 + $0x3] ss:$4 sm:$0xff] %v7742_v33  ;;  %2667 = vrot.lane.b32.xlu1 %v2665_v23, %s9660_s20 }
 0x75f   : > { %v2538_v3 = vpop.permute.xlu1 %2537 }
 0x760   : > { %v2541_v17 = vsel %vm720_vm8, %v2538_v3, %v2540_v34 }
 0x761   : > { %v2568_v9 = vsel %vm382_vm4, %v2566_v42, %v2541_v17 }
 0x762   : > { %2932 = vrot.lane.b32.xlu2 %v2568_v9, %s9649_s2 }
 0x763   : > { %v2603_v40 = vpop.permute.xlu2 %2602 }
 0x764   : > { %v2671_v21 = vld.sshfl [vmem:[#allocation1] sm:$0xff pattern:$0x73625140] }
 0x765   : > { %2709 = vst [vmem:[#allocation1 + $0x1] ss:$4 sm:$0xff] %v7742_v33 }
 0x767   : > { %v2579_v39 = vpop.permute.xlu0 %2578  ;;  %v2581_v14 = vpop.permute.xlu1 %2580 }
 0x768   : > { %v2582_v45 = vsel %vm9589_vm1, %v2579_v39, %v2581_v14  ;;  %v2678_v28 = vsel %vm376_vm0, %v7722_v53, %v2581_v14 }
 0x769   : > { %v2676_v20 = vsel %vm376_vm0, %v7720_v6, %v2582_v45 }
 0x76a   : > { %2673 = vrot.lane.b32.xlu2 %v2671_v21, %s9661_s24 }
 0x76c   : > { %v2710_v48 = vld.sshfl [vmem:[#allocation1] sm:$0xff pattern:$0x73625140] }
 0x76d   : > { %2712 = vrot.lane.b32.xlu0 %v2710_v48, %s9646_s21  ;;  %2715 = vst [vmem:[#allocation1 + $0x2] ss:$4 sm:$0xff] %v7742_v33 }
 0x76f   : > { %v2592_v56 = vpop.permute.xlu0 %2591 }
 0x770   : > { %v2593_v24 = vsel %vm9588_vm3, %v2590_v43, %v2592_v56  ;;  %v2682_v35 = vsel %vm379_vm2, %v2678_v28, %v2592_v56 }
 0x771   : > { %v2680_v54 = vsel %vm379_vm2, %v2676_v20, %v2593_v24  ;;  %v2686_v32 = vsel %vm382_vm4, %v2682_v35, %v2603_v40 }
 0x774   : > { %v2716_v30 = vld.sshfl [vmem:[#allocation1] sm:$0xff pattern:$0x73625140] }
 0x775   : > { %2718 = vrot.lane.b32.xlu1 %v2716_v30, %s9631_s18  ;;  %2721 = vst [vmem:[#allocation1 + $0x3] ss:$4 sm:$0xff] %v7742_v33 }
 0x777   : > { %v2601_v4 = vpop.permute.xlu1 %2600  ;;  %v2622_v19 = vpop.permute.xlu2 %2621 }
 0x778   : > { %v2997_v6 = vpop.f32.mrf.mxu1  ;;  %v2604_v5 = vsel %vm9707_vm15, %v2601_v4, %v2603_v40  ;;  %vm9711_vm15 = vcmask 646144  }
 0x779   : > { %v7813_v12 = vadd.f32 %v2997_v6, %v2985_v0  ;;  %v2684_v53 = vsel %vm382_vm4, %v2680_v54, %v2604_v5 }
 0x77a   : > { %2943 = vrot.lane.b32.xlu0 %v2684_v53, %s9708_s10 }
 0x77c   : > { %v2722_v31 = vld.sshfl [vmem:[#allocation1] sm:$0xff pattern:$0x73625140] }
 0x77d   : > { %2726 = vst [vmem:[#allocation1] ss:$4 sm:$0xff] %v7742_v33  ;;  %2945 = vrot.lane.b32.xlu1 %v2686_v32, %s9708_s10  ;;  %2724 = vrot.lane.b32.xlu2 %v2722_v31, %s9647_s14 }
 0x77f   : > { %v2610_v27 = vpop.permute.xlu0 %2609 }
 0x780   : > { %v2999_v18 = vpop.f32.mrf.mxu1 }
 0x784   : > { %v2727_v38 = vld.sshfl [vmem:[#allocation1] sm:$0xff pattern:$0x73625140]  ;;  %v2729_v2 = vld.sshfl [vmem:[#allocation1 + $0x8] sm:$0xff pattern:$0x73625140] }
 0x785   : > { %2731 = vrot.lane.b32.xlu0 %v2727_v38, %s9648_s0  ;;  %2737 = vst [vmem:[#allocation1 + $0x1] ss:$4 sm:$0xff] %v7742_v33  ;;  %2733 = vrot.lane.b32.xlu1 %v2729_v2, %s9648_s0 }
 0x787   : > { %v2616_v10 = vpop.permute.xlu1 %2615 }
 0x788   : > { %v2689_v51 = vsel %vm376_vm0, %v2610_v27, %v2616_v10 }
 0x789   : > { %v2691_v34 = vsel %vm379_vm2, %v2689_v51, %v2622_v19 }
 0x78b   : > { %v2929_v59 = vpop.permute.xlu0 %2928 }
 0x78c   : > { %v2740_v55 = vld.sshfl [vmem:[#allocation1 + $0x8] sm:$0xff pattern:$0x73625140]  ;;  %v2738_v22 = vld.sshfl [vmem:[#allocation1] sm:$0xff pattern:$0x73625140] }
 0x78d   : > { %2744 = vrot.lane.b32.xlu0 %v2740_v55, %s9649_s2  ;;  %2748 = vst [vmem:[#allocation1 + $0x2] ss:$4 sm:$0xff] %v7742_v33  ;;  %2742 = vrot.lane.b32.xlu2 %v2738_v22, %s9649_s2 }
 0x78f   : > { %v2639_v21 = vpop.permute.xlu2 %2638 }
 0x794   : > { %v2749_v1 = vld.sshfl [vmem:[#allocation1] sm:$0xff pattern:$0x73625140]  ;;  %v2751_v16 = vld.sshfl [vmem:[#allocation1 + $0x8] sm:$0xff pattern:$0x73625140] }
 0x795   : > { %2759 = vst [vmem:[#allocation1 + $0x3] ss:$4 sm:$0xff] %v7742_v33  ;;  %2753 = vrot.lane.b32.xlu1 %v2749_v1, %s9635_s9  ;;  %2755 = vrot.lane.b32.xlu2 %v2751_v16, %s9635_s9 }
 0x797   : > { %v2628_v61 = vpop.permute.xlu0 %2627 }
 0x798   : > { %v2693_v62 = vsel %vm382_vm4, %v2691_v34, %v2628_v61 }
 0x79c   : > { %v2760_v23 = vld.sshfl [vmem:[#allocation1] sm:$0xff pattern:$0x73625140]  ;;  %v2762_v42 = vld.sshfl [vmem:[#allocation1 + $0x8] sm:$0xff pattern:$0x73625140] }
 0x79d   : > { %2764 = vrot.lane.b32.xlu0 %v2760_v23, %s9650_s30  ;;  %2769 = vst [vmem:[#allocation1] ss:$4 sm:$0xff] %v7742_v33  ;;  %2766 = vrot.lane.b32.xlu1 %v2762_v42, %s9650_s30 }
 0x79e   : > { %2947 = vrot.lane.b32.xlu2 %v2693_v62, %s9708_s10 }
 0x79f   : > { %v2633_v3 = vpop.permute.xlu1 %2632 }
 0x7a0   : > { %v2696_v45 = vsel %vm376_vm0, %v2633_v3, %v2639_v21 }
 0x7a4   : > { %v2772_v17 = vld.sshfl [vmem:[#allocation1 + $0x8] sm:$0xff pattern:$0x73625140]  ;;  %v2770_v9 = vld.sshfl [vmem:[#allocation1] sm:$0xff pattern:$0x73625140] }
 0x7a5   : > { %2776 = vrot.lane.b32.xlu0 %v2772_v17, %s9652_s27  ;;  %2780 = vst [vmem:[#allocation1 + $0x1] ss:$4 sm:$0xff] %v7742_v33 }
 0x7a6   : > { %2774 = vrot.lane.b32.xlu2 %v2770_v9, %s9652_s27 }
 0x7a7   : > { %v2656_v14 = vpop.permute.xlu2 %2655 }
 0x7ac   : > { %v2781_v39 = vld.sshfl [vmem:[#allocation1] sm:$0xff pattern:$0x73625140]  ;;  %v2783_v43 = vld.sshfl [vmem:[#allocation1 + $0x8] sm:$0xff pattern:$0x73625140]  ;;  %v2931_v48 = vpop.permute.xlu1 %2930 }
 0x7ad   : > { %2791 = vst [vmem:[#allocation1 + $0x2] ss:$4 sm:$0xff] %v7742_v33  ;;  %2785 = vrot.lane.b32.xlu1 %v2781_v39, %s9653_s26 }
 0x7ae   : > { %2787 = vrot.lane.b32.xlu2 %v2783_v43, %s9653_s26 }
 0x7af   : > { %v2645_v20 = vpop.permute.xlu0 %2644 }
 0x7b0   : > { %v2698_v28 = vsel %vm379_vm2, %v2696_v45, %v2645_v20 }
 0x7b4   : > { %v2792_v56 = vld.sshfl [vmem:[#allocation1] sm:$0xff pattern:$0x73625140]  ;;  %v2794_v24 = vld.sshfl [vmem:[#allocation1 + $0x8] sm:$0xff pattern:$0x73625140] }
 0x7b5   : > { %2796 = vrot.lane.b32.xlu0 %v2792_v56, %s9630_s19  ;;  %2798 = vrot.lane.b32.xlu1 %v2794_v24, %s9630_s19  ;;  %2802 = vst [vmem:[#allocation1 + $0x3] ss:$4 sm:$0xff] %v7742_v33 }
 0x7b7   : > { %v2651_v30 = vpop.permute.xlu1 %2650 }
 0x7b8   : > { %v2700_v40 = vsel %vm382_vm4, %v2698_v28, %v2651_v30 }
 0x7bc   : > { %v2933_v54 = vpop.permute.xlu2 %2932  ;;  %v2805_v0 = vld.sshfl [vmem:[#allocation1 + $0x8] sm:$0xff pattern:$0x73625140]  ;;  %v2803_v35 = vld.sshfl [vmem:[#allocation1] sm:$0xff pattern:$0x73625140] }
 0x7bd   : > { %3001 = vmatpush.bf16.msrb.mxu2 %v2933_v54  ;;  %2949 = vrot.lane.b32.xlu0 %v2700_v40, %s9708_s10  ;;  %2812 = vst [vmem:[#allocation1] ss:$4 sm:$0xff] %v7742_v33 }
 0x7be   : > { %2807 = vrot.lane.b32.xlu2 %v2803_v35, %s9654_s23 }
 0x7c1   : > { %3002 = vmatpush.bf16.msrb.mxu2 %v2931_v48 }
 0x7c4   : > { %v2813_v4 = vld.sshfl [vmem:[#allocation1] sm:$0xff pattern:$0x73625140]  ;;  %v2815_v6 = vld.sshfl [vmem:[#allocation1 + $0x8] sm:$0xff pattern:$0x73625140]  ;;  %v2674_v38 = vpop.permute.xlu2 %2673 }
 0x7c5   : > { %3003 = vmatpush.bf16.msrb.mxu2 %v2929_v59  ;;  %2809 = vrot.lane.b32.xlu0 %v2805_v0, %s9654_s23  ;;  %3057 = vst [vmem:[#allocation1 + $0x1] ss:$4 sm:$0xff] %v6815_v29 }
 0x7c6   : > { %2817 = vrot.lane.b32.xlu1 %v2813_v4, %s9655_s22  ;;  %2819 = vrot.lane.b32.xlu2 %v2815_v6, %s9655_s22 }
 0x7c7   : > { %v2662_v5 = vpop.permute.xlu0 %2661 }
 0x7c8   : > { %v2703_v32 = vsel %vm376_vm0, %v2656_v14, %v2662_v5 }
 0x7c9   : > { %3004 = vmatpush.bf16.msrb.mxu2 %v7793_v50 }
 0x7cc   : > { %v3058_v53 = vld.sshfl [vmem:[#allocation1] sm:$0xff pattern:$0x73625140] }
 0x7cd   : > { %3005 = vmatpush.bf16.msrb.mxu2 %v7782_v36  ;;  %3063 = vst [vmem:[#allocation1 + $0x2] ss:$4 sm:$0xff] %v6815_v29 }
 0x7ce   : > { %3060 = vrot.lane.b32.xlu1 %v3058_v53, %s9646_s21 }
 0x7cf   : > { %v2668_v31 = vpop.permute.xlu1 %2667 }
 0x7d0   : > { %v2705_v18 = vsel %vm379_vm2, %v2703_v32, %v2668_v31 }
 0x7d1   : > { %3006 = vmatpush.bf16.msrb.mxu2 %v7765_v41  ;;  %v2707_v2 = vsel %vm382_vm4, %v2705_v18, %v2674_v38 }
 0x7d4   : > { %v3064_v27 = vld.sshfl [vmem:[#allocation1] sm:$0xff pattern:$0x73625140] }
 0x7d5   : > { %3007 = vmatpush.bf16.msrb.mxu2 %v7759_v26  ;;  %3069 = vst [vmem:[#allocation1 + $0x3] ss:$4 sm:$0xff] %v6815_v29  ;;  %3066 = vrot.lane.b32.xlu2 %v3064_v27, %s9631_s18 }
 0x7d6   : > { %2951 = vrot.lane.b32.xlu1 %v2707_v2, %s9708_s10  ;;  %s9713_s10 = smov 91  }
 0x7d7   : > { %v2725_v59 = vpop.permute.xlu2 %2724 }
 0x7d9   : > { %3008 = vmatpush.bf16.msrb.mxu2 %v7744_v57 }
 0x7dc   : > { %3009 = vmatmul.bf16.vlgmr.msrb.gmra.mxu2 %v7217_v7  ;;  %v3070_v36 = vld.sshfl [vmem:[#allocation1] sm:$0xff pattern:$0x73625140] }
 0x7dd   : > { %3074 = vst [vmem:[#allocation1] ss:$4 sm:$0xff] %v6815_v29  ;;  %3072 = vrot.lane.b32.xlu0 %v3070_v36, %s9632_s28 }
 0x7df   : > { %v2713_v26 = vpop.permute.xlu0 %2712 }
 0x7e0   : > { %v2823_v50 = vsel %vm376_vm0, %v7742_v33, %v2713_v26 }
 0x7e4   : > { %v3075_v41 = vld.sshfl [vmem:[#allocation1] sm:$0xff pattern:$0x73625140] }
 0x7e5   : > { %3077 = vrot.lane.b32.xlu1 %v3075_v41, %s9634_s16  ;;  %3080 = vst [vmem:[#allocation1 + $0x1] ss:$4 sm:$0xff] %v6815_v29 }
 0x7e7   : > { %v2719_v57 = vpop.permute.xlu1 %2718  ;;  %v2743_v34 = vpop.permute.xlu2 %2742 }
 0x7e8   : > { %v2825_v22 = vsel %vm379_vm2, %v2823_v50, %v2719_v57 }
 0x7e9   : > { %v2827_v10 = vsel %vm382_vm4, %v2825_v22, %v2725_v59 }
 0x7ec   : > { %v3081_v55 = vld.sshfl [vmem:[#allocation1] sm:$0xff pattern:$0x73625140]  ;;  %v7880_v16 = vpop.permute.xlu0 %2943 }
 0x7ed   : > { %3086 = vst [vmem:[#allocation1 + $0x2] ss:$4 sm:$0xff] %v6815_v29  ;;  %3083 = vrot.lane.b32.xlu2 %v3081_v55, %s9649_s2 }
 0x7ef   : > { %v7885_v51 = vpop.permute.xlu1 %2945  ;;  %v2756_v42 = vpop.permute.xlu2 %2755 }
 0x7f4   : > { %v3087_v1 = vld.sshfl [vmem:[#allocation1] sm:$0xff pattern:$0x73625140] }
 0x7f5   : > { %3092 = vst [vmem:[#allocation1 + $0x3] ss:$4 sm:$0xff] %v6815_v29  ;;  %2961 = vrot.lane.b32.xlu2 %v2827_v10, %s9655_s22  ;;  %3089 = vrot.lane.b32.xlu0 %v3087_v1, %s9635_s9 }
 0x7f7   : > { %v2732_v61 = vpop.permute.xlu0 %2731  ;;  %v2734_v62 = vpop.permute.xlu1 %2733 }
 0x7f8   : > { %v2735_v39 = vsel %vm458_vm6, %v2732_v61, %v2734_v62  ;;  %v7895_v43 = vpop.permute.xlu2 %2947 }
 0x7fc   : > { %v3093_v19 = vld.sshfl [vmem:[#allocation1] sm:$0xff pattern:$0x73625140] }
 0x7fd   : > { %3095 = vrot.lane.b32.xlu1 %v3093_v19, %s9650_s30  ;;  %3097 = vst [vmem:[#allocation1] ss:$4 sm:$0xff] %v6815_v29 }
 0x7ff   : > { %v2745_v3 = vpop.permute.xlu0 %2744 }
 0x800   : > { %v2746_v21 = vsel %vm470_vm7, %v2743_v34, %v2745_v3  ;;  %v2775_v40 = vpop.permute.xlu2 %2774 }
 0x801   : > { %v2830_v14 = vsel %vm376_vm0, %v2735_v39, %v2746_v21 }
 0x804   : > { %v3098_v23 = vld.sshfl [vmem:[#allocation1] sm:$0xff pattern:$0x73625140] }
 0x805   : > { %3103 = vst [vmem:[#allocation1 + $0x1] ss:$4 sm:$0xff] %v6815_v29  ;;  %3100 = vrot.lane.b32.xlu2 %v3098_v23, %s9636_s29 }
 0x807   : > { %v2754_v17 = vpop.permute.xlu1 %2753 }
 0x808   : > { %v2757_v45 = vsel %vm9709_vm5, %v2754_v17, %v2756_v42  ;;  %v2788_v4 = vpop.permute.xlu2 %2787  ;;  %vm9712_vm5 = vcmask 1022976  }
 0x809   : > { %v2832_v24 = vsel %vm379_vm2, %v2830_v14, %v2757_v45 }
 0x80c   : > { %v3104_v9 = vld.sshfl [vmem:[#allocation1] sm:$0xff pattern:$0x73625140] }
 0x80d   : > { %3109 = vst [vmem:[#allocation1 + $0x2] ss:$4 sm:$0xff] %v6815_v29  ;;  %3106 = vrot.lane.b32.xlu0 %v3104_v9, %s9637_s17 }
 0x80f   : > { %v2765_v48 = vpop.permute.xlu0 %2764  ;;  %v2767_v20 = vpop.permute.xlu1 %2766 }
 0x810   : > { %v2768_v28 = vsel %vm9710_vm9, %v2765_v48, %v2767_v20  ;;  %vm9714_vm9 = vcmask 941056  }
 0x811   : > { %v2834_v30 = vsel %vm382_vm4, %v2832_v24, %v2768_v28 }
 0x814   : > { %v3110_v56 = vld.sshfl [vmem:[#allocation1] sm:$0xff pattern:$0x73625140] }
 0x815   : > { %3112 = vrot.lane.b32.xlu1 %v3110_v56, %s9630_s19  ;;  %3115 = vst [vmem:[#allocation1 + $0x3] ss:$4 sm:$0xff] %v6815_v29  ;;  %2963 = vrot.lane.b32.xlu0 %v2834_v30, %s9655_s22 }
 0x817   : > { %v2777_v0 = vpop.permute.xlu0 %2776 }
 0x818   : > { %v2808_v31 = vpop.permute.xlu2 %2807  ;;  %v2778_v18 = vsel %vm960_vm10, %v2775_v40, %v2777_v0 }
 0x81c   : > { %v3116_v54 = vld.sshfl [vmem:[#allocation1] sm:$0xff pattern:$0x73625140] }
 0x81d   : > { %3120 = vst [vmem:[#allocation1] ss:$4 sm:$0xff] %v6815_v29  ;;  %3118 = vrot.lane.b32.xlu2 %v3116_v54, %s9654_s23 }
 0x81f   : > { %v2786_v6 = vpop.permute.xlu1 %2785 }
 0x820   : > { %v2789_v38 = vsel %vm649_vm11, %v2786_v6, %v2788_v4  ;;  %v2820_v55 = vpop.permute.xlu2 %2819 }
 0x821   : > { %v2837_v27 = vsel %vm376_vm0, %v2778_v18, %v2789_v38 }
 0x824   : > { %v3121_v35 = vld.sshfl [vmem:[#allocation1] sm:$0xff pattern:$0x73625140] }
 0x825   : > { %3126 = vst [vmem:[#allocation1 + $0x1] ss:$4 sm:$0xff] %v6815_v29  ;;  %3123 = vrot.lane.b32.xlu0 %v3121_v35, %s9655_s22 }
 0x827   : > { %v2797_v5 = vpop.permute.xlu0 %2796  ;;  %v2799_v2 = vpop.permute.xlu1 %2798 }
 0x828   : > { %v2800_v36 = vsel %vm661_vm12, %v2797_v5, %v2799_v2 }
 0x829   : > { %v2839_v26 = vsel %vm379_vm2, %v2837_v27, %v2800_v36 }
 0x82c   : > { %v3127_v53 = vld.sshfl [vmem:[#allocation1] sm:$0xff pattern:$0x73625140] }
 0x82d   : > { %3129 = vrot.lane.b32.xlu1 %v3127_v53, %s9638_s11  ;;  %3132 = vst [vmem:[#allocation1 + $0x2] ss:$4 sm:$0xff] %v6815_v29 }
 0x82f   : > { %v7911_v32 = vpop.permute.xlu0 %2949  ;;  %v7940_v9 = vpop.permute.xlu2 %3066 }
 0x834   : > { %v3133_v41 = vld.sshfl [vmem:[#allocation1] sm:$0xff pattern:$0x73625140] }
 0x835   : > { %3135 = vrot.lane.b32.xlu2 %v3133_v41, %s9633_s15  ;;  %3138 = vst [vmem:[#allocation1 + $0x3] ss:$4 sm:$0xff] %v6815_v29 }
 0x837   : > { %v2810_v50 = vpop.permute.xlu0 %2809 }
 0x838   : > { %v2811_v57 = vsel %vm673_vm13, %v2808_v31, %v2810_v50  ;;  %v2818_v22 = vpop.permute.xlu1 %2817 }
 0x839   : > { %v2841_v59 = vsel %vm382_vm4, %v2839_v26, %v2811_v57  ;;  %v2821_v10 = vsel %vm684_vm14, %v2818_v22, %v2820_v55 }
 0x83a   : > { %2965 = vrot.lane.b32.xlu1 %v2841_v59, %s9655_s22 }
 0x83c   : > { %v3139_v1 = vld.sshfl [vmem:[#allocation1] sm:$0xff pattern:$0x73625140] }
 0x83d   : > { %2967 = vrot.lane.b32.xlu2 %v2821_v10, %s9655_s22  ;;  %3141 = vrot.lane.b32.xlu0 %v3139_v1, %s9659_s5  ;;  %3174 = vst [vmem:[#allocation1] ss:$4 sm:$0xff] %v6815_v29 }
 0x844   : > { %v7927_v19 = vld.sshfl [vmem:[#allocation1] sm:$0xff pattern:$0x73625140]  ;;  %v7929_v34 = vld.sshfl [vmem:[#allocation1 + $0x8] sm:$0xff pattern:$0x73625140] }
 0x845   : > { %3178 = vst [vmem:[#allocation1 + $0x1] ss:$4 sm:$0xff] %v6815_v29 }
 0x847   : > { %v7949_v45 = vpop.permute.xlu2 %3083 }
 0x84c   : > { %v3179_v61 = vld.sshfl [vmem:[#allocation1] sm:$0xff pattern:$0x73625140]  ;;  %v3181_v62 = vld.sshfl [vmem:[#allocation1 + $0x8] sm:$0xff pattern:$0x73625140] }
 0x84d   : > { %3183 = vrot.lane.b32.xlu1 %v3179_v61, %s9646_s21  ;;  %3189 = vst [vmem:[#allocation1 + $0x2] ss:$4 sm:$0xff] %v6815_v29  ;;  %3185 = vrot.lane.b32.xlu2 %v3181_v62, %s9646_s21 }
 0x84f   : > { %v2962_v28 = vpop.permute.xlu2 %2961  ;;  %v7971_v38 = vpop.permute.xlu0 %3072 }
 0x854   : > { %v3190_v23 = vld.sshfl [vmem:[#allocation1] sm:$0xff pattern:$0x73625140]  ;;  %v3192_v42 = vld.sshfl [vmem:[#allocation1 + $0x8] sm:$0xff pattern:$0x73625140] }
 0x855   : > { %3194 = vrot.lane.b32.xlu0 %v3190_v23, %s9631_s18  ;;  %3196 = vrot.lane.b32.xlu1 %v3192_v42, %s9631_s18  ;;  %3200 = vst [vmem:[#allocation1 + $0x3] ss:$4 sm:$0xff] %v6815_v29 }
 0x85c   : > { %v3203_v3 = vld.sshfl [vmem:[#allocation1 + $0x8] sm:$0xff pattern:$0x73625140]  ;;  %v3201_v17 = vld.sshfl [vmem:[#allocation1] sm:$0xff pattern:$0x73625140] }
 0x85d   : > { %3207 = vrot.lane.b32.xlu0 %v3203_v3, %s9632_s28  ;;  %3210 = vst [vmem:[#allocation1] ss:$4 sm:$0xff] %v6815_v29  ;;  %3205 = vrot.lane.b32.xlu2 %v3201_v17, %s9632_s28 }
 0x85f   : > { %v3010_v21 = vpop.f32.mrf.mxu2  ;;  %v7959_v0 = vpop.permute.xlu2 %3100 }
 0x860   : > { %v7944_v39 = vadd.f32 %v3010_v21, %v7813_v12  ;;  %v7954_v12 = vpop.permute.xlu1 %3060 }
 0x864   : > { %v3211_v48 = vld.sshfl [vmem:[#allocation1] sm:$0xff pattern:$0x73625140]  ;;  %v3213_v14 = vld.sshfl [vmem:[#allocation1 + $0x8] sm:$0xff pattern:$0x73625140] }
 0x865   : > { %3215 = vrot.lane.b32.xlu1 %v3211_v48, %s9648_s0  ;;  %3221 = vst [vmem:[#allocation1 + $0x1] ss:$4 sm:$0xff] %v6815_v29  ;;  %3217 = vrot.lane.b32.xlu2 %v3213_v14, %s9648_s0  ;;  %v2953_v14 = vsel %vm9711_vm15, %v7880_v16, %v7885_v51  ;;  %vm9715_vm15 = vcmask 932864  }
 0x867   : > { %v3012_v56 = vpop.f32.mrf.mxu2  ;;  %v7981_v41 = vpop.permute.xlu0 %3089 }
 0x868   : > { %v2952_v54 = vpop.permute.xlu1 %2951 }
 0x86c   : > { %v3222_v20 = vld.sshfl [vmem:[#allocation1] sm:$0xff pattern:$0x73625140]  ;;  %v3224_v24 = vld.sshfl [vmem:[#allocation1 + $0x8] sm:$0xff pattern:$0x73625140] }
 0x86d   : > { %3226 = vrot.lane.b32.xlu0 %v3222_v20, %s9649_s2  ;;  %3228 = vrot.lane.b32.xlu1 %v3224_v24, %s9649_s2  ;;  %3232 = vst [vmem:[#allocation1 + $0x2] ss:$4 sm:$0xff] %v6815_v29 }
 0x870   : > { %v7964_v6 = vpop.permute.xlu1 %3077 }
 0x874   : > { %v3235_v30 = vld.sshfl [vmem:[#allocation1 + $0x8] sm:$0xff pattern:$0x73625140]  ;;  %v3233_v40 = vld.sshfl [vmem:[#allocation1] sm:$0xff pattern:$0x73625140] }
 0x875   : > { %3239 = vrot.lane.b32.xlu0 %v3235_v30, %s9635_s9  ;;  %3243 = vst [vmem:[#allocation1 + $0x3] ss:$4 sm:$0xff] %v6815_v29  ;;  %3237 = vrot.lane.b32.xlu2 %v3233_v40, %s9635_s9 }
 0x877   : > { %v7966_v31 = vpop.permute.xlu2 %3118 }
 0x878   : > { %v7975_v2 = vpop.permute.xlu1 %3095 }
 0x87c   : > { %v3244_v35 = vld.sshfl [vmem:[#allocation1] sm:$0xff pattern:$0x73625140]  ;;  %v3246_v4 = vld.sshfl [vmem:[#allocation1 + $0x8] sm:$0xff pattern:$0x73625140] }
 0x87d   : > { %3248 = vrot.lane.b32.xlu1 %v3244_v35, %s9650_s30  ;;  %3253 = vst [vmem:[#allocation1] ss:$4 sm:$0xff] %v6815_v29  ;;  %3250 = vrot.lane.b32.xlu2 %v3246_v4, %s9650_s30 }
 0x87f   : > { %v7988_v22 = vpop.permute.xlu0 %3106 }
 0x884   : > { %v3254_v5 = vld.sshfl [vmem:[#allocation1] sm:$0xff pattern:$0x73625140]  ;;  %v3256_v53 = vld.sshfl [vmem:[#allocation1 + $0x8] sm:$0xff pattern:$0x73625140] }
 0x885   : > { %3258 = vrot.lane.b32.xlu0 %v3254_v5, %s9636_s29  ;;  %3260 = vrot.lane.b32.xlu1 %v3256_v53, %s9636_s29  ;;  %3264 = vst [vmem:[#allocation1 + $0x1] ss:$4 sm:$0xff] %v6967_v8 }
 0x887   : > { %v7983_v50 = vpop.permute.xlu1 %3112  ;;  %v2964_v1 = vpop.permute.xlu0 %2963 }
 0x88c   : > { %v3265_v18 = vld.sshfl [vmem:[#allocation1] sm:$0xff pattern:$0x73625140] }
 0x88d   : > { %3270 = vst [vmem:[#allocation1 + $0x2] ss:$4 sm:$0xff] %v6967_v8  ;;  %3267 = vrot.lane.b32.xlu2 %v3265_v18, %s9701_s6 }
 0x88f   : > { %v7977_v27 = vpop.permute.xlu2 %3135 }
 0x894   : > { %v3271_v36 = vld.sshfl [vmem:[#allocation1] sm:$0xff pattern:$0x73625140] }
 0x895   : > { %3273 = vrot.lane.b32.xlu0 %v3271_v36, %s9702_s3  ;;  %3276 = vst [vmem:[#allocation1 + $0x3] ss:$4 sm:$0xff] %v6967_v8 }
 0x897   : > { %v2968_v26 = vpop.permute.xlu2 %2967  ;;  %v7996_v23 = vpop.permute.xlu0 %3123 }
 0x898   : > { %v2973_v55 = vsel %vm376_vm0, %v2968_v26, 0 }
 0x899   : > { %3014 = vmatpush.bf16.msrb.mxu3 %v2973_v55 }
 0x89c   : > { %v3277_v57 = vld.sshfl [vmem:[#allocation1] sm:$0xff pattern:$0x73625140] }
 0x89d   : > { %3279 = vrot.lane.b32.xlu1 %v3277_v57, %s9643_s8  ;;  %3281 = vst [vmem:[#allocation1] ss:$4 sm:$0xff] %v6967_v8 }
 0x89f   : > { %v7990_v59 = vpop.permute.xlu1 %3129 }
 0x8a4   : > { %v3282_v10 = vld.sshfl [vmem:[#allocation1] sm:$0xff pattern:$0x73625140] }
 0x8a5   : > { %3287 = vst [vmem:[#allocation1 + $0x1] ss:$4 sm:$0xff] %v6967_v8  ;;  %3284 = vrot.lane.b32.xlu2 %v3282_v10, %s9703_s25  ;;  %s9718_s25 = smov 93  }
 0x8a7   : > { %v3186_v21 = vpop.permute.xlu2 %3185 }
 0x8ac   : > { %v2966_v61 = vpop.permute.xlu1 %2965  ;;  %v3288_v62 = vld.sshfl [vmem:[#allocation1] sm:$0xff pattern:$0x73625140] }
 0x8ad   : > { %3015 = vmatpush.bf16.msrb.mxu3 %v2966_v61  ;;  %3290 = vrot.lane.b32.xlu0 %v3288_v62, %s9704_s1  ;;  %3293 = vst [vmem:[#allocation1 + $0x2] ss:$4 sm:$0xff] %v6967_v8  ;;  %s9717_s1 = smov 94  }
 0x8af   : > { %v8001_v17 = vpop.permute.xlu0 %3141 }
 0x8b1   : > { %3016 = vmatpush.bf16.msrb.mxu3 %v2964_v1 }
 0x8b4   : > { %v3294_v42 = vld.sshfl [vmem:[#allocation1] sm:$0xff pattern:$0x73625140] }
 0x8b5   : > { %3017 = vmatpush.bf16.msrb.mxu3 %v2962_v28  ;;  %3296 = vrot.lane.b32.xlu1 %v3294_v42, %s9660_s20  ;;  %3299 = vst [vmem:[#allocation1 + $0x3] ss:$4 sm:$0xff] %v6967_v8 }
 0x8b7   : > { %v3206_v24 = vpop.permute.xlu2 %3205 }
 0x8b9   : > { %3018 = vmatpush.bf16.msrb.mxu3 %v2952_v54 }
 0x8bc   : > { %v3300_v3 = vld.sshfl [vmem:[#allocation1] sm:$0xff pattern:$0x73625140] }
 0x8bd   : > { %3019 = vmatpush.bf16.msrb.mxu3 %v7911_v32  ;;  %3349 = vst [vmem:[#allocation1 + $0x1] ss:$4 sm:$0xff] %v6967_v8  ;;  %3302 = vrot.lane.b32.xlu2 %v3300_v3, %s9661_s24 }
 0x8bf   : > { %v3184_v48 = vpop.permute.xlu1 %3183 }
 0x8c0   : > { %v3187_v20 = vsel %vm9589_vm1, %v3184_v48, %v3186_v21 }
 0x8c1   : > { %3020 = vmatpush.bf16.msrb.mxu3 %v7895_v43  ;;  %v3307_v43 = vsel %vm376_vm0, %v7929_v34, %v3186_v21  ;;  %v3305_v16 = vsel %vm376_vm0, %v7927_v19, %v3187_v20  ;;  %v3218_v19 = vpop.permute.xlu2 %3217 }
 0x8c4   : > { %v3350_v56 = vld.sshfl [vmem:[#allocation1] sm:$0xff pattern:$0x73625140] }
 0x8c5   : > { %3021 = vmatpush.bf16.msrb.mxu3 %v2953_v14  ;;  %3352 = vrot.lane.b32.xlu0 %v3350_v56, %s9646_s21  ;;  %3355 = vst [vmem:[#allocation1 + $0x2] ss:$4 sm:$0xff] %v6967_v8 }
 0x8c7   : > { %v3195_v32 = vpop.permute.xlu0 %3194  ;;  %v3197_v28 = vpop.permute.xlu1 %3196 }
 0x8c8   : > { %6002 = vmatmul.msk.bf16.vlgmr.msrb.gmra.mxu3 %vm470_vm7, %v7363_v49  ;;  %v3198_v51 = vsel %vm9588_vm3, %v3195_v32, %v3197_v28  ;;  %v3311_v40 = vsel %vm379_vm2, %v3307_v43, %v3197_v28 }
 0x8c9   : > { %v3309_v35 = vsel %vm379_vm2, %v3305_v16, %v3198_v51 }
 0x8cc   : > { %v3356_v30 = vld.sshfl [vmem:[#allocation1] sm:$0xff pattern:$0x73625140] }
 0x8cd   : > { %3358 = vrot.lane.b32.xlu1 %v3356_v30, %s9631_s18  ;;  %3361 = vst [vmem:[#allocation1 + $0x3] ss:$4 sm:$0xff] %v6967_v8 }
 0x8cf   : > { %v3208_v54 = vpop.permute.xlu0 %3207  ;;  %v3238_v26 = vpop.permute.xlu2 %3237 }
 0x8d0   : > { %v3315_v4 = vsel %vm382_vm4, %v3311_v40, %v3208_v54  ;;  %v3209_v34 = vsel %vm9712_vm5, %v3206_v24, %v3208_v54  ;;  %vm9716_vm5 = vcmask 924672  }
 0x8d1   : > { %4203 = vrot.lane.b32.xlu2 %v3315_v4, %s9713_s10  ;;  %v3313_v5 = vsel %vm382_vm4, %v3309_v35, %v3209_v34 }
 0x8d4   : > { %v3362_v53 = vld.sshfl [vmem:[#allocation1] sm:$0xff pattern:$0x73625140] }
 0x8d5   : > { %3366 = vst [vmem:[#allocation1] ss:$4 sm:$0xff] %v6967_v8  ;;  %4201 = vrot.lane.b32.xlu1 %v3313_v5, %s9713_s10 }
 0x8d7   : > { %v3216_v18 = vpop.permute.xlu1 %3215  ;;  %v3251_v62 = vpop.permute.xlu2 %3250 }
 0x8d8   : > { %v3219_v42 = vsel %vm458_vm6, %v3216_v18, %v3218_v19 }
 0x8d9   : > { %3364 = vrot.lane.b32.xlu2 %v3362_v53, %s9647_s14 }
 0x8dc   : > { %v3367_v36 = vld.sshfl [vmem:[#allocation1] sm:$0xff pattern:$0x73625140] }
 0x8dd   : > { %3372 = vst [vmem:[#allocation1 + $0x1] ss:$4 sm:$0xff] %v6967_v8  ;;  %3369 = vrot.lane.b32.xlu0 %v3367_v36, %s9648_s0 }
 0x8df   : > { %v3227_v55 = vpop.permute.xlu0 %3226  ;;  %v3229_v57 = vpop.permute.xlu1 %3228 }
 0x8e0   : > { %v3321_v1 = vsel %vm376_vm0, %v3218_v19, %v3229_v57  ;;  %v3230_v3 = vsel %vm470_vm7, %v3227_v55, %v3229_v57 }
 0x8e1   : > { %v3318_v14 = vsel %vm376_vm0, %v3219_v42, %v3230_v3 }
 0x8e4   : > { %v3373_v10 = vld.sshfl [vmem:[#allocation1] sm:$0xff pattern:$0x73625140] }
 0x8e5   : > { %3375 = vrot.lane.b32.xlu1 %v3373_v10, %s9649_s2  ;;  %3378 = vst [vmem:[#allocation1 + $0x2] ss:$4 sm:$0xff] %v6967_v8 }
 0x8e7   : > { %v3240_v61 = vpop.permute.xlu0 %3239  ;;  %v3268_v4 = vpop.permute.xlu2 %3267 }
 0x8e8   : > { %v3325_v21 = vsel %vm379_vm2, %v3321_v1, %v3240_v61  ;;  %v3241_v56 = vsel %vm9714_vm9, %v3238_v26, %v3240_v61  ;;  %vm9727_vm9 = vcmask 744448  }
 0x8e9   : > { %v3329_v48 = vsel %vm382_vm4, %v3325_v21, %v3251_v62  ;;  %v3323_v20 = vsel %vm379_vm2, %v3318_v14, %v3241_v56 }
 0x8ec   : > { %v3379_v32 = vld.sshfl [vmem:[#allocation1] sm:$0xff pattern:$0x73625140] }
 0x8ed   : > { %4207 = vrot.lane.b32.xlu1 %v3329_v48, %s9713_s10  ;;  %3381 = vrot.lane.b32.xlu2 %v3379_v32, %s9635_s9  ;;  %3384 = vst [vmem:[#allocation1 + $0x3] ss:$4 sm:$0xff] %v6967_v8 }
 0x8ef   : > { %v3249_v24 = vpop.permute.xlu1 %3248 }
 0x8f0   : > { %v3252_v43 = vsel %vm9715_vm15, %v3249_v24, %v3251_v62  ;;  %vm9728_vm15 = vmmov %vm9727_vm9 }
 0x8f1   : > { %v3327_v28 = vsel %vm382_vm4, %v3323_v20, %v3252_v43 }
 0x8f2   : > { %4205 = vrot.lane.b32.xlu0 %v3327_v28, %s9713_s10 }
 0x8f4   : > { %v3385_v30 = vld.sshfl [vmem:[#allocation1] sm:$0xff pattern:$0x73625140] }
 0x8f5   : > { %3389 = vst [vmem:[#allocation1] ss:$4 sm:$0xff] %v6967_v8 }
 0x8f7   : > { %v3259_v51 = vpop.permute.xlu0 %3258  ;;  %v3261_v35 = vpop.permute.xlu1 %3260 }
 0x8f8   : > { %v3262_v34 = vsel %vm9716_vm5, %v3259_v51, %v3261_v35  ;;  %v3334_v5 = vsel %vm376_vm0, %v3261_v35, %v3268_v4  ;;  %vm9729_vm5 = vcmask 769024  }
 0x8f9   : > { %v3332_v36 = vsel %vm376_vm0, %v3262_v34, %v3268_v4 }
 0x8fa   : > { %3387 = vrot.lane.b32.xlu0 %v3385_v30, %s9650_s30 }
 0x8fc   : > { %v3390_v16 = vld.sshfl [vmem:[#allocation1] sm:$0xff pattern:$0x73625140] }
 0x8fd   : > { %3392 = vrot.lane.b32.xlu1 %v3390_v16, %s9652_s27  ;;  %3395 = vst [vmem:[#allocation1 + $0x1] ss:$4 sm:$0xff] %v6967_v8 }
 0x8ff   : > { %v3285_v14 = vpop.permute.xlu2 %3284 }
 0x904   : > { %v3396_v40 = vld.sshfl [vmem:[#allocation1] sm:$0xff pattern:$0x73625140]  ;;  %v3398_v54 = vld.sshfl [vmem:[#allocation1 + $0x8] sm:$0xff pattern:$0x73625140] }
 0x905   : > { %3400 = vrot.lane.b32.xlu2 %v3396_v40, %s9653_s26  ;;  %3406 = vst [vmem:[#allocation1 + $0x2] ss:$4 sm:$0xff] %v6967_v8  ;;  %3402 = vrot.lane.b32.xlu0 %v3398_v54, %s9653_s26 }
 0x907   : > { %v3274_v19 = vpop.permute.xlu0 %3273 }
 0x908   : > { %v3337_v26 = vsel %vm379_vm2, %v3334_v5, %v3274_v19  ;;  %v3336_v55 = vsel %vm379_vm2, %v3332_v36, %v3274_v19 }
 0x90c   : > { %v3407_v53 = vld.sshfl [vmem:[#allocation1] sm:$0xff pattern:$0x73625140]  ;;  %v3409_v18 = vld.sshfl [vmem:[#allocation1 + $0x8] sm:$0xff pattern:$0x73625140] }
 0x90d   : > { %3411 = vrot.lane.b32.xlu1 %v3407_v53, %s9630_s19  ;;  %3413 = vrot.lane.b32.xlu2 %v3409_v18, %s9630_s19  ;;  %3417 = vst [vmem:[#allocation1 + $0x3] ss:$4 sm:$0xff] %v6967_v8 }
 0x90f   : > { %v3280_v57 = vpop.permute.xlu1 %3279 }
 0x910   : > { %v3340_v10 = vsel %vm382_vm4, %v3337_v26, %v3280_v57  ;;  %v3339_v1 = vsel %vm382_vm4, %v3336_v55, %v3280_v57 }
 0x911   : > { %4211 = vrot.lane.b32.xlu0 %v3340_v10, %s9713_s10 }
 0x914   : > { %v3420_v61 = vld.sshfl [vmem:[#allocation1 + $0x8] sm:$0xff pattern:$0x73625140]  ;;  %v3418_v62 = vld.sshfl [vmem:[#allocation1] sm:$0xff pattern:$0x73625140] }
 0x915   : > { %3424 = vrot.lane.b32.xlu1 %v3420_v61, %s9654_s23  ;;  %3427 = vst [vmem:[#allocation1] ss:$4 sm:$0xff] %v6967_v8  ;;  %4209 = vrot.lane.b32.xlu2 %v3339_v1, %s9713_s10 }
 0x917   : > { %v3303_v30 = vpop.permute.xlu2 %3302 }
 0x919   : > { %3422 = vrot.lane.b32.xlu0 %v3418_v62, %s9654_s23 }
 0x91c   : > { %v3428_v42 = vld.sshfl [vmem:[#allocation1] sm:$0xff pattern:$0x73625140]  ;;  %v3430_v3 = vld.sshfl [vmem:[#allocation1 + $0x8] sm:$0xff pattern:$0x73625140] }
 0x91d   : > { %3438 = vst [vmem:[#allocation1 + $0x1] ss:$4 sm:$0xff] %v6967_v8  ;;  %3432 = vrot.lane.b32.xlu2 %v3428_v42, %s9655_s22 }
 0x91f   : > { %v3291_v56 = vpop.permute.xlu0 %3290 }
 0x920   : > { %v3343_v20 = vsel %vm376_vm0, %v3285_v14, %v3291_v56 }
 0x921   : > { %3434 = vrot.lane.b32.xlu0 %v3430_v3, %s9655_s22 }
 0x924   : > { %v3439_v21 = vld.sshfl [vmem:[#allocation1] sm:$0xff pattern:$0x73625140]  ;;  %v3441_v48 = vld.sshfl [vmem:[#allocation1 + $0x8] sm:$0xff pattern:$0x73625140] }
 0x925   : > { %3443 = vrot.lane.b32.xlu1 %v3439_v21, %s9717_s1  ;;  %3449 = vst [vmem:[#allocation1 + $0x2] ss:$4 sm:$0xff] %v6967_v8  ;;  %3445 = vrot.lane.b32.xlu2 %v3441_v48, %s9717_s1  ;;  %s9721_s1 = smov 120  }
 0x927   : > { %v3297_v24 = vpop.permute.xlu1 %3296 }
 0x928   : > { %v3345_v28 = vsel %vm379_vm2, %v3343_v20, %v3297_v24 }
 0x929   : > { %v3347_v16 = vsel %vm382_vm4, %v3345_v28, %v3303_v30 }
 0x92b   : > { %v8090_v4 = vpop.permute.xlu2 %4203 }
 0x92c   : > { %v3452_v32 = vld.sshfl [vmem:[#allocation1 + $0x8] sm:$0xff pattern:$0x73625140]  ;;  %v3450_v43 = vld.sshfl [vmem:[#allocation1] sm:$0xff pattern:$0x73625140] }
 0x92d   : > { %3456 = vrot.lane.b32.xlu1 %v3452_v32, %s9718_s25  ;;  %3454 = vrot.lane.b32.xlu0 %v3450_v43, %s9718_s25  ;;  %3460 = vst [vmem:[#allocation1 + $0x3] ss:$4 sm:$0xff] %v6967_v8  ;;  %s9720_s25 = smov 51  }
 0x933   : > { %v3365_v26 = vpop.permute.xlu2 %3364 }
 0x934   : > { %v3461_v51 = vld.sshfl [vmem:[#allocation1] sm:$0xff pattern:$0x73625140]  ;;  %v3463_v40 = vld.sshfl [vmem:[#allocation1 + $0x8] sm:$0xff pattern:$0x73625140] }
 0x935   : > { %4213 = vrot.lane.b32.xlu1 %v3347_v16, %s9713_s10  ;;  %3465 = vrot.lane.b32.xlu2 %v3461_v51, %s9659_s5  ;;  %3497 = vst [vmem:[#allocation1] ss:$4 sm:$0xff] %v6967_v8  ;;  %s9724_s10 = smov 38  }
 0x936   : > { %3467 = vrot.lane.b32.xlu0 %v3463_v40, %s9659_s5 }
 0x937   : > { %v3353_v34 = vpop.permute.xlu0 %3352 }
 0x938   : > { %v3471_v53 = vsel %vm376_vm0, %v6967_v8, %v3353_v34 }
 0x93c   : > { %v8086_v54 = vld.sshfl [vmem:[#allocation1] sm:$0xff pattern:$0x73625140]  ;;  %v8088_v35 = vld.sshfl [vmem:[#allocation1 + $0x8] sm:$0xff pattern:$0x73625140] }
 0x93d   : > { %3501 = vst [vmem:[#allocation1 + $0x1] ss:$4 sm:$0xff] %v6967_v8 }
 0x93f   : > { %v3359_v18 = vpop.permute.xlu1 %3358 }
 0x940   : > { %v3473_v36 = vsel %vm379_vm2, %v3471_v53, %v3359_v18 }
 0x941   : > { %v3475_v55 = vsel %vm382_vm4, %v3473_v36, %v3365_v26 }
 0x944   : > { %v3504_v5 = vld.sshfl [vmem:[#allocation1 + $0x8] sm:$0xff pattern:$0x73625140]  ;;  %v3502_v19 = vld.sshfl [vmem:[#allocation1] sm:$0xff pattern:$0x73625140] }
 0x945   : > { %3508 = vrot.lane.b32.xlu2 %v3504_v5, %s9646_s21  ;;  %3506 = vrot.lane.b32.xlu1 %v3502_v19, %s9646_s21  ;;  %3512 = vst [vmem:[#allocation1 + $0x2] ss:$4 sm:$0xff] %v7090_v58 }
 0x947   : > { %v3382_v24 = vpop.permute.xlu2 %3381 }
 0x94b   : > { %v3023_v57 = vpop.f32.mrf.mxu3 }
 0x94c   : > { %v8101_v10 = vadd.f32 %v3023_v57, %v7944_v39  ;;  %v3513_v1 = vld.sshfl [vmem:[#allocation1] sm:$0xff pattern:$0x73625140]  ;;  %v8115_v39 = vpop.permute.xlu1 %4201 }
 0x94d   : > { %4226 = vrot.lane.b32.xlu2 %v3475_v55, %s9650_s30  ;;  %3515 = vrot.lane.b32.xlu0 %v3513_v1, %s9720_s25  ;;  %3518 = vst [vmem:[#allocation1 + $0x3] ss:$4 sm:$0xff] %v7090_v58  ;;  %s9722_s25 = smov 50  }
 0x94e   : > { %9719 = vst [vmem:[#allocation42_spill] sm:$0xff] %v8101_v10  ;;  %3031 = vrot.lane.b32.xlu1 %v8101_v10, %s9721_s1 }
 0x94f   : > { %v3370_v42 = vpop.permute.xlu0 %3369 }
 0x953   : > { %v3025_v61 = vpop.f32.mrf.mxu3 }
 0x954   : > { %v3519_v62 = vld.sshfl [vmem:[#allocation1] sm:$0xff pattern:$0x73625140] }
 0x955   : > { %3034 = vrot.lane.b32.xlu2 %v8101_v10, %s9649_s2  ;;  %3028 = vrot.lane.b32.xlu0 %v8101_v10, %s9634_s16  ;;  %3523 = vst [vmem:[#allocation1] ss:$4 sm:$0xff] %v7090_v58 }
 0x956   : > { %3040 = vrot.lane.b32.xlu1 %v8101_v10, %s9670_s4 }
 0x957   : > { %v3376_v21 = vpop.permute.xlu1 %3375 }
 0x958   : > { %v3478_v56 = vsel %vm376_vm0, %v3370_v42, %v3376_v21 }
 0x959   : > { %v3480_v43 = vsel %vm379_vm2, %v3478_v56, %v3382_v24 }
 0x95c   : > { %v3524_v3 = vld.sshfl [vmem:[#allocation1] sm:$0xff pattern:$0x73625140] }
 0x95d   : > { %3043 = vrot.lane.b32.xlu2 %v8101_v10, %s9630_s19  ;;  %3037 = vrot.lane.b32.xlu0 %v8101_v10, %s9637_s17  ;;  %3529 = vst [vmem:[#allocation1 + $0x1] ss:$4 sm:$0xff] %v7090_v58 }
 0x95e   : > { %3521 = vrot.lane.b32.xlu1 %v3519_v62, %s9722_s25  ;;  %s9723_s25 = smov 39  }
 0x95f   : > { %v4208_v20 = vpop.permute.xlu1 %4207  ;;  %v3401_v34 = vpop.permute.xlu2 %3400 }
 0x964   : > { %v3530_v48 = vld.sshfl [vmem:[#allocation1] sm:$0xff pattern:$0x73625140]  ;;  %v8125_v14 = vpop.permute.xlu0 %4205 }
 0x965   : > { %3046 = vrot.lane.b32.xlu0 %v8101_v10, %s9633_s15  ;;  %3535 = vst [vmem:[#allocation1 + $0x2] ss:$4 sm:$0xff] %v7090_v58  ;;  %3526 = vrot.lane.b32.xlu2 %v3524_v3, %s9640_s12 }
 0x967   : > { %v3414_v26 = vpop.permute.xlu2 %3413 }
 0x96c   : > { %v3536_v32 = vld.sshfl [vmem:[#allocation1] sm:$0xff pattern:$0x73625140]  ;;  %v3388_v28 = vpop.permute.xlu0 %3387 }
 0x96d   : > { %3532 = vrot.lane.b32.xlu0 %v3530_v48, %s9674_s13  ;;  %3538 = vrot.lane.b32.xlu1 %v3536_v32, %s9673_s7  ;;  %3541 = vst [vmem:[#allocation1 + $0x3] ss:$4 sm:$0xff] %v7090_v58  ;;  %v3482_v30 = vsel %vm382_vm4, %v3480_v43, %v3388_v28 }
 0x96f   : > { %v3393_v51 = vpop.permute.xlu1 %3392  ;;  %v4210_v48 = vpop.permute.xlu2 %4209 }
 0x974   : > { %v3542_v16 = vld.sshfl [vmem:[#allocation1] sm:$0xff pattern:$0x73625140] }
 0x975   : > { %4228 = vrot.lane.b32.xlu0 %v3482_v30, %s9650_s30  ;;  %3546 = vst [vmem:[#allocation1] ss:$4 sm:$0xff] %v7090_v58  ;;  %3544 = vrot.lane.b32.xlu2 %v3542_v16, %s9723_s25  ;;  %s9726_s25 = smov 26  }
 0x977   : > { %v3403_v40 = vpop.permute.xlu0 %3402  ;;  %v3433_v24 = vpop.permute.xlu2 %3432 }
 0x978   : > { %v3404_v18 = vsel %vm649_vm11, %v3401_v34, %v3403_v40 }
 0x979   : > { %v3485_v57 = vsel %vm376_vm0, %v3393_v51, %v3404_v18  ;;  %v4216_v18 = vsel %vm9728_vm15, %v8125_v14, %v4208_v20  ;;  %vm9730_vm15 = vcmask 760832  }
 0x97c   : > { %v3547_v5 = vld.sshfl [vmem:[#allocation1] sm:$0xff pattern:$0x73625140] }
 0x97d   : > { %3549 = vrot.lane.b32.xlu0 %v3547_v5, %s9724_s10  ;;  %3552 = vst [vmem:[#allocation1 + $0x1] ss:$4 sm:$0xff] %v7090_v58  ;;  %s9725_s10 = smov 27  }
 0x97f   : > { %v3412_v19 = vpop.permute.xlu1 %3411  ;;  %v3446_v51 = vpop.permute.xlu2 %3445 }
 0x980   : > { %v3415_v55 = vsel %vm661_vm12, %v3412_v19, %v3414_v26  ;;  %v3168_v26 = vsel %vm376_vm0, %v7996_v23, %v7990_v59  ;;  %v3160_v59 = vsel %vm376_vm0, %v7959_v0, %v7988_v22  ;;  %v3152_v0 = vsel %vm376_vm0, %v7964_v6, %v7949_v45 }
 0x981   : > { %v3487_v1 = vsel %vm379_vm2, %v3485_v57, %v3415_v55  ;;  %v4215_v57 = vsel %vm9727_vm9, %v8115_v39, %v8090_v4 }
 0x983   : > { %v4212_v53 = vpop.permute.xlu0 %4211 }
 0x984   : > { %v3553_v36 = vld.sshfl [vmem:[#allocation1] sm:$0xff pattern:$0x73625140]  ;;  %v4217_v34 = vsel %vm9727_vm9, %v4210_v48, %v4212_v53  ;;  %vm9743_vm9 = vcmask 965632  }
 0x985   : > { %3555 = vrot.lane.b32.xlu1 %v3553_v36, %s9701_s6  ;;  %3558 = vst [vmem:[#allocation1 + $0x2] ss:$4 sm:$0xff] %v7090_v58 }
 0x987   : > { %v3425_v61 = vpop.permute.xlu1 %3424 }
 0x98b   : > { %v3423_v62 = vpop.permute.xlu0 %3422 }
 0x98c   : > { %v3559_v42 = vld.sshfl [vmem:[#allocation1] sm:$0xff pattern:$0x73625140]  ;;  %v3426_v3 = vsel %vm673_vm13, %v3423_v62, %v3425_v61  ;;  %v3170_v61 = vsel %vm379_vm2, %v3168_v26, %v7977_v27  ;;  %v3162_v27 = vsel %vm379_vm2, %v3160_v59, %v7983_v50  ;;  %v3144_v50 = vsel %vm376_vm0, %v6815_v29, %v7954_v12 }
 0x98d   : > { %3564 = vst [vmem:[#allocation1 + $0x3] ss:$4 sm:$0xff] %v7090_v58  ;;  %v3489_v21 = vsel %vm382_vm4, %v3487_v1, %v3426_v3  ;;  %3561 = vrot.lane.b32.xlu2 %v3559_v42, %s9702_s3  ;;  %v3172_v62 = vsel %vm382_vm4, %v3170_v61, %v8001_v17  ;;  %v3154_v17 = vsel %vm379_vm2, %v3152_v0, %v7981_v41 }
 0x98e   : > { %4230 = vrot.lane.b32.xlu1 %v3489_v21, %s9650_s30  ;;  %v3164_v21 = vsel %vm382_vm4, %v3162_v27, %v7966_v31  ;;  %v3156_v6 = vsel %vm382_vm4, %v3154_v17, %v7975_v2  ;;  %v3146_v31 = vsel %vm379_vm2, %v3144_v50, %v7940_v9 }
 0x98f   : > { %v3466_v36 = vpop.permute.xlu2 %3465  ;;  %v3148_v41 = vsel %vm382_vm4, %v3146_v31, %v7971_v38 }
 0x993   : > { %v3435_v30 = vpop.permute.xlu0 %3434 }
 0x994   : > { %v3565_v56 = vld.sshfl [vmem:[#allocation1] sm:$0xff pattern:$0x73625140]  ;;  %v3436_v53 = vsel %vm684_vm14, %v3433_v24, %v3435_v30 }
 0x995   : > { %3567 = vrot.lane.b32.xlu0 %v3565_v56, %s9643_s8  ;;  %3569 = vst [vmem:[#allocation1] ss:$4 sm:$0xff] %v7090_v58  ;;  %s9732_s8 = smov 119  }
 0x997   : > { %v3444_v32 = vpop.permute.xlu1 %3443 }
 0x998   : > { %v3447_v55 = vsel %vm9729_vm5, %v3444_v32, %v3446_v51  ;;  %vm9742_vm5 = vcmask 973824  }
 0x999   : > { %v3492_v14 = vsel %vm376_vm0, %v3436_v53, %v3447_v55 }
 0x99c   : > { %v3570_v43 = vld.sshfl [vmem:[#allocation1] sm:$0xff pattern:$0x73625140] }
 0x99d   : > { %3572 = vrot.lane.b32.xlu1 %v3570_v43, %s9725_s10  ;;  %3575 = vst [vmem:[#allocation1 + $0x1] ss:$4 sm:$0xff] %v7090_v58 }
 0x99f   : > { %v3457_v28 = vpop.permute.xlu1 %3456  ;;  %v3455_v5 = vpop.permute.xlu0 %3454 }
 0x9a0   : > { %v3458_v20 = vsel %vm9730_vm15, %v3455_v5, %v3457_v28  ;;  %v3509_v22 = vpop.permute.xlu2 %3508  ;;  %vm9744_vm15 = vcmask 883712  }
 0x9a1   : > { %v3494_v4 = vsel %vm379_vm2, %v3492_v14, %v3458_v20  ;;  %v3595_v38 = vsel %vm376_vm0, %v8088_v35, %v3509_v22 }
 0x9a4   : > { %v3576_v16 = vld.sshfl [vmem:[#allocation1] sm:$0xff pattern:$0x73625140] }
 0x9a5   : > { %3581 = vst [vmem:[#allocation1 + $0x2] ss:$4 sm:$0xff] %v7090_v58  ;;  %3578 = vrot.lane.b32.xlu2 %v3576_v16, %s9726_s25 }
 0x9a7   : > { %v4214_v40 = vpop.permute.xlu1 %4213 }
 0x9a8   : > { %4327 = vmatpush.bf16.msra.mxu0 %v4214_v40  ;;  %v3468_v23 = vpop.permute.xlu0 %3467  ;;  %v8204_v32 = vpop.permute.xlu2 %4226 }
 0x9a9   : > { %v3469_v39 = vsel %vm720_vm8, %v3466_v36, %v3468_v23 }
 0x9aa   : > { %v3496_v3 = vsel %vm382_vm4, %v3494_v4, %v3469_v39 }
 0x9ac   : > { %4328 = vmatpush.bf16.msra.mxu0 %v4217_v34  ;;  %v3582_v19 = vld.sshfl [vmem:[#allocation1] sm:$0xff pattern:$0x73625140] }
 0x9ad   : > { %3584 = vrot.lane.b32.xlu0 %v3582_v19, %s9660_s20  ;;  %3587 = vst [vmem:[#allocation1 + $0x3] ss:$4 sm:$0xff] %v7090_v58  ;;  %4232 = vrot.lane.b32.xlu2 %v3496_v3, %s9650_s30 }
 0x9b0   : > { %4329 = vmatpush.bf16.msra.mxu0 %v4216_v18  ;;  %v8222_v16 = vpop.permute.xlu2 %3034 }
 0x9b1   : > { %9735 = vst [vmem:[#allocation46_spill] sm:$0xff] %v8222_v16 }
 0x9b4   : > { %4330 = vmatpush.bf16.msra.mxu0 %v4215_v57  ;;  %v3588_v1 = vld.sshfl [vmem:[#allocation1] sm:$0xff pattern:$0x73625140] }
 0x9b5   : > { %3590 = vrot.lane.b32.xlu1 %v3588_v1, %s9661_s24  ;;  %3624 = vst [vmem:[#allocation1 + $0x1] ss:$4 sm:$0xff] %v7090_v58 }
 0x9b7   : > { %v3507_v42 = vpop.permute.xlu1 %3506 }
 0x9b8   : > { %4331 = vmatpush.bf16.msra.mxu0 %v3172_v62  ;;  %v3510_v9 = vsel %vm9589_vm1, %v3507_v42, %v3509_v22  ;;  %v8236_v36 = vpop.permute.xlu2 %3043 }
 0x9b9   : > { %v3593_v43 = vsel %vm376_vm0, %v8086_v54, %v3510_v9  ;;  %9738 = vst [vmem:[#allocation48_spill] sm:$0xff] %v8236_v36 }
 0x9bc   : > { %4332 = vmatpush.bf16.msra.mxu0 %v3164_v21  ;;  %v3625_v48 = vld.sshfl [vmem:[#allocation1] sm:$0xff pattern:$0x73625140] }
 0x9bd   : > { %3630 = vst [vmem:[#allocation1 + $0x2] ss:$4 sm:$0xff] %v7090_v58  ;;  %3627 = vrot.lane.b32.xlu2 %v3625_v48, %s9721_s1  ;;  %s9740_s1 = smov 107  }
 0x9bf   : > { %v3516_v45 = vpop.permute.xlu0 %3515 }
 0x9c0   : > { %4333 = vmatpush.bf16.msra.mxu0 %v3156_v6  ;;  %v8200_v56 = vpop.permute.xlu1 %3031  ;;  %v3597_v51 = vsel %vm379_vm2, %v3593_v43, %v3516_v45  ;;  %v3598_v40 = vsel %vm379_vm2, %v3595_v38, %v3516_v45  ;;  %v3527_v57 = vpop.permute.xlu2 %3526 }
 0x9c1   : > { %9731 = vst [vmem:[#allocation43_spill] sm:$0xff] %v8200_v56 }
 0x9c4   : > { %4334 = vmatpush.bf16.msra.mxu0 %v3148_v41  ;;  %v3631_v29 = vld.sshfl [vmem:[#allocation1] sm:$0xff pattern:$0x73625140]  ;;  %v3633_v12 = vld.sshfl [vmem:[#allocation1 + $0x8] sm:$0xff pattern:$0x73625140] }
 0x9c5   : > { %3635 = vrot.lane.b32.xlu0 %v3631_v29, %s9732_s8  ;;  %3637 = vrot.lane.b32.xlu1 %v3633_v12, %s9732_s8  ;;  %3641 = vst [vmem:[#allocation1 + $0x3] ss:$4 sm:$0xff] %v7090_v58  ;;  %s9737_s8 = smov 77  }
 0x9c7   : > { %4335 = vmatmul.bf16.vlgmr.msra.gmra.mxu0 %v6919_v11  ;;  %v8213_v2 = vpop.permute.xlu0 %3028 }
 0x9c8   : > { %9733 = vst [vmem:[#allocation44_spill] sm:$0xff] %v8213_v2  ;;  %v8216_v24 = vpop.permute.xlu1 %3040 }
 0x9c9   : > { %9734 = vst [vmem:[#allocation45_spill] sm:$0xff] %v8216_v24 }
 0x9cc   : > { %v3644_v28 = vld.sshfl [vmem:[#allocation1 + $0x8] sm:$0xff pattern:$0x73625140]  ;;  %v3642_v30 = vld.sshfl [vmem:[#allocation1] sm:$0xff pattern:$0x73625140] }
 0x9cd   : > { %3651 = vst [vmem:[#allocation1] ss:$4 sm:$0xff] %v7090_v58  ;;  %3646 = vrot.lane.b32.xlu2 %v3642_v30, %s9647_s14 }
 0x9cf   : > { %v8228_v5 = vpop.permute.xlu0 %3037  ;;  %v3545_v4 = vpop.permute.xlu2 %3544 }
 0x9d0   : > { %v3522_v34 = vpop.permute.xlu1 %3521  ;;  %9736 = vst [vmem:[#allocation47_spill] sm:$0xff] %v8228_v5 }
 0x9d1   : > { %v3600_v35 = vsel %vm382_vm4, %v3597_v51, %v3522_v34  ;;  %v3601_v19 = vsel %vm382_vm4, %v3598_v40, %v3522_v34 }
 0x9d2   : > { %4243 = vrot.lane.b32.xlu0 %v3600_v35, %s9737_s8  ;;  %4245 = vrot.lane.b32.xlu1 %v3601_v19, %s9737_s8 }
 0x9d4   : > { %v3652_v54 = vld.sshfl [vmem:[#allocation1] sm:$0xff pattern:$0x73625140]  ;;  %v3654_v18 = vld.sshfl [vmem:[#allocation1 + $0x8] sm:$0xff pattern:$0x73625140] }
 0x9d5   : > { %3662 = vst [vmem:[#allocation1 + $0x1] ss:$4 sm:$0xff] %v7090_v58  ;;  %3658 = vrot.lane.b32.xlu2 %v3654_v18, %s9648_s0 }
 0x9d7   : > { %v8240_v26 = vpop.permute.xlu0 %3046 }
 0x9d8   : > { %9739 = vst [vmem:[#allocation49_spill] sm:$0xff] %v8240_v26 }
 0x9da   : > { %3648 = vrot.lane.b32.xlu0 %v3644_v28, %s9647_s14  ;;  %3656 = vrot.lane.b32.xlu1 %v3652_v54, %s9648_s0 }
 0x9dc   : > { %v3663_v55 = vld.sshfl [vmem:[#allocation1] sm:$0xff pattern:$0x73625140]  ;;  %v3665_v53 = vld.sshfl [vmem:[#allocation1 + $0x8] sm:$0xff pattern:$0x73625140] }
 0x9dd   : > { %3673 = vst [vmem:[#allocation1 + $0x2] ss:$4 sm:$0xff] %v7090_v58 }
 0x9df   : > { %v3533_v14 = vpop.permute.xlu0 %3532  ;;  %v3539_v59 = vpop.permute.xlu1 %3538 }
 0x9e0   : > { %v3604_v61 = vsel %vm376_vm0, %v3527_v57, %v3533_v14 }
 0x9e1   : > { %v3606_v23 = vsel %vm379_vm2, %v3604_v61, %v3539_v59 }
 0x9e2   : > { %3667 = vrot.lane.b32.xlu0 %v3663_v55, %s9649_s2  ;;  %3669 = vrot.lane.b32.xlu1 %v3665_v53, %s9649_s2  ;;  %v3608_v39 = vsel %vm382_vm4, %v3606_v23, %v3545_v4 }
 0x9e4   : > { %v3676_v20 = vld.sshfl [vmem:[#allocation1 + $0x8] sm:$0xff pattern:$0x73625140]  ;;  %v3674_v1 = vld.sshfl [vmem:[#allocation1] sm:$0xff pattern:$0x73625140] }
 0x9e5   : > { %3684 = vst [vmem:[#allocation1 + $0x3] ss:$4 sm:$0xff] %v7090_v58  ;;  %3678 = vrot.lane.b32.xlu2 %v3674_v1, %s9670_s4 }
 0x9e7   : > { %v8254_v27 = vpop.permute.xlu0 %4228  ;;  %v3562_v45 = vpop.permute.xlu2 %3561 }
 0x9ea   : > { %3680 = vrot.lane.b32.xlu0 %v3676_v20, %s9670_s4 }
 0x9ec   : > { %v3685_v62 = vld.sshfl [vmem:[#allocation1] sm:$0xff pattern:$0x73625140]  ;;  %v3687_v42 = vld.sshfl [vmem:[#allocation1 + $0x8] sm:$0xff pattern:$0x73625140] }
 0x9ed   : > { %3694 = vst [vmem:[#allocation1] ss:$4 sm:$0xff] %v7090_v58  ;;  %3689 = vrot.lane.b32.xlu1 %v3685_v62, %s9740_s1  ;;  %4247 = vrot.lane.b32.xlu2 %v3608_v39, %s9737_s8 }
 0x9ef   : > { %v3550_v17 = vpop.permute.xlu0 %3549 }
 0x9f4   : > { %v3695_v0 = vld.sshfl [vmem:[#allocation1] sm:$0xff pattern:$0x73625140]  ;;  %v3697_v22 = vld.sshfl [vmem:[#allocation1 + $0x8] sm:$0xff pattern:$0x73625140] }
 0x9f5   : > { %3699 = vrot.lane.b32.xlu0 %v3695_v0, %s9652_s27  ;;  %3705 = vst [vmem:[#allocation1 + $0x1] ss:$4 sm:$0xff] %v7090_v58  ;;  %3701 = vrot.lane.b32.xlu1 %v3697_v22, %s9652_s27 }
 0x9f6   : > { %3691 = vrot.lane.b32.xlu2 %v3687_v42, %s9740_s1  ;;  %s9741_s1 = smov 28  }
 0x9f7   : > { %v3556_v48 = vpop.permute.xlu1 %3555 }
 0x9f8   : > { %v3611_v50 = vsel %vm376_vm0, %v3550_v17, %v3556_v48 }
 0x9f9   : > { %v3613_v41 = vsel %vm379_vm2, %v3611_v50, %v3562_v45 }
 0x9fc   : > { %v3708_v3 = vld.sshfl [vmem:[#allocation1 + $0x8] sm:$0xff pattern:$0x73625140]  ;;  %v3706_v21 = vld.sshfl [vmem:[#allocation1] sm:$0xff pattern:$0x73625140] }
 0x9fd   : > { %3712 = vrot.lane.b32.xlu0 %v3708_v3, %s9653_s26  ;;  %3716 = vst [vmem:[#allocation1 + $0x2] ss:$4 sm:$0xff] %v7090_v58 }
 0x9fe   : > { %3710 = vrot.lane.b32.xlu2 %v3706_v21, %s9653_s26 }
 0x9ff   : > { %v3579_v51 = vpop.permute.xlu2 %3578 }
 0xa00   : > { %v8272_v38 = vpop.permute.xlu1 %4230 }
 0xa04   : > { %v3717_v6 = vld.sshfl [vmem:[#allocation1] sm:$0xff pattern:$0x73625140]  ;;  %v3719_v31 = vld.sshfl [vmem:[#allocation1 + $0x8] sm:$0xff pattern:$0x73625140] }
 0xa05   : > { %3721 = vrot.lane.b32.xlu1 %v3717_v6, %s9630_s19  ;;  %3727 = vst [vmem:[#allocation1 + $0x3] ss:$4 sm:$0xff] %v7742_v33 }
 0xa06   : > { %3723 = vrot.lane.b32.xlu2 %v3719_v31, %s9630_s19 }
 0xa07   : > { %v3568_v29 = vpop.permute.xlu0 %3567  ;;  %v8282_v54 = vpop.permute.xlu2 %4232 }
 0xa08   : > { %v3615_v12 = vsel %vm382_vm4, %v3613_v41, %v3568_v29 }
 0xa09   : > { %4249 = vrot.lane.b32.xlu0 %v3615_v12, %s9737_s8 }
 0xa0c   : > { %v3728_v9 = vld.sshfl [vmem:[#allocation1] sm:$0xff pattern:$0x73625140] }
 0xa0d   : > { %3732 = vst [vmem:[#allocation1] ss:$4 sm:$0xff] %v7742_v33 }
 0xa0f   : > { %v3573_v30 = vpop.permute.xlu1 %3572 }
 0xa10   : > { %v3618_v40 = vsel %vm376_vm0, %v3573_v30, %v3579_v51 }
 0xa11   : > { %3730 = vrot.lane.b32.xlu0 %v3728_v9, %s9741_s1  ;;  %s9749_s1 = smov 45  }
 0xa14   : > { %v3733_v43 = vld.sshfl [vmem:[#allocation1] sm:$0xff pattern:$0x73625140] }
 0xa15   : > { %3735 = vrot.lane.b32.xlu1 %v3733_v43, %s9725_s10  ;;  %3738 = vst [vmem:[#allocation1 + $0x1] ss:$4 sm:$0xff] %v7742_v33  ;;  %s9756_s10 = smov 79  }
 0xa17   : > { %v3628_v57 = vpop.permute.xlu2 %3627 }
 0xa18   : > { %v3756_v0 = vsel %vm376_vm0, %v7090_v58, %v3628_v57 }
 0xa1c   : > { %v3739_v28 = vld.sshfl [vmem:[#allocation1] sm:$0xff pattern:$0x73625140] }
 0xa1d   : > { %3744 = vst [vmem:[#allocation1 + $0x2] ss:$4 sm:$0xff] %v7742_v33  ;;  %3741 = vrot.lane.b32.xlu2 %v3739_v28, %s9726_s25  ;;  %s9754_s25 = smov 33  }
 0xa1f   : > { %v3585_v34 = vpop.permute.xlu0 %3584 }
 0xa20   : > { %v3620_v19 = vsel %vm379_vm2, %v3618_v40, %v3585_v34 }
 0xa24   : > { %v3745_v35 = vld.sshfl [vmem:[#allocation1] sm:$0xff pattern:$0x73625140] }
 0xa25   : > { %3747 = vrot.lane.b32.xlu0 %v3745_v35, %s9660_s20  ;;  %3750 = vst [vmem:[#allocation1 + $0x3] ss:$4 sm:$0xff] %v7742_v33 }
 0xa27   : > { %v3591_v18 = vpop.permute.xlu1 %3590  ;;  %v3647_v20 = vpop.permute.xlu2 %3646 }
 0xa28   : > { %v3622_v55 = vsel %vm382_vm4, %v3620_v19, %v3591_v18 }
 0xa29   : > { %4251 = vrot.lane.b32.xlu1 %v3622_v55, %s9737_s8  ;;  %s9747_s8 = sld [smem:[#allocation27_spill]] }
 0xa2c   : > { %v3751_v53 = vld.sshfl [vmem:[#allocation1] sm:$0xff pattern:$0x73625140] }
 0xa2d   : > { %3783 = vst [vmem:[#allocation1 + $0x1] ss:$4 sm:$0xff] %v7742_v33 }
 0xa2f   : > { %v3659_v23 = vpop.permute.xlu2 %3658 }
 0xa31   : > { %3753 = vrot.lane.b32.xlu1 %v3751_v53, %s9661_s24 }
 0xa34   : > { %v3784_v14 = vld.sshfl [vmem:[#allocation1] sm:$0xff pattern:$0x73625140] }
 0xa35   : > { %3789 = vst [vmem:[#allocation1 + $0x2] ss:$4 sm:$0xff] %v7742_v33  ;;  %3786 = vrot.lane.b32.xlu2 %v3784_v14, %s9646_s21 }
 0xa37   : > { %v3636_v1 = vpop.permute.xlu0 %3635  ;;  %v3638_v61 = vpop.permute.xlu1 %3637 }
 0xa38   : > { %v3639_v22 = vsel %vm9742_vm5, %v3636_v1, %v3638_v61  ;;  %vm9745_vm5 = vcmask 875520  }
 0xa39   : > { %v3758_v45 = vsel %vm379_vm2, %v3756_v0, %v3639_v22 }
 0xa3c   : > { %v3790_v59 = vld.sshfl [vmem:[#allocation1] sm:$0xff pattern:$0x73625140] }
 0xa3d   : > { %3792 = vrot.lane.b32.xlu0 %v3790_v59, %s9631_s18  ;;  %3795 = vst [vmem:[#allocation1 + $0x3] ss:$4 sm:$0xff] %v7742_v33 }
 0xa3f   : > { %v3679_v3 = vpop.permute.xlu2 %3678 }
 0xa44   : > { %v8292_v4 = vpop.f32.mrf.mxu0  ;;  %v8294_v39 = vpop.permute.xlu0 %4243  ;;  %v3796_v62 = vld.sshfl [vmem:[#allocation1] sm:$0xff pattern:$0x73625140] }
 0xa45   : > { %v8296_v42 = vpop.permute.xlu1 %4245  ;;  %3798 = vrot.lane.b32.xlu1 %v3796_v62, %s9632_s28  ;;  %3800 = vst [vmem:[#allocation1] ss:$4 sm:$0xff] %v7742_v33 }
 0xa47   : > { %v8308_v9 = vpop.permute.xlu2 %4247 }
 0xa4c   : > { %v3649_v21 = vpop.permute.xlu0 %3648  ;;  %v3801_v17 = vld.sshfl [vmem:[#allocation1] sm:$0xff pattern:$0x73625140]  ;;  %v4338_v48 = vpop.f32.mrf.mxu0 }
 0xa4d   : > { %v3657_v50 = vpop.permute.xlu1 %3656  ;;  %3806 = vst [vmem:[#allocation1 + $0x1] ss:$4 sm:$0xff] %v7742_v33  ;;  %v3650_v6 = vsel %vm9743_vm9, %v3647_v20, %v3649_v21  ;;  %vm9746_vm9 = vcmask 629760  }
 0xa4e   : > { %v3760_v31 = vsel %vm382_vm4, %v3758_v45, %v3650_v6  ;;  %v3660_v43 = vsel %vm458_vm6, %v3657_v50, %v3659_v23 }
 0xa4f   : > { %4262 = vrot.lane.b32.xlu2 %v3760_v31, %s9633_s15 }
 0xa50   : > { %v3692_v19 = vpop.permute.xlu2 %3691 }
 0xa54   : > { %v3668_v41 = vpop.permute.xlu0 %3667  ;;  %v3807_v29 = vld.sshfl [vmem:[#allocation1] sm:$0xff pattern:$0x73625140] }
 0xa55   : > { %v3670_v12 = vpop.permute.xlu1 %3669  ;;  %3809 = vrot.lane.b32.xlu0 %v3807_v29, %s9649_s2  ;;  %3812 = vst [vmem:[#allocation1 + $0x2] ss:$4 sm:$0xff] %v7742_v33 }
 0xa56   : > { %v3671_v28 = vsel %vm470_vm7, %v3668_v41, %v3670_v12 }
 0xa57   : > { %3803 = vrot.lane.b32.xlu2 %v3801_v17, %s9634_s16  ;;  %v3763_v30 = vsel %vm376_vm0, %v3660_v43, %v3671_v28 }
 0xa58   : > { %v3711_v1 = vpop.permute.xlu2 %3710 }
 0xa5c   : > { %v3681_v51 = vpop.permute.xlu0 %3680  ;;  %v3813_v40 = vld.sshfl [vmem:[#allocation1] sm:$0xff pattern:$0x73625140] }
 0xa5d   : > { %v3682_v34 = vsel %vm9744_vm15, %v3679_v3, %v3681_v51  ;;  %3815 = vrot.lane.b32.xlu1 %v3813_v40, %s9635_s9  ;;  %3818 = vst [vmem:[#allocation1 + $0x3] ss:$4 sm:$0xff] %v7742_v33  ;;  %vm9752_vm15 = vcmask 826368  }
 0xa5e   : > { %v3765_v35 = vsel %vm379_vm2, %v3763_v30, %v3682_v34 }
 0xa5f   : > { %v3690_v18 = vpop.permute.xlu1 %3689 }
 0xa60   : > { %v3693_v55 = vsel %vm9745_vm5, %v3690_v18, %v3692_v19  ;;  %v3724_v62 = vpop.permute.xlu2 %3723  ;;  %vm9753_vm5 = vcmask 818176  }
 0xa61   : > { %v3767_v53 = vsel %vm382_vm4, %v3765_v35, %v3693_v55 }
 0xa62   : > { %4264 = vrot.lane.b32.xlu0 %v3767_v53, %s9633_s15 }
 0xa64   : > { %v3819_v57 = vld.sshfl [vmem:[#allocation1] sm:$0xff pattern:$0x73625140] }
 0xa65   : > { %3823 = vst [vmem:[#allocation1] ss:$4 sm:$0xff] %v7742_v33  ;;  %3821 = vrot.lane.b32.xlu2 %v3819_v57, %s9650_s30 }
 0xa67   : > { %v3700_v14 = vpop.permute.xlu0 %3699  ;;  %v3702_v59 = vpop.permute.xlu1 %3701 }
 0xa68   : > { %v3703_v0 = vsel %vm960_vm10, %v3700_v14, %v3702_v59 }
 0xa6c   : > { %v3824_v20 = vld.sshfl [vmem:[#allocation1] sm:$0xff pattern:$0x73625140] }
 0xa6d   : > { %3829 = vst [vmem:[#allocation1 + $0x1] ss:$4 sm:$0xff] %v7742_v33  ;;  %3826 = vrot.lane.b32.xlu0 %v3824_v20, %s9636_s29 }
 0xa6f   : > { %v3713_v61 = vpop.permute.xlu0 %3712 }
 0xa70   : > { %v3714_v22 = vsel %vm649_vm11, %v3711_v1, %v3713_v61  ;;  %v4253_v61 = vsel %vm9746_vm9, %v8294_v39, %v8296_v42  ;;  %vm9755_vm9 = vcmask 1022976  }
 0xa71   : > { %v3770_v48 = vsel %vm376_vm0, %v3703_v0, %v3714_v22 }
 0xa74   : > { %v3830_v23 = vld.sshfl [vmem:[#allocation1] sm:$0xff pattern:$0x73625140] }
 0xa75   : > { %3832 = vrot.lane.b32.xlu1 %v3830_v23, %s9637_s17  ;;  %3835 = vst [vmem:[#allocation1 + $0x2] ss:$4 sm:$0xff] %v7742_v33 }
 0xa77   : > { %v3722_v21 = vpop.permute.xlu1 %3721  ;;  %v3742_v34 = vpop.permute.xlu2 %3741 }
 0xa78   : > { %v3725_v50 = vsel %vm661_vm12, %v3722_v21, %v3724_v62 }
 0xa79   : > { %v3772_v45 = vsel %vm379_vm2, %v3770_v48, %v3725_v50 }
 0xa7b   : > { %v4250_v3 = vpop.permute.xlu0 %4249 }
 0xa7c   : > { %v3836_v17 = vld.sshfl [vmem:[#allocation1] sm:$0xff pattern:$0x73625140] }
 0xa7d   : > { %3841 = vst [vmem:[#allocation1 + $0x3] ss:$4 sm:$0xff] %v7742_v33  ;;  %3838 = vrot.lane.b32.xlu2 %v3836_v17, %s9630_s19  ;;  %v8385_v17 = vld [vmem:[%s9747_s8 + $0x18] sm:$0xf]  ;;  %s9748_s8 = smov 46  }
 0xa83   : > { %v3731_v6 = vpop.permute.xlu0 %3730 }
 0xa84   : > { %v3774_v31 = vsel %vm382_vm4, %v3772_v45, %v3731_v6  ;;  %v3842_v41 = vld.sshfl [vmem:[#allocation1] sm:$0xff pattern:$0x73625140]  ;;  %v3844_v29 = vld.sshfl [vmem:[#allocation1 + $0x8] sm:$0xff pattern:$0x73625140] }
 0xa85   : > { %4266 = vrot.lane.b32.xlu1 %v3774_v31, %s9633_s15  ;;  %3846 = vrot.lane.b32.xlu0 %v3842_v41, %s9654_s23  ;;  %3851 = vst [vmem:[#allocation1] ss:$4 sm:$0xff] %v7742_v33 }
 0xa87   : > { %v3736_v28 = vpop.permute.xlu1 %3735 }
 0xa88   : > { %v3777_v18 = vsel %vm376_vm0, %v3736_v28, %v3742_v34 }
 0xa8c   : > { %v3854_v12 = vld.sshfl [vmem:[#allocation1 + $0x8] sm:$0xff pattern:$0x73625140]  ;;  %v3852_v43 = vld.sshfl [vmem:[#allocation1] sm:$0xff pattern:$0x73625140] }
 0xa8d   : > { %3848 = vrot.lane.b32.xlu1 %v3844_v29, %s9654_s23  ;;  %3858 = vrot.lane.b32.xlu0 %v3854_v12, %s9655_s22  ;;  %3862 = vst [vmem:[#allocation1 + $0x1] ss:$4 sm:$0xff] %v7742_v33 }
 0xa8e   : > { %3856 = vrot.lane.b32.xlu2 %v3852_v43, %s9655_s22 }
 0xa8f   : > { %v3787_v23 = vpop.permute.xlu2 %3786 }
 0xa90   : > { %v3895_v39 = vsel %vm376_vm0, %v7742_v33, %v3787_v23 }
 0xa94   : > { %v3863_v30 = vld.sshfl [vmem:[#allocation1] sm:$0xff pattern:$0x73625140]  ;;  %v3865_v51 = vld.sshfl [vmem:[#allocation1 + $0x8] sm:$0xff pattern:$0x73625140] }
 0xa95   : > { %3867 = vrot.lane.b32.xlu1 %v3863_v30, %s9638_s11  ;;  %3873 = vst [vmem:[#allocation1 + $0x2] ss:$4 sm:$0xff] %v7742_v33 }
 0xa96   : > { %3869 = vrot.lane.b32.xlu2 %v3865_v51, %s9638_s11 }
 0xa97   : > { %v3748_v55 = vpop.permute.xlu0 %3747 }
 0xa98   : > { %v3779_v53 = vsel %vm379_vm2, %v3777_v18, %v3748_v55 }
 0xa9b   : > { %v4252_v40 = vpop.permute.xlu1 %4251 }
 0xa9c   : > { %4340 = vmatpush.bf16.msra.mxu1 %v4252_v40  ;;  %v3874_v35 = vld.sshfl [vmem:[#allocation1] sm:$0xff pattern:$0x73625140]  ;;  %v3876_v19 = vld.sshfl [vmem:[#allocation1 + $0x8] sm:$0xff pattern:$0x73625140] }
 0xa9d   : > { %3878 = vrot.lane.b32.xlu0 %v3874_v35, %s9633_s15  ;;  %3880 = vrot.lane.b32.xlu1 %v3876_v19, %s9633_s15  ;;  %3884 = vst [vmem:[#allocation1 + $0x3] ss:$4 sm:$0xff] %v7742_v33 }
 0xaa0   : > { %4341 = vmatpush.bf16.msra.mxu1 %v4250_v3 }
 0xaa3   : > { %v3754_v57 = vpop.permute.xlu1 %3753 }
 0xaa4   : > { %4342 = vmatpush.bf16.msra.mxu1 %v8308_v9  ;;  %v3887_v14 = vld.sshfl [vmem:[#allocation1 + $0x8] sm:$0xff pattern:$0x73625140]  ;;  %v3781_v20 = vsel %vm382_vm4, %v3779_v53, %v3754_v57  ;;  %v3885_v1 = vld.sshfl [vmem:[#allocation1] sm:$0xff pattern:$0x73625140] }
 0xaa5   : > { %3891 = vrot.lane.b32.xlu0 %v3887_v14, %s9659_s5  ;;  %4268 = vrot.lane.b32.xlu2 %v3781_v20, %s9633_s15  ;;  %3921 = vst [vmem:[#allocation1] ss:$4 sm:$0xff] %v7742_v33 }
 0xaa8   : > { %4343 = vmatpush.bf16.msra.mxu1 %v4253_v61 }
 0xaac   : > { %4344 = vmatpush.bf16.msra.mxu1 %v8282_v54  ;;  %v8361_v59 = vld.sshfl [vmem:[#allocation1] sm:$0xff pattern:$0x73625140]  ;;  %v8363_v9 = vld.sshfl [vmem:[#allocation1 + $0x8] sm:$0xff pattern:$0x73625140] }
 0xaad   : > { %3889 = vrot.lane.b32.xlu2 %v3885_v1, %s9659_s5  ;;  %3925 = vst [vmem:[#allocation1 + $0x1] ss:$4 sm:$0xff] %v7742_v33 }
 0xaaf   : > { %v3793_v42 = vpop.permute.xlu0 %3792 }
 0xab0   : > { %4345 = vmatpush.bf16.msra.mxu1 %v8272_v38  ;;  %v3897_v54 = vsel %vm379_vm2, %v3895_v39, %v3793_v42 }
 0xab4   : > { %4346 = vmatpush.bf16.msra.mxu1 %v8254_v27  ;;  %v3926_v62 = vld.sshfl [vmem:[#allocation1] sm:$0xff pattern:$0x73625140]  ;;  %v3928_v0 = vld.sshfl [vmem:[#allocation1 + $0x8] sm:$0xff pattern:$0x73625140]  ;;  %v8379_v27 = vpop.permute.xlu2 %4262 }
 0xab5   : > { %3930 = vrot.lane.b32.xlu1 %v3926_v62, %s9646_s21  ;;  %3936 = vst [vmem:[#allocation1 + $0x2] ss:$4 sm:$0xff] %v7742_v33  ;;  %3932 = vrot.lane.b32.xlu2 %v3928_v0, %s9646_s21 }
 0xab7   : > { %v3799_v22 = vpop.permute.xlu1 %3798 }
 0xab8   : > { %4347 = vmatpush.bf16.msra.mxu1 %v8204_v32  ;;  %v3899_v38 = vsel %vm382_vm4, %v3897_v54, %v3799_v22 }
 0xab9   : > { %4278 = vrot.lane.b32.xlu0 %v3899_v38, %s9649_s2 }
 0xabb   : > { %4348 = vmatmul.bf16.vlgmr.msra.gmra.mxu1 %v7080_v63 }
 0xabc   : > { %v3939_v3 = vld.sshfl [vmem:[#allocation1 + $0x8] sm:$0xff pattern:$0x73625140]  ;;  %v3937_v21 = vld.sshfl [vmem:[#allocation1] sm:$0xff pattern:$0x73625140]  ;;  %v3804_v50 = vpop.permute.xlu2 %3803 }
 0xabd   : > { %3943 = vrot.lane.b32.xlu1 %v3939_v3, %s9631_s18  ;;  %3947 = vst [vmem:[#allocation1 + $0x3] ss:$4 sm:$0xff] %v7742_v33 }
 0xac1   : > { %3941 = vrot.lane.b32.xlu0 %v3937_v21, %s9631_s18 }
 0xac4   : > { %v3948_v48 = vld.sshfl [vmem:[#allocation1] sm:$0xff pattern:$0x73625140]  ;;  %v3950_v32 = vld.sshfl [vmem:[#allocation1 + $0x8] sm:$0xff pattern:$0x73625140]  ;;  %v3822_v29 = vpop.permute.xlu2 %3821 }
 0xac5   : > { %3958 = vst [vmem:[#allocation1] ss:$4 sm:$0xff] %v8385_v17  ;;  %3952 = vrot.lane.b32.xlu2 %v3948_v48, %s9632_s28 }
 0xac7   : > { %v3810_v6 = vpop.permute.xlu0 %3809 }
 0xac8   : > { %v3902_v31 = vsel %vm376_vm0, %v3804_v50, %v3810_v6 }
 0xac9   : > { %3954 = vrot.lane.b32.xlu0 %v3950_v32, %s9632_s28 }
 0xacc   : > { %v3959_v45 = vld.sshfl [vmem:[#allocation1] sm:$0xff pattern:$0x73625140] }
 0xacd   : > { %3961 = vrot.lane.b32.xlu1 %v3959_v45, %s9640_s12  ;;  %3964 = vst [vmem:[#allocation1 + $0x1] ss:$4 sm:$0xff] %v8385_v17 }
 0xacf   : > { %v3816_v41 = vpop.permute.xlu1 %3815 }
 0xad0   : > { %v3904_v12 = vsel %vm379_vm2, %v3902_v31, %v3816_v41 }
 0xad1   : > { %v3906_v43 = vsel %vm382_vm4, %v3904_v12, %v3822_v29 }
 0xad4   : > { %v3965_v28 = vld.sshfl [vmem:[#allocation1] sm:$0xff pattern:$0x73625140]  ;;  %v8402_v40 = vpop.permute.xlu0 %4264 }
 0xad5   : > { %4280 = vrot.lane.b32.xlu1 %v3906_v43, %s9649_s2  ;;  %3970 = vst [vmem:[#allocation1 + $0x2] ss:$4 sm:$0xff] %v8385_v17  ;;  %3967 = vrot.lane.b32.xlu2 %v3965_v28, %s9674_s13 }
 0xad7   : > { %v3839_v19 = vpop.permute.xlu2 %3838 }
 0xadc   : > { %v3971_v30 = vld.sshfl [vmem:[#allocation1] sm:$0xff pattern:$0x73625140] }
 0xadd   : > { %3973 = vrot.lane.b32.xlu0 %v3971_v30, %s9673_s7  ;;  %3976 = vst [vmem:[#allocation1 + $0x3] ss:$4 sm:$0xff] %v8385_v17 }
 0xadf   : > { %v3827_v18 = vpop.permute.xlu0 %3826 }
 0xae4   : > { %v3977_v51 = vld.sshfl [vmem:[#allocation1] sm:$0xff pattern:$0x73625140] }
 0xae5   : > { %3979 = vrot.lane.b32.xlu1 %v3977_v51, %s9748_s8  ;;  %3981 = vst [vmem:[#allocation1] ss:$4 sm:$0xff] %v8385_v17  ;;  %s9751_s8 = smov 34  }
 0xae7   : > { %v3833_v35 = vpop.permute.xlu1 %3832 }
 0xae8   : > { %v3857_v57 = vpop.permute.xlu2 %3856  ;;  %v3909_v14 = vsel %vm376_vm0, %v3827_v18, %v3833_v35 }
 0xae9   : > { %v3911_v61 = vsel %vm379_vm2, %v3909_v14, %v3839_v19 }
 0xaec   : > { %v3982_v34 = vld.sshfl [vmem:[#allocation1] sm:$0xff pattern:$0x73625140] }
 0xaed   : > { %3987 = vst [vmem:[#allocation1 + $0x1] ss:$4 sm:$0xff] %v8385_v17  ;;  %3984 = vrot.lane.b32.xlu2 %v3982_v34, %s9749_s1  ;;  %s9750_s1 = smov 35  }
 0xaf0   : > { %v3870_v42 = vpop.permute.xlu2 %3869 }
 0xaf4   : > { %v3988_v55 = vld.sshfl [vmem:[#allocation1] sm:$0xff pattern:$0x73625140] }
 0xaf5   : > { %3990 = vrot.lane.b32.xlu0 %v3988_v55, %s9701_s6  ;;  %3993 = vst [vmem:[#allocation1 + $0x2] ss:$4 sm:$0xff] %v8385_v17 }
 0xaf7   : > { %v8408_v53 = vpop.permute.xlu1 %4266  ;;  %v3847_v20 = vpop.permute.xlu0 %3846 }
 0xafc   : > { %v3994_v1 = vld.sshfl [vmem:[#allocation1] sm:$0xff pattern:$0x73625140] }
 0xafd   : > { %3999 = vst [vmem:[#allocation1 + $0x3] ss:$4 sm:$0xff] %v8385_v17  ;;  %3996 = vrot.lane.b32.xlu1 %v3994_v1, %s9702_s3  ;;  %v4337_v1 = vadd.f32 %v8292_v4, %v6686_v37 }
 0xaff   : > { %v3849_v23 = vpop.permute.xlu1 %3848  ;;  %v3859_v54 = vpop.permute.xlu0 %3858 }
 0xb00   : > { %v3850_v39 = vsel %vm673_vm13, %v3847_v20, %v3849_v23  ;;  %v8419_v38 = vpop.permute.xlu2 %4268  ;;  %v3860_v48 = vsel %vm684_vm14, %v3857_v57, %v3859_v54 }
 0xb01   : > { %v3913_v62 = vsel %vm382_vm4, %v3911_v61, %v3850_v39 }
 0xb02   : > { %4282 = vrot.lane.b32.xlu2 %v3913_v62, %s9649_s2 }
 0xb04   : > { %v4000_v0 = vld.sshfl [vmem:[#allocation1] sm:$0xff pattern:$0x73625140] }
 0xb05   : > { %4004 = vst [vmem:[#allocation1] ss:$4 sm:$0xff] %v8385_v17 }
 0xb07   : > { %v3868_v22 = vpop.permute.xlu1 %3867 }
 0xb08   : > { %v3871_v32 = vsel %vm9752_vm15, %v3868_v22, %v3870_v42  ;;  %v3890_v41 = vpop.permute.xlu2 %3889  ;;  %vm9757_vm15 = vcmask 941056  }
 0xb09   : > { %v3916_v45 = vsel %vm376_vm0, %v3860_v48, %v3871_v32 }
 0xb0a   : > { %4002 = vrot.lane.b32.xlu2 %v4000_v0, %s9750_s1 }
 0xb0c   : > { %v4005_v3 = vld.sshfl [vmem:[#allocation1] sm:$0xff pattern:$0x73625140] }
 0xb0d   : > { %4007 = vrot.lane.b32.xlu0 %v4005_v3, %s9751_s8  ;;  %4010 = vst [vmem:[#allocation1 + $0x1] ss:$4 sm:$0xff] %v8385_v17 }
 0xb0f   : > { %v3879_v21 = vpop.permute.xlu0 %3878  ;;  %v3881_v50 = vpop.permute.xlu1 %3880 }
 0xb10   : > { %v3882_v6 = vsel %vm9753_vm5, %v3879_v21, %v3881_v50  ;;  %v3933_v18 = vpop.permute.xlu2 %3932  ;;  %vm9758_vm5 = vcmask 932864  }
 0xb11   : > { %v3918_v29 = vsel %vm379_vm2, %v3916_v45, %v3882_v6  ;;  %v4030_v62 = vsel %vm376_vm0, %v8363_v9, %v3933_v18 }
 0xb14   : > { %v4011_v31 = vld.sshfl [vmem:[#allocation1] sm:$0xff pattern:$0x73625140] }
 0xb15   : > { %4016 = vst [vmem:[#allocation1 + $0x2] ss:$4 sm:$0xff] %v8385_v17  ;;  %4013 = vrot.lane.b32.xlu1 %v4011_v31, %s9754_s25 }
 0xb17   : > { %v3892_v12 = vpop.permute.xlu0 %3891 }
 0xb18   : > { %v3893_v43 = vsel %vm720_vm8, %v3890_v41, %v3892_v12 }
 0xb19   : > { %v3920_v28 = vsel %vm382_vm4, %v3918_v29, %v3893_v43 }
 0xb1a   : > { %4284 = vrot.lane.b32.xlu0 %v3920_v28, %s9649_s2 }
 0xb1c   : > { %v4017_v30 = vld.sshfl [vmem:[#allocation1] sm:$0xff pattern:$0x73625140] }
 0xb1d   : > { %4022 = vst [vmem:[#allocation1 + $0x3] ss:$4 sm:$0xff] %v8385_v17  ;;  %4019 = vrot.lane.b32.xlu2 %v4017_v30, %s9660_s20 }
 0xb1f   : > { %v3953_v54 = vpop.permute.xlu2 %3952 }
 0xb24   : > { %v4023_v51 = vld.sshfl [vmem:[#allocation1] sm:$0xff pattern:$0x73625140] }
 0xb25   : > { %4025 = vrot.lane.b32.xlu0 %v4023_v51, %s9661_s24  ;;  %4061 = vst [vmem:[#allocation1 + $0x1] ss:$4 sm:$0xff] %v8385_v17 }
 0xb27   : > { %v3931_v35 = vpop.permute.xlu1 %3930 }
 0xb28   : > { %v3934_v14 = vsel %vm9589_vm1, %v3931_v35, %v3933_v18 }
 0xb29   : > { %v4028_v61 = vsel %vm376_vm0, %v8361_v59, %v3934_v14 }
 0xb2b   : > { %v8437_v34 = vpop.permute.xlu0 %4278 }
 0xb2c   : > { %v4062_v19 = vld.sshfl [vmem:[#allocation1] sm:$0xff pattern:$0x73625140] }
 0xb2d   : > { %4067 = vst [vmem:[#allocation1 + $0x2] ss:$4 sm:$0xff] %v8385_v17  ;;  %4064 = vrot.lane.b32.xlu1 %v4062_v19, %s9646_s21 }
 0xb2f   : > { %v3944_v20 = vpop.permute.xlu1 %3943  ;;  %v3968_v29 = vpop.permute.xlu2 %3967 }
 0xb30   : > { %v4034_v59 = vsel %vm379_vm2, %v4030_v62, %v3944_v20 }
 0xb33   : > { %v3942_v55 = vpop.permute.xlu0 %3941 }
 0xb34   : > { %v4068_v57 = vld.sshfl [vmem:[#allocation1] sm:$0xff pattern:$0x73625140]  ;;  %v3945_v23 = vsel %vm9588_vm3, %v3942_v55, %v3944_v20  ;;  %vm9591_vm3 = vcmask 261120  }
 0xb35   : > { %4073 = vst [vmem:[#allocation1 + $0x3] ss:$4 sm:$0xff] %v8385_v17  ;;  %4070 = vrot.lane.b32.xlu2 %v4068_v57, %s9631_s18  ;;  %v4032_v0 = vsel %vm379_vm2, %v4028_v61, %v3945_v23 }
 0xb38   : > { %v4349_v39 = vpop.f32.mrf.mxu1 }
 0xb39   : > { %v8449_v42 = vadd.f32 %v4349_v39, %v4337_v1 }
 0xb3b   : > { %v3955_v22 = vpop.permute.xlu0 %3954 }
 0xb3c   : > { %v4074_v3 = vld.sshfl [vmem:[#allocation1] sm:$0xff pattern:$0x73625140]  ;;  %v3956_v21 = vsel %vm9755_vm9, %v3953_v54, %v3955_v22  ;;  %v4038_v48 = vsel %vm382_vm4, %v4034_v59, %v3955_v22  ;;  %vm9774_vm9 = vcmask 646144  }
 0xb3d   : > { %4076 = vrot.lane.b32.xlu0 %v4074_v3, %s9647_s14  ;;  %4078 = vst [vmem:[#allocation1] ss:$4 sm:$0xff] %v8385_v17  ;;  %v4036_v4 = vsel %vm382_vm4, %v4032_v0, %v3956_v21  ;;  %4297 = vrot.lane.b32.xlu2 %v4038_v48, %s9756_s10 }
 0xb3e   : > { %4295 = vrot.lane.b32.xlu1 %v4036_v4, %s9756_s10 }
 0xb3f   : > { %v3962_v32 = vpop.permute.xlu1 %3961 }
 0xb40   : > { %v4351_v9 = vpop.f32.mrf.mxu1  ;;  %v4041_v28 = vsel %vm376_vm0, %v3962_v32, %v3968_v29 }
 0xb44   : > { %v4079_v50 = vld.sshfl [vmem:[#allocation1] sm:$0xff pattern:$0x73625140]  ;;  %v4081_v45 = vld.sshfl [vmem:[#allocation1 + $0x8] sm:$0xff pattern:$0x73625140] }
 0xb45   : > { %4089 = vst [vmem:[#allocation1 + $0x1] ss:$4 sm:$0xff] %v8385_v17  ;;  %4085 = vrot.lane.b32.xlu2 %v4081_v45, %s9648_s0 }
 0xb46   : > { %4083 = vrot.lane.b32.xlu1 %v4079_v50, %s9648_s0 }
 0xb47   : > { %v4281_v41 = vpop.permute.xlu1 %4280  ;;  %v3985_v20 = vpop.permute.xlu2 %3984 }
 0xb4c   : > { %v4090_v6 = vld.sshfl [vmem:[#allocation1] sm:$0xff pattern:$0x73625140]  ;;  %v4092_v31 = vld.sshfl [vmem:[#allocation1 + $0x8] sm:$0xff pattern:$0x73625140] }
 0xb4d   : > { %4094 = vrot.lane.b32.xlu0 %v4090_v6, %s9649_s2  ;;  %4100 = vst [vmem:[#allocation1 + $0x2] ss:$4 sm:$0xff] %v8385_v17 }
 0xb4e   : > { %4096 = vrot.lane.b32.xlu1 %v4092_v31, %s9649_s2 }
 0xb4f   : > { %v3974_v30 = vpop.permute.xlu0 %3973 }
 0xb50   : > { %v4043_v51 = vsel %vm379_vm2, %v4041_v28, %v3974_v30 }
 0xb54   : > { %v4103_v12 = vld.sshfl [vmem:[#allocation1 + $0x8] sm:$0xff pattern:$0x73625140]  ;;  %v4101_v43 = vld.sshfl [vmem:[#allocation1] sm:$0xff pattern:$0x73625140] }
 0xb55   : > { %4107 = vrot.lane.b32.xlu0 %v4103_v12, %s9635_s9  ;;  %4111 = vst [vmem:[#allocation1 + $0x3] ss:$4 sm:$0xff] %v8385_v17  ;;  %4105 = vrot.lane.b32.xlu2 %v4101_v43, %s9635_s9 }
 0xb57   : > { %v3980_v35 = vpop.permute.xlu1 %3979 }
 0xb58   : > { %v4045_v19 = vsel %vm382_vm4, %v4043_v51, %v3980_v35 }
 0xb5c   : > { %v4112_v18 = vld.sshfl [vmem:[#allocation1] sm:$0xff pattern:$0x73625140]  ;;  %v4114_v55 = vld.sshfl [vmem:[#allocation1 + $0x8] sm:$0xff pattern:$0x73625140]  ;;  %v4283_v23 = vpop.permute.xlu2 %4282 }
 0xb5d   : > { %4299 = vrot.lane.b32.xlu0 %v4045_v19, %s9756_s10  ;;  %4121 = vst [vmem:[#allocation1] ss:$4 sm:$0xff] %v8385_v17  ;;  %4116 = vrot.lane.b32.xlu1 %v4112_v18, %s9650_s30 }
 0xb5e   : > { %4118 = vrot.lane.b32.xlu2 %v4114_v55, %s9650_s30 }
 0xb64   : > { %v4122_v57 = vld.sshfl [vmem:[#allocation1] sm:$0xff pattern:$0x73625140]  ;;  %v4124_v14 = vld.sshfl [vmem:[#allocation1 + $0x8] sm:$0xff pattern:$0x73625140]  ;;  %v4003_v3 = vpop.permute.xlu2 %4002 }
 0xb65   : > { %4126 = vrot.lane.b32.xlu0 %v4122_v57, %s9652_s27  ;;  %4132 = vst [vmem:[#allocation1 + $0x1] ss:$4 sm:$0xff] %v8385_v17  ;;  %4128 = vrot.lane.b32.xlu1 %v4124_v14, %s9652_s27 }
 0xb67   : > { %v3991_v0 = vpop.permute.xlu0 %3990 }
 0xb68   : > { %v4048_v54 = vsel %vm376_vm0, %v3985_v20, %v3991_v0 }
 0xb6c   : > { %v4135_v1 = vld.sshfl [vmem:[#allocation1 + $0x8] sm:$0xff pattern:$0x73625140]  ;;  %v4133_v61 = vld.sshfl [vmem:[#allocation1] sm:$0xff pattern:$0x73625140] }
 0xb6d   : > { %4139 = vrot.lane.b32.xlu0 %v4135_v1, %s9653_s26  ;;  %4143 = vst [vmem:[#allocation1 + $0x2] ss:$4 sm:$0xff] %v8385_v17  ;;  %4137 = vrot.lane.b32.xlu2 %v4133_v61, %s9653_s26 }
 0xb6f   : > { %v3997_v22 = vpop.permute.xlu1 %3996 }
 0xb70   : > { %v4050_v21 = vsel %vm379_vm2, %v4048_v54, %v3997_v22 }
 0xb71   : > { %v4052_v4 = vsel %vm382_vm4, %v4050_v21, %v4003_v3 }
 0xb74   : > { %v4144_v39 = vld.sshfl [vmem:[#allocation1] sm:$0xff pattern:$0x73625140]  ;;  %v4146_v62 = vld.sshfl [vmem:[#allocation1 + $0x8] sm:$0xff pattern:$0x73625140] }
 0xb75   : > { %4154 = vst [vmem:[#allocation1 + $0x3] ss:$4 sm:$0xff] %v8385_v17  ;;  %4148 = vrot.lane.b32.xlu1 %v4144_v39, %s9630_s19  ;;  %4150 = vrot.lane.b32.xlu2 %v4146_v62, %s9630_s19 }
 0xb77   : > { %v4020_v43 = vpop.permute.xlu2 %4019 }
 0xb7c   : > { %v4155_v59 = vld.sshfl [vmem:[#allocation1] sm:$0xff pattern:$0x73625140]  ;;  %v4157_v48 = vld.sshfl [vmem:[#allocation1 + $0x8] sm:$0xff pattern:$0x73625140] }
 0xb7d   : > { %4159 = vrot.lane.b32.xlu0 %v4155_v59, %s9654_s23  ;;  %4164 = vst [vmem:[#allocation1] ss:$4 sm:$0xff] %v8385_v17  ;;  %4301 = vrot.lane.b32.xlu1 %v4052_v4, %s9756_s10 }
 0xb7f   : > { %v4008_v9 = vpop.permute.xlu0 %4007 }
 0xb84   : > { %v4167_v32 = vld.sshfl [vmem:[#allocation1 + $0x8] sm:$0xff pattern:$0x73625140]  ;;  %v4165_v50 = vld.sshfl [vmem:[#allocation1] sm:$0xff pattern:$0x73625140] }
 0xb85   : > { %4171 = vrot.lane.b32.xlu0 %v4167_v32, %s9655_s22  ;;  %4169 = vrot.lane.b32.xlu2 %v4165_v50, %s9655_s22  ;;  %4409 = vst [vmem:[#allocation1 + $0x1] ss:$4 sm:$0xff] %v6967_v8 }
 0xb86   : > { %4161 = vrot.lane.b32.xlu1 %v4157_v48, %s9654_s23 }
 0xb87   : > { %v4014_v12 = vpop.permute.xlu1 %4013 }
 0xb88   : > { %v4055_v18 = vsel %vm376_vm0, %v4008_v9, %v4014_v12 }
 0xb89   : > { %v4057_v14 = vsel %vm379_vm2, %v4055_v18, %v4020_v43 }
 0xb8c   : > { %v4285_v45 = vpop.permute.xlu0 %4284  ;;  %v4410_v6 = vld.sshfl [vmem:[#allocation1] sm:$0xff pattern:$0x73625140] }
 0xb8d   : > { %4353 = vmatpush.bf16.msra.mxu2 %v4285_v45  ;;  %4415 = vst [vmem:[#allocation1 + $0x2] ss:$4 sm:$0xff] %v6967_v8  ;;  %4412 = vrot.lane.b32.xlu2 %v4410_v6, %s9646_s21 }
 0xb91   : > { %4354 = vmatpush.bf16.msra.mxu2 %v4283_v23 }
 0xb94   : > { %v4416_v31 = vld.sshfl [vmem:[#allocation1] sm:$0xff pattern:$0x73625140] }
 0xb95   : > { %4355 = vmatpush.bf16.msra.mxu2 %v4281_v41  ;;  %4418 = vrot.lane.b32.xlu0 %v4416_v31, %s9631_s18  ;;  %4421 = vst [vmem:[#allocation1 + $0x3] ss:$4 sm:$0xff] %v6967_v8 }
 0xb97   : > { %v4026_v41 = vpop.permute.xlu0 %4025 }
 0xb98   : > { %v4059_v1 = vsel %vm382_vm4, %v4057_v14, %v4026_v41 }
 0xb99   : > { %4356 = vmatpush.bf16.msra.mxu2 %v8437_v34  ;;  %4303 = vrot.lane.b32.xlu2 %v4059_v1, %s9756_s10  ;;  %s9776_s10 = smov 91  }
 0xb9c   : > { %v4422_v29 = vld.sshfl [vmem:[#allocation1] sm:$0xff pattern:$0x73625140] }
 0xb9d   : > { %4357 = vmatpush.bf16.msra.mxu2 %v8419_v38  ;;  %4426 = vst [vmem:[#allocation1] ss:$4 sm:$0xff] %v6967_v8  ;;  %4424 = vrot.lane.b32.xlu1 %v4422_v29, %s9632_s28 }
 0xb9f   : > { %v4065_v34 = vpop.permute.xlu1 %4064 }
 0xba0   : > { %v4175_v30 = vsel %vm376_vm0, %v8385_v17, %v4065_v34 }
 0xba1   : > { %4358 = vmatpush.bf16.msra.mxu2 %v8408_v53  ;;  %v4071_v53 = vpop.permute.xlu2 %4070 }
 0xba2   : > { %v4177_v51 = vsel %vm379_vm2, %v4175_v30, %v4071_v53 }
 0xba4   : > { %v4427_v28 = vld.sshfl [vmem:[#allocation1] sm:$0xff pattern:$0x73625140] }
 0xba5   : > { %4359 = vmatpush.bf16.msra.mxu2 %v8402_v40  ;;  %4432 = vst [vmem:[#allocation1 + $0x1] ss:$4 sm:$0xff] %v6967_v8  ;;  %4429 = vrot.lane.b32.xlu2 %v4427_v28, %s9634_s16 }
 0xba9   : > { %4360 = vmatpush.bf16.msra.mxu2 %v8379_v27  ;;  %v8522_v55 = vpop.permute.xlu2 %4297 }
 0xbac   : > { %4361 = vmatmul.bf16.vlgmr.msra.gmra.mxu2 %v7217_v7  ;;  %v4433_v38 = vld.sshfl [vmem:[#allocation1] sm:$0xff pattern:$0x73625140] }
 0xbad   : > { %4435 = vrot.lane.b32.xlu0 %v4433_v38, %s9649_s2  ;;  %4438 = vst [vmem:[#allocation1 + $0x2] ss:$4 sm:$0xff] %v6967_v8 }
 0xbaf   : > { %v4077_v40 = vpop.permute.xlu0 %4076 }
 0xbb0   : > { %v4179_v35 = vsel %vm382_vm4, %v4177_v51, %v4077_v40  ;;  %v8519_v27 = vpop.permute.xlu1 %4295 }
 0xbb1   : > { %v4086_v39 = vpop.permute.xlu2 %4085 }
 0xbb4   : > { %v4439_v19 = vld.sshfl [vmem:[#allocation1] sm:$0xff pattern:$0x73625140] }
 0xbb5   : > { %4313 = vrot.lane.b32.xlu0 %v4179_v35, %s9655_s22  ;;  %4444 = vst [vmem:[#allocation1 + $0x3] ss:$4 sm:$0xff] %v6967_v8  ;;  %4441 = vrot.lane.b32.xlu1 %v4439_v19, %s9635_s9 }
 0xbb8   : > { %v4084_v61 = vpop.permute.xlu1 %4083 }
 0xbb9   : > { %v4106_v22 = vpop.permute.xlu2 %4105  ;;  %v4087_v59 = vsel %vm458_vm6, %v4084_v61, %v4086_v39 }
 0xbbc   : > { %v4445_v57 = vld.sshfl [vmem:[#allocation1] sm:$0xff pattern:$0x73625140] }
 0xbbd   : > { %4449 = vst [vmem:[#allocation1] ss:$4 sm:$0xff] %v6967_v8  ;;  %4447 = vrot.lane.b32.xlu2 %v4445_v57, %s9650_s30 }
 0xbbf   : > { %v4095_v20 = vpop.permute.xlu0 %4094 }
 0xbc0   : > { %v4097_v0 = vpop.permute.xlu1 %4096 }
 0xbc1   : > { %v4098_v48 = vsel %vm470_vm7, %v4095_v20, %v4097_v0  ;;  %v4119_v9 = vpop.permute.xlu2 %4118 }
 0xbc2   : > { %v4182_v50 = vsel %vm376_vm0, %v4087_v59, %v4098_v48 }
 0xbc4   : > { %v4450_v23 = vld.sshfl [vmem:[#allocation1] sm:$0xff pattern:$0x73625140] }
 0xbc5   : > { %4452 = vrot.lane.b32.xlu0 %v4450_v23, %s9636_s29  ;;  %4455 = vst [vmem:[#allocation1 + $0x1] ss:$4 sm:$0xff] %v6967_v8 }
 0xbc7   : > { %v4108_v62 = vpop.permute.xlu0 %4107 }
 0xbc8   : > { %v4109_v32 = vsel %vm9757_vm15, %v4106_v22, %v4108_v62  ;;  %vm9775_vm15 = vcmask 924672  }
 0xbc9   : > { %v4184_v12 = vsel %vm379_vm2, %v4182_v50, %v4109_v32  ;;  %v4138_v28 = vpop.permute.xlu2 %4137 }
 0xbcc   : > { %v4456_v54 = vld.sshfl [vmem:[#allocation1] sm:$0xff pattern:$0x73625140] }
 0xbcd   : > { %4461 = vst [vmem:[#allocation1 + $0x2] ss:$4 sm:$0xff] %v6967_v8  ;;  %4458 = vrot.lane.b32.xlu1 %v4456_v54, %s9637_s17 }
 0xbcf   : > { %v8533_v3 = vpop.permute.xlu0 %4299  ;;  %v4117_v4 = vpop.permute.xlu1 %4116 }
 0xbd0   : > { %v4120_v6 = vsel %vm9758_vm5, %v4117_v4, %v4119_v9  ;;  %vm1690_vm5 = vcmask 64512  }
 0xbd1   : > { %v4186_v43 = vsel %vm382_vm4, %v4184_v12, %v4120_v6  ;;  %v4151_v53 = vpop.permute.xlu2 %4150 }
 0xbd4   : > { %v4462_v21 = vld.sshfl [vmem:[#allocation1] sm:$0xff pattern:$0x73625140] }
 0xbd5   : > { %4467 = vst [vmem:[#allocation1 + $0x3] ss:$4 sm:$0xff] %v6967_v8  ;;  %4464 = vrot.lane.b32.xlu2 %v4462_v21, %s9630_s19  ;;  %4315 = vrot.lane.b32.xlu1 %v4186_v43, %s9655_s22 }
 0xbd7   : > { %v4127_v45 = vpop.permute.xlu0 %4126  ;;  %v4129_v29 = vpop.permute.xlu1 %4128 }
 0xbd8   : > { %v4130_v19 = vsel %vm960_vm10, %v4127_v45, %v4129_v29 }
 0xbdc   : > { %v4468_v31 = vld.sshfl [vmem:[#allocation1] sm:$0xff pattern:$0x73625140] }
 0xbdd   : > { %4470 = vrot.lane.b32.xlu0 %v4468_v31, %s9654_s23  ;;  %4472 = vst [vmem:[#allocation1] ss:$4 sm:$0xff] %v6967_v8 }
 0xbdf   : > { %v4140_v34 = vpop.permute.xlu0 %4139  ;;  %v4170_v1 = vpop.permute.xlu2 %4169 }
 0xbe0   : > { %v4141_v35 = vsel %vm649_vm11, %v4138_v28, %v4140_v34 }
 0xbe1   : > { %v4189_v57 = vsel %vm376_vm0, %v4130_v19, %v4141_v35 }
 0xbe4   : > { %v4473_v41 = vld.sshfl [vmem:[#allocation1] sm:$0xff pattern:$0x73625140] }
 0xbe5   : > { %4478 = vst [vmem:[#allocation1 + $0x1] ss:$4 sm:$0xff] %v6967_v8  ;;  %4475 = vrot.lane.b32.xlu1 %v4473_v41, %s9655_s22 }
 0xbe7   : > { %v4149_v38 = vpop.permute.xlu1 %4148 }
 0xbe8   : > { %v4152_v14 = vsel %vm661_vm12, %v4149_v38, %v4151_v53  ;;  %v8596_v38 = vpop.permute.xlu2 %4412 }
 0xbe9   : > { %v4191_v61 = vsel %vm379_vm2, %v4189_v57, %v4152_v14  ;;  %9760 = vst [vmem:[#allocation51_spill] sm:$0xff] %v8596_v38 }
 0xbec   : > { %v4479_v30 = vld.sshfl [vmem:[#allocation1] sm:$0xff pattern:$0x73625140] }
 0xbed   : > { %4484 = vst [vmem:[#allocation1 + $0x2] ss:$4 sm:$0xff] %v6967_v8  ;;  %4481 = vrot.lane.b32.xlu2 %v4479_v30, %s9638_s11 }
 0xbef   : > { %v4160_v51 = vpop.permute.xlu0 %4159  ;;  %v8552_v40 = vpop.permute.xlu1 %4301 }
 0xbf3   : > { %v4304_v35 = vpop.permute.xlu2 %4303 }
 0xbf4   : > { %v4485_v18 = vld.sshfl [vmem:[#allocation1] sm:$0xff pattern:$0x73625140] }
 0xbf5   : > { %4487 = vrot.lane.b32.xlu0 %v4485_v18, %s9633_s15  ;;  %4490 = vst [vmem:[#allocation1 + $0x3] ss:$4 sm:$0xff] %v6967_v8 }
 0xbf7   : > { %v4172_v20 = vpop.permute.xlu0 %4171 }
 0xbf8   : > { %v4162_v23 = vpop.permute.xlu1 %4161  ;;  %v4173_v62 = vsel %vm684_vm14, %v4170_v1, %v4172_v20 }
 0xbf9   : > { %v4163_v39 = vsel %vm673_vm13, %v4160_v51, %v4162_v23 }
 0xbfa   : > { %v4193_v0 = vsel %vm382_vm4, %v4191_v61, %v4163_v39 }
 0xbfb   : > { %4317 = vrot.lane.b32.xlu2 %v4193_v0, %s9655_s22 }
 0xbfc   : > { %v4491_v54 = vld.sshfl [vmem:[#allocation1] sm:$0xff pattern:$0x73625140] }
 0xbfd   : > { %4319 = vrot.lane.b32.xlu0 %v4173_v62, %s9655_s22  ;;  %4493 = vrot.lane.b32.xlu1 %v4491_v54, %s9659_s5  ;;  %4526 = vst [vmem:[#allocation1] ss:$4 sm:$0xff] %v6967_v8 }
 0xbff   : > { %v8606_v14 = vpop.permute.xlu2 %4429 }
 0xc00   : > { %9762 = vst [vmem:[#allocation53_spill] sm:$0xff] %v8606_v14 }
 0xc04   : > { %v8568_v22 = vld.sshfl [vmem:[#allocation1] sm:$0xff pattern:$0x73625140]  ;;  %v8570_v21 = vld.sshfl [vmem:[#allocation1 + $0x8] sm:$0xff pattern:$0x73625140] }
 0xc05   : > { %4530 = vst [vmem:[#allocation1 + $0x1] ss:$4 sm:$0xff] %v6967_v8 }
 0xc07   : > { %v8591_v34 = vpop.permute.xlu0 %4418 }
 0xc08   : > { %9759 = vst [vmem:[#allocation50_spill] sm:$0xff] %v8591_v34 }
 0xc0c   : > { %v4531_v4 = vld.sshfl [vmem:[#allocation1] sm:$0xff pattern:$0x73625140]  ;;  %v4533_v59 = vld.sshfl [vmem:[#allocation1 + $0x8] sm:$0xff pattern:$0x73625140] }
 0xc0d   : > { %4541 = vst [vmem:[#allocation1 + $0x2] ss:$4 sm:$0xff] %v6967_v8  ;;  %4537 = vrot.lane.b32.xlu0 %v4533_v59, %s9646_s21  ;;  %4535 = vrot.lane.b32.xlu2 %v4531_v4, %s9646_s21 }
 0xc0f   : > { %v8616_v39 = vpop.permute.xlu1 %4424 }
 0xc10   : > { %9765 = vst [vmem:[#allocation56_spill] sm:$0xff] %v8616_v39 }
 0xc14   : > { %v4542_v48 = vld.sshfl [vmem:[#allocation1] sm:$0xff pattern:$0x73625140]  ;;  %v4544_v9 = vld.sshfl [vmem:[#allocation1 + $0x8] sm:$0xff pattern:$0x73625140] }
 0xc15   : > { %4546 = vrot.lane.b32.xlu1 %v4542_v48, %s9631_s18  ;;  %4552 = vst [vmem:[#allocation1 + $0x3] ss:$4 sm:$0xff] %v6967_v8  ;;  %4548 = vrot.lane.b32.xlu2 %v4544_v9, %s9631_s18 }
 0xc17   : > { %v8612_v23 = vpop.permute.xlu2 %4447 }
 0xc18   : > { %9764 = vst [vmem:[#allocation55_spill] sm:$0xff] %v8612_v23 }
 0xc1c   : > { %v4555_v32 = vld.sshfl [vmem:[#allocation1 + $0x8] sm:$0xff pattern:$0x73625140]  ;;  %v4553_v50 = vld.sshfl [vmem:[#allocation1] sm:$0xff pattern:$0x73625140] }
 0xc1d   : > { %4559 = vrot.lane.b32.xlu1 %v4555_v32, %s9632_s28  ;;  %4557 = vrot.lane.b32.xlu0 %v4553_v50, %s9632_s28  ;;  %4562 = vst [vmem:[#allocation1] ss:$4 sm:$0xff] %v6967_v8 }
 0xc24   : > { %v4563_v45 = vld.sshfl [vmem:[#allocation1] sm:$0xff pattern:$0x73625140]  ;;  %v4565_v6 = vld.sshfl [vmem:[#allocation1 + $0x8] sm:$0xff pattern:$0x73625140] }
 0xc25   : > { %4573 = vst [vmem:[#allocation1 + $0x1] ss:$4 sm:$0xff] %v6967_v8  ;;  %4569 = vrot.lane.b32.xlu0 %v4565_v6, %s9648_s0  ;;  %4567 = vrot.lane.b32.xlu2 %v4563_v45, %s9648_s0 }
 0xc27   : > { %v8624_v4 = vpop.permute.xlu1 %4441 }
 0xc28   : > { %9768 = vst [vmem:[#allocation59_spill] sm:$0xff] %v8624_v4 }
 0xc2c   : > { %v4574_v31 = vld.sshfl [vmem:[#allocation1] sm:$0xff pattern:$0x73625140]  ;;  %v4576_v29 = vld.sshfl [vmem:[#allocation1 + $0x8] sm:$0xff pattern:$0x73625140] }
 0xc2d   : > { %4578 = vrot.lane.b32.xlu1 %v4574_v31, %s9649_s2  ;;  %4584 = vst [vmem:[#allocation1 + $0x2] ss:$4 sm:$0xff] %v6967_v8  ;;  %4580 = vrot.lane.b32.xlu2 %v4576_v29, %s9649_s2 }
 0xc2f   : > { %v4362_v12 = vpop.f32.mrf.mxu2  ;;  %v8622_v54 = vpop.permute.xlu2 %4464 }
 0xc30   : > { %v8589_v43 = vadd.f32 %v4362_v12, %v8449_v42  ;;  %v8601_v42 = vpop.permute.xlu0 %4435  ;;  %9767 = vst [vmem:[#allocation58_spill] sm:$0xff] %v8622_v54 }
 0xc31   : > { %9761 = vst [vmem:[#allocation52_spill] sm:$0xff] %v8601_v42 }
 0xc34   : > { %v4587_v28 = vld.sshfl [vmem:[#allocation1 + $0x8] sm:$0xff pattern:$0x73625140]  ;;  %v4585_v41 = vld.sshfl [vmem:[#allocation1] sm:$0xff pattern:$0x73625140] }
 0xc35   : > { %4591 = vrot.lane.b32.xlu1 %v4587_v28, %s9635_s9  ;;  %4589 = vrot.lane.b32.xlu0 %v4585_v41, %s9635_s9  ;;  %4595 = vst [vmem:[#allocation1 + $0x3] ss:$4 sm:$0xff] %v6967_v8 }
 0xc37   : > { %v4364_v30 = vpop.f32.mrf.mxu2 }
 0xc38   : > { %v4314_v57 = vpop.permute.xlu0 %4313 }
 0xc3c   : > { %v4596_v53 = vld.sshfl [vmem:[#allocation1] sm:$0xff pattern:$0x73625140]  ;;  %v4598_v51 = vld.sshfl [vmem:[#allocation1 + $0x8] sm:$0xff pattern:$0x73625140] }
 0xc3d   : > { %4605 = vst [vmem:[#allocation1] ss:$4 sm:$0xff] %v6967_v8  ;;  %4602 = vrot.lane.b32.xlu0 %v4598_v51, %s9650_s30  ;;  %4600 = vrot.lane.b32.xlu2 %v4596_v53, %s9650_s30  ;;  %v4305_v51 = vsel %vm9774_vm9, %v8519_v27, %v8522_v55  ;;  %vm1692_vm9 = vcmask 130048  }
 0xc3f   : > { %v8632_v32 = vpop.permute.xlu1 %4458 }
 0xc40   : > { %v8610_v1 = vpop.permute.xlu0 %4452  ;;  %9771 = vst [vmem:[#allocation62_spill] sm:$0xff] %v8632_v32 }
 0xc41   : > { %9763 = vst [vmem:[#allocation54_spill] sm:$0xff] %v8610_v1 }
 0xc44   : > { %v4606_v19 = vld.sshfl [vmem:[#allocation1] sm:$0xff pattern:$0x73625140]  ;;  %v4608_v18 = vld.sshfl [vmem:[#allocation1 + $0x8] sm:$0xff pattern:$0x73625140] }
 0xc45   : > { %4610 = vrot.lane.b32.xlu1 %v4606_v19, %s9636_s29  ;;  %4616 = vst [vmem:[#allocation1 + $0x1] ss:$4 sm:$0xff] %v7090_v58  ;;  %4612 = vrot.lane.b32.xlu2 %v4608_v18, %s9636_s29 }
 0xc47   : > { %v8630_v9 = vpop.permute.xlu2 %4481  ;;  %v4316_v12 = vpop.permute.xlu1 %4315 }
 0xc48   : > { %9770 = vst [vmem:[#allocation61_spill] sm:$0xff] %v8630_v9 }
 0xc4c   : > { %v4617_v20 = vld.sshfl [vmem:[#allocation1] sm:$0xff pattern:$0x73625140] }
 0xc4d   : > { %4622 = vst [vmem:[#allocation1 + $0x2] ss:$4 sm:$0xff] %v7090_v58  ;;  %4619 = vrot.lane.b32.xlu0 %v4617_v20, %s9701_s6 }
 0xc4f   : > { %v8618_v0 = vpop.permute.xlu0 %4470 }
 0xc50   : > { %9766 = vst [vmem:[#allocation57_spill] sm:$0xff] %v8618_v0 }
 0xc54   : > { %v4623_v61 = vld.sshfl [vmem:[#allocation1] sm:$0xff pattern:$0x73625140] }
 0xc55   : > { %4625 = vrot.lane.b32.xlu1 %v4623_v61, %s9702_s3  ;;  %4628 = vst [vmem:[#allocation1 + $0x3] ss:$4 sm:$0xff] %v7090_v58  ;;  %v4318_v31 = vpop.permute.xlu2 %4317 }
 0xc57   : > { %v8641_v41 = vpop.permute.xlu1 %4475 }
 0xc58   : > { %9772 = vst [vmem:[#allocation63_spill] sm:$0xff] %v8641_v41 }
 0xc5c   : > { %v4629_v62 = vld.sshfl [vmem:[#allocation1] sm:$0xff pattern:$0x73625140] }
 0xc5d   : > { %4631 = vrot.lane.b32.xlu1 %v4629_v62, %s9750_s1  ;;  %4633 = vst [vmem:[#allocation1] ss:$4 sm:$0xff] %v7090_v58 }
 0xc64   : > { %v4634_v59 = vld.sshfl [vmem:[#allocation1] sm:$0xff pattern:$0x73625140] }
 0xc65   : > { %4639 = vst [vmem:[#allocation1 + $0x1] ss:$4 sm:$0xff] %v7090_v58  ;;  %4636 = vrot.lane.b32.xlu1 %v4634_v59, %s9751_s8  ;;  %s9778_s8 = smov 93  }
 0xc67   : > { %v8628_v48 = vpop.permute.xlu0 %4487 }
 0xc68   : > { %9769 = vst [vmem:[#allocation60_spill] sm:$0xff] %v8628_v48 }
 0xc6c   : > { %v4640_v50 = vld.sshfl [vmem:[#allocation1] sm:$0xff pattern:$0x73625140] }
 0xc6d   : > { %4645 = vst [vmem:[#allocation1 + $0x2] ss:$4 sm:$0xff] %v7090_v58  ;;  %4642 = vrot.lane.b32.xlu2 %v4640_v50, %s9754_s25  ;;  %s9777_s25 = smov 94  }
 0xc6f   : > { %v4320_v45 = vpop.permute.xlu0 %4319  ;;  %v8647_v53 = vpop.permute.xlu1 %4493 }
 0xc70   : > { %v4325_v6 = vsel %vm376_vm0, %v4320_v45, 0  ;;  %9773 = vst [vmem:[#allocation64_spill] sm:$0xff] %v8647_v53 }
 0xc71   : > { %4366 = vmatpush.bf16.msra.mxu3 %v4325_v6 }
 0xc74   : > { %v4646_v29 = vld.sshfl [vmem:[#allocation1] sm:$0xff pattern:$0x73625140] }
 0xc75   : > { %4367 = vmatpush.bf16.msra.mxu3 %v4318_v31  ;;  %4648 = vrot.lane.b32.xlu0 %v4646_v29, %s9660_s20  ;;  %4651 = vst [vmem:[#allocation1 + $0x3] ss:$4 sm:$0xff] %v7090_v58 }
 0xc79   : > { %4368 = vmatpush.bf16.msra.mxu3 %v4316_v12 }
 0xc7c   : > { %v4652_v28 = vld.sshfl [vmem:[#allocation1] sm:$0xff pattern:$0x73625140] }
 0xc7d   : > { %4369 = vmatpush.bf16.msra.mxu3 %v4314_v57  ;;  %4654 = vrot.lane.b32.xlu0 %v4652_v28, %s9661_s24  ;;  %4701 = vst [vmem:[#allocation1 + $0x1] ss:$4 sm:$0xff] %v7090_v58 }
 0xc81   : > { %4370 = vmatpush.bf16.msra.mxu3 %v4304_v35 }
 0xc84   : > { %v4702_v30 = vld.sshfl [vmem:[#allocation1] sm:$0xff pattern:$0x73625140] }
 0xc85   : > { %4371 = vmatpush.bf16.msra.mxu3 %v8552_v40  ;;  %4707 = vst [vmem:[#allocation1 + $0x2] ss:$4 sm:$0xff] %v7090_v58  ;;  %4704 = vrot.lane.b32.xlu2 %v4702_v30, %s9646_s21  ;;  %v8656_v40 = vpop.permute.xlu2 %4535 }
 0xc87   : > { %v8658_v18 = vpop.permute.xlu1 %4546 }
 0xc89   : > { %4372 = vmatpush.bf16.msra.mxu3 %v8533_v3  ;;  %v8662_v3 = vpop.permute.xlu0 %4537 }
 0xc8c   : > { %v4708_v19 = vld.sshfl [vmem:[#allocation1] sm:$0xff pattern:$0x73625140] }
 0xc8d   : > { %4373 = vmatpush.bf16.msra.mxu3 %v4305_v51  ;;  %4713 = vst [vmem:[#allocation1 + $0x3] ss:$4 sm:$0xff] %v7090_v58  ;;  %4710 = vrot.lane.b32.xlu0 %v4708_v19, %s9631_s18  ;;  %v8666_v55 = vpop.permute.xlu2 %4548 }
 0xc8f   : > { %v8668_v57 = vpop.permute.xlu1 %4559 }
 0xc90   : > { %6003 = vmatmul.msk.bf16.vlgmr.msra.gmra.mxu3 %vm470_vm7, %v7363_v49 }
 0xc91   : > { %v8670_v20 = vpop.permute.xlu0 %4557 }
 0xc94   : > { %v4714_v35 = vld.sshfl [vmem:[#allocation1] sm:$0xff pattern:$0x73625140] }
 0xc95   : > { %4716 = vrot.lane.b32.xlu1 %v4714_v35, %s9647_s14  ;;  %4718 = vst [vmem:[#allocation1] ss:$4 sm:$0xff] %v7090_v58  ;;  %v8674_v62 = vpop.permute.xlu2 %4567 }
 0xc99   : > { %v8678_v50 = vpop.permute.xlu0 %4569 }
 0xc9c   : > { %v4719_v27 = vld.sshfl [vmem:[#allocation1] sm:$0xff pattern:$0x73625140] }
 0xc9d   : > { %4724 = vst [vmem:[#allocation1 + $0x1] ss:$4 sm:$0xff] %v7090_v58  ;;  %4721 = vrot.lane.b32.xlu1 %v4719_v27, %s9648_s0  ;;  %v8682_v6 = vpop.permute.xlu2 %4580 }
 0xc9f   : > { %v8676_v59 = vpop.permute.xlu1 %4578 }
 0xca4   : > { %v4725_v61 = vld.sshfl [vmem:[#allocation1] sm:$0xff pattern:$0x73625140] }
 0xca5   : > { %4730 = vst [vmem:[#allocation1 + $0x2] ss:$4 sm:$0xff] %v7090_v58  ;;  %4727 = vrot.lane.b32.xlu2 %v4725_v61, %s9649_s2  ;;  %v8690_v28 = vpop.permute.xlu2 %4600 }
 0xca7   : > { %v8684_v31 = vpop.permute.xlu1 %4591  ;;  %v8686_v12 = vpop.permute.xlu0 %4589 }
 0xcac   : > { %v4731_v45 = vld.sshfl [vmem:[#allocation1] sm:$0xff pattern:$0x73625140] }
 0xcad   : > { %4736 = vst [vmem:[#allocation1 + $0x3] ss:$4 sm:$0xff] %v7090_v58  ;;  %4733 = vrot.lane.b32.xlu0 %v4731_v45, %s9635_s9  ;;  %v8699_v61 = vpop.permute.xlu2 %4612 }
 0xcaf   : > { %v8694_v19 = vpop.permute.xlu0 %4602 }
 0xcb4   : > { %v4737_v29 = vld.sshfl [vmem:[#allocation1] sm:$0xff pattern:$0x73625140] }
 0xcb5   : > { %4741 = vst [vmem:[#allocation1] ss:$4 sm:$0xff] %v7090_v58  ;;  %4739 = vrot.lane.b32.xlu2 %v4737_v29, %s9650_s30 }
 0xcb7   : > { %v4611_v51 = vpop.permute.xlu1 %4610 }
 0xcb8   : > { %v4614_v29 = vsel %vm9775_vm15, %v4611_v51, %v8699_v61  ;;  %vm1694_vm15 = vcmask 195584  }
 0xcbc   : > { %v4742_v30 = vld.sshfl [vmem:[#allocation1] sm:$0xff pattern:$0x73625140] }
 0xcbd   : > { %4747 = vst [vmem:[#allocation1 + $0x1] ss:$4 sm:$0xff] %v7090_v58  ;;  %4744 = vrot.lane.b32.xlu0 %v4742_v30, %s9652_s27 }
 0xcbf   : > { %v8705_v13 = vpop.permute.xlu0 %4619 }
 0xcc0   : > { %v4684_v25 = vsel %vm376_vm0, %v4614_v29, %v8705_v13 }
 0xcc4   : > { %v4748_v35 = vld.sshfl [vmem:[#allocation1] sm:$0xff pattern:$0x73625140]  ;;  %v4750_v27 = vld.sshfl [vmem:[#allocation1 + $0x8] sm:$0xff pattern:$0x73625140] }
 0xcc5   : > { %4758 = vst [vmem:[#allocation1 + $0x2] ss:$4 sm:$0xff] %v7090_v58  ;;  %4752 = vrot.lane.b32.xlu2 %v4748_v35, %s9653_s26  ;;  %4754 = vrot.lane.b32.xlu0 %v4750_v27, %s9653_s26 }
 0xcc7   : > { %v8701_v45 = vpop.permute.xlu1 %4625  ;;  %v4643_v15 = vpop.permute.xlu2 %4642 }
 0xcc8   : > { %v4688_v27 = vsel %vm379_vm2, %v4684_v25, %v8701_v45 }
 0xccc   : > { %v4759_v30 = vld.sshfl [vmem:[#allocation1] sm:$0xff pattern:$0x73625140]  ;;  %v4761_v44 = vld.sshfl [vmem:[#allocation1 + $0x8] sm:$0xff pattern:$0x73625140] }
 0xccd   : > { %4763 = vrot.lane.b32.xlu1 %v4759_v30, %s9630_s19  ;;  %4769 = vst [vmem:[#allocation1 + $0x3] ss:$4 sm:$0xff] %v7090_v58  ;;  %4765 = vrot.lane.b32.xlu2 %v4761_v44, %s9630_s19 }
 0xccf   : > { %v8712_v35 = vpop.permute.xlu1 %4631 }
 0xcd0   : > { %v4691_v51 = vsel %vm382_vm4, %v4688_v27, %v8712_v35 }
 0xcd4   : > { %v4772_v52 = vld.sshfl [vmem:[#allocation1 + $0x8] sm:$0xff pattern:$0x73625140]  ;;  %v4770_v60 = vld.sshfl [vmem:[#allocation1] sm:$0xff pattern:$0x73625140] }
 0xcd5   : > { %5561 = vrot.lane.b32.xlu1 %v4691_v51, %s9776_s10  ;;  %4779 = vst [vmem:[#allocation1] ss:$4 sm:$0xff] %v7090_v58  ;;  %4774 = vrot.lane.b32.xlu0 %v4770_v60, %s9654_s23 }
 0xcdc   : > { %v4780_v29 = vld.sshfl [vmem:[#allocation1] sm:$0xff pattern:$0x73625140]  ;;  %v4782_v30 = vld.sshfl [vmem:[#allocation1 + $0x8] sm:$0xff pattern:$0x73625140] }
 0xcdd   : > { %4776 = vrot.lane.b32.xlu1 %v4772_v52, %s9654_s23  ;;  %4790 = vst [vmem:[#allocation1 + $0x1] ss:$4 sm:$0xff] %v7090_v58  ;;  %4786 = vrot.lane.b32.xlu2 %v4782_v30, %s9655_s22  ;;  %v4637_v52 = vpop.permute.xlu1 %4636 }
 0xcde   : > { %v4695_v30 = vsel %vm376_vm0, %v4637_v52, %v4643_v15 }
 0xce4   : > { %v4793_v25 = vld.sshfl [vmem:[#allocation1 + $0x8] sm:$0xff pattern:$0x73625140]  ;;  %v4791_v44 = vld.sshfl [vmem:[#allocation1] sm:$0xff pattern:$0x73625140] }
 0xce5   : > { %4784 = vrot.lane.b32.xlu1 %v4780_v29, %s9655_s22  ;;  %4801 = vst [vmem:[#allocation1 + $0x2] ss:$4 sm:$0xff] %v7090_v58  ;;  %4795 = vrot.lane.b32.xlu0 %v4791_v44, %s9777_s25 }
 0xce7   : > { %v4649_v60 = vpop.permute.xlu0 %4648 }
 0xce8   : > { %v4697_v29 = vsel %vm379_vm2, %v4695_v30, %v4649_v60 }
 0xcec   : > { %v4802_v27 = vld.sshfl [vmem:[#allocation1] sm:$0xff pattern:$0x73625140]  ;;  %v4804_v51 = vld.sshfl [vmem:[#allocation1 + $0x8] sm:$0xff pattern:$0x73625140] }
 0xced   : > { %4797 = vrot.lane.b32.xlu1 %v4793_v25, %s9777_s25  ;;  %4812 = vst [vmem:[#allocation1 + $0x3] ss:$4 sm:$0xff] %v7090_v58  ;;  %4808 = vrot.lane.b32.xlu2 %v4804_v51, %s9778_s8  ;;  %s9779_s25 = smov 51  }
 0xcef   : > { %v4655_v25 = vpop.permute.xlu0 %4654 }
 0xcf0   : > { %v4699_v44 = vsel %vm382_vm4, %v4697_v29, %v4655_v25 }
 0xcf4   : > { %v4815_v46 = vld.sshfl [vmem:[#allocation1 + $0x8] sm:$0xff pattern:$0x73625140]  ;;  %v4813_v47 = vld.sshfl [vmem:[#allocation1] sm:$0xff pattern:$0x73625140] }
 0xcf5   : > { %4806 = vrot.lane.b32.xlu1 %v4802_v27, %s9778_s8  ;;  %4849 = vst [vmem:[#allocation1] ss:$4 sm:$0xff] %v7090_v58  ;;  %4817 = vrot.lane.b32.xlu0 %v4813_v47, %s9659_s5  ;;  %s9780_s8 = smov 120  }
 0xcfc   : > { %v8736_v26 = vld.sshfl [vmem:[#allocation1] sm:$0xff pattern:$0x73625140]  ;;  %v8738_v51 = vld.sshfl [vmem:[#allocation1 + $0x8] sm:$0xff pattern:$0x73625140] }
 0xcfd   : > { %5565 = vrot.lane.b32.xlu1 %v4699_v44, %s9776_s10  ;;  %4853 = vst [vmem:[#allocation1 + $0x1] ss:$4 sm:$0xff] %v7090_v58  ;;  %s9783_s10 = smov 39  }
 0xd04   : > { %v4854_v15 = vld.sshfl [vmem:[#allocation1] sm:$0xff pattern:$0x73625140]  ;;  %v4856_v52 = vld.sshfl [vmem:[#allocation1 + $0x8] sm:$0xff pattern:$0x73625140] }
 0xd05   : > { %4819 = vrot.lane.b32.xlu1 %v4815_v46, %s9659_s5  ;;  %4860 = vrot.lane.b32.xlu2 %v4856_v52, %s9646_s21  ;;  %4864 = vst [vmem:[#allocation1 + $0x2] ss:$4 sm:$0xff] %v7742_v33 }
 0xd07   : > { %v8768_v25 = vpop.permute.xlu1 %4716 }
 0xd0c   : > { %v4865_v47 = vld.sshfl [vmem:[#allocation1] sm:$0xff pattern:$0x73625140] }
 0xd0d   : > { %4858 = vrot.lane.b32.xlu1 %v4854_v15, %s9646_s21  ;;  %4870 = vst [vmem:[#allocation1 + $0x3] ss:$4 sm:$0xff] %v7742_v33 }
 0xd0f   : > { %v8774_v52 = vpop.permute.xlu1 %4721 }
 0xd10   : > { %9782 = vst [vmem:[#allocation65_spill] sm:$0xff] %v8774_v52 }
 0xd13   : > { %v4375_v27 = vpop.f32.mrf.mxu3 }
 0xd14   : > { %v8748_v60 = vadd.f32 %v4375_v27, %v8589_v43  ;;  %v4871_v30 = vld.sshfl [vmem:[#allocation1] sm:$0xff pattern:$0x73625140] }
 0xd15   : > { %4867 = vrot.lane.b32.xlu1 %v4865_v47, %s9779_s25  ;;  %4875 = vst [vmem:[#allocation1] ss:$4 sm:$0xff] %v7742_v33  ;;  %s9781_s25 = smov 50   ;;  %v8779_v47 = vpop.permute.xlu2 %4704 }
 0xd16   : > { %4386 = vrot.lane.b32.xlu0 %v8748_v60, %s9649_s2  ;;  %4383 = vrot.lane.b32.xlu2 %v8748_v60, %s9780_s8 }
 0xd1b   : > { %v4377_v46 = vpop.f32.mrf.mxu3 }
 0xd1c   : > { %v4876_v29 = vld.sshfl [vmem:[#allocation1] sm:$0xff pattern:$0x73625140] }
 0xd1d   : > { %4380 = vrot.lane.b32.xlu1 %v8748_v60, %s9634_s16  ;;  %4881 = vst [vmem:[#allocation1 + $0x1] ss:$4 sm:$0xff] %v7742_v33 }
 0xd1e   : > { %4395 = vrot.lane.b32.xlu0 %v8748_v60, %s9630_s19  ;;  %4392 = vrot.lane.b32.xlu2 %v8748_v60, %s9670_s4 }
 0xd24   : > { %v4882_v43 = vld.sshfl [vmem:[#allocation1] sm:$0xff pattern:$0x73625140] }
 0xd25   : > { %4389 = vrot.lane.b32.xlu1 %v8748_v60, %s9637_s17  ;;  %4887 = vst [vmem:[#allocation1 + $0x2] ss:$4 sm:$0xff] %v7742_v33 }
 0xd26   : > { %4873 = vrot.lane.b32.xlu2 %v4871_v30, %s9781_s25  ;;  %4884 = vrot.lane.b32.xlu0 %v4882_v43, %s9674_s13  ;;  %s9784_s25 = smov 38  }
 0xd2c   : > { %v4888_v44 = vld.sshfl [vmem:[#allocation1] sm:$0xff pattern:$0x73625140] }
 0xd2d   : > { %4398 = vrot.lane.b32.xlu1 %v8748_v60, %s9633_s15  ;;  %4893 = vst [vmem:[#allocation1 + $0x3] ss:$4 sm:$0xff] %v7742_v33 }
 0xd2e   : > { %4878 = vrot.lane.b32.xlu2 %v4876_v29, %s9640_s12  ;;  %v8785_v29 = vpop.permute.xlu2 %4727 }
 0xd2f   : > { %9786 = vst [vmem:[#allocation67_spill] sm:$0xff] %v8785_v29 }
 0xd34   : > { %v4894_v15 = vld.sshfl [vmem:[#allocation1] sm:$0xff pattern:$0x73625140] }
 0xd35   : > { %4898 = vst [vmem:[#allocation1] ss:$4 sm:$0xff] %v7742_v33  ;;  %4896 = vrot.lane.b32.xlu0 %v4894_v15, %s9783_s10  ;;  %v8791_v15 = vpop.permute.xlu0 %4710  ;;  %s9790_s10 = smov 27  }
 0xd36   : > { %4890 = vrot.lane.b32.xlu2 %v4888_v44, %s9673_s7 }
 0xd3c   : > { %v4899_v27 = vld.sshfl [vmem:[#allocation1] sm:$0xff pattern:$0x73625140] }
 0xd3d   : > { %4901 = vrot.lane.b32.xlu1 %v4899_v27, %s9784_s25  ;;  %4904 = vst [vmem:[#allocation1 + $0x1] ss:$4 sm:$0xff] %v7742_v33  ;;  %v8795_v27 = vpop.permute.xlu2 %4739  ;;  %v8799_v5 = vpop.permute.xlu0 %4733  ;;  %s9792_s25 = smov 26  }
 0xd3e   : > { %9787 = vst [vmem:[#allocation68_spill] sm:$0xff] %v8795_v27 }
 0xd3f   : > { %v8783_v30 = vpop.permute.xlu1 %4763  ;;  %9789 = vst [vmem:[#allocation70_spill] sm:$0xff] %v8799_v5 }
 0xd40   : > { %9785 = vst [vmem:[#allocation66_spill] sm:$0xff] %v8783_v30 }
 0xd44   : > { %v4905_v46 = vld.sshfl [vmem:[#allocation1] sm:$0xff pattern:$0x73625140] }
 0xd45   : > { %4910 = vst [vmem:[#allocation1 + $0x2] ss:$4 sm:$0xff] %v7742_v33  ;;  %4907 = vrot.lane.b32.xlu2 %v4905_v46, %s9701_s6  ;;  %v8805_v16 = vpop.permute.xlu2 %4752  ;;  %v8811_v10 = vpop.permute.xlu0 %4744 }
 0xd46   : > { %9791 = vst [vmem:[#allocation71_spill] sm:$0xff] %v8811_v10 }
 0xd47   : > { %v8789_v43 = vpop.permute.xlu1 %5561 }
 0xd4c   : > { %v4911_v44 = vld.sshfl [vmem:[#allocation1] sm:$0xff pattern:$0x73625140] }
 0xd4d   : > { %4916 = vst [vmem:[#allocation1 + $0x3] ss:$4 sm:$0xff] %v7742_v33  ;;  %4913 = vrot.lane.b32.xlu2 %v4911_v44, %s9702_s3  ;;  %v8813_v2 = vpop.permute.xlu2 %4765  ;;  %v8819_v49 = vpop.permute.xlu0 %4754 }
 0xd4f   : > { %v8797_v36 = vpop.permute.xlu1 %4776 }
 0xd50   : > { %9788 = vst [vmem:[#allocation69_spill] sm:$0xff] %v8797_v36 }
 0xd54   : > { %v4917_v24 = vld.sshfl [vmem:[#allocation1] sm:$0xff pattern:$0x73625140] }
 0xd55   : > { %4921 = vst [vmem:[#allocation1] ss:$4 sm:$0xff] %v7742_v33  ;;  %4919 = vrot.lane.b32.xlu2 %v4917_v24, %s9750_s1  ;;  %v8821_v7 = vpop.permute.xlu2 %4786  ;;  %v8825_v11 = vpop.permute.xlu0 %4774  ;;  %s9794_s1 = smov 119  }
 0xd56   : > { %9793 = vst [vmem:[#allocation72_spill] sm:$0xff] %v8825_v11 }
 0xd57   : > { %v8803_v46 = vpop.permute.xlu1 %4784 }
 0xd5c   : > { %v4922_v56 = vld.sshfl [vmem:[#allocation1] sm:$0xff pattern:$0x73625140] }
 0xd5d   : > { %4924 = vrot.lane.b32.xlu1 %v4922_v56, %s9790_s10  ;;  %4927 = vst [vmem:[#allocation1 + $0x1] ss:$4 sm:$0xff] %v7742_v33  ;;  %v8833_v8 = vpop.permute.xlu0 %4795 }
 0xd5f   : > { %v8809_v44 = vpop.permute.xlu1 %4797 }
 0xd64   : > { %v4928_v37 = vld.sshfl [vmem:[#allocation1] sm:$0xff pattern:$0x73625140] }
 0xd65   : > { %4933 = vst [vmem:[#allocation1 + $0x2] ss:$4 sm:$0xff] %v7742_v33  ;;  %4930 = vrot.lane.b32.xlu2 %v4928_v37, %s9792_s25  ;;  %v8829_v37 = vpop.permute.xlu2 %4808 }
 0xd67   : > { %v8817_v24 = vpop.permute.xlu1 %4806  ;;  %v8843_v14 = vpop.permute.xlu0 %4817 }
 0xd6c   : > { %v4934_v63 = vld.sshfl [vmem:[#allocation1] sm:$0xff pattern:$0x73625140] }
 0xd6d   : > { %4939 = vst [vmem:[#allocation1 + $0x3] ss:$4 sm:$0xff] %v7742_v33  ;;  %4936 = vrot.lane.b32.xlu2 %v4934_v63, %s9660_s20 }
 0xd6f   : > { %v5566_v56 = vpop.permute.xlu1 %5565 }
 0xd70   : > { %5679 = vmatpush.bf16.msrb.mxu0 %v5566_v56  ;;  %v4861_v56 = vpop.permute.xlu2 %4860 }
 0xd74   : > { %v4940_v39 = vld.sshfl [vmem:[#allocation1] sm:$0xff pattern:$0x73625140] }
 0xd75   : > { %4942 = vrot.lane.b32.xlu1 %v4940_v39, %s9661_s24  ;;  %4976 = vst [vmem:[#allocation1 + $0x1] ss:$4 sm:$0xff] %v7742_v33 }
 0xd77   : > { %v8831_v34 = vpop.permute.xlu1 %4819 }
 0xd7c   : > { %v4977_v23 = vld.sshfl [vmem:[#allocation1] sm:$0xff pattern:$0x73625140] }
 0xd7d   : > { %4982 = vst [vmem:[#allocation1 + $0x2] ss:$4 sm:$0xff] %v7742_v33  ;;  %4979 = vrot.lane.b32.xlu0 %v4977_v23, %s9780_s8 }
 0xd7f   : > { %v4859_v63 = vpop.permute.xlu1 %4858 }
 0xd80   : > { %v4862_v38 = vsel %vm9589_vm1, %v4859_v63, %v4861_v56  ;;  %vm9590_vm1 = vcmask 326656  }
 0xd81   : > { %v4945_v39 = vsel %vm376_vm0, %v8736_v26, %v4862_v38  ;;  %v4384_v26 = vpop.permute.xlu2 %4383 }
 0xd84   : > { %v4983_v4 = vld.sshfl [vmem:[#allocation1] sm:$0xff pattern:$0x73625140]  ;;  %v4985_v0 = vld.sshfl [vmem:[#allocation1 + $0x8] sm:$0xff pattern:$0x73625140] }
 0xd85   : > { %4987 = vrot.lane.b32.xlu1 %v4983_v4, %s9794_s1  ;;  %4993 = vst [vmem:[#allocation1 + $0x3] ss:$4 sm:$0xff] %v7742_v33  ;;  %4989 = vrot.lane.b32.xlu2 %v4985_v0, %s9794_s1  ;;  %s9796_s1 = smov 107  }
 0xd87   : > { %v4868_v42 = vpop.permute.xlu1 %4867 }
 0xd88   : > { %v4949_v23 = vsel %vm379_vm2, %v4945_v39, %v4868_v42  ;;  %v4387_v4 = vpop.permute.xlu0 %4386 }
 0xd8c   : > { %v4994_v54 = vld.sshfl [vmem:[#allocation1] sm:$0xff pattern:$0x73625140]  ;;  %v4996_v27 = vld.sshfl [vmem:[#allocation1 + $0x8] sm:$0xff pattern:$0x73625140] }
 0xd8d   : > { %4998 = vrot.lane.b32.xlu1 %v4994_v54, %s9647_s14  ;;  %5003 = vst [vmem:[#allocation1] ss:$4 sm:$0xff] %v7742_v33  ;;  %5000 = vrot.lane.b32.xlu2 %v4996_v27, %s9647_s14  ;;  %v4393_v27 = vpop.permute.xlu2 %4392 }
 0xd8f   : > { %v4381_v38 = vpop.permute.xlu1 %4380 }
 0xd90   : > { %v4401_v0 = vsel %vm1690_vm5, %v8748_v60, %v4381_v38 }
 0xd91   : > { %v4402_v63 = vsel %vm1692_vm9, %v4401_v0, %v4384_v26 }
 0xd92   : > { %v4403_v39 = vsel %vm1694_vm15, %v4402_v63, %v4387_v4 }
 0xd94   : > { %v5004_v53 = vld.sshfl [vmem:[#allocation1] sm:$0xff pattern:$0x73625140]  ;;  %v5006_v1 = vld.sshfl [vmem:[#allocation1 + $0x8] sm:$0xff pattern:$0x73625140] }
 0xd95   : > { %5014 = vst [vmem:[#allocation1 + $0x1] ss:$4 sm:$0xff] %v7742_v33  ;;  %5008 = vrot.lane.b32.xlu1 %v5004_v53, %s9648_s0  ;;  %5010 = vrot.lane.b32.xlu2 %v5006_v1, %s9648_s0 }
 0xd97   : > { %v4390_v54 = vpop.permute.xlu1 %4389 }
 0xd98   : > { %v4404_v60 = vsel %vm9591_vm3, %v4403_v39, %v4390_v54  ;;  %vm9802_vm3 = vcmask 965632  }
 0xd99   : > { %v8858_v38 = vsel %vm9590_vm1, %v4404_v60, %v4393_v27  ;;  %v4947_v27 = vsel %vm376_vm0, %v8738_v51, %v4861_v56  ;;  %vm9800_vm1 = vcmask 973824  }
 0xd9a   : > { %9795 = vst [vmem:[#allocation73_spill] sm:$0xff] %v8858_v38  ;;  %v4950_v60 = vsel %vm379_vm2, %v4947_v27, %v4868_v42  ;;  %v8893_v27 = vpop.permute.xlu0 %4395 }
 0xd9b   : > { %9798 = vst [vmem:[#allocation74_spill] sm:$0xff] %v8893_v27 }
 0xd9c   : > { %v5015_v26 = vld.sshfl [vmem:[#allocation1] sm:$0xff pattern:$0x73625140]  ;;  %v5017_v0 = vld.sshfl [vmem:[#allocation1 + $0x8] sm:$0xff pattern:$0x73625140] }
 0xd9d   : > { %5019 = vrot.lane.b32.xlu0 %v5015_v26, %s9649_s2  ;;  %5025 = vst [vmem:[#allocation1 + $0x2] ss:$4 sm:$0xff] %v7742_v33  ;;  %5021 = vrot.lane.b32.xlu1 %v5017_v0, %s9649_s2 }
 0xda4   : > { %v5026_v53 = vld.sshfl [vmem:[#allocation1] sm:$0xff pattern:$0x73625140]  ;;  %v5028_v4 = vld.sshfl [vmem:[#allocation1 + $0x8] sm:$0xff pattern:$0x73625140] }
 0xda5   : > { %5030 = vrot.lane.b32.xlu0 %v5026_v53, %s9670_s4  ;;  %5036 = vst [vmem:[#allocation1 + $0x3] ss:$4 sm:$0xff] %v7742_v33  ;;  %5032 = vrot.lane.b32.xlu1 %v5028_v4, %s9670_s4  ;;  %v4874_v53 = vpop.permute.xlu2 %4873 }
 0xda6   : > { %v8879_v4 = vsel %vm382_vm4, %v4949_v23, %v4874_v53 }
 0xdac   : > { %v5039_v1 = vld.sshfl [vmem:[#allocation1 + $0x8] sm:$0xff pattern:$0x73625140]  ;;  %v5037_v63 = vld.sshfl [vmem:[#allocation1] sm:$0xff pattern:$0x73625140] }
 0xdad   : > { %5043 = vrot.lane.b32.xlu0 %v5039_v1, %s9796_s1  ;;  %5046 = vst [vmem:[#allocation1] ss:$4 sm:$0xff] %v7742_v33  ;;  %5041 = vrot.lane.b32.xlu2 %v5037_v63, %s9796_s1  ;;  %v8882_v1 = vsel %vm382_vm4, %v4950_v60, %v4874_v53  ;;  %s9797_s1 = smov 28   ;;  %v4879_v23 = vpop.permute.xlu2 %4878 }
 0xdb4   : > { %v5049_v39 = vld.sshfl [vmem:[#allocation1 + $0x8] sm:$0xff pattern:$0x73625140]  ;;  %v5047_v54 = vld.sshfl [vmem:[#allocation1] sm:$0xff pattern:$0x73625140] }
 0xdb5   : > { %5053 = vrot.lane.b32.xlu0 %v5049_v39, %s9652_s27  ;;  %5057 = vst [vmem:[#allocation1 + $0x1] ss:$4 sm:$0xff] %v7742_v33  ;;  %5051 = vrot.lane.b32.xlu2 %v5047_v54, %s9652_s27  ;;  %v4891_v60 = vpop.permute.xlu2 %4890 }
 0xdbc   : > { %v5058_v26 = vld.sshfl [vmem:[#allocation1] sm:$0xff pattern:$0x73625140]  ;;  %v5060_v0 = vld.sshfl [vmem:[#allocation1 + $0x8] sm:$0xff pattern:$0x73625140] }
 0xdbd   : > { %5068 = vst [vmem:[#allocation1 + $0x2] ss:$4 sm:$0xff] %v7742_v33  ;;  %5062 = vrot.lane.b32.xlu1 %v5058_v26, %s9653_s26  ;;  %5064 = vrot.lane.b32.xlu2 %v5060_v0, %s9653_s26  ;;  %v4885_v0 = vpop.permute.xlu0 %4884 }
 0xdbe   : > { %v4956_v53 = vsel %vm376_vm0, %v4879_v23, %v4885_v0 }
 0xdc4   : > { %v5069_v63 = vld.sshfl [vmem:[#allocation1] sm:$0xff pattern:$0x73625140]  ;;  %v5071_v39 = vld.sshfl [vmem:[#allocation1 + $0x8] sm:$0xff pattern:$0x73625140] }
 0xdc5   : > { %5073 = vrot.lane.b32.xlu0 %v5069_v63, %s9630_s19  ;;  %5079 = vst [vmem:[#allocation1 + $0x3] ss:$4 sm:$0xff] %v8385_v17  ;;  %5075 = vrot.lane.b32.xlu1 %v5071_v39, %s9630_s19  ;;  %v4908_v63 = vpop.permute.xlu2 %4907  ;;  %v4897_v23 = vpop.permute.xlu0 %4896 }
 0xdcc   : > { %v5080_v42 = vld.sshfl [vmem:[#allocation1] sm:$0xff pattern:$0x73625140] }
 0xdcd   : > { %5084 = vst [vmem:[#allocation1] ss:$4 sm:$0xff] %v8385_v17  ;;  %5082 = vrot.lane.b32.xlu2 %v5080_v42, %s9797_s1  ;;  %v8900_v42 = vpop.permute.xlu1 %4398 }
 0xdce   : > { %9799 = vst [vmem:[#allocation75_spill] sm:$0xff] %v8900_v42 }
 0xdd4   : > { %v5085_v51 = vld.sshfl [vmem:[#allocation1] sm:$0xff pattern:$0x73625140] }
 0xdd5   : > { %5090 = vst [vmem:[#allocation1 + $0x1] ss:$4 sm:$0xff] %v8385_v17  ;;  %5087 = vrot.lane.b32.xlu2 %v5085_v51, %s9790_s10  ;;  %s9801_s10 = smov 77  }
 0xddc   : > { %v5091_v56 = vld.sshfl [vmem:[#allocation1] sm:$0xff pattern:$0x73625140] }
 0xddd   : > { %5093 = vrot.lane.b32.xlu0 %v5091_v56, %s9792_s25  ;;  %5096 = vst [vmem:[#allocation1 + $0x2] ss:$4 sm:$0xff] %v8385_v17  ;;  %v4902_v56 = vpop.permute.xlu1 %4901 }
 0xdde   : > { %v4963_v38 = vsel %vm376_vm0, %v4902_v56, %v4908_v63 }
 0xde4   : > { %v5097_v54 = vld.sshfl [vmem:[#allocation1] sm:$0xff pattern:$0x73625140] }
 0xde5   : > { %5099 = vrot.lane.b32.xlu0 %v5097_v54, %s9660_s20  ;;  %5102 = vst [vmem:[#allocation1 + $0x3] ss:$4 sm:$0xff] %v8385_v17  ;;  %v4914_v54 = vpop.permute.xlu2 %4913 }
 0xde6   : > { %v4965_v0 = vsel %vm379_vm2, %v4963_v38, %v4914_v54 }
 0xdec   : > { %v5103_v26 = vld.sshfl [vmem:[#allocation1] sm:$0xff pattern:$0x73625140] }
 0xded   : > { %5105 = vrot.lane.b32.xlu1 %v5103_v26, %s9661_s24  ;;  %5135 = vst [vmem:[#allocation1 + $0x1] ss:$4 sm:$0xff] %v8385_v17  ;;  %v4958_v26 = vsel %vm379_vm2, %v4956_v53, %v4891_v60  ;;  %v4925_v60 = vpop.permute.xlu1 %4924 }
 0xdee   : > { %v8910_v42 = vsel %vm382_vm4, %v4958_v26, %v4897_v23 }
 0xdef   : > { %v4980_v23 = vpop.permute.xlu0 %4979 }
 0xdf4   : > { %v5136_v39 = vld.sshfl [vmem:[#allocation1] sm:$0xff pattern:$0x73625140] }
 0xdf5   : > { %5141 = vst [vmem:[#allocation1 + $0x2] ss:$4 sm:$0xff] %v8385_v17  ;;  %5138 = vrot.lane.b32.xlu1 %v5136_v39, %s9646_s21  ;;  %v4920_v39 = vpop.permute.xlu2 %4919  ;;  %v4943_v38 = vpop.permute.xlu1 %4942 }
 0xdfc   : > { %v5142_v51 = vld.sshfl [vmem:[#allocation1] sm:$0xff pattern:$0x73625140] }
 0xdfd   : > { %5144 = vrot.lane.b32.xlu0 %v5142_v51, %s9631_s18  ;;  %5147 = vst [vmem:[#allocation1 + $0x3] ss:$4 sm:$0xff] %v8385_v17  ;;  %v8915_v51 = vsel %vm382_vm4, %v4965_v0, %v4920_v39  ;;  %v4931_v63 = vpop.permute.xlu2 %4930 }
 0xdfe   : > { %v4970_v26 = vsel %vm376_vm0, %v4925_v60, %v4931_v63 }
 0xe04   : > { %v5148_v27 = vld.sshfl [vmem:[#allocation1] sm:$0xff pattern:$0x73625140] }
 0xe05   : > { %5152 = vst [vmem:[#allocation1] ss:$4 sm:$0xff] %v8385_v17  ;;  %5150 = vrot.lane.b32.xlu1 %v5148_v27, %s9632_s28  ;;  %v4937_v54 = vpop.permute.xlu2 %4936 }
 0xe06   : > { %v4972_v0 = vsel %vm379_vm2, %v4970_v26, %v4937_v54 }
 0xe0c   : > { %v5153_v32 = vld.sshfl [vmem:[#allocation1] sm:$0xff pattern:$0x73625140] }
 0xe0d   : > { %5155 = vrot.lane.b32.xlu0 %v5153_v32, %s9634_s16  ;;  %5158 = vst [vmem:[#allocation1 + $0x1] ss:$4 sm:$0xff] %v8385_v17  ;;  %v4988_v32 = vpop.permute.xlu1 %4987  ;;  %v4990_v48 = vpop.permute.xlu2 %4989 }
 0xe0e   : > { %v4991_v5 = vsel %vm9800_vm1, %v4988_v32, %v4990_v48  ;;  %vm9803_vm1 = vcmask 883712  }
 0xe0f   : > { %v5020_v63 = vpop.permute.xlu0 %5019 }
 0xe14   : > { %v5159_v53 = vld.sshfl [vmem:[#allocation1] sm:$0xff pattern:$0x73625140] }
 0xe15   : > { %5164 = vst [vmem:[#allocation1 + $0x2] ss:$4 sm:$0xff] %v8385_v17  ;;  %5161 = vrot.lane.b32.xlu1 %v5159_v53, %s9649_s2  ;;  %v5108_v53 = vsel %vm376_vm0, %v7742_v33, %v4980_v23  ;;  %v5001_v26 = vpop.permute.xlu2 %5000 }
 0xe16   : > { %v8935_v60 = vsel %vm379_vm2, %v5108_v53, %v4991_v5 }
 0xe17   : > { %v5031_v48 = vpop.permute.xlu0 %5030 }
 0xe1c   : > { %v5165_v56 = vld.sshfl [vmem:[#allocation1] sm:$0xff pattern:$0x73625140] }
 0xe1d   : > { %5167 = vrot.lane.b32.xlu0 %v5165_v56, %s9635_s9  ;;  %5170 = vst [vmem:[#allocation1 + $0x3] ss:$4 sm:$0xff] %v8385_v17  ;;  %v4999_v56 = vpop.permute.xlu1 %4998  ;;  %v5011_v32 = vpop.permute.xlu2 %5010 }
 0xe1e   : > { %v8940_v23 = vsel %vm9802_vm3, %v4999_v56, %v5001_v26  ;;  %vm9804_vm3 = vcmask 875520  }
 0xe1f   : > { %v5044_v56 = vpop.permute.xlu0 %5043 }
 0xe24   : > { %v5171_v27 = vld.sshfl [vmem:[#allocation1] sm:$0xff pattern:$0x73625140] }
 0xe25   : > { %5173 = vrot.lane.b32.xlu0 %v5171_v27, %s9650_s30  ;;  %5175 = vst [vmem:[#allocation1] ss:$4 sm:$0xff] %v8385_v17  ;;  %v4974_v27 = vsel %vm382_vm4, %v4972_v0, %v4943_v38  ;;  %v5009_v33 = vpop.permute.xlu1 %5008  ;;  %v5042_v52 = vpop.permute.xlu2 %5041 }
 0xe26   : > { %5603 = vrot.lane.b32.xlu2 %v4974_v27, %s9801_s10  ;;  %v5012_v0 = vsel %vm458_vm6, %v5009_v33, %v5011_v32 }
 0xe2c   : > { %v5176_v39 = vld.sshfl [vmem:[#allocation1] sm:$0xff pattern:$0x73625140] }
 0xe2d   : > { %5178 = vrot.lane.b32.xlu0 %v5176_v39, %s9636_s29  ;;  %5181 = vst [vmem:[#allocation1 + $0x1] ss:$4 sm:$0xff] %v8385_v17  ;;  %v5022_v38 = vpop.permute.xlu1 %5021  ;;  %s9806_s29 = smov 46  }
 0xe2e   : > { %v5023_v5 = vsel %vm470_vm7, %v5020_v63, %v5022_v38  ;;  %v5045_v38 = vsel %vm9804_vm3, %v5042_v52, %v5044_v56  ;;  %vm9812_vm3 = vcmask 818176  }
 0xe2f   : > { %v5115_v53 = vsel %vm376_vm0, %v5012_v0, %v5023_v5  ;;  %v5054_v5 = vpop.permute.xlu0 %5053 }
 0xe34   : > { %v5182_v54 = vld.sshfl [vmem:[#allocation1] sm:$0xff pattern:$0x73625140] }
 0xe35   : > { %5184 = vrot.lane.b32.xlu1 %v5182_v54, %s9637_s17  ;;  %5187 = vst [vmem:[#allocation1 + $0x2] ss:$4 sm:$0xff] %v8385_v17  ;;  %v5033_v26 = vpop.permute.xlu1 %5032 }
 0xe37   : > { %v5074_v52 = vpop.permute.xlu0 %5073 }
 0xe3c   : > { %v5188_v39 = vld.sshfl [vmem:[#allocation1] sm:$0xff pattern:$0x73625140] }
 0xe3d   : > { %5190 = vrot.lane.b32.xlu0 %v5188_v39, %s9630_s19  ;;  %5193 = vst [vmem:[#allocation1 + $0x3] ss:$4 sm:$0xff] %v8385_v17  ;;  %v5034_v39 = vsel %vm9803_vm1, %v5031_v48, %v5033_v26  ;;  %v5063_v0 = vpop.permute.xlu1 %5062  ;;  %vm9811_vm1 = vcmask 826368  }
 0xe3e   : > { %v5117_v63 = vsel %vm379_vm2, %v5115_v53, %v5034_v39 }
 0xe44   : > { %v5194_v27 = vld.sshfl [vmem:[#allocation1] sm:$0xff pattern:$0x73625140]  ;;  %v5196_v54 = vld.sshfl [vmem:[#allocation1 + $0x8] sm:$0xff pattern:$0x73625140] }
 0xe45   : > { %5198 = vrot.lane.b32.xlu1 %v5194_v27, %s9654_s23  ;;  %5203 = vst [vmem:[#allocation1] ss:$4 sm:$0xff] %v8385_v17  ;;  %5200 = vrot.lane.b32.xlu2 %v5196_v54, %s9654_s23  ;;  %v5052_v27 = vpop.permute.xlu2 %5051  ;;  %v5076_v53 = vpop.permute.xlu1 %5075 }
 0xe46   : > { %v5055_v54 = vsel %vm960_vm10, %v5052_v27, %v5054_v5  ;;  %v5077_v26 = vsel %vm661_vm12, %v5074_v52, %v5076_v53 }
 0xe4c   : > { %v5206_v33 = vld.sshfl [vmem:[#allocation1 + $0x8] sm:$0xff pattern:$0x73625140]  ;;  %v5204_v32 = vld.sshfl [vmem:[#allocation1] sm:$0xff pattern:$0x73625140] }
 0xe4d   : > { %5210 = vrot.lane.b32.xlu0 %v5206_v33, %s9655_s22  ;;  %5214 = vst [vmem:[#allocation1 + $0x1] ss:$4 sm:$0xff] %v8385_v17  ;;  %5208 = vrot.lane.b32.xlu2 %v5204_v32, %s9655_s22  ;;  %v5065_v56 = vpop.permute.xlu2 %5064 }
 0xe4e   : > { %v5066_v39 = vsel %vm649_vm11, %v5063_v0, %v5065_v56 }
 0xe4f   : > { %v5122_v33 = vsel %vm376_vm0, %v5055_v54, %v5066_v39 }
 0xe50   : > { %v5124_v32 = vsel %vm379_vm2, %v5122_v33, %v5077_v26 }
 0xe54   : > { %v5215_v29 = vld.sshfl [vmem:[#allocation1] sm:$0xff pattern:$0x73625140]  ;;  %v5217_v48 = vld.sshfl [vmem:[#allocation1 + $0x8] sm:$0xff pattern:$0x73625140] }
 0xe55   : > { %5219 = vrot.lane.b32.xlu1 %v5215_v29, %s9638_s11  ;;  %5225 = vst [vmem:[#allocation1 + $0x2] ss:$4 sm:$0xff] %v8385_v17  ;;  %5221 = vrot.lane.b32.xlu2 %v5217_v48, %s9638_s11  ;;  %v5094_v29 = vpop.permute.xlu0 %5093  ;;  %v5083_v48 = vpop.permute.xlu2 %5082  ;;  %s9810_s11 = smov 33  }
 0xe56   : > { %v8968_v41 = vsel %vm382_vm4, %v5124_v32, %v5083_v48  ;;  %v8985_v48 = vsel %vm382_vm4, %v8935_v60, %v8940_v23 }
 0xe5c   : > { %v5226_v5 = vld.sshfl [vmem:[#allocation1] sm:$0xff pattern:$0x73625140]  ;;  %v5228_v27 = vld.sshfl [vmem:[#allocation1 + $0x8] sm:$0xff pattern:$0x73625140] }
 0xe5d   : > { %5230 = vrot.lane.b32.xlu0 %v5226_v5, %s9633_s15  ;;  %5232 = vrot.lane.b32.xlu1 %v5228_v27, %s9633_s15  ;;  %5236 = vst [vmem:[#allocation1 + $0x3] ss:$4 sm:$0xff] %v8385_v17  ;;  %v5100_v54 = vpop.permute.xlu0 %5099  ;;  %v5088_v56 = vpop.permute.xlu2 %5087 }
 0xe5e   : > { %v5129_v26 = vsel %vm376_vm0, %v5088_v56, %v5094_v29 }
 0xe5f   : > { %v5106_v52 = vpop.permute.xlu1 %5105  ;;  %v5131_v39 = vsel %vm379_vm2, %v5129_v26, %v5100_v54  ;;  %v8992_v26 = vsel %vm382_vm4, %v5117_v63, %v5045_v38 }
 0xe64   : > { %v5239_v53 = vld.sshfl [vmem:[#allocation1 + $0x8] sm:$0xff pattern:$0x73625140]  ;;  %v5237_v0 = vld.sshfl [vmem:[#allocation1] sm:$0xff pattern:$0x73625140] }
 0xe65   : > { %5243 = vrot.lane.b32.xlu0 %v5239_v53, %s9659_s5  ;;  %5241 = vrot.lane.b32.xlu2 %v5237_v0, %s9659_s5  ;;  %5273 = vst [vmem:[#allocation1] ss:$4 sm:$0xff] %v8385_v17  ;;  %s9805_s5 = sld [smem:[#allocation27_spill]] }
 0xe67   : > { %v5139_v32 = vpop.permute.xlu1 %5138 }
 0xe68   : > { %v5247_v27 = vsel %vm376_vm0, %v8385_v17, %v5139_v32 }
 0xe6c   : > { %v8975_v33 = vld.sshfl [vmem:[#allocation1] sm:$0xff pattern:$0x73625140]  ;;  %v8977_v5 = vld.sshfl [vmem:[#allocation1 + $0x8] sm:$0xff pattern:$0x73625140] }
 0xe6d   : > { %5277 = vst [vmem:[#allocation1 + $0x1] ss:$4 sm:$0xff] %v8385_v17 }
 0xe6f   : > { %v5145_v53 = vpop.permute.xlu0 %5144 }
 0xe70   : > { %v5249_v29 = vsel %vm379_vm2, %v5247_v27, %v5145_v53  ;;  %v9001_v27 = vld [vmem:[%s9805_s5 + $0x1c] sm:$0xf] }
 0xe74   : > { %v5278_v0 = vld.sshfl [vmem:[#allocation1] sm:$0xff pattern:$0x73625140]  ;;  %v5280_v54 = vld.sshfl [vmem:[#allocation1 + $0x8] sm:$0xff pattern:$0x73625140] }
 0xe75   : > { %5282 = vrot.lane.b32.xlu0 %v5278_v0, %s9646_s21  ;;  %5284 = vrot.lane.b32.xlu1 %v5280_v54, %s9646_s21  ;;  %5288 = vst [vmem:[#allocation1 + $0x2] ss:$4 sm:$0xff] %v8385_v17 }
 0xe77   : > { %v5151_v56 = vpop.permute.xlu1 %5150 }
 0xe78   : > { %v8995_v32 = vsel %vm382_vm4, %v5249_v29, %v5151_v56 }
 0xe7c   : > { %v5289_v60 = vld.sshfl [vmem:[#allocation1] sm:$0xff pattern:$0x73625140]  ;;  %v5291_v23 = vld.sshfl [vmem:[#allocation1 + $0x8] sm:$0xff pattern:$0x73625140] }
 0xe7d   : > { %5293 = vrot.lane.b32.xlu0 %v5289_v60, %s9631_s18  ;;  %5295 = vrot.lane.b32.xlu1 %v5291_v23, %s9631_s18  ;;  %5299 = vst [vmem:[#allocation1 + $0x3] ss:$4 sm:$0xff] %v8385_v17 }
 0xe7f   : > { %v5156_v54 = vpop.permute.xlu0 %5155 }
 0xe80   : > { %v5604_v29 = vpop.permute.xlu2 %5603 }
 0xe81   : > { %5692 = vmatpush.bf16.msrb.mxu1 %v5604_v29 }
 0xe84   : > { %v5300_v53 = vld.sshfl [vmem:[#allocation1] sm:$0xff pattern:$0x73625140]  ;;  %v5302_v0 = vld.sshfl [vmem:[#allocation1 + $0x8] sm:$0xff pattern:$0x73625140] }
 0xe85   : > { %5304 = vrot.lane.b32.xlu0 %v5300_v53, %s9632_s28  ;;  %5306 = vrot.lane.b32.xlu1 %v5302_v0, %s9632_s28  ;;  %5310 = vst [vmem:[#allocation1] ss:$4 sm:$0xff] %v9001_v27 }
 0xe87   : > { %v5162_v63 = vpop.permute.xlu1 %5161 }
 0xe88   : > { %v5254_v38 = vsel %vm376_vm0, %v5156_v54, %v5162_v63  ;;  %v9018_v63 = vsel %vm382_vm4, %v5131_v39, %v5106_v52 }
 0xe8c   : > { %v5311_v56 = vld.sshfl [vmem:[#allocation1] sm:$0xff pattern:$0x73625140] }
 0xe8d   : > { %5316 = vst [vmem:[#allocation1 + $0x1] ss:$4 sm:$0xff] %v9001_v27  ;;  %5313 = vrot.lane.b32.xlu1 %v5311_v56, %s9640_s12 }
 0xe8f   : > { %v5168_v17 = vpop.permute.xlu0 %5167 }
 0xe90   : > { %v5256_v60 = vsel %vm379_vm2, %v5254_v38, %v5168_v17 }
 0xe94   : > { %v5317_v23 = vld.sshfl [vmem:[#allocation1] sm:$0xff pattern:$0x73625140] }
 0xe95   : > { %5322 = vst [vmem:[#allocation1 + $0x2] ss:$4 sm:$0xff] %v9001_v27  ;;  %5319 = vrot.lane.b32.xlu2 %v5317_v23, %s9674_s13  ;;  %s9807_s13 = smov 45  }
 0xe97   : > { %v5174_v53 = vpop.permute.xlu0 %5173 }
 0xe98   : > { %v9013_v0 = vsel %vm382_vm4, %v5256_v60, %v5174_v53 }
 0xe9c   : > { %v5323_v54 = vld.sshfl [vmem:[#allocation1] sm:$0xff pattern:$0x73625140] }
 0xe9d   : > { %5325 = vrot.lane.b32.xlu0 %v5323_v54, %s9673_s7  ;;  %5328 = vst [vmem:[#allocation1 + $0x3] ss:$4 sm:$0xff] %v9001_v27  ;;  %s9808_s7 = smov 35  }
 0xe9f   : > { %v5179_v38 = vpop.permute.xlu0 %5178  ;;  %v5201_v54 = vpop.permute.xlu2 %5200 }
 0xea4   : > { %v5329_v29 = vld.sshfl [vmem:[#allocation1] sm:$0xff pattern:$0x73625140] }
 0xea5   : > { %5333 = vst [vmem:[#allocation1] ss:$4 sm:$0xff] %v9001_v27  ;;  %5331 = vrot.lane.b32.xlu2 %v5329_v29, %s9806_s29 }
 0xea7   : > { %v5185_v17 = vpop.permute.xlu1 %5184 }
 0xea8   : > { %v5261_v60 = vsel %vm376_vm0, %v5179_v38, %v5185_v17 }
 0xeac   : > { %v5334_v56 = vld.sshfl [vmem:[#allocation1] sm:$0xff pattern:$0x73625140] }
 0xead   : > { %5336 = vrot.lane.b32.xlu0 %v5334_v56, %s9807_s13  ;;  %5339 = vst [vmem:[#allocation1 + $0x1] ss:$4 sm:$0xff] %v9001_v27 }
 0xeaf   : > { %v5191_v23 = vpop.permute.xlu0 %5190 }
 0xeb0   : > { %v5263_v52 = vsel %vm379_vm2, %v5261_v60, %v5191_v23  ;;  %v5209_v23 = vpop.permute.xlu2 %5208 }
 0xeb4   : > { %v5340_v53 = vld.sshfl [vmem:[#allocation1] sm:$0xff pattern:$0x73625140] }
 0xeb5   : > { %5345 = vst [vmem:[#allocation1 + $0x2] ss:$4 sm:$0xff] %v9001_v27  ;;  %5342 = vrot.lane.b32.xlu1 %v5340_v53, %s9701_s6  ;;  %s9809_s6 = smov 34  }
 0xeb7   : > { %v5199_v39 = vpop.permute.xlu1 %5198 }
 0xeb8   : > { %v5202_v29 = vsel %vm673_vm13, %v5199_v39, %v5201_v54 }
 0xeb9   : > { %v5265_v9 = vsel %vm382_vm4, %v5263_v52, %v5202_v29 }
 0xeba   : > { %5634 = vrot.lane.b32.xlu0 %v5265_v9, %s9649_s2  ;;  %v5222_v9 = vpop.permute.xlu2 %5221 }
 0xebc   : > { %v5346_v56 = vld.sshfl [vmem:[#allocation1] sm:$0xff pattern:$0x73625140] }
 0xebd   : > { %5348 = vrot.lane.b32.xlu2 %v5346_v56, %s9702_s3  ;;  %5351 = vst [vmem:[#allocation1 + $0x3] ss:$4 sm:$0xff] %v9001_v27  ;;  %s9822_s3 = smov 79  }
 0xebf   : > { %v5211_v60 = vpop.permute.xlu0 %5210 }
 0xec0   : > { %v5212_v39 = vsel %vm684_vm14, %v5209_v23, %v5211_v60 }
 0xec4   : > { %v5352_v38 = vld.sshfl [vmem:[#allocation1] sm:$0xff pattern:$0x73625140] }
 0xec5   : > { %5356 = vst [vmem:[#allocation1] ss:$4 sm:$0xff] %v9001_v27  ;;  %5354 = vrot.lane.b32.xlu2 %v5352_v38, %s9808_s7 }
 0xec7   : > { %v5220_v53 = vpop.permute.xlu1 %5219 }
 0xec8   : > { %v5223_v29 = vsel %vm9811_vm1, %v5220_v53, %v5222_v9  ;;  %vm9813_vm1 = vcmask 1039360  }
 0xec9   : > { %v5268_v38 = vsel %vm376_vm0, %v5212_v39, %v5223_v29 }
 0xecc   : > { %v5357_v17 = vld.sshfl [vmem:[#allocation1] sm:$0xff pattern:$0x73625140] }
 0xecd   : > { %5362 = vst [vmem:[#allocation1 + $0x1] ss:$4 sm:$0xff] %v9001_v27  ;;  %5359 = vrot.lane.b32.xlu2 %v5357_v17, %s9809_s6 }
 0xecf   : > { %v5231_v52 = vpop.permute.xlu0 %5230  ;;  %v5233_v17 = vpop.permute.xlu1 %5232 }
 0xed0   : > { %v5234_v36 = vsel %vm9812_vm3, %v5231_v52, %v5233_v17  ;;  %vm9814_vm3 = vcmask 1031168  }
 0xed1   : > { %v5270_v10 = vsel %vm379_vm2, %v5268_v38, %v5234_v36 }
 0xed4   : > { %v5363_v54 = vld.sshfl [vmem:[#allocation1] sm:$0xff pattern:$0x73625140] }
 0xed5   : > { %5365 = vrot.lane.b32.xlu0 %v5363_v54, %s9810_s11  ;;  %5368 = vst [vmem:[#allocation1 + $0x2] ss:$4 sm:$0xff] %v9001_v27  ;;  %v5242_v54 = vpop.permute.xlu2 %5241 }
 0xed7   : > { %v5244_v11 = vpop.permute.xlu0 %5243 }
 0xed8   : > { %v5245_v30 = vsel %vm720_vm8, %v5242_v54, %v5244_v11 }
 0xed9   : > { %v5272_v60 = vsel %vm382_vm4, %v5270_v10, %v5245_v30 }
 0xeda   : > { %5636 = vrot.lane.b32.xlu2 %v5272_v60, %s9649_s2 }
 0xedc   : > { %v5369_v56 = vld.sshfl [vmem:[#allocation1] sm:$0xff pattern:$0x73625140] }
 0xedd   : > { %5374 = vst [vmem:[#allocation1 + $0x3] ss:$4 sm:$0xff] %v9001_v27  ;;  %5371 = vrot.lane.b32.xlu0 %v5369_v56, %s9660_s20 }
 0xee4   : > { %v5375_v23 = vld.sshfl [vmem:[#allocation1] sm:$0xff pattern:$0x73625140] }
 0xee5   : > { %5413 = vst [vmem:[#allocation1 + $0x1] ss:$4 sm:$0xff] %v9001_v27  ;;  %5377 = vrot.lane.b32.xlu2 %v5375_v23, %s9661_s24 }
 0xee7   : > { %v5283_v39 = vpop.permute.xlu0 %5282  ;;  %v5285_v29 = vpop.permute.xlu1 %5284 }
 0xee8   : > { %v5286_v56 = vsel %vm9813_vm1, %v5283_v39, %v5285_v29  ;;  %v5382_v17 = vsel %vm376_vm0, %v8977_v5, %v5285_v29  ;;  %vm9815_vm1 = vcmask 1022976  }
 0xee9   : > { %v5380_v23 = vsel %vm376_vm0, %v8975_v33, %v5286_v56 }
 0xeec   : > { %v5414_v53 = vld.sshfl [vmem:[#allocation1] sm:$0xff pattern:$0x73625140] }
 0xeed   : > { %5419 = vst [vmem:[#allocation1 + $0x2] ss:$4 sm:$0xff] %v9001_v27  ;;  %5416 = vrot.lane.b32.xlu2 %v5414_v53, %s9646_s21 }
 0xeef   : > { %v5320_v38 = vpop.permute.xlu2 %5319  ;;  %v5294_v53 = vpop.permute.xlu0 %5293 }
 0xef4   : > { %v5420_v9 = vld.sshfl [vmem:[#allocation1] sm:$0xff pattern:$0x73625140] }
 0xef5   : > { %5422 = vrot.lane.b32.xlu0 %v5420_v9, %s9631_s18  ;;  %5425 = vst [vmem:[#allocation1 + $0x3] ss:$4 sm:$0xff] %v9001_v27  ;;  %v5296_v9 = vpop.permute.xlu1 %5295 }
 0xef7   : > { %v5305_v33 = vpop.permute.xlu0 %5304 }
 0xefc   : > { %v5426_v11 = vld.sshfl [vmem:[#allocation1] sm:$0xff pattern:$0x73625140] }
 0xefd   : > { %5428 = vrot.lane.b32.xlu1 %v5426_v11, %s9647_s14  ;;  %5430 = vst [vmem:[#allocation1] ss:$4 sm:$0xff] %v9001_v27  ;;  %v5297_v11 = vsel %vm9814_vm3, %v5294_v53, %v5296_v9  ;;  %v5307_v39 = vpop.permute.xlu1 %5306  ;;  %vm9816_vm3 = vcmask 941056   ;;  %s9890_s14 = sld [smem:[#allocation12_spill]] }
 0xefe   : > { %v5384_v5 = vsel %vm379_vm2, %v5380_v23, %v5297_v11  ;;  %v5308_v29 = vsel %vm9815_vm1, %v5305_v33, %v5307_v39  ;;  %vm9817_vm1 = vcmask 932864  }
 0xeff   : > { %v9082_v23 = vsel %vm382_vm4, %v5384_v5, %v5308_v29 }
 0xf04   : > { %v5431_v10 = vld.sshfl [vmem:[#allocation1] sm:$0xff pattern:$0x73625140]  ;;  %v5433_v36 = vld.sshfl [vmem:[#allocation1 + $0x8] sm:$0xff pattern:$0x73625140] }
 0xf05   : > { %5435 = vrot.lane.b32.xlu1 %v5431_v10, %s9648_s0  ;;  %5441 = vst [vmem:[#allocation1 + $0x1] ss:$4 sm:$0xff] %v9001_v27  ;;  %5437 = vrot.lane.b32.xlu2 %v5433_v36, %s9648_s0  ;;  %v5386_v10 = vsel %vm379_vm2, %v5382_v17, %v5296_v9  ;;  %v5332_v36 = vpop.permute.xlu2 %5331  ;;  %s9818_s0 = smov 91  }
 0xf06   : > { %v9079_v56 = vsel %vm382_vm4, %v5386_v10, %v5307_v39  ;;  %v5314_v10 = vpop.permute.xlu1 %5313 }
 0xf07   : > { %v5393_v5 = vsel %vm376_vm0, %v5314_v10, %v5320_v38  ;;  %v4582_v38 = vsel %vm470_vm7, %v8676_v59, %v8682_v6 }
 0xf0c   : > { %v5444_v30 = vld.sshfl [vmem:[#allocation1 + $0x8] sm:$0xff pattern:$0x73625140]  ;;  %v5442_v52 = vld.sshfl [vmem:[#allocation1] sm:$0xff pattern:$0x73625140] }
 0xf0d   : > { %5448 = vrot.lane.b32.xlu1 %v5444_v30, %s9649_s2  ;;  %5446 = vrot.lane.b32.xlu0 %v5442_v52, %s9649_s2  ;;  %5452 = vst [vmem:[#allocation1 + $0x2] ss:$4 sm:$0xff] %v9001_v27 }
 0xf0f   : > { %v5326_v9 = vpop.permute.xlu0 %5325 }
 0xf14   : > { %v5453_v54 = vld.sshfl [vmem:[#allocation1] sm:$0xff pattern:$0x73625140]  ;;  %v5455_v60 = vld.sshfl [vmem:[#allocation1 + $0x8] sm:$0xff pattern:$0x73625140] }
 0xf15   : > { %5457 = vrot.lane.b32.xlu1 %v5453_v54, %s9635_s9  ;;  %5463 = vst [vmem:[#allocation1 + $0x3] ss:$4 sm:$0xff] %v9001_v27  ;;  %5459 = vrot.lane.b32.xlu2 %v5455_v60, %s9635_s9 }
 0xf17   : > { %v5349_v54 = vpop.permute.xlu2 %5348 }
 0xf1c   : > { %v5466_v30 = vld.sshfl [vmem:[#allocation1 + $0x8] sm:$0xff pattern:$0x73625140]  ;;  %v5464_v52 = vld.sshfl [vmem:[#allocation1] sm:$0xff pattern:$0x73625140] }
 0xf1d   : > { %5470 = vrot.lane.b32.xlu1 %v5466_v30, %s9650_s30  ;;  %5468 = vrot.lane.b32.xlu0 %v5464_v52, %s9650_s30  ;;  %5473 = vst [vmem:[#allocation1] ss:$4 sm:$0xff] %v9001_v27  ;;  %v5395_v52 = vsel %vm379_vm2, %v5393_v5, %v5326_v9 }
 0xf1e   : > { %v9093_v39 = vsel %vm382_vm4, %v5395_v52, %v5332_v36 }
 0xf1f   : > { %v5355_v53 = vpop.permute.xlu2 %5354 }
 0xf24   : > { %v5476_v17 = vld.sshfl [vmem:[#allocation1 + $0x8] sm:$0xff pattern:$0x73625140]  ;;  %v5474_v60 = vld.sshfl [vmem:[#allocation1] sm:$0xff pattern:$0x73625140] }
 0xf25   : > { %5480 = vrot.lane.b32.xlu1 %v5476_v17, %s9652_s27  ;;  %5478 = vrot.lane.b32.xlu0 %v5474_v60, %s9652_s27  ;;  %5484 = vst [vmem:[#allocation1 + $0x1] ss:$4 sm:$0xff] %v9001_v27  ;;  %v5337_v60 = vpop.permute.xlu0 %5336  ;;  %s9888_s27 = sld [smem:[#allocation16_spill]] }
 0xf27   : > { %v5360_v33 = vpop.permute.xlu2 %5359  ;;  %v5343_v5 = vpop.permute.xlu1 %5342 }
 0xf28   : > { %v5400_v59 = vsel %vm376_vm0, %v5337_v60, %v5343_v5  ;;  %v4659_v60 = vsel %vm376_vm0, %v8570_v21, %v8662_v3 }
 0xf2b   : > { %s6010_s9 = sshll.u32 %s9888_s27, 1 }
 0xf2c   : > { %v5487_v11 = vld.sshfl [vmem:[#allocation1 + $0x8] sm:$0xff pattern:$0x73625140]  ;;  %v5485_v30 = vld.sshfl [vmem:[#allocation1] sm:$0xff pattern:$0x73625140] }
 0xf2d   : > { %5491 = vrot.lane.b32.xlu0 %v5487_v11, %s9653_s26  ;;  %5489 = vrot.lane.b32.xlu2 %v5485_v30, %s9653_s26  ;;  %5495 = vst [vmem:[#allocation1 + $0x2] ss:$4 sm:$0xff] %v9001_v27  ;;  %v4571_v11 = vsel %vm458_vm6, %v8674_v62, %v8678_v50  ;;  %v4593_v62 = vsel %vm9816_vm3, %v8686_v12, %v8684_v31  ;;  %v5635_v52 = vpop.permute.xlu0 %5634  ;;  %vm9819_vm3 = vcmask 1039360   ;;  %s9884_s26 = sld [smem:[#allocation79_spill]] }
 0xf2e   : > { %v4670_v10 = vsel %vm376_vm0, %v4571_v11, %v4582_v38 }
 0xf34   : > { %v5498_v29 = vld.sshfl [vmem:[#allocation1 + $0x8] sm:$0xff pattern:$0x73625140]  ;;  %v5496_v17 = vld.sshfl [vmem:[#allocation1] sm:$0xff pattern:$0x73625140]  ;;  %v5637_v9 = vpop.permute.xlu2 %5636 }
 0xf35   : > { %5502 = vrot.lane.b32.xlu0 %v5498_v29, %s9630_s19  ;;  %5500 = vrot.lane.b32.xlu2 %v5496_v17, %s9630_s19  ;;  %5506 = vst [vmem:[#allocation1 + $0x3] ss:$4 sm:$0xff] %v9001_v27  ;;  %v5402_v29 = vsel %vm379_vm2, %v5400_v59, %v5349_v54  ;;  %v4675_v17 = vsel %vm379_vm2, %v4670_v10, %v4593_v62 }
 0xf36   : > { %5705 = vmatpush.bf16.msrb.mxu2 %v5637_v9  ;;  %v4604_v9 = vsel %vm9817_vm1, %v8690_v28, %v8694_v19  ;;  %v4686_v54 = vsel %vm376_vm0, %v8699_v61, %v8705_v13  ;;  %v4673_v13 = vsel %vm376_vm0, %v8678_v50, %v8682_v6  ;;  %v4663_v61 = vsel %vm379_vm2, %v4659_v60, %v8666_v55 }
 0xf37   : > { %v4679_v11 = vsel %vm382_vm4, %v4675_v17, %v4604_v9  ;;  %v4689_v28 = vsel %vm379_vm2, %v4686_v54, %v8701_v45  ;;  %v4677_v45 = vsel %vm379_vm2, %v4673_v13, %v8684_v31  ;;  %v4667_v21 = vsel %vm382_vm4, %v4663_v61, %v8668_v57 }
 0xf38   : > { %v4681_v50 = vsel %vm382_vm4, %v4677_v45, %v8694_v19  ;;  %vm9820_vm1 = vcmask 1031168   ;;  %v4823_v59 = vsel %vm376_vm0, %v7090_v58, %v8779_v47 }
 0xf39   : > { %v4550_v31 = vsel %vm9820_vm1, %v8658_v18, %v8666_v55  ;;  %vm9823_vm1 = vcmask 941056  }
 0xf3a   : > { %5706 = vmatpush.bf16.msrb.mxu2 %v5635_v52 }
 0xf3c   : > { %v5509_v36 = vld.sshfl [vmem:[#allocation1 + $0x8] sm:$0xff pattern:$0x73625140]  ;;  %v5507_v30 = vld.sshfl [vmem:[#allocation1] sm:$0xff pattern:$0x73625140] }
 0xf3d   : > { %5513 = vrot.lane.b32.xlu0 %v5509_v36, %s9654_s23  ;;  %5511 = vrot.lane.b32.xlu2 %v5507_v30, %s9654_s23  ;;  %5516 = vst [vmem:[#allocation1] ss:$4 sm:$0xff] %v9001_v27  ;;  %v9118_v36 = vsel %vm382_vm4, %v5402_v29, %v5355_v53  ;;  %v4692_v53 = vsel %vm382_vm4, %v4689_v28, %v8712_v35 }
 0xf3e   : > { %v4539_v35 = vsel %vm9819_vm3, %v8656_v40, %v8662_v3  ;;  %vm9821_vm3 = vcmask 1022976  }
 0xf3f   : > { %v4657_v6 = vsel %vm376_vm0, %v8568_v22, %v4539_v35  ;;  %v4561_v3 = vsel %vm9821_vm3, %v8670_v20, %v8668_v57  ;;  %v5378_v22 = vpop.permute.xlu2 %5377  ;;  %vm9824_vm3 = vcmask 932864  }
 0xf44   : > { %v5519_v38 = vld.sshfl [vmem:[#allocation1 + $0x8] sm:$0xff pattern:$0x73625140]  ;;  %v5517_v12 = vld.sshfl [vmem:[#allocation1] sm:$0xff pattern:$0x73625140] }
 0xf45   : > { %5557 = vrot.lane.b32.xlu0 %v4679_v11, %s9818_s0  ;;  %5523 = vrot.lane.b32.xlu2 %v5519_v38, %s9655_s22 }
 0xf46   : > { %5521 = vrot.lane.b32.xlu1 %v5517_v12, %s9655_s22 }
 0xf47   : > { %v5366_v40 = vpop.permute.xlu0 %5365  ;;  %v5417_v20 = vpop.permute.xlu2 %5416 }
 0xf48   : > { %v5407_v55 = vsel %vm376_vm0, %v5360_v33, %v5366_v40  ;;  %v5527_v19 = vsel %vm376_vm0, %v9001_v27, %v5417_v20 }
 0xf4d   : > { %5599 = vrot.lane.b32.xlu0 %v8910_v42, %s9801_s10  ;;  %5563 = vrot.lane.b32.xlu2 %v4692_v53, %s9818_s0  ;;  %v4661_v42 = vsel %vm379_vm2, %v4657_v6, %v4550_v31 }
 0xf4e   : > { %5601 = vrot.lane.b32.xlu1 %v8915_v51, %s9801_s10  ;;  %v4665_v51 = vsel %vm382_vm4, %v4661_v42, %v4561_v3  ;;  %v4788_v3 = vsel %vm684_vm14, %v8803_v46, %v8821_v7 }
 0xf4f   : > { %v5372_v18 = vpop.permute.xlu0 %5371 }
 0xf50   : > { %v5409_v57 = vsel %vm379_vm2, %v5407_v55, %v5372_v18 }
 0xf55   : > { %5555 = vrot.lane.b32.xlu0 %v4667_v21, %s9818_s0  ;;  %5632 = vrot.lane.b32.xlu2 %v9013_v0, %s9649_s2  ;;  %v5411_v0 = vsel %vm382_vm4, %v5409_v57, %v5378_v22  ;;  %v4821_v57 = vsel %vm720_vm8, %v8843_v14, %v8831_v34 }
 0xf56   : > { %5559 = vrot.lane.b32.xlu1 %v4681_v50, %s9818_s0 }
 0xf5d   : > { %5597 = vrot.lane.b32.xlu0 %v8882_v1, %s9801_s10  ;;  %5553 = vrot.lane.b32.xlu2 %v4665_v51, %s9818_s0 }
 0xf5e   : > { %5630 = vrot.lane.b32.xlu1 %v8995_v32, %s9649_s2 }
 0xf65   : > { %5595 = vrot.lane.b32.xlu2 %v8879_v4, %s9801_s10  ;;  %v5438_v4 = vpop.permute.xlu2 %5437 }
 0xf66   : > { %5620 = vrot.lane.b32.xlu1 %v9018_v63, %s9633_s15 }
 0xf67   : > { %v5423_v1 = vpop.permute.xlu0 %5422 }
 0xf68   : > { %v5529_v32 = vsel %vm379_vm2, %v5527_v19, %v5423_v1  ;;  %v9829_v19 = vld [vmem:[#allocation71_spill] sm:$0xff]  ;;  %v9830_v1 = vld [vmem:[#allocation69_spill] sm:$0xff] }
 0xf6d   : > { %5655 = vrot.lane.b32.xlu2 %v5411_v0, %s9822_s3  ;;  %v9831_v0 = vld [vmem:[#allocation72_spill] sm:$0xff] }
 0xf6f   : > { %v5429_v33 = vpop.permute.xlu1 %5428  ;;  %v5460_v10 = vpop.permute.xlu2 %5459 }
 0xf70   : > { %v5531_v30 = vsel %vm382_vm4, %v5529_v32, %v5429_v33  ;;  %v4778_v32 = vsel %vm673_vm13, %v9831_v0, %v9830_v1 }
 0xf71   : > { %5665 = vrot.lane.b32.xlu1 %v5531_v30, %s9655_s22 }
 0xf77   : > { %v5436_v63 = vpop.permute.xlu1 %5435 }
 0xf78   : > { %v5439_v29 = vsel %vm458_vm6, %v5436_v63, %v5438_v4  ;;  %vm9825_vm6 = vcmask 744448   ;;  %v9834_v63 = vld [vmem:[#allocation63_spill] sm:$0xff] }
 0xf79   : > { %5618 = vrot.lane.b32.xlu1 %v8968_v41, %s9633_s15  ;;  %v4825_v41 = vsel %vm379_vm2, %v4823_v59, %v8791_v15  ;;  %vm9832_vm8 = vmmov %vm9825_vm6  ;;  %v9838_v59 = vld [vmem:[#allocation70_spill] sm:$0xff] }
 0xf7a   : > { %v4827_v58 = vsel %vm382_vm4, %v4825_v41, %v8768_v25 }
 0xf7f   : > { %v5449_v62 = vpop.permute.xlu1 %5448  ;;  %v5447_v27 = vpop.permute.xlu0 %5446 }
 0xf80   : > { %v5450_v17 = vsel %vm470_vm7, %v5447_v27, %v5449_v62  ;;  %v9835_v62 = vld [vmem:[#allocation67_spill] sm:$0xff]  ;;  %v9836_v27 = vld [vmem:[#allocation65_spill] sm:$0xff] }
 0xf81   : > { %5616 = vrot.lane.b32.xlu1 %v8992_v26, %s9633_s15  ;;  %v5534_v9 = vsel %vm376_vm0, %v5439_v29, %v5450_v17  ;;  %v9839_v17 = vld [vmem:[#allocation60_spill] sm:$0xff] }
 0xf87   : > { %v5458_v5 = vpop.permute.xlu1 %5457  ;;  %v5490_v52 = vpop.permute.xlu2 %5489 }
 0xf88   : > { %v5461_v26 = vsel %vm9823_vm1, %v5458_v5, %v5460_v10  ;;  %vm9827_vm1 = vcmask 760832   ;;  %v4830_v5 = vsel %vm376_vm0, %v9836_v27, %v9835_v62  ;;  %v9860_v27 = vld [vmem:[#allocation28_spill] sm:$0xff] }
 0xf89   : > { %5614 = vrot.lane.b32.xlu1 %v8985_v48, %s9633_s15  ;;  %v5536_v12 = vsel %vm379_vm2, %v5534_v9, %v5461_v26  ;;  %v4810_v18 = vsel %vm9827_vm1, %v8817_v24, %v8829_v37  ;;  %v9828_v24 = vld [vmem:[#allocation66_spill] sm:$0xff]  ;;  %v4832_v29 = vsel %vm379_vm2, %v4830_v5, %v9838_v59 }
 0xf8a   : > { %v4767_v37 = vsel %vm661_vm12, %v9828_v24, %v8813_v2  ;;  %v9833_v2 = vld [vmem:[#allocation61_spill] sm:$0xff]  ;;  %v9840_v9 = vld [vmem:[#allocation62_spill] sm:$0xff] }
 0xf8b   : > { %v4520_v10 = vsel %vm376_vm0, %v9834_v63, %v9833_v2  ;;  %v9841_v26 = vld [vmem:[#allocation54_spill] sm:$0xff] }
 0xf8c   : > { %v4522_v41 = vsel %vm379_vm2, %v4520_v10, %v9839_v17 }
 0xf8f   : > { %v5471_v11 = vpop.permute.xlu1 %5470  ;;  %v5469_v38 = vpop.permute.xlu0 %5468 }
 0xf90   : > { %v5472_v48 = vsel %vm9824_vm3, %v5469_v38, %v5471_v11  ;;  %v5501_v54 = vpop.permute.xlu2 %5500  ;;  %v4512_v11 = vsel %vm376_vm0, %v9841_v26, %v9840_v9  ;;  %v9861_v9 = vld [vmem:[#allocation44_spill] sm:$0xff]  ;;  %v9862_v26 = vld [vmem:[#allocation42_spill] sm:$0xff]  ;;  %vm1702_vm3 = vcmask 457728  }
 0xf91   : > { %5578 = vrot.lane.b32.xlu1 %v4827_v58, %s9650_s30  ;;  %v5538_v47 = vsel %vm382_vm4, %v5536_v12, %v5472_v48  ;;  %v9843_v58 = vld [vmem:[#allocation64_spill] sm:$0xff] }
 0xf92   : > { %5667 = vrot.lane.b32.xlu2 %v5538_v47, %s9655_s22  ;;  %v4524_v47 = vsel %vm382_vm4, %v4522_v41, %v9843_v58 }
 0xf97   : > { %v5479_v15 = vpop.permute.xlu0 %5478  ;;  %v5481_v45 = vpop.permute.xlu1 %5480 }
 0xf98   : > { %v5512_v28 = vpop.permute.xlu2 %5511 }
 0xf9a   : > { %5653 = vrot.lane.b32.xlu2 %v9118_v36, %s9822_s3  ;;  %v5482_v36 = vsel %vm960_vm10, %v5479_v15, %v5481_v45  ;;  %vm9826_vm10 = vcmask 769024   ;;  %v9844_v15 = vld [vmem:[#allocation68_spill] sm:$0xff]  ;;  %v9848_v45 = vld [vmem:[#allocation57_spill] sm:$0xff] }
 0xf9b   : > { %v4799_v42 = vsel %vm9826_vm10, %v8833_v8, %v8809_v44  ;;  %v4756_v8 = vsel %vm649_vm11, %v8805_v16, %v8819_v49 }
 0xf9c   : > { %v4844_v55 = vsel %vm376_vm0, %v4788_v3, %v4799_v42  ;;  %v4837_v34 = vsel %vm376_vm0, %v9829_v19, %v4756_v8  ;;  %v9854_v42 = vld [vmem:[#allocation56_spill] sm:$0xff] }
 0xf9d   : > { %v4846_v7 = vsel %vm379_vm2, %v4844_v55, %v4810_v18  ;;  %v4839_v49 = vsel %vm379_vm2, %v4837_v34, %v4767_v37 }
 0xf9e   : > { %v4848_v20 = vsel %vm382_vm4, %v4846_v7, %v4821_v57  ;;  %v4841_v4 = vsel %vm382_vm4, %v4839_v49, %v4778_v32 }
 0xf9f   : > { %v5492_v53 = vpop.permute.xlu0 %5491 }
 0xfa0   : > { %v5524_v60 = vpop.permute.xlu2 %5523  ;;  %v5493_v35 = vsel %vm649_vm11, %v5490_v52, %v5492_v53  ;;  %vm9837_vm11 = vmmov %vm9825_vm6  ;;  %v9845_v53 = vld [vmem:[#allocation58_spill] sm:$0xff] }
 0xfa1   : > { %v5541_v50 = vsel %vm376_vm0, %v5482_v36, %v5493_v35 }
 0xfa2   : > { %5651 = vrot.lane.b32.xlu2 %v9093_v39, %s9822_s3 }
 0xfa7   : > { %v5503_v13 = vpop.permute.xlu0 %5502 }
 0xfa8   : > { %v5564_v61 = vpop.permute.xlu2 %5563  ;;  %v5504_v21 = vsel %vm661_vm12, %v5501_v54, %v5503_v13  ;;  %vm9842_vm12 = vcmask 629760   ;;  %v9846_v13 = vld [vmem:[#allocation52_spill] sm:$0xff] }
 0xfa9   : > { %v5569_v25 = vsel %vm9825_vm6, %v8789_v43, %v5564_v61  ;;  %v5543_v39 = vsel %vm379_vm2, %v5541_v50, %v5504_v21  ;;  %v9847_v61 = vld [vmem:[#allocation53_spill] sm:$0xff]  ;;  %v9849_v21 = vld [vmem:[#allocation59_spill] sm:$0xff] }
 0xfaa   : > { %5680 = vmatpush.bf16.msrb.mxu0 %v5569_v25  ;;  %5647 = vrot.lane.b32.xlu2 %v9082_v23, %s9822_s3  ;;  %v4504_v25 = vsel %vm376_vm0, %v9847_v61, %v9846_v13  ;;  %v9850_v50 = vld [vmem:[#allocation51_spill] sm:$0xff]  ;;  %v9870_v61 = vld [vmem:[#allocation49_spill] sm:$0xff] }
 0xfab   : > { %v4506_v36 = vsel %vm379_vm2, %v4504_v25, %v9849_v21 }
 0xfaf   : > { %v5514_v6 = vpop.permute.xlu0 %5513 }
 0xfb0   : > { %v5515_v31 = vsel %vm673_vm13, %v5512_v28, %v5514_v6  ;;  %v5633_v40 = vpop.permute.xlu2 %5632  ;;  %v4834_v28 = vsel %vm382_vm4, %v4832_v29, %v9844_v15  ;;  %v9851_v6 = vld [vmem:[#allocation30_spill] sm:$0xff]  ;;  %vm9868_vm13 = vcmask 326656  }
 0xfb1   : > { %5707 = vmatpush.bf16.msrb.mxu2 %v5633_v40  ;;  %v5545_v43 = vsel %vm382_vm4, %v5543_v39, %v5515_v31  ;;  %v4496_v39 = vsel %vm376_vm0, %v9851_v6, %v9850_v50  ;;  %v9852_v40 = vld [vmem:[#allocation55_spill] sm:$0xff]  ;;  %vm9879_vm1 = vmmov %vm9868_vm13 }
 0xfb2   : > { %5669 = vrot.lane.b32.xlu0 %v5545_v43, %s9655_s22  ;;  %v4508_v43 = vsel %vm382_vm4, %v4506_v36, %v9852_v40 }
 0xfb7   : > { %v5558_v23 = vpop.permute.xlu0 %5557 }
 0xfb8   : > { %v5522_v51 = vpop.permute.xlu1 %5521  ;;  %v5554_v14 = vpop.permute.xlu2 %5553 }
 0xfb9   : > { %v5525_v22 = vsel %vm684_vm14, %v5522_v51, %v5524_v60  ;;  %v4514_v60 = vsel %vm379_vm2, %v4512_v11, %v9845_v53  ;;  %v3049_v11 = vsel %vm1690_vm5, %v9862_v26, %v9861_v9  ;;  %vm1700_vm14 = vcmask 392192  }
 0xfba   : > { %5671 = vrot.lane.b32.xlu0 %v5525_v22, %s9655_s22  ;;  %v4516_v35 = vsel %vm382_vm4, %v4514_v60, %v9848_v45  ;;  %v9855_v22 = vld [vmem:[#allocation29_spill] sm:$0xff]  ;;  %v9869_v60 = vld [vmem:[#allocation48_spill] sm:$0xff]  ;;  %s9871_s22 = sld [smem:[#allocation80_spill]] }
 0xfbf   : > { %v5600_v46 = vpop.permute.xlu0 %5599 }
 0xfc0   : > { %v5602_v44 = vpop.permute.xlu1 %5601  ;;  %v5596_v38 = vpop.permute.xlu2 %5595 }
 0xfc1   : > { %5693 = vmatpush.bf16.msrb.mxu1 %v5602_v44 }
 0xfc2   : > { %5584 = vrot.lane.b32.xlu0 %v4848_v20, %s9650_s30 }
 0xfc5   : > { %5694 = vmatpush.bf16.msrb.mxu1 %v5600_v46  ;;  %v9856_v46 = vld [vmem:[#allocation32_spill] sm:$0xff] }
 0xfc7   : > { %v5556_v16 = vpop.permute.xlu0 %5555 }
 0xfc8   : > { %v5560_v33 = vpop.permute.xlu1 %5559  ;;  %v5567_v52 = vsel %vm9837_vm11, %v5554_v14, %v5556_v16  ;;  %v9857_v16 = vld [vmem:[#allocation31_spill] sm:$0xff] }
 0xfc9   : > { %v5568_v30 = vsel %vm9832_vm8, %v5558_v23, %v5560_v33  ;;  %v9853_v23 = vld [vmem:[#allocation50_spill] sm:$0xff] }
 0xfca   : > { %5681 = vmatpush.bf16.msrb.mxu0 %v5568_v30  ;;  %5582 = vrot.lane.b32.xlu0 %v4841_v4, %s9650_s30  ;;  %v4498_v3 = vsel %vm379_vm2, %v4496_v39, %v9853_v23  ;;  %v9859_v30 = vld [vmem:[#allocation33_spill] sm:$0xff]  ;;  %v9874_v23 = vld [vmem:[#allocation36_spill] sm:$0xff] }
 0xfcb   : > { %v4500_v51 = vsel %vm382_vm4, %v4498_v3, %v9854_v42  ;;  %vm9858_vm4 = vcmask 646144   ;;  %v9872_v39 = vld [vmem:[#allocation37_spill] sm:$0xff] }
 0xfce   : > { %5682 = vmatpush.bf16.msrb.mxu0 %v5567_v52 }
 0xfcf   : > { %v5598_v12 = vpop.permute.xlu0 %5597 }
 0xfd0   : > { %v5631_v48 = vpop.permute.xlu1 %5630  ;;  %v5605_v54 = vsel %vm9842_vm12, %v5596_v38, %v5598_v12  ;;  %v9863_v38 = vld [vmem:[#allocation43_spill] sm:$0xff] }
 0xfd1   : > { %5708 = vmatpush.bf16.msrb.mxu2 %v5631_v48  ;;  %5695 = vmatpush.bf16.msrb.mxu1 %v5605_v54  ;;  %v3050_v12 = vsel %vm1692_vm9, %v3049_v11, %v9863_v38  ;;  %v9864_v54 = vld [vmem:[#allocation46_spill] sm:$0xff] }
 0xfd2   : > { %5683 = vmatpush.bf16.msrb.mxu0 %v4524_v47  ;;  %5580 = vrot.lane.b32.xlu0 %v4834_v28, %s9650_s30  ;;  %v3051_v58 = vsel %vm1694_vm15, %v3050_v12, %v9864_v54  ;;  %v9865_v47 = vld [vmem:[#allocation47_spill] sm:$0xff]  ;;  %v9867_v28 = vld [vmem:[#allocation45_spill] sm:$0xff]  ;;  %s9889_s30 = sld [smem:[#allocation17_spill]] }
 0xfd6   : > { %5684 = vmatpush.bf16.msrb.mxu0 %v4516_v35  ;;  %v5774_v35 = vld [vmem:[%s9871_s22] sm:$0xf] }
 0xfd8   : > { %v5621_v31 = vpop.permute.xlu1 %5620 }
 0xfd9   : > { %5709 = vmatpush.bf16.msrb.mxu2 %v5621_v31  ;;  %v9873_v31 = vld [vmem:[#allocation34_spill] sm:$0xff] }
 0xfda   : > { %5685 = vmatpush.bf16.msrb.mxu0 %v4508_v43  ;;  %5649 = vrot.lane.b32.xlu0 %v9079_v56, %s9822_s3  ;;  %v5656_v56 = vpop.permute.xlu2 %5655  ;;  %v1691_v40 = vsel %vm1690_vm5, %v9873_v31, %v9872_v39 }
 0xfdb   : > { %v1693_v3 = vsel %vm1692_vm9, %v1691_v40, %v9874_v23 }
 0xfde   : > { %5686 = vmatpush.bf16.msrb.mxu0 %v4500_v51  ;;  %v9875_v51 = vld [vmem:[#allocation39_spill] sm:$0xff] }
 0xfe1   : > { %5687 = vmatmul.bf16.vlgmr.msrb.gmra.mxu0 %v9855_v22  ;;  %v1695_v22 = vsel %vm1694_vm15, %v1693_v3, %v9875_v51 }
 0xfe3   : > { %v5666_v18 = vpop.permute.xlu1 %5665 }
 0xfeb   : > { %v5619_v55 = vpop.permute.xlu1 %5618 }
 0xfec   : > { %5710 = vmatpush.bf16.msrb.mxu2 %v5619_v55  ;;  %v5668_v24 = vpop.permute.xlu2 %5667 }
 0xff3   : > { %v5617_v57 = vpop.permute.xlu1 %5616 }
 0xff4   : > { %5711 = vmatpush.bf16.msrb.mxu2 %v5617_v57  ;;  %v5654_v19 = vpop.permute.xlu2 %5653 }
 0xffb   : > { %v5615_v7 = vpop.permute.xlu1 %5614 }
 0xffc   : > { %5712 = vmatpush.bf16.msrb.mxu2 %v5615_v7  ;;  %v5652_v14 = vpop.permute.xlu2 %5651  ;;  %v9877_v7 = vld [vmem:[#allocation38_spill] sm:$0xff] }
 0xfff   : > { %5713 = vmatmul.bf16.vlgmr.msrb.gmra.mxu2 %v9856_v46 }
0x1003   : > { %v5579_v0 = vpop.permute.xlu1 %5578 }
0x1004   : > { %v5648_v32 = vpop.permute.xlu2 %5647 }
0x1024   : > { %v5670_v8 = vpop.permute.xlu0 %5669 }
0x102c   : > { %v5672_v44 = vpop.permute.xlu0 %5671 }
0x102d   : > { %v5677_v20 = vsel %vm376_vm0, %v5672_v44, 0 }
0x102e   : > { %5718 = vmatpush.bf16.msrb.mxu3 %v5677_v20 }
0x1032   : > { %5719 = vmatpush.bf16.msrb.mxu3 %v5670_v8 }
0x1034   : > { %v5585_v37 = vpop.permute.xlu0 %5584 }
0x1035   : > { %5696 = vmatpush.bf16.msrb.mxu1 %v5585_v37 }
0x1036   : > { %5720 = vmatpush.bf16.msrb.mxu3 %v5668_v24  ;;  %v9880_v24 = vld [vmem:[#allocation35_spill] sm:$0xff] }
0x103a   : > { %5721 = vmatpush.bf16.msrb.mxu3 %v5666_v18 }
0x103c   : > { %v5583_v34 = vpop.permute.xlu0 %5582 }
0x103d   : > { %5697 = vmatpush.bf16.msrb.mxu1 %v5583_v34 }
0x103e   : > { %5722 = vmatpush.bf16.msrb.mxu3 %v5656_v56 }
0x1042   : > { %5723 = vmatpush.bf16.msrb.mxu3 %v5654_v19  ;;  %v9882_v19 = vld [vmem:[#allocation40_spill] sm:$0xff] }
0x1044   : > { %v5581_v1 = vpop.permute.xlu0 %5580 }
0x1045   : > { %5698 = vmatpush.bf16.msrb.mxu1 %v5581_v1 }
0x1046   : > { %5724 = vmatpush.bf16.msrb.mxu3 %v5652_v14  ;;  %v9883_v14 = vld [vmem:[#allocation41_spill] sm:$0xff] }
0x1049   : > { %5699 = vmatpush.bf16.msrb.mxu1 %v5579_v0 }
0x104c   : > { %v5650_v49 = vpop.permute.xlu0 %5649  ;;  %5700 = vmatmul.bf16.vlgmr.msrb.gmra.mxu1 %v9857_v16 }
0x104d   : > { %v5657_v33 = vsel %vm9858_vm4, %v5648_v32, %v5650_v49 }
0x104e   : > { %5725 = vmatpush.bf16.msrb.mxu3 %v5657_v33  ;;  %v5771_v33 = vld [vmem:[%s9884_s26] sm:$0x3] }
0x1051   : > { %6004 = vmatmul.msk.bf16.vlgmr.msrb.gmra.mxu3 %vm470_vm7, %v9859_v30  ;;  %vm9866_vm7 = vcmask 261120   ;;  %v9885_v30 = vld [vmem:[#allocation74_spill] sm:$0xff] }
0x1052   : > { %v3052_v15 = vsel %vm9866_vm7, %v3051_v58, %v9865_v47  ;;  %vm9876_vm6 = vmmov %vm9866_vm7 }
0x1053   : > { %v3053_v53 = vsel %vm9868_vm13, %v3052_v15, %v9867_v28  ;;  %vm9878_vm10 = vmmov %vm9876_vm6 }
0x1054   : > { %v3054_v13 = vsel %vm1700_vm14, %v3053_v53, %v9869_v60  ;;  %v1697_v46 = vsel %vm9878_vm10, %v1695_v22, %v9877_v7 }
0x1055   : > { %v3055_v25 = vsel %vm1702_vm3, %v3054_v13, %v9870_v61 }
0x105e   : > { %v5688_v4 = vpop.f32.mrf.mxu0 }
0x105f   : > { %v5689_v5 = vadd.f32 %v5688_v4, %v9860_v27  ;;  %v9886_v4 = vld [vmem:[#allocation73_spill] sm:$0xff] }
0x1066   : > { %v5690_v2 = vpop.f32.mrf.mxu0 }
0x1067   : > { %v4406_v2 = vsel %vm1700_vm14, %v9886_v4, %v9885_v30 }
0x1082   : > { %v5714_v63 = vpop.f32.mrf.mxu2 }
0x108a   : > { %v5716_v10 = vpop.f32.mrf.mxu2 }
0x10c9   : > { %v5701_v62 = vpop.f32.mrf.mxu1 }
0x10ca   : > { %v5702_v52 = vadd.f32 %v5701_v62, %v5689_v5 }
0x10cc   : > { %v5715_v29 = vadd.f32 %v5714_v63, %v5702_v52  ;;  %v9887_v63 = vld [vmem:[#allocation75_spill] sm:$0xff] }
0x10cd   : > { %v4407_v10 = vsel %vm1702_vm3, %v4406_v2, %v9887_v63 }
0x10d1   : > { %v5703_v59 = vpop.f32.mrf.mxu1 }
0x10d4   : > { %v5727_v17 = vpop.f32.mrf.mxu3 }
0x10d5   : > { %v5728_v41 = vadd.f32 %v5727_v17, %v5715_v29 }
0x10d7   : > { %5738 = vrot.lane.b32.xlu1 %v5728_v41, %s9649_s2  ;;  %5735 = vrot.lane.b32.xlu0 %v5728_v41, %s9780_s8  ;;  %s6437_s2 = smov 64  }
0x10d8   : > { %5732 = vrot.lane.b32.xlu2 %v5728_v41, %s9634_s16  ;;  %s9891_s16 = sld [smem:[#allocation81_spill]] }
0x10dc   : > { %v5729_v48 = vpop.f32.mrf.mxu3 }
0x10de   : > { %s6278_s0 = scalar_lea.hbm %s9891_s16, 32 }
0x10df   : > { %5747 = vrot.lane.b32.xlu1 %v5728_v41, %s9630_s19  ;;  %5744 = vrot.lane.b32.xlu0 %v5728_v41, %s9670_s4 }
0x10e0   : > { %5741 = vrot.lane.b32.xlu2 %v5728_v41, %s9637_s17  ;;  %s6011_s17 = sshll.u32 %s9889_s30, 2 }
0x10e1   : > { %s5886_s21 = sadd.s32 %s6011_s17, %s6010_s9 }
0x10e2   : > { %s6012_s12 = sshll.u32 %s5886_s21, 2 }
0x10e3   : > { %s5888_s8 = scalar_lea.hbm %s9891_s16, %s6012_s12 }
0x10e4   : > { %s5892_s5 = sshll.u32 %s5888_s8, 4  ;;  %s5893_s5 = int_to_ptr.hbm [resolvable:$true] %s5892_s5 }
0x10e5   : > { %s6272_s13 = sshra.s32 %s5893_s5, 4  ;;  %s6273_s13 = int_to_ptr.hbm [resolvable:$true] %s6272_s13 }
0x10e6   : > { %s6274_s7 = scalar_lea.hbm %s6273_s13, 8  ;;  %p6279_p0 = scmp.lt.s32.totalorder %s6273_s13, %s9891_s16 }
0x10e7   : > { %5761 = vrot.lane.b32.xlu1 %v3055_v25, %s6437_s2  ;;  %p6275_p3 = scmp.ne.s32.totalorder %s6273_s13, %s6274_s7  ;;  %p6280_p1 = scmp.lt.s32.totalorder %s6278_s0, %s6274_s7 }
0x10e8   : > { %5750 = vrot.lane.b32.xlu2 %v5728_v41, %s9633_s15  ;;  %s271_s15 = sand.u32 1, %s9890_s14  }
0x10e9   : > { %s5997_s18 = sshll.u32 %s271_s15, 3  ;;  %s5875_s29 = scalar_lea.sflag [#allocation4], %s271_s15 }
0x10ea   : > { %s273_s1 = scalar_lea.vmem [#allocation7], %s5997_s18  ;;  %p6276_p6 = pnand %p6275_p3, %p6547_p10 }
0x10eb   : > { %s5890_s10 = sshll.u32 %s273_s1, 4  ;;  %p6281_p2 = por %p6280_p1, %p6279_p0  ;;  %s5891_s10 = int_to_ptr.vmem [resolvable:$true] %s5890_s10 }
0x10ec   : > { %p6277_p13 = pneg %p6276_p6 }
0x10ee   : > { %p6282_p5 = pnand %p6281_p2, %p6277_p13 }
0x10f0   : > { %5777 = vperm.xlu2 %6185, %v5774_v35  }
0x1132   : > { %v5733_v45 = vpop.permute.xlu2 %5732 }
0x1133   : > { %v5753_v6 = vsel %vm1690_vm5, %v5728_v41, %v5733_v45  ;;  %vm9881_vm5 = vmmov %vm9879_vm1 }
0x1134   : > { %v1699_v37 = vsel %vm9881_vm5, %v1697_v46, %v9880_v24 }
0x1135   : > { %v1701_v34 = vsel %vm1700_vm14, %v1699_v37, %v9882_v19 }
0x1136   : > { %v1703_v1 = vsel %vm1702_vm3, %v1701_v34, %v9883_v14 }
0x113a   : > { %v5742_v21 = vpop.permute.xlu2 %5741 }
0x1142   : > { %v5751_v56 = vpop.permute.xlu2 %5750 }
0x1149   : > { %v5739_v36 = vpop.permute.xlu1 %5738  ;;  %v5736_v50 = vpop.permute.xlu0 %5735 }
0x114a   : > { %v5754_v43 = vsel %vm1692_vm9, %v5753_v6, %v5736_v50  ;;  %vm5768_vm9 = vcmask 523264   ;;  %v5778_v59 = vpop.permute.xlu2 %5777 }
0x114b   : > { %v5755_v42 = vsel %vm1694_vm15, %v5754_v43, %v5739_v36  ;;  %vm5780_vm15 = vcmask 31744  }
0x114c   : > { %v5756_v57 = vsel %vm9876_vm6, %v5755_v42, %v5742_v21 }
0x1151   : > { %v5748_v18 = vpop.permute.xlu1 %5747  ;;  %v5745_v55 = vpop.permute.xlu0 %5744 }
0x1152   : > { %v5757_v8 = vsel %vm9879_vm1, %v5756_v57, %v5745_v55 }
0x1153   : > { %v5758_v44 = vsel %vm1700_vm14, %v5757_v8, %v5748_v18 }
0x1154   : > { %v5759_v20 = vsel %vm1702_vm3, %v5758_v44, %v5751_v56 }
0x1155   : > { %5765 = vrot.lane.b32.xlu0 %v5759_v20, %s6437_s2 }
0x1159   : > { %v5762_v0 = vpop.permute.xlu1 %5761 }
0x115a   : > { %v5769_v32 = vsel %vm5768_vm9, %v1703_v1, %v5762_v0 }
0x115b   : > { %v5772_v49 = vpack.c.bf16 %v5769_v32, %v5769_v32  ;;  %v5856_v47 = vrot.slane %v5769_v32, 4 }
0x115d   : > { %v5785_v16 = vsel %vm376_vm0, %v5772_v49, 0  ;;  %v5860_v60 = vsub.f32 %v5769_v32, %v5856_v47 }
0x115e   : > { %5797 = vmatpush.bf16.msra.mxu0 %v5785_v16 }
0x1161   : > { %6005 = vmatmul.msk.bf16.vlgmr.msra.gmra.mxu0 %vm5780_vm15, %v5771_v33 }
0x11c7   : > { %v5766_v62 = vpop.permute.xlu0 %5765 }
0x11c8   : > { %v5770_v27 = vsel %vm5768_vm9, %v4407_v10, %v5766_v62 }
0x11c9   : > { %v5773_v5 = vpack.c.bf16 %v5770_v27, %v5770_v27  ;;  %v5857_v3 = vrot.slane %v5770_v27, 4 }
0x11cb   : > { %v5788_v52 = vsel %vm376_vm0, %v5773_v5, 0  ;;  %v5861_v55 = vsub.f32 %v5770_v27, %v5857_v3 }
0x11cc   : > { %5810 = vmatpush.bf16.msra.mxu1 %v5788_v52 }
0x11cf   : > { %6006 = vmatmul.msk.bf16.vlgmr.msra.gmra.mxu1 %vm5780_vm15, %v5771_v33 }
0x11de   : > { %v5799_v29 = vpop.f32.mrf.mxu0 }
0x11df   : > { %v5800_v17 = vadd.f32 %v5799_v29, %v5778_v59 }
0x11e1   : > { %v6007_v41 = vmul.f32 -1.442695, %v5800_v17 }
0x11e3   : > { %6186 = vpow2.f32 %v6007_v41 }
0x11e6   : > { %v5801_v9 = vpop.f32.mrf.mxu0 }
0x11e9   : > { %v6187_v26 = vpop.eup %6186 }
0x11ea   : > { %v5822_v11 = vadd.f32 1.0, %v6187_v26 }
0x11ec   : > { %6188 = vrcp.f32 %v5822_v11  ;;  %v5835_v48 = vand.u32 2147483648, %v5822_v11  ;;  %vm5829_vm8 = vweird.f32 %v5822_v11  ;;  %v5833_v58 = vand.u32 2147483647, %v5822_v11 }
0x11ee   : > { %v5836_v28 = vor.u32 1.1754944e-38, %v5835_v48  ;;  %vm5834_vm12 = vcmp.eq.f32.partialorder %v5833_v58, 8.507059e+37 }
0x11f2   : > { %v6189_v38 = vpop.eup %6188 }
0x11f3   : > { %v5825_v12 = vmul.f32 %v6189_v38, %v5822_v11  ;;  %vm5830_vm11 = vweird.f32 %v6189_v38 }
0x11f4   : > { %vm5831_vm0 = vmor %vm5829_vm8, %vm5830_vm11 }
0x11f5   : > { %v5826_v54 = vsub.f32 1.0, %v5825_v12 }
0x11f7   : > { %v5827_v15 = vmul.f32 %v6189_v38, %v5826_v54 }
0x11f9   : > { %v5828_v53 = vadd.f32 %v6189_v38, %v5827_v15 }
0x11fb   : > { %v5832_v13 = vsel %vm5831_vm0, %v6189_v38, %v5828_v53 }
0x11fc   : > { %v5837_v61 = vsel %vm5834_vm12, %v5836_v28, %v5832_v13 }
0x11fd   : > { %v5862_v25 = vmul.f32 %v5860_v60, %v5837_v61 }
0x11ff   : > { %v5864_v45 = vadd.f32 %v5862_v25, %v5856_v47 }
0x124c   : > { %v5812_v35 = vpop.f32.mrf.mxu1 }
0x124d   : > { %v5813_v21 = vadd.f32 %v5812_v35, %v5778_v59 }
0x124f   : > { %v6008_v36 = vmul.f32 -1.442695, %v5813_v21 }
0x1251   : > { %6190 = vpow2.f32 %v6008_v36 }
0x1254   : > { %v5814_v50 = vpop.f32.mrf.mxu1 }
0x1257   : > { %v6191_v6 = vpop.eup %6190 }
0x1258   : > { %v5823_v39 = vadd.f32 1.0, %v6191_v6 }
0x125a   : > { %6192 = vrcp.f32 %v5823_v39  ;;  %v5850_v23 = vand.u32 2147483648, %v5823_v39  ;;  %v5848_v51 = vand.u32 2147483647, %v5823_v39  ;;  %vm5844_vm7 = vweird.f32 %v5823_v39 }
0x125c   : > { %v5851_v18 = vor.u32 1.1754944e-38, %v5850_v23  ;;  %vm5849_vm14 = vcmp.eq.f32.partialorder %v5848_v51, 8.507059e+37 }
0x1260   : > { %v6193_v31 = vpop.eup %6192 }
0x1261   : > { %v5840_v40 = vmul.f32 %v6193_v31, %v5823_v39  ;;  %vm5845_vm4 = vweird.f32 %v6193_v31 }
0x1262   : > { %vm5846_vm13 = vmor %vm5844_vm7, %vm5845_vm4 }
0x1263   : > { %v5841_v43 = vsub.f32 1.0, %v5840_v40 }
0x1265   : > { %v5842_v42 = vmul.f32 %v6193_v31, %v5841_v43 }
0x1267   : > { %v5843_v22 = vadd.f32 %v6193_v31, %v5842_v42 }
0x1269   : > { %v5847_v57 = vsel %vm5846_vm13, %v6193_v31, %v5843_v22 }
0x126a   : > { %v5852_v7 = vsel %vm5849_vm14, %v5851_v18, %v5847_v57 }
0x126b   : > { %v5863_v46 = vmul.f32 %v5861_v55, %v5852_v7 }
0x126d   : > { %v5865_v8 = vadd.f32 %v5863_v46, %v5857_v3 }
0x126f   : > { %6194 = vtanh.f32 %v5865_v8 }
0x1270   : > { %6196 = vtanh.f32 %v5864_v45 }
0x1275   : > { %v6195_v56 = vpop.eup %6194 }
0x1276   : > { %v5870_v44 = vrot.slane %v6195_v56, 4  ;;  %v6197_v20 = vpop.eup %6196 }
0x1278   : > { %v5871_v24 = vsel %vm379_vm2, %v6197_v20, %v5870_v44 }
0x1279   : > { %5873 = vst [vmem:[%s273_s1] sm:$0xff] %v5871_v24 }
0x127a   : > { %6285 = shalt.err (!%p6282_p5)
}
0x127b   : > { %6026 = dma.vmem_to_hbm [thread:$0]  (%p6547_p10), %s5891_s10, 128, %s5893_s5, %s5875_s29  }
0x127c PF: > { %s9893_s20 = sld [smem:[#allocation20_spill]] }
0x127d   : > { %s9894_s4 = sld [smem:[#allocation11_spill]] }
0x1282   : > { %p6043_p7 = scmp.ge.s32.totalorder %s9893_s20, 2 }
0x1283   : > { %s5904_s23 = sand.u32 1, %s9894_s4  }
0x1284   : > { %p6037_p8 = pnand %p6043_p7, %p6552_p12  ;;  %s5905_s24 = scalar_lea.sflag [#allocation4], %s5904_s23 }
0x1286   : > { %p6038_p4 = pneg %p6037_p8 }
0x1288   : > { %6339 = dma.done.wait (%p6038_p4), %s5905_s24, 128  }
0x1289   : > { %6341 = vsyncadd (%p6038_p4), %s5905_s24, 4294967168  ;;  %s22_s28 = sadd.s32 1, %s9893_s20   ;;  %s9896_s18 = sld [smem:[#allocation12_spill]] }
0x128a   : > { %p19_p9 = scmp.ge.s32.totalorder %s22_s28, 6   ;;  %s9897_s19 = sld [smem:[#allocation13_spill]] }
0x128b   : > { %s9898_s20 = sld [smem:[#allocation26_spill]] }
0x128c   : > { %s9899_s21 = sld [smem:[#allocation14_spill]] }
0x128d   : > { %s9900_s22 = sld [smem:[#allocation15_spill]] }
0x128e   : > { %s9901_s23 = sld [smem:[#allocation25_spill]]  ;;  %21 = sbr.rel (!%p19_p9) target bundleno = 17 (0x11), region = 462 }
0x128f   : > { %s9902_s24 = sld [smem:[#allocation18_spill]] }
0x1290   : > { %s9903_s25 = sld [smem:[#allocation19_spill]] }
0x1291   : > { %s9904_s26 = sld [smem:[#allocation23_spill]] }
0x1292   : > { %s9905_s27 = sld [smem:[#allocation24_spill]] }
0x1293   :  { %5911 = vsyncpa [#allocation3], 1 }
0x1294   :  { %5913 = vsyncpa [#allocation3 + $0x1], 1 }
0x1295   :  { %5914 = vsyncpa [#allocation6], 1 }
0x1296   :  { %5915 = vsyncpa [#allocation4], 1 }
0x1297   :  { %5917 = vsyncpa [#allocation4 + $0x1], 1 }

</bundles_post_ra>
